<compile_context>
chip_gen: v6e
topology: v6e:2x2x1
jax: 0.10.0
libtpu: 0.0.40
codegen_flags: <defaults>
</compile_context>

<pallas_src>
import jax
import jax.numpy as jnp
from jax.experimental import pallas as pl
from jax.experimental.pallas import tpu as pltpu  # noqa: F401  (TPU backend assumed)

C_IN = 128
C_OUT = 128
BN_EPS = 1e-5


def _cnet_kernel(px_ref, pb_ref, w_ref, bias_ref,
                 fc1w_ref, fc1b_ref, fc2w_ref, fc2b_ref, o_ref):
    """Fused CNet forward.

    px_ref, pb_ref : (512, 1024) bf16  block-1 im2col patches for inputs x and b.
                     row = (pd,ph,pw | kd2,kh2,kw2 | d2',h2',w2'), col = (kd1,kh1,kw1,c)
    w_ref          : (1024, 128) bf16  conv weight * BN scale; rows = (kd, kh, kw, c_in)
    bias_ref       : (1, 128)    f32   fused BN shift = (conv_b - mean)*scale + beta
    fc1w_ref       : (256, 64)   f32   fc1 weight, rows in torch flatten (n, c) order
    fc1b_ref       : (1, 64)     f32
    fc2w_ref       : (64, 1)     f32
    fc2b_ref       : (1, 1)      f32
    o_ref          : (1, 1)      f32   sigmoid output
    """
    c = w_ref.shape[1]
    w16 = w_ref[...]                      # bf16 weights for the big block-1 matmul
    w32 = w16.astype(jnp.float32)         # f32 copy for the tiny block-2 matmuls
    bias = bias_ref[...]

    def conv_block1(p_ref):
        # (512, 1024) @ (1024, 128) -> (512, 128); +bias; relu; max over 8 pool positions.
        z = jnp.dot(p_ref[...], w16, preferred_element_type=jnp.float32)
        y = jnp.maximum(z + bias, 0.0)
        m = y.shape[0] // 8
        return jnp.max(y.reshape(8, m, c), axis=0)            # (64, 128) f32

    def conv_block2(y1):
        # y1 rows are grouped by block-2 kernel position (8 groups of 8 rows), so the
        # second conv is a sum of 8 tile-aligned matmuls -- no in-kernel transpose.
        z = jnp.dot(y1[0:8, :], w32[0:c, :], preferred_element_type=jnp.float32)
        for k in range(1, 8):
            z = z + jnp.dot(y1[k * 8:(k + 1) * 8, :], w32[k * c:(k + 1) * c, :],
                            preferred_element_type=jnp.float32)
        y = jnp.maximum(z + bias, 0.0)                         # (8, 128)
        return jnp.max(y, axis=0, keepdims=True)               # (1, 128): maxpool to 1x1x1

    y2x = conv_block2(conv_block1(px_ref))   # sample 0 (x)
    y2b = conv_block2(conv_block1(pb_ref))   # sample 1 (b)

    # torch: squeeze(2) + view(1, -1) flattens in (n, c) order -> fc1 -> fc2 -> sigmoid.
    h = (jnp.dot(y2x, fc1w_ref[0:c, :], preferred_element_type=jnp.float32)
         + jnp.dot(y2b, fc1w_ref[c:2 * c, :], preferred_element_type=jnp.float32)
         + fc1b_ref[...])
    out = jnp.dot(h, fc2w_ref[...], preferred_element_type=jnp.float32) + fc2b_ref[...]
    o_ref[...] = jax.nn.sigmoid(out)


def _patches(x_ncdhw):
    """(1, C, 16, 16, 16) NCDHW -> (512, 8*C) bf16 two-level im2col patch matrix.

    Per spatial dim:  d = 8*d2' + 4*kd2 + 2*pd1 + kd1
      kd1: block-1 conv kernel offset    pd1: block-1 max-pool offset
      kd2: block-2 conv kernel offset    d2': block-2 conv output index
    Row order (pd1,ph1,pw1 | kd2,kh2,kw2 | d2',h2',w2'), col order (kd1,kh1,kw1,c).
    Single fused cast+transpose pass in XLA.
    """
    n, cc, d, h, w = x_ncdhw.shape
    assert n == 1 and d == 16 and h == 16 and w == 16, x_ncdhw.shape
    v = x_ncdhw.astype(jnp.bfloat16).reshape(cc, 2, 2, 2, 2, 2, 2, 2, 2, 2, 2, 2, 2)
    # axes: 0:c 1:d2' 2:kd2 3:pd1 4:kd1 5:h2' 6:kh2 7:ph1 8:kh1 9:w2' 10:kw2 11:pw1 12:kw1
    v = jnp.transpose(v, (3, 7, 11, 2, 6, 10, 1, 5, 9, 4, 8, 12, 0))
    return v.reshape(512, 8 * cc)


def cnet_forward(x_ncdhw, b_ncdhw, params):
    # conv weight (C_out, C_in, kD, kH, kW) -> (kd, kh, kw, c_in) x c_out matrix,
    # with the eval-mode BN scale folded into the output-channel columns.
    w_mat = jnp.transpose(params["conv_w"], (2, 3, 4, 1, 0)).reshape(8 * C_IN, C_OUT)
    scale = params["bn_gamma"] / jnp.sqrt(params["bn_var"] + BN_EPS)
    w_fused = (w_mat * scale[None, :]).astype(jnp.bfloat16)
    bias = ((params["conv_b"] - params["bn_mean"]) * scale
            + params["bn_beta"]).reshape(1, C_OUT).astype(jnp.float32)

    # torch.cat((x, b), dim=0): the two samples are processed as two patch matrices
    # inside the same kernel (avoids the concat copy entirely).
    px = _patches(x_ncdhw)
    pb = _patches(b_ncdhw)

    return pl.pallas_call(
        _cnet_kernel,
        out_shape=jax.ShapeDtypeStruct((1, 1), jnp.float32),
    )(px, pb, w_fused, bias,
      params["fc1_w"], params["fc1_b"], params["fc2_w"], params["fc2_b"])


def _reference_forward(x_ncdhw, b_ncdhw, params):
    """Plain-JAX f32 reference of the torch forward (for validation)."""
    v = jnp.concatenate([x_ncdhw, b_ncdhw], axis=0).astype(jnp.float32)
    scale = params["bn_gamma"] / jnp.sqrt(params["bn_var"] + BN_EPS)

    def block(t):
        z = jax.lax.conv_general_dilated(
            t, params["conv_w"], window_strides=(2, 2, 2), padding="VALID",
            dimension_numbers=("NCDHW", "OIDHW", "NCDHW"),
            precision=jax.lax.Precision.HIGHEST)
        z = z + params["conv_b"].reshape(1, -1, 1, 1, 1)
        z = (z - params["bn_mean"].reshape(1, -1, 1, 1, 1)) * scale.reshape(1, -1, 1, 1, 1) \
            + params["bn_beta"].reshape(1, -1, 1, 1, 1)
        z = jnp.maximum(z, 0.0)
        return jax.lax.reduce_window(z, -jnp.inf, jax.lax.max,
                                     (1, 1, 2, 2, 2), (1, 1, 2, 2, 2), "VALID")

    v = block(block(v))                  # (2, 128, 1, 1, 1)
    flat = v.reshape(1, -1)              # (1, 256) in torch (n, c) order
    h = flat @ params["fc1_w"] + params["fc1_b"]
    return jax.nn.sigmoid(h @ params["fc2_w"] + params["fc2_b"])


if __name__ == "__main__":
    key = jax.random.PRNGKey(0)
    ks = jax.random.split(key, 8)

    params = {
        "conv_w": jax.random.normal(ks[0], (C_OUT, C_IN, 2, 2, 2), jnp.float32)
        * (1.0 / (8 * C_IN) ** 0.5),
        "conv_b": jax.random.normal(ks[1], (C_OUT,), jnp.float32) * 0.01,
        # BatchNorm3d eval-mode parameters (PyTorch defaults at init)
        "bn_gamma": jnp.ones((C_OUT,), jnp.float32),
        "bn_beta": jnp.zeros((C_OUT,), jnp.float32),
        "bn_mean": jnp.zeros((C_OUT,), jnp.float32),
        "bn_var": jnp.ones((C_OUT,), jnp.float32),
        # flattened feature dim after two blocks (D=H=W=16, N=2) is 2*128 = 256
        "fc1_w": jax.random.normal(ks[2], (256, 64), jnp.float32) * (1.0 / 256 ** 0.5),
        "fc1_b": jax.random.normal(ks[3], (1, 64), jnp.float32) * 0.01,
        "fc2_w": jax.random.normal(ks[4], (64, 1), jnp.float32) * (1.0 / 64 ** 0.5),
        "fc2_b": jax.random.normal(ks[5], (1, 1), jnp.float32) * 0.01,
    }

    # PyTorch NCDHW inputs: (N=1, C=128, D=16, H=16, W=16) each
    x = jax.random.normal(ks[6], (1, 128, 16, 16, 16), jnp.float32)
    b = jax.random.normal(ks[7], (1, 128, 16, 16, 16), jnp.float32)

    out = jax.jit(cnet_forward)(x, b, params)
    out = jax.block_until_ready(out)
    assert out.shape == (1, 1), out.shape
    assert bool(jnp.isfinite(out).all())

    # loose tolerance: kernel uses bf16 inputs/weights with f32 accumulation
    ref = jax.block_until_ready(jax.jit(_reference_forward)(x, b, params))
    assert float(jnp.max(jnp.abs(out - ref))) < 5e-2, (out, ref)

    print("KERNEL_OK")
</pallas_src>

<mosaic_0001>
module attributes {stable_mosaic.version = 11 : i64} {
  func.func @_cnet_kernel(%arg0: memref<512x1024xbf16, #tpu.memory_space<vmem>>, %arg1: memref<512x1024xbf16, #tpu.memory_space<vmem>>, %arg2: memref<1024x128xbf16, #tpu.memory_space<vmem>>, %arg3: memref<1x128xf32, #tpu.memory_space<vmem>>, %arg4: memref<256x64xf32, #tpu.memory_space<vmem>>, %arg5: memref<1x64xf32, #tpu.memory_space<vmem>>, %arg6: memref<64x1xf32, #tpu.memory_space<vmem>>, %arg7: memref<1x1xf32, #tpu.memory_space<vmem>>, %arg8: memref<1x1xf32, #tpu.memory_space<vmem>>) attributes {dimension_semantics = [], scalar_prefetch = 0 : i64, scratch_operands = 0 : i64, tpu.core_type = #tpu.core_type<tc>} {
    %c0 = arith.constant 0 : index
    %c0_0 = arith.constant 0 : index
    %0 = vector.load %arg2[%c0, %c0_0] : memref<1024x128xbf16, #tpu.memory_space<vmem>>, vector<1024x128xbf16>
    %1 = arith.extf %0 : vector<1024x128xbf16> to vector<1024x128xf32>
    %c0_1 = arith.constant 0 : index
    %c0_2 = arith.constant 0 : index
    %2 = vector.load %arg3[%c0_1, %c0_2] : memref<1x128xf32, #tpu.memory_space<vmem>>, vector<1x128xf32>
    %c0_3 = arith.constant 0 : index
    %c0_4 = arith.constant 0 : index
    %3 = vector.load %arg0[%c0_3, %c0_4] : memref<512x1024xbf16, #tpu.memory_space<vmem>>, vector<512x1024xbf16>
    %cst = arith.constant dense<0.000000e+00> : vector<512x128xf32>
    %4 = tpu.matmul %3, %0, %cst {dimension_numbers = #tpu.dot_dimension_numbers<[1], [0], [0], [1], [0, 0, 1, 1], [], []>} : vector<512x1024xbf16>, vector<1024x128xbf16>, vector<512x128xf32> -> vector<512x128xf32>
    %5 = vector.broadcast %2 : vector<1x128xf32> to vector<512x128xf32>
    %6 = arith.addf %4, %5 : vector<512x128xf32>
    %cst_5 = arith.constant 0.000000e+00 : f32
    %7 = vector.broadcast %cst_5 : f32 to vector<512x128xf32>
    %8 = arith.maximumf %6, %7 : vector<512x128xf32>
    %9 = vector.shape_cast %8 : vector<512x128xf32> to vector<8x64x128xf32>
    %cst_6 = arith.constant dense<0xFF800000> : vector<64x128xf32>
    %10 = vector.multi_reduction <maximumf>, %9, %cst_6 [0] : vector<8x64x128xf32> to vector<64x128xf32>
    %11 = vector.extract_strided_slice %10 {offsets = [0, 0], sizes = [8, 128], strides = [1, 1]} : vector<64x128xf32> to vector<8x128xf32>
    %12 = vector.extract_strided_slice %1 {offsets = [0, 0], sizes = [128, 128], strides = [1, 1]} : vector<1024x128xf32> to vector<128x128xf32>
    %cst_7 = arith.constant dense<0.000000e+00> : vector<8x128xf32>
    %13 = tpu.matmul %11, %12, %cst_7 {dimension_numbers = #tpu.dot_dimension_numbers<[1], [0], [0], [1], [0, 0, 1, 1], [], []>} : vector<8x128xf32>, vector<128x128xf32>, vector<8x128xf32> -> vector<8x128xf32>
    %14 = vector.extract_strided_slice %10 {offsets = [8, 0], sizes = [8, 128], strides = [1, 1]} : vector<64x128xf32> to vector<8x128xf32>
    %15 = vector.extract_strided_slice %1 {offsets = [128, 0], sizes = [128, 128], strides = [1, 1]} : vector<1024x128xf32> to vector<128x128xf32>
    %cst_8 = arith.constant dense<0.000000e+00> : vector<8x128xf32>
    %16 = tpu.matmul %14, %15, %cst_8 {dimension_numbers = #tpu.dot_dimension_numbers<[1], [0], [0], [1], [0, 0, 1, 1], [], []>} : vector<8x128xf32>, vector<128x128xf32>, vector<8x128xf32> -> vector<8x128xf32>
    %17 = arith.addf %13, %16 : vector<8x128xf32>
    %18 = vector.extract_strided_slice %10 {offsets = [16, 0], sizes = [8, 128], strides = [1, 1]} : vector<64x128xf32> to vector<8x128xf32>
    %19 = vector.extract_strided_slice %1 {offsets = [256, 0], sizes = [128, 128], strides = [1, 1]} : vector<1024x128xf32> to vector<128x128xf32>
    %cst_9 = arith.constant dense<0.000000e+00> : vector<8x128xf32>
    %20 = tpu.matmul %18, %19, %cst_9 {dimension_numbers = #tpu.dot_dimension_numbers<[1], [0], [0], [1], [0, 0, 1, 1], [], []>} : vector<8x128xf32>, vector<128x128xf32>, vector<8x128xf32> -> vector<8x128xf32>
    %21 = arith.addf %17, %20 : vector<8x128xf32>
    %22 = vector.extract_strided_slice %10 {offsets = [24, 0], sizes = [8, 128], strides = [1, 1]} : vector<64x128xf32> to vector<8x128xf32>
    %23 = vector.extract_strided_slice %1 {offsets = [384, 0], sizes = [128, 128], strides = [1, 1]} : vector<1024x128xf32> to vector<128x128xf32>
    %cst_10 = arith.constant dense<0.000000e+00> : vector<8x128xf32>
    %24 = tpu.matmul %22, %23, %cst_10 {dimension_numbers = #tpu.dot_dimension_numbers<[1], [0], [0], [1], [0, 0, 1, 1], [], []>} : vector<8x128xf32>, vector<128x128xf32>, vector<8x128xf32> -> vector<8x128xf32>
    %25 = arith.addf %21, %24 : vector<8x128xf32>
    %26 = vector.extract_strided_slice %10 {offsets = [32, 0], sizes = [8, 128], strides = [1, 1]} : vector<64x128xf32> to vector<8x128xf32>
    %27 = vector.extract_strided_slice %1 {offsets = [512, 0], sizes = [128, 128], strides = [1, 1]} : vector<1024x128xf32> to vector<128x128xf32>
    %cst_11 = arith.constant dense<0.000000e+00> : vector<8x128xf32>
    %28 = tpu.matmul %26, %27, %cst_11 {dimension_numbers = #tpu.dot_dimension_numbers<[1], [0], [0], [1], [0, 0, 1, 1], [], []>} : vector<8x128xf32>, vector<128x128xf32>, vector<8x128xf32> -> vector<8x128xf32>
    %29 = arith.addf %25, %28 : vector<8x128xf32>
    %30 = vector.extract_strided_slice %10 {offsets = [40, 0], sizes = [8, 128], strides = [1, 1]} : vector<64x128xf32> to vector<8x128xf32>
    %31 = vector.extract_strided_slice %1 {offsets = [640, 0], sizes = [128, 128], strides = [1, 1]} : vector<1024x128xf32> to vector<128x128xf32>
    %cst_12 = arith.constant dense<0.000000e+00> : vector<8x128xf32>
    %32 = tpu.matmul %30, %31, %cst_12 {dimension_numbers = #tpu.dot_dimension_numbers<[1], [0], [0], [1], [0, 0, 1, 1], [], []>} : vector<8x128xf32>, vector<128x128xf32>, vector<8x128xf32> -> vector<8x128xf32>
    %33 = arith.addf %29, %32 : vector<8x128xf32>
    %34 = vector.extract_strided_slice %10 {offsets = [48, 0], sizes = [8, 128], strides = [1, 1]} : vector<64x128xf32> to vector<8x128xf32>
    %35 = vector.extract_strided_slice %1 {offsets = [768, 0], sizes = [128, 128], strides = [1, 1]} : vector<1024x128xf32> to vector<128x128xf32>
    %cst_13 = arith.constant dense<0.000000e+00> : vector<8x128xf32>
    %36 = tpu.matmul %34, %35, %cst_13 {dimension_numbers = #tpu.dot_dimension_numbers<[1], [0], [0], [1], [0, 0, 1, 1], [], []>} : vector<8x128xf32>, vector<128x128xf32>, vector<8x128xf32> -> vector<8x128xf32>
    %37 = arith.addf %33, %36 : vector<8x128xf32>
    %38 = vector.extract_strided_slice %10 {offsets = [56, 0], sizes = [8, 128], strides = [1, 1]} : vector<64x128xf32> to vector<8x128xf32>
    %39 = vector.extract_strided_slice %1 {offsets = [896, 0], sizes = [128, 128], strides = [1, 1]} : vector<1024x128xf32> to vector<128x128xf32>
    %cst_14 = arith.constant dense<0.000000e+00> : vector<8x128xf32>
    %40 = tpu.matmul %38, %39, %cst_14 {dimension_numbers = #tpu.dot_dimension_numbers<[1], [0], [0], [1], [0, 0, 1, 1], [], []>} : vector<8x128xf32>, vector<128x128xf32>, vector<8x128xf32> -> vector<8x128xf32>
    %41 = arith.addf %37, %40 : vector<8x128xf32>
    %42 = vector.broadcast %2 : vector<1x128xf32> to vector<8x128xf32>
    %43 = arith.addf %41, %42 : vector<8x128xf32>
    %cst_15 = arith.constant 0.000000e+00 : f32
    %44 = vector.broadcast %cst_15 : f32 to vector<8x128xf32>
    %45 = arith.maximumf %43, %44 : vector<8x128xf32>
    %cst_16 = arith.constant dense<0xFF800000> : vector<128xf32>
    %46 = vector.multi_reduction <maximumf>, %45, %cst_16 [0] : vector<8x128xf32> to vector<128xf32>
    %47 = vector.shape_cast %46 : vector<128xf32> to vector<1x128xf32>
    %c0_17 = arith.constant 0 : index
    %c0_18 = arith.constant 0 : index
    %48 = vector.load %arg1[%c0_17, %c0_18] : memref<512x1024xbf16, #tpu.memory_space<vmem>>, vector<512x1024xbf16>
    %cst_19 = arith.constant dense<0.000000e+00> : vector<512x128xf32>
    %49 = tpu.matmul %48, %0, %cst_19 {dimension_numbers = #tpu.dot_dimension_numbers<[1], [0], [0], [1], [0, 0, 1, 1], [], []>} : vector<512x1024xbf16>, vector<1024x128xbf16>, vector<512x128xf32> -> vector<512x128xf32>
    %50 = vector.broadcast %2 : vector<1x128xf32> to vector<512x128xf32>
    %51 = arith.addf %49, %50 : vector<512x128xf32>
    %cst_20 = arith.constant 0.000000e+00 : f32
    %52 = vector.broadcast %cst_20 : f32 to vector<512x128xf32>
    %53 = arith.maximumf %51, %52 : vector<512x128xf32>
    %54 = vector.shape_cast %53 : vector<512x128xf32> to vector<8x64x128xf32>
    %cst_21 = arith.constant dense<0xFF800000> : vector<64x128xf32>
    %55 = vector.multi_reduction <maximumf>, %54, %cst_21 [0] : vector<8x64x128xf32> to vector<64x128xf32>
    %56 = vector.extract_strided_slice %55 {offsets = [0, 0], sizes = [8, 128], strides = [1, 1]} : vector<64x128xf32> to vector<8x128xf32>
    %57 = vector.extract_strided_slice %1 {offsets = [0, 0], sizes = [128, 128], strides = [1, 1]} : vector<1024x128xf32> to vector<128x128xf32>
    %cst_22 = arith.constant dense<0.000000e+00> : vector<8x128xf32>
    %58 = tpu.matmul %56, %57, %cst_22 {dimension_numbers = #tpu.dot_dimension_numbers<[1], [0], [0], [1], [0, 0, 1, 1], [], []>} : vector<8x128xf32>, vector<128x128xf32>, vector<8x128xf32> -> vector<8x128xf32>
    %59 = vector.extract_strided_slice %55 {offsets = [8, 0], sizes = [8, 128], strides = [1, 1]} : vector<64x128xf32> to vector<8x128xf32>
    %60 = vector.extract_strided_slice %1 {offsets = [128, 0], sizes = [128, 128], strides = [1, 1]} : vector<1024x128xf32> to vector<128x128xf32>
    %cst_23 = arith.constant dense<0.000000e+00> : vector<8x128xf32>
    %61 = tpu.matmul %59, %60, %cst_23 {dimension_numbers = #tpu.dot_dimension_numbers<[1], [0], [0], [1], [0, 0, 1, 1], [], []>} : vector<8x128xf32>, vector<128x128xf32>, vector<8x128xf32> -> vector<8x128xf32>
    %62 = arith.addf %58, %61 : vector<8x128xf32>
    %63 = vector.extract_strided_slice %55 {offsets = [16, 0], sizes = [8, 128], strides = [1, 1]} : vector<64x128xf32> to vector<8x128xf32>
    %64 = vector.extract_strided_slice %1 {offsets = [256, 0], sizes = [128, 128], strides = [1, 1]} : vector<1024x128xf32> to vector<128x128xf32>
    %cst_24 = arith.constant dense<0.000000e+00> : vector<8x128xf32>
    %65 = tpu.matmul %63, %64, %cst_24 {dimension_numbers = #tpu.dot_dimension_numbers<[1], [0], [0], [1], [0, 0, 1, 1], [], []>} : vector<8x128xf32>, vector<128x128xf32>, vector<8x128xf32> -> vector<8x128xf32>
    %66 = arith.addf %62, %65 : vector<8x128xf32>
    %67 = vector.extract_strided_slice %55 {offsets = [24, 0], sizes = [8, 128], strides = [1, 1]} : vector<64x128xf32> to vector<8x128xf32>
    %68 = vector.extract_strided_slice %1 {offsets = [384, 0], sizes = [128, 128], strides = [1, 1]} : vector<1024x128xf32> to vector<128x128xf32>
    %cst_25 = arith.constant dense<0.000000e+00> : vector<8x128xf32>
    %69 = tpu.matmul %67, %68, %cst_25 {dimension_numbers = #tpu.dot_dimension_numbers<[1], [0], [0], [1], [0, 0, 1, 1], [], []>} : vector<8x128xf32>, vector<128x128xf32>, vector<8x128xf32> -> vector<8x128xf32>
    %70 = arith.addf %66, %69 : vector<8x128xf32>
    %71 = vector.extract_strided_slice %55 {offsets = [32, 0], sizes = [8, 128], strides = [1, 1]} : vector<64x128xf32> to vector<8x128xf32>
    %72 = vector.extract_strided_slice %1 {offsets = [512, 0], sizes = [128, 128], strides = [1, 1]} : vector<1024x128xf32> to vector<128x128xf32>
    %cst_26 = arith.constant dense<0.000000e+00> : vector<8x128xf32>
    %73 = tpu.matmul %71, %72, %cst_26 {dimension_numbers = #tpu.dot_dimension_numbers<[1], [0], [0], [1], [0, 0, 1, 1], [], []>} : vector<8x128xf32>, vector<128x128xf32>, vector<8x128xf32> -> vector<8x128xf32>
    %74 = arith.addf %70, %73 : vector<8x128xf32>
    %75 = vector.extract_strided_slice %55 {offsets = [40, 0], sizes = [8, 128], strides = [1, 1]} : vector<64x128xf32> to vector<8x128xf32>
    %76 = vector.extract_strided_slice %1 {offsets = [640, 0], sizes = [128, 128], strides = [1, 1]} : vector<1024x128xf32> to vector<128x128xf32>
    %cst_27 = arith.constant dense<0.000000e+00> : vector<8x128xf32>
    %77 = tpu.matmul %75, %76, %cst_27 {dimension_numbers = #tpu.dot_dimension_numbers<[1], [0], [0], [1], [0, 0, 1, 1], [], []>} : vector<8x128xf32>, vector<128x128xf32>, vector<8x128xf32> -> vector<8x128xf32>
    %78 = arith.addf %74, %77 : vector<8x128xf32>
    %79 = vector.extract_strided_slice %55 {offsets = [48, 0], sizes = [8, 128], strides = [1, 1]} : vector<64x128xf32> to vector<8x128xf32>
    %80 = vector.extract_strided_slice %1 {offsets = [768, 0], sizes = [128, 128], strides = [1, 1]} : vector<1024x128xf32> to vector<128x128xf32>
    %cst_28 = arith.constant dense<0.000000e+00> : vector<8x128xf32>
    %81 = tpu.matmul %79, %80, %cst_28 {dimension_numbers = #tpu.dot_dimension_numbers<[1], [0], [0], [1], [0, 0, 1, 1], [], []>} : vector<8x128xf32>, vector<128x128xf32>, vector<8x128xf32> -> vector<8x128xf32>
    %82 = arith.addf %78, %81 : vector<8x128xf32>
    %83 = vector.extract_strided_slice %55 {offsets = [56, 0], sizes = [8, 128], strides = [1, 1]} : vector<64x128xf32> to vector<8x128xf32>
    %84 = vector.extract_strided_slice %1 {offsets = [896, 0], sizes = [128, 128], strides = [1, 1]} : vector<1024x128xf32> to vector<128x128xf32>
    %cst_29 = arith.constant dense<0.000000e+00> : vector<8x128xf32>
    %85 = tpu.matmul %83, %84, %cst_29 {dimension_numbers = #tpu.dot_dimension_numbers<[1], [0], [0], [1], [0, 0, 1, 1], [], []>} : vector<8x128xf32>, vector<128x128xf32>, vector<8x128xf32> -> vector<8x128xf32>
    %86 = arith.addf %82, %85 : vector<8x128xf32>
    %87 = vector.broadcast %2 : vector<1x128xf32> to vector<8x128xf32>
    %88 = arith.addf %86, %87 : vector<8x128xf32>
    %cst_30 = arith.constant 0.000000e+00 : f32
    %89 = vector.broadcast %cst_30 : f32 to vector<8x128xf32>
    %90 = arith.maximumf %88, %89 : vector<8x128xf32>
    %cst_31 = arith.constant dense<0xFF800000> : vector<128xf32>
    %91 = vector.multi_reduction <maximumf>, %90, %cst_31 [0] : vector<8x128xf32> to vector<128xf32>
    %92 = vector.shape_cast %91 : vector<128xf32> to vector<1x128xf32>
    %c0_32 = arith.constant 0 : index
    %c0_33 = arith.constant 0 : index
    %93 = vector.load %arg4[%c0_32, %c0_33] : memref<256x64xf32, #tpu.memory_space<vmem>>, vector<128x64xf32>
    %cst_34 = arith.constant dense<0.000000e+00> : vector<1x64xf32>
    %94 = tpu.matmul %47, %93, %cst_34 {dimension_numbers = #tpu.dot_dimension_numbers<[1], [0], [0], [1], [0, 0, 1, 1], [], []>} : vector<1x128xf32>, vector<128x64xf32>, vector<1x64xf32> -> vector<1x64xf32>
    %c128 = arith.constant 128 : index
    %c0_35 = arith.constant 0 : index
    %95 = vector.load %arg4[%c128, %c0_35] : memref<256x64xf32, #tpu.memory_space<vmem>>, vector<128x64xf32>
    %cst_36 = arith.constant dense<0.000000e+00> : vector<1x64xf32>
    %96 = tpu.matmul %92, %95, %cst_36 {dimension_numbers = #tpu.dot_dimension_numbers<[1], [0], [0], [1], [0, 0, 1, 1], [], []>} : vector<1x128xf32>, vector<128x64xf32>, vector<1x64xf32> -> vector<1x64xf32>
    %97 = arith.addf %94, %96 : vector<1x64xf32>
    %c0_37 = arith.constant 0 : index
    %c0_38 = arith.constant 0 : index
    %98 = vector.load %arg5[%c0_37, %c0_38] : memref<1x64xf32, #tpu.memory_space<vmem>>, vector<1x64xf32>
    %99 = arith.addf %97, %98 : vector<1x64xf32>
    %c0_39 = arith.constant 0 : index
    %c0_40 = arith.constant 0 : index
    %100 = vector.load %arg6[%c0_39, %c0_40] : memref<64x1xf32, #tpu.memory_space<vmem>>, vector<64x1xf32>
    %cst_41 = arith.constant dense<0.000000e+00> : vector<1x1xf32>
    %101 = tpu.matmul %99, %100, %cst_41 {dimension_numbers = #tpu.dot_dimension_numbers<[1], [0], [0], [1], [0, 0, 1, 1], [], []>} : vector<1x64xf32>, vector<64x1xf32>, vector<1x1xf32> -> vector<1x1xf32>
    %c0_42 = arith.constant 0 : index
    %c0_43 = arith.constant 0 : index
    %102 = vector.load %arg7[%c0_42, %c0_43] : memref<1x1xf32, #tpu.memory_space<vmem>>, vector<1x1xf32>
    %103 = arith.addf %101, %102 : vector<1x1xf32>
    %104 = arith.negf %103 : vector<1x1xf32>
    %105 = math.exp %104 : vector<1x1xf32>
    %cst_44 = arith.constant 1.000000e+00 : f32
    %106 = vector.broadcast %cst_44 : f32 to vector<1x1xf32>
    %107 = arith.addf %106, %105 : vector<1x1xf32>
    %108 = arith.divf %106, %107 : vector<1x1xf32>
    %c0_45 = arith.constant 0 : index
    %c0_46 = arith.constant 0 : index
    %109 = vector.load %arg8[%c0_45, %c0_46] : memref<1x1xf32, #tpu.memory_space<vmem>>, vector<1x1xf32>
    tpu.vector_store %arg8[%c0_45, %c0_46], %108 {strides = array<i32>} : memref<1x1xf32, #tpu.memory_space<vmem>>, vector<1x1xf32>,
    return
  }
}

</mosaic_0001>

<bundles_post_ra>
// kernel: cnet_forward.1
= control target key start
LH: loop header
LB: loop body
LE: loop exit
PB: predicated region body
PF: predicated region fallthrough
CT: control target
= control target key end

     0   :  { %s14177_s0 = inlined_call_operand.vmem [shape: bf16[512,1024], index: 0, kind: input, shape index: {}]   ;;  %s14178_s1 = inlined_call_operand.vmem [shape: bf16[512,1024], index: 1, kind: input, shape index: {}]   ;;  %s14179_s2 = inlined_call_operand.vmem [shape: bf16[1024,128], index: 2, kind: input, shape index: {}]   ;;  %s14180_s3 = inlined_call_operand.vmem [shape: f32[1,128], index: 3, kind: input, shape index: {}]   ;;  %s14181_s4 = inlined_call_operand.vmem [shape: f32[256,64], index: 4, kind: input, shape index: {}]   ;;  %s14182_s5 = inlined_call_operand.vmem [shape: f32[1,64], index: 5, kind: input, shape index: {}]   ;;  %s14183_s6 = inlined_call_operand.vmem [shape: f32[64,1], index: 6, kind: input, shape index: {}]   ;;  %s14184_s7 = inlined_call_operand.<no memory space> [shape: f32[1,1], index: 7, kind: input, shape index: {}]   ;;  %s14185_s8 = inlined_call_operand.hbm [shape: f32[1,1], index: 8, kind: output, shape index: {}]  }
   0x1   :  { %v13_v0 = vstv %s14184_s7 }
   0x2   :  { %14 = vst [vmem:[#allocation2] sm:$0x1] %v13_v0 }
   0x3   :  { %v9555_v1 = vld [vmem:[%s14179_s2 + $0x38] sm:$0xff]   ;;  %v9565_v3 = vld [vmem:[%s14179_s2 + $0x30] sm:$0xff]   ;;  %v14192_v4 = vmov 0   ;;  %v9580_v6 = vld [vmem:[%s14179_s2 + $0x28] sm:$0xff]  }
   0x4   :  { %14484 = vst [vmem:[#allocation6_spill] sm:$0xff] %v9555_v1  ;;  %v9560_v2 = vld [vmem:[%s14179_s2 + $0xb8] sm:$0xff]   ;;  %14486 = vst [vmem:[#allocation8_spill] sm:$0xff] %v9565_v3  ;;  %2216 = vmatprep.subr.bf16.mxu0 %v14192_v4  ;;  %2505 = vmatprep.subr.bf16.mxu1 %v14192_v4  ;;  %v9572_v5 = vld [vmem:[%s14179_s2 + $0xb0] sm:$0xff]  }
   0x5   :  { %14485 = vst [vmem:[#allocation7_spill] sm:$0xff] %v9560_v2  ;;  %14487 = vst [vmem:[#allocation9_spill] sm:$0xff] %v9572_v5  ;;  %2217 = vmatpush1.bf16.msra.mxu0 %v9555_v1  ;;  %2506 = vmatpush1.bf16.msra.mxu1 %v9560_v2  ;;  %v9586_v7 = vld [vmem:[%s14179_s2 + $0xa8] sm:$0xff]   ;;  %v9594_v8 = vld [vmem:[%s14179_s2 + $0x20] sm:$0xff]  }
   0x6   :  { %2218 = vmatprep.subr.bf16.mxu0 %v14192_v4  ;;  %14488 = vst [vmem:[#allocation10_spill] sm:$0xff] %v9580_v6  ;;  %2507 = vmatprep.subr.bf16.mxu1 %v14192_v4  ;;  %14489 = vst [vmem:[#allocation11_spill] sm:$0xff] %v9586_v7  ;;  %v9600_v9 = vld [vmem:[%s14179_s2 + $0xa0] sm:$0xff]   ;;  %v9608_v10 = vld [vmem:[%s14179_s2 + $0x18] sm:$0xff]  }
   0x7   :  { %14490 = vst [vmem:[#allocation12_spill] sm:$0xff] %v9594_v8  ;;  %14491 = vst [vmem:[#allocation13_spill] sm:$0xff] %v9600_v9  ;;  %v9614_v11 = vld [vmem:[%s14179_s2 + $0x98] sm:$0xff]   ;;  %v9622_v12 = vld [vmem:[%s14179_s2 + $0x10] sm:$0xff]  }
   0x8   :  { %14492 = vst [vmem:[#allocation14_spill] sm:$0xff] %v9608_v10  ;;  %14493 = vst [vmem:[#allocation15_spill] sm:$0xff] %v9614_v11  ;;  %v9628_v13 = vld [vmem:[%s14179_s2 + $0x90] sm:$0xff]   ;;  %v9636_v14 = vld [vmem:[%s14179_s2 + $0x8] sm:$0xff]  }
   0x9   :  { %2219 = vmatpush1.bf16.msra.mxu0 %v9565_v3  ;;  %2508 = vmatpush1.bf16.msra.mxu1 %v9572_v5  ;;  %14494 = vst [vmem:[#allocation16_spill] sm:$0xff] %v9622_v12  ;;  %14495 = vst [vmem:[#allocation17_spill] sm:$0xff] %v9628_v13  ;;  %v9642_v15 = vld [vmem:[%s14179_s2 + $0x88] sm:$0xff]   ;;  %v9647_v16 = vld [vmem:[%s14177_s0] sm:$0xff] }
   0xa   :  { %2220 = vmatprep.subr.bf16.mxu0 %v14192_v4  ;;  %2509 = vmatprep.subr.bf16.mxu1 %v14192_v4  ;;  %14496 = vst [vmem:[#allocation18_spill] sm:$0xff] %v9636_v14  ;;  %14497 = vst [vmem:[#allocation19_spill] sm:$0xff] %v9642_v15  ;;  %v9652_v17 = vld [vmem:[%s14177_s0 + $0x20] sm:$0xff]  ;;  %v9657_v18 = vld [vmem:[%s14177_s0 + $0x8] sm:$0xff] }
   0xb   :  { %v9662_v19 = vld [vmem:[%s14177_s0 + $0x28] sm:$0xff]  ;;  %v9670_v20 = vld [vmem:[%s14179_s2] sm:$0xff]   ;;  %v7733_v22 = vcombine.high %v9647_v16, %v9652_v17  ;;  %v9688_v24 = vld [vmem:[%s14179_s2 + $0x78] sm:$0xff]  }
   0xc   :  { %14498 = vst [vmem:[#allocation20_spill] sm:$0xff] %v9670_v20  ;;  %v9676_v21 = vld [vmem:[%s14179_s2 + $0x80] sm:$0xff]   ;;  %v7735_v23 = vcombine.high %v9657_v18, %v9662_v19  ;;  %14500 = vst [vmem:[#allocation22_spill] sm:$0xff] %v9688_v24  ;;  %v9694_v25 = vld [vmem:[%s14179_s2 + $0xf8] sm:$0xff]  }
   0xd   :  { %2221 = vmatpush1.bf16.msra.mxu0 %v9580_v6  ;;  %2510 = vmatpush1.bf16.msra.mxu1 %v9586_v7  ;;  %14499 = vst [vmem:[#allocation21_spill] sm:$0xff] %v9676_v21  ;;  %14501 = vst [vmem:[#allocation23_spill] sm:$0xff] %v9694_v25  ;;  %v9702_v26 = vld [vmem:[%s14179_s2 + $0x70] sm:$0xff]  }
   0xe   :  { %2222 = vmatprep.subr.bf16.mxu0 %v14192_v4  ;;  %2511 = vmatprep.subr.bf16.mxu1 %v14192_v4  ;;  %14502 = vst [vmem:[#allocation24_spill] sm:$0xff] %v9702_v26 }
   0xf   :  { %2248 = vmatprep.mubr.bf16.mxu0 %v7733_v22  ;;  %2537 = vmatprep.mubr.bf16.mxu1 %v7735_v23 }
  0x11   :  { %2223 = vmatpush1.bf16.msra.mxu0 %v9594_v8  ;;  %2512 = vmatpush1.bf16.msra.mxu1 %v9600_v9 }
  0x12   :  { %2224 = vmatprep.subr.bf16.mxu0 %v14192_v4  ;;  %2513 = vmatprep.subr.bf16.mxu1 %v14192_v4 }
  0x15   :  { %2225 = vmatpush1.bf16.msra.mxu0 %v9608_v10  ;;  %2514 = vmatpush1.bf16.msra.mxu1 %v9614_v11 }
  0x16   :  { %2226 = vmatprep.subr.bf16.mxu0 %v14192_v4  ;;  %2515 = vmatprep.subr.bf16.mxu1 %v14192_v4 }
  0x19   :  { %2227 = vmatpush1.bf16.msra.mxu0 %v9622_v12  ;;  %2516 = vmatpush1.bf16.msra.mxu1 %v9628_v13 }
  0x1a   :  { %2228 = vmatprep.subr.bf16.mxu0 %v14192_v4  ;;  %2517 = vmatprep.subr.bf16.mxu1 %v14192_v4 }
  0x1d   :  { %2229 = vmatpush1.bf16.msra.mxu0 %v9636_v14  ;;  %2518 = vmatpush1.bf16.msra.mxu1 %v9642_v15 }
  0x1e   :  { %2230 = vmatprep.subr.bf16.mxu0 %v14192_v4  ;;  %2519 = vmatprep.subr.bf16.mxu1 %v14192_v4 }
  0x21   :  { %2231 = vmatpush1.bf16.msra.mxu0 %v9670_v20  ;;  %2520 = vmatpush1.bf16.msra.mxu1 %v9676_v21 }
  0x22   :  { %2232 = vmatprep.subr.bf16.mxu0 %v14192_v4 }
  0x23   :  { %15 = vsyncpa [#allocation4], 0  ;;  %2521 = vmatprep.subr.bf16.mxu1 %v14192_v4  ;;  %v9708_v27 = vld [vmem:[%s14179_s2 + $0xf0] sm:$0xff]   ;;  %v9716_v28 = vld [vmem:[%s14179_s2 + $0x68] sm:$0xff]   ;;  %v7732_v44 = vcombine.low %v9647_v16, %v9652_v17  ;;  %v7734_v47 = vcombine.low %v9657_v18, %v9662_v19  ;;  %vm9502_vm0 = vmmov 0   ;;  %vm7635_vm1 = vcmask 523264  }
  0x24   :  { %14503 = vst [vmem:[#allocation25_spill] sm:$0xff] %v9708_v27  ;;  %14504 = vst [vmem:[#allocation26_spill] sm:$0xff] %v9716_v28  ;;  %v9722_v29 = vld [vmem:[%s14179_s2 + $0xe8] sm:$0xff]   ;;  %v9730_v30 = vld [vmem:[%s14179_s2 + $0x60] sm:$0xff]   ;;  %vm7715_vm2 = vcmask 0  }
  0x25   :  { %2233 = vmatpush2.bf16.msra.mxu0 %v9688_v24  ;;  %2522 = vmatpush2.bf16.msra.mxu1 %v9694_v25  ;;  %14505 = vst [vmem:[#allocation27_spill] sm:$0xff] %v9722_v29  ;;  %14506 = vst [vmem:[#allocation28_spill] sm:$0xff] %v9730_v30  ;;  %v9736_v31 = vld [vmem:[%s14179_s2 + $0xe0] sm:$0xff]   ;;  %v9744_v32 = vld [vmem:[%s14179_s2 + $0x58] sm:$0xff]  }
  0x26   :  { %2234 = vmatprep.subr.bf16.mxu0 %v14192_v4  ;;  %2523 = vmatprep.subr.bf16.mxu1 %v14192_v4  ;;  %14507 = vst [vmem:[#allocation29_spill] sm:$0xff] %v9736_v31  ;;  %14508 = vst [vmem:[#allocation30_spill] sm:$0xff] %v9744_v32  ;;  %v9750_v33 = vld [vmem:[%s14179_s2 + $0xd8] sm:$0xff]   ;;  %v9758_v34 = vld [vmem:[%s14179_s2 + $0x50] sm:$0xff]  }
  0x27   :  { %14509 = vst [vmem:[#allocation31_spill] sm:$0xff] %v9750_v33  ;;  %14510 = vst [vmem:[#allocation32_spill] sm:$0xff] %v9758_v34  ;;  %v9764_v35 = vld [vmem:[%s14179_s2 + $0xd0] sm:$0xff]   ;;  %v9772_v36 = vld [vmem:[%s14179_s2 + $0x48] sm:$0xff]  }
  0x28   :  { %14511 = vst [vmem:[#allocation33_spill] sm:$0xff] %v9764_v35  ;;  %14512 = vst [vmem:[#allocation34_spill] sm:$0xff] %v9772_v36  ;;  %v9778_v37 = vld [vmem:[%s14179_s2 + $0xc8] sm:$0xff]   ;;  %v9786_v38 = vld [vmem:[%s14179_s2 + $0x40] sm:$0xff]  }
  0x29   :  { %2235 = vmatpush2.bf16.msra.mxu0 %v9702_v26  ;;  %2524 = vmatpush2.bf16.msra.mxu1 %v9708_v27  ;;  %14513 = vst [vmem:[#allocation35_spill] sm:$0xff] %v9778_v37  ;;  %14514 = vst [vmem:[#allocation36_spill] sm:$0xff] %v9786_v38  ;;  %v9792_v39 = vld [vmem:[%s14179_s2 + $0xc0] sm:$0xff]   ;;  %v9800_v40 = vld [vmem:[%s14179_s2 + $0x138] sm:$0xff]  }
  0x2a   :  { %2236 = vmatprep.subr.bf16.mxu0 %v14192_v4  ;;  %2525 = vmatprep.subr.bf16.mxu1 %v14192_v4  ;;  %14515 = vst [vmem:[#allocation37_spill] sm:$0xff] %v9792_v39  ;;  %14516 = vst [vmem:[#allocation38_spill] sm:$0xff] %v9800_v40  ;;  %v9806_v41 = vld [vmem:[%s14179_s2 + $0x1b8] sm:$0xff]   ;;  %v298_v42 = vld [vmem:[%s14177_s0 + $0x40] sm:$0xff] }
  0x2b   :  { %14517 = vst [vmem:[#allocation39_spill] sm:$0xff] %v9806_v41  ;;  %v302_v43 = vld [vmem:[%s14177_s0 + $0x60] sm:$0xff]  ;;  %v299_v45 = vld [vmem:[%s14177_s0 + $0x48] sm:$0xff]  ;;  %v9830_v49 = vld [vmem:[%s14179_s2 + $0x130] sm:$0xff]  }
  0x2c   :  { %v303_v46 = vld [vmem:[%s14177_s0 + $0x68] sm:$0xff]  ;;  %v7741_v48 = vcombine.high %v298_v42, %v302_v43  ;;  %14518 = vst [vmem:[#allocation40_spill] sm:$0xff] %v9830_v49  ;;  %v9836_v51 = vld [vmem:[%s14179_s2 + $0x1b0] sm:$0xff]   ;;  %v306_v52 = vld [vmem:[%s14177_s0 + $0x80] sm:$0xff]  ;;  %v7740_v57 = vcombine.low %v298_v42, %v302_v43 }
  0x2d   :  { %2237 = vmatpush2.bf16.msra.mxu0 %v9716_v28  ;;  %2526 = vmatpush2.bf16.msra.mxu1 %v9722_v29  ;;  %v7743_v50 = vcombine.high %v299_v45, %v303_v46  ;;  %14519 = vst [vmem:[#allocation41_spill] sm:$0xff] %v9836_v51  ;;  %v310_v53 = vld [vmem:[%s14177_s0 + $0xa0] sm:$0xff]  ;;  %v307_v54 = vld [vmem:[%s14177_s0 + $0x88] sm:$0xff]  ;;  %v7742_v59 = vcombine.low %v299_v45, %v303_v46  ;;  %v9896_v19 = vld [vmem:[%s14179_s2 + $0x118] sm:$0xff]  }
  0x2e   :  { %2238 = vmatprep.subr.bf16.mxu0 %v14192_v4  ;;  %2527 = vmatprep.subr.bf16.mxu1 %v14192_v4  ;;  %v311_v55 = vld [vmem:[%s14177_s0 + $0xa8] sm:$0xff]  ;;  %v7749_v60 = vcombine.high %v306_v52, %v310_v53  ;;  %v9871_v62 = vld [vmem:[%s14179_s2 + $0x120] sm:$0xff]   ;;  %14524 = vst [vmem:[#allocation46_spill] sm:$0xff] %v9896_v19  ;;  %v7748_v22 = vcombine.low %v306_v52, %v310_v53  ;;  %v9902_v23 = vld [vmem:[%s14179_s2 + $0x198] sm:$0xff]  }
  0x2f   :  { %v9856_v56 = vld [vmem:[%s14179_s2 + $0x128] sm:$0xff]   ;;  %v7751_v61 = vcombine.high %v307_v54, %v311_v55  ;;  %14522 = vst [vmem:[#allocation44_spill] sm:$0xff] %v9871_v62  ;;  %v9876_v63 = vld [vmem:[%s14179_s2 + $0x1a0] sm:$0xff]   ;;  %14525 = vst [vmem:[#allocation47_spill] sm:$0xff] %v9902_v23  ;;  %v7750_v42 = vcombine.low %v307_v54, %v311_v55 }
  0x30   :  { %14520 = vst [vmem:[#allocation42_spill] sm:$0xff] %v9856_v56  ;;  %v9862_v58 = vld [vmem:[%s14179_s2 + $0x1a8] sm:$0xff]   ;;  %14523 = vst [vmem:[#allocation45_spill] sm:$0xff] %v9876_v63  ;;  %v314_v0 = vld [vmem:[%s14177_s0 + $0xc0] sm:$0xff] }
  0x31   :  { %2239 = vmatpush2.bf16.msra.mxu0 %v9730_v30  ;;  %2528 = vmatpush2.bf16.msra.mxu1 %v9736_v31  ;;  %14521 = vst [vmem:[#allocation43_spill] sm:$0xff] %v9862_v58  ;;  %v318_v16 = vld [vmem:[%s14177_s0 + $0xe0] sm:$0xff]  ;;  %v315_v17 = vld [vmem:[%s14177_s0 + $0xc8] sm:$0xff]  ;;  %v9910_v45 = vld [vmem:[%s14179_s2 + $0x110] sm:$0xff]  }
  0x32   :  { %2240 = vmatprep.subr.bf16.mxu0 %v14192_v4  ;;  %2529 = vmatprep.subr.bf16.mxu1 %v14192_v4  ;;  %v319_v18 = vld [vmem:[%s14177_s0 + $0xe8] sm:$0xff]  ;;  %v7757_v43 = vcombine.high %v314_v0, %v318_v16  ;;  %14526 = vst [vmem:[#allocation48_spill] sm:$0xff] %v9910_v45  ;;  %v9916_v46 = vld [vmem:[%s14179_s2 + $0x190] sm:$0xff]   ;;  %v7756_v54 = vcombine.low %v314_v0, %v318_v16  ;;  %v9956_v0 = vld [vmem:[%s14179_s2 + $0x180] sm:$0xff]  }
  0x33   :  { %14527 = vst [vmem:[#allocation49_spill] sm:$0xff] %v9916_v46  ;;  %v327_v52 = vld [vmem:[%s14177_s0 + $0x128] sm:$0xff]  ;;  %14531 = vst [vmem:[#allocation53_spill] sm:$0xff] %v9956_v0  ;;  %v330_v16 = vld [vmem:[%s14177_s0 + $0x140] sm:$0xff] }
  0x34   :  { %v9936_v53 = vld [vmem:[%s14179_s2 + $0x108] sm:$0xff]   ;;  %v10759_v13 = vld [vmem:[%s14177_s0 + $0x290] sm:$0xff] }
  0x35   :  { %2241 = vmatpush2.bf16.msra.mxu0 %v9744_v32  ;;  %2530 = vmatpush2.bf16.msra.mxu1 %v9750_v33  ;;  %14528 = vst [vmem:[#allocation50_spill] sm:$0xff] %v9936_v53  ;;  %v9942_v55 = vld [vmem:[%s14179_s2 + $0x188] sm:$0xff]  }
  0x36   :  { %2242 = vmatprep.subr.bf16.mxu0 %v14192_v4  ;;  %2531 = vmatprep.subr.bf16.mxu1 %v14192_v4  ;;  %14529 = vst [vmem:[#allocation51_spill] sm:$0xff] %v9942_v55 }
  0x39   :  { %2243 = vmatpush2.bf16.msra.mxu0 %v9758_v34  ;;  %2532 = vmatpush2.bf16.msra.mxu1 %v9764_v35 }
  0x3a   :  { %2244 = vmatprep.subr.bf16.mxu0 %v14192_v4  ;;  %2533 = vmatprep.subr.bf16.mxu1 %v14192_v4 }
  0x3d   :  { %2245 = vmatpush2.bf16.msra.mxu0 %v9772_v36  ;;  %2534 = vmatpush2.bf16.msra.mxu1 %v9778_v37 }
  0x3e   :  { %2246 = vmatprep.subr.bf16.mxu0 %v14192_v4  ;;  %2535 = vmatprep.subr.bf16.mxu1 %v14192_v4 }
  0x41   :  { %2247 = vmatpush2.bf16.msra.mxu0 %v9786_v38  ;;  %2536 = vmatpush2.bf16.msra.mxu1 %v9792_v39 }
  0x42   :  { %2794 = vmatprep.subr.bf16.mxu0 %v14192_v4  ;;  %3083 = vmatprep.subr.bf16.mxu1 %v14192_v4 }
  0x44   :  { %2249 = vmatmul.mubr.bf16.vlgmr.msra.gmra.mxu0 %v7732_v44  ;;  %2538 = vmatmul.mubr.bf16.vlgmr.msra.gmra.mxu1 %v7734_v47  ;;  %v7759_v44 = vcombine.high %v315_v17, %v319_v18  ;;  %v322_v47 = vld [vmem:[%s14177_s0 + $0x100] sm:$0xff] }
  0x45   :  { %2795 = vmatpush1.bf16.msra.mxu0 %v9800_v40  ;;  %3084 = vmatpush1.bf16.msra.mxu1 %v9806_v41 }
  0x46   :  { %2256 = vmatprep.mubr.bf16.mxu0 %v7741_v48  ;;  %2545 = vmatprep.mubr.bf16.mxu1 %v7743_v50  ;;  %v326_v48 = vld [vmem:[%s14177_s0 + $0x120] sm:$0xff]  ;;  %v323_v50 = vld [vmem:[%s14177_s0 + $0x108] sm:$0xff] }
  0x47   :  { %2796 = vmatprep.subr.bf16.mxu0 %v14192_v4  ;;  %3085 = vmatprep.subr.bf16.mxu1 %v14192_v4 }
  0x49   :  { %2797 = vmatpush1.bf16.msra.mxu0 %v9830_v49  ;;  %3086 = vmatpush1.bf16.msra.mxu1 %v9836_v51 }
  0x4a   :  { %2798 = vmatprep.subr.bf16.mxu0 %v14192_v4  ;;  %3087 = vmatprep.subr.bf16.mxu1 %v14192_v4 }
  0x4c   :  { %2257 = vmatmul.mubr.bf16.gmra.mxu0 %v7740_v57  ;;  %2546 = vmatmul.mubr.bf16.gmra.mxu1 %v7742_v59  ;;  %v7758_v57 = vcombine.low %v315_v17, %v319_v18  ;;  %v7765_v59 = vcombine.high %v322_v47, %v326_v48  ;;  %v334_v17 = vld [vmem:[%s14177_s0 + $0x160] sm:$0xff]  ;;  %v331_v18 = vld [vmem:[%s14177_s0 + $0x148] sm:$0xff] }
  0x4d   :  { %2264 = vmatprep.mubr.bf16.mxu0 %v7749_v60  ;;  %2553 = vmatprep.mubr.bf16.mxu1 %v7751_v61  ;;  %v7767_v60 = vcombine.high %v323_v50, %v327_v52  ;;  %v9950_v61 = vld [vmem:[%s14179_s2 + $0x100] sm:$0xff]  }
  0x4e   :  { %2799 = vmatpush1.bf16.msra.mxu0 %v9856_v56  ;;  %3088 = vmatpush1.bf16.msra.mxu1 %v9862_v58  ;;  %14530 = vst [vmem:[#allocation52_spill] sm:$0xff] %v9950_v61 }
  0x4f   :  { %2800 = vmatprep.subr.bf16.mxu0 %v14192_v4  ;;  %3089 = vmatprep.subr.bf16.mxu1 %v14192_v4 }
  0x52   :  { %2801 = vmatpush1.bf16.msra.mxu0 %v9871_v62  ;;  %3090 = vmatpush1.bf16.msra.mxu1 %v9876_v63 }
  0x53   :  { %2802 = vmatprep.subr.bf16.mxu0 %v14192_v4  ;;  %3091 = vmatprep.subr.bf16.mxu1 %v14192_v4 }
  0x54   :  { %2265 = vmatmul.mubr.bf16.gmra.mxu0 %v7748_v22  ;;  %2554 = vmatmul.mubr.bf16.gmra.mxu1 %v7750_v42  ;;  %v335_v22 = vld [vmem:[%s14177_s0 + $0x168] sm:$0xff]  ;;  %v9976_v42 = vld [vmem:[%s14179_s2 + $0x178] sm:$0xff]  }
  0x55   :  { %2272 = vmatprep.mubr.bf16.mxu0 %v7757_v43  ;;  %2561 = vmatprep.mubr.bf16.mxu1 %v7759_v44  ;;  %14532 = vst [vmem:[#allocation54_spill] sm:$0xff] %v9976_v42  ;;  %v7764_v43 = vcombine.low %v322_v47, %v326_v48  ;;  %v9982_v44 = vld [vmem:[%s14179_s2 + $0x1f8] sm:$0xff]   ;;  %v9990_v47 = vld [vmem:[%s14179_s2 + $0x170] sm:$0xff]  }
  0x56   :  { %2803 = vmatpush1.bf16.msra.mxu0 %v9896_v19  ;;  %3092 = vmatpush1.bf16.msra.mxu1 %v9902_v23  ;;  %14533 = vst [vmem:[#allocation55_spill] sm:$0xff] %v9982_v44  ;;  %14534 = vst [vmem:[#allocation56_spill] sm:$0xff] %v9990_v47  ;;  %v9996_v48 = vld [vmem:[%s14179_s2 + $0x1f0] sm:$0xff]  }
  0x57   :  { %2804 = vmatprep.subr.bf16.mxu0 %v14192_v4  ;;  %3093 = vmatprep.subr.bf16.mxu1 %v14192_v4  ;;  %14535 = vst [vmem:[#allocation57_spill] sm:$0xff] %v9996_v48 }
  0x5a   :  { %2805 = vmatpush1.bf16.msra.mxu0 %v9910_v45  ;;  %3094 = vmatpush1.bf16.msra.mxu1 %v9916_v46 }
  0x5b   :  { %2806 = vmatprep.subr.bf16.mxu0 %v14192_v4  ;;  %3095 = vmatprep.subr.bf16.mxu1 %v14192_v4 }
  0x5c   :  { %2273 = vmatmul.mubr.bf16.gmra.mxu0 %v7756_v54  ;;  %2562 = vmatmul.mubr.bf16.gmra.mxu1 %v7758_v57  ;;  %v7766_v54 = vcombine.low %v323_v50, %v327_v52  ;;  %v7773_v57 = vcombine.high %v330_v16, %v334_v17  ;;  %v338_v50 = vld [vmem:[%s14177_s0 + $0x180] sm:$0xff] }
  0x5d   :  { %2280 = vmatprep.mubr.bf16.mxu0 %v7765_v59  ;;  %2569 = vmatprep.mubr.bf16.mxu1 %v7767_v60  ;;  %v7775_v59 = vcombine.high %v331_v18, %v335_v22  ;;  %v342_v52 = vld [vmem:[%s14177_s0 + $0x1a0] sm:$0xff]  ;;  %v339_v60 = vld [vmem:[%s14177_s0 + $0x188] sm:$0xff] }
  0x5e   :  { %2807 = vmatpush1.bf16.msra.mxu0 %v9936_v53  ;;  %3096 = vmatpush1.bf16.msra.mxu1 %v9942_v55 }
  0x5f   :  { %2808 = vmatprep.subr.bf16.mxu0 %v14192_v4  ;;  %3097 = vmatprep.subr.bf16.mxu1 %v14192_v4 }
  0x62   :  { %2809 = vmatpush1.bf16.msra.mxu0 %v9950_v61  ;;  %3098 = vmatpush1.bf16.msra.mxu1 %v9956_v0  ;;  %v7781_v61 = vcombine.high %v338_v50, %v342_v52 }
  0x63   :  { %2810 = vmatprep.subr.bf16.mxu0 %v14192_v4  ;;  %3099 = vmatprep.subr.bf16.mxu1 %v14192_v4 }
  0x64   :  { %2281 = vmatmul.mubr.bf16.gmra.mxu0 %v7764_v43  ;;  %2570 = vmatmul.mubr.bf16.gmra.mxu1 %v7766_v54  ;;  %v343_v43 = vld [vmem:[%s14177_s0 + $0x1a8] sm:$0xff] }
  0x65   :  { %2288 = vmatprep.mubr.bf16.mxu0 %v7773_v57  ;;  %2577 = vmatprep.mubr.bf16.mxu1 %v7775_v59  ;;  %v10016_v54 = vld [vmem:[%s14179_s2 + $0x168] sm:$0xff]   ;;  %v7772_v57 = vcombine.low %v330_v16, %v334_v17  ;;  %v7783_v0 = vcombine.high %v339_v60, %v343_v43  ;;  %v346_v16 = vld [vmem:[%s14177_s0 + $0x1c0] sm:$0xff] }
  0x66   :  { %2811 = vmatpush2.bf16.msra.mxu0 %v9976_v42  ;;  %3100 = vmatpush2.bf16.msra.mxu1 %v9982_v44  ;;  %14536 = vst [vmem:[#allocation58_spill] sm:$0xff] %v10016_v54  ;;  %v10022_v59 = vld [vmem:[%s14179_s2 + $0x1e8] sm:$0xff]   ;;  %v7774_v42 = vcombine.low %v331_v18, %v335_v22  ;;  %v350_v17 = vld [vmem:[%s14177_s0 + $0x1e0] sm:$0xff] }
  0x67   :  { %2812 = vmatprep.subr.bf16.mxu0 %v14192_v4  ;;  %3101 = vmatprep.subr.bf16.mxu1 %v14192_v4  ;;  %14537 = vst [vmem:[#allocation59_spill] sm:$0xff] %v10022_v59  ;;  %v347_v18 = vld [vmem:[%s14177_s0 + $0x1c8] sm:$0xff] }
  0x68   :  { %v351_v22 = vld [vmem:[%s14177_s0 + $0x1e8] sm:$0xff] }
  0x6a   :  { %2813 = vmatpush2.bf16.msra.mxu0 %v9990_v47  ;;  %3102 = vmatpush2.bf16.msra.mxu1 %v9996_v48  ;;  %v362_v47 = vld [vmem:[%s14177_s0 + $0x240] sm:$0xff] }
  0x6b   :  { %2814 = vmatprep.subr.bf16.mxu0 %v14192_v4  ;;  %3103 = vmatprep.subr.bf16.mxu1 %v14192_v4  ;;  %v430_v48 = vld [vmem:[%s14177_s0 + $0x460] sm:$0xff] }
  0x6c   :  { %2289 = vmatmul.mubr.bf16.gmra.mxu0 %v7772_v57  ;;  %2578 = vmatmul.mubr.bf16.gmra.mxu1 %v7774_v42  ;;  %v7789_v42 = vcombine.high %v346_v16, %v350_v17  ;;  %v7791_v57 = vcombine.high %v347_v18, %v351_v22 }
  0x6d   :  { %2296 = vmatprep.mubr.bf16.mxu0 %v7781_v61  ;;  %2585 = vmatprep.mubr.bf16.mxu1 %v7783_v0  ;;  %v7780_v61 = vcombine.low %v338_v50, %v342_v52  ;;  %v7782_v0 = vcombine.low %v339_v60, %v343_v43  ;;  %v354_v50 = vld [vmem:[%s14177_s0 + $0x200] sm:$0xff]  ;;  %v355_v60 = vld [vmem:[%s14177_s0 + $0x208] sm:$0xff] }
  0x6e   :  { %2815 = vmatpush2.bf16.msra.mxu0 %v10016_v54  ;;  %3104 = vmatpush2.bf16.msra.mxu1 %v10022_v59  ;;  %v10047_v54 = vld [vmem:[%s14179_s2 + $0x160] sm:$0xff]   ;;  %v359_v43 = vld [vmem:[%s14177_s0 + $0x228] sm:$0xff] }
  0x6f   :  { %2816 = vmatprep.subr.bf16.mxu0 %v14192_v4  ;;  %3105 = vmatprep.subr.bf16.mxu1 %v14192_v4  ;;  %14538 = vst [vmem:[#allocation60_spill] sm:$0xff] %v10047_v54  ;;  %v10052_v59 = vld [vmem:[%s14179_s2 + $0x1e0] sm:$0xff]  }
  0x70   :  { %14539 = vst [vmem:[#allocation61_spill] sm:$0xff] %v10052_v59  ;;  %v358_v52 = vld [vmem:[%s14177_s0 + $0x220] sm:$0xff] }
  0x72   :  { %2817 = vmatpush2.bf16.msra.mxu0 %v10047_v54  ;;  %3106 = vmatpush2.bf16.msra.mxu1 %v10052_v59  ;;  %v371_v54 = vld [vmem:[%s14177_s0 + $0x288] sm:$0xff]  ;;  %v378_v59 = vld [vmem:[%s14177_s0 + $0x2c0] sm:$0xff] }
  0x73   :  { %2818 = vmatprep.subr.bf16.mxu0 %v14192_v4  ;;  %3107 = vmatprep.subr.bf16.mxu1 %v14192_v4  ;;  %v374_v4 = vld [vmem:[%s14177_s0 + $0x2a0] sm:$0xff] }
  0x74   :  { %2297 = vmatmul.mubr.bf16.gmra.mxu0 %v7780_v61  ;;  %2586 = vmatmul.mubr.bf16.gmra.mxu1 %v7782_v0  ;;  %v7788_v61 = vcombine.low %v346_v16, %v350_v17  ;;  %v7790_v0 = vcombine.low %v347_v18, %v351_v22  ;;  %v366_v16 = vld [vmem:[%s14177_s0 + $0x260] sm:$0xff]  ;;  %v363_v17 = vld [vmem:[%s14177_s0 + $0x248] sm:$0xff]  ;;  %v7796_v22 = vcombine.low %v354_v50, %v358_v52 }
  0x75   :  { %2304 = vmatprep.mubr.bf16.mxu0 %v7789_v42  ;;  %2593 = vmatprep.mubr.bf16.mxu1 %v7791_v57  ;;  %v7797_v42 = vcombine.high %v354_v50, %v358_v52  ;;  %v7799_v57 = vcombine.high %v355_v60, %v359_v43  ;;  %v367_v18 = vld [vmem:[%s14177_s0 + $0x268] sm:$0xff]  ;;  %v10097_v52 = vld [vmem:[%s14179_s2 + $0x158] sm:$0xff]  }
  0x76   :  { %v375_v50 = vld [vmem:[%s14177_s0 + $0x2a8] sm:$0xff]  ;;  %14540 = vst [vmem:[#allocation62_spill] sm:$0xff] %v10097_v52  ;;  %2819 = vmatpush2.bf16.msra.mxu0 %v10097_v52  ;;  %v390_v52 = vld [vmem:[%s14177_s0 + $0x320] sm:$0xff] }
  0x7c   :  { %2305 = vmatmul.mubr.bf16.gmra.mxu0 %v7788_v61  ;;  %2594 = vmatmul.mubr.bf16.gmra.mxu1 %v7790_v0  ;;  %v7798_v61 = vcombine.low %v355_v60, %v359_v43  ;;  %v7805_v0 = vcombine.high %v362_v47, %v366_v16  ;;  %v10102_v60 = vld [vmem:[%s14179_s2 + $0x1d8] sm:$0xff]   ;;  %v7804_v43 = vcombine.low %v362_v47, %v366_v16  ;;  %v382_v47 = vld [vmem:[%s14177_s0 + $0x2e0] sm:$0xff]  ;;  %v379_v16 = vld [vmem:[%s14177_s0 + $0x2c8] sm:$0xff] }
  0x7d   :  { %2312 = vmatprep.mubr.bf16.mxu0 %v7797_v42  ;;  %2601 = vmatprep.mubr.bf16.mxu1 %v7799_v57  ;;  %v7807_v42 = vcombine.high %v363_v17, %v367_v18  ;;  %v370_v57 = vld [vmem:[%s14177_s0 + $0x280] sm:$0xff]  ;;  %14541 = vst [vmem:[#allocation63_spill] sm:$0xff] %v10102_v60 }
  0x7e   :  { %3108 = vmatpush2.bf16.msra.mxu1 %v10102_v60  ;;  %v387_v60 = vld [vmem:[%s14177_s0 + $0x308] sm:$0xff] }
  0x84   :  { %2313 = vmatmul.mubr.bf16.gmra.mxu0 %v7796_v22  ;;  %2602 = vmatmul.mubr.bf16.gmra.mxu1 %v7798_v61  ;;  %v7806_v22 = vcombine.low %v363_v17, %v367_v18  ;;  %v7813_v61 = vcombine.high %v370_v57, %v374_v4  ;;  %v383_v17 = vld [vmem:[%s14177_s0 + $0x2e8] sm:$0xff]  ;;  %v7812_v18 = vcombine.low %v370_v57, %v374_v4  ;;  %v10140_v57 = vld [vmem:[%s14179_s2 + $0x1d0] sm:$0xff]  }
  0x85   :  { %2320 = vmatprep.mubr.bf16.mxu0 %v7805_v0  ;;  %2609 = vmatprep.mubr.bf16.mxu1 %v7807_v42  ;;  %v7815_v0 = vcombine.high %v371_v54, %v375_v50  ;;  %v14542_v42 = vmov 0   ;;  %v391_v4 = vld [vmem:[%s14177_s0 + $0x328] sm:$0xff]  ;;  %14544 = vst [vmem:[#allocation65_spill] sm:$0xff] %v10140_v57 }
  0x86   :  { %2820 = vmatprep.subr.bf16.mxu0 %v14542_v42  ;;  %3109 = vmatprep.subr.bf16.mxu1 %v14542_v42 }
  0x87   :  { %3110 = vmatpush2.bf16.msra.mxu1 %v10140_v57  ;;  %v403_v57 = vld [vmem:[%s14177_s0 + $0x388] sm:$0xff] }
  0x88   :  { %3111 = vmatprep.subr.bf16.mxu1 %v14542_v42 }
  0x8c   :  { %2321 = vmatmul.mubr.bf16.gmra.mxu0 %v7804_v43  ;;  %2610 = vmatmul.mubr.bf16.gmra.mxu1 %v7806_v22  ;;  %v7814_v43 = vcombine.low %v371_v54, %v375_v50  ;;  %v7821_v22 = vcombine.high %v378_v59, %v382_v47  ;;  %v10135_v54 = vld [vmem:[%s14179_s2 + $0x150] sm:$0xff]   ;;  %v7820_v50 = vcombine.low %v378_v59, %v382_v47  ;;  %v398_v59 = vld [vmem:[%s14177_s0 + $0x360] sm:$0xff]  ;;  %v395_v47 = vld [vmem:[%s14177_s0 + $0x348] sm:$0xff] }
  0x8d   :  { %2328 = vmatprep.mubr.bf16.mxu0 %v7813_v61  ;;  %2617 = vmatprep.mubr.bf16.mxu1 %v7815_v0  ;;  %v7823_v61 = vcombine.high %v379_v16, %v383_v17  ;;  %v386_v0 = vld [vmem:[%s14177_s0 + $0x300] sm:$0xff]  ;;  %14543 = vst [vmem:[#allocation64_spill] sm:$0xff] %v10135_v54 }
  0x8e   :  { %2821 = vmatpush2.bf16.msra.mxu0 %v10135_v54  ;;  %v406_v54 = vld [vmem:[%s14177_s0 + $0x3a0] sm:$0xff] }
  0x8f   :  { %2822 = vmatprep.subr.bf16.mxu0 %v14542_v42 }
  0x94   :  { %2329 = vmatmul.mubr.bf16.gmra.mxu0 %v7812_v18  ;;  %2618 = vmatmul.mubr.bf16.gmra.mxu1 %v7814_v43  ;;  %v7822_v18 = vcombine.low %v379_v16, %v383_v17  ;;  %v7829_v43 = vcombine.high %v386_v0, %v390_v52  ;;  %v399_v16 = vld [vmem:[%s14177_s0 + $0x368] sm:$0xff]  ;;  %v7828_v17 = vcombine.low %v386_v0, %v390_v52 }
  0x95   :  { %2336 = vmatprep.mubr.bf16.mxu0 %v7821_v22  ;;  %2625 = vmatprep.mubr.bf16.mxu1 %v7823_v61  ;;  %v7831_v22 = vcombine.high %v387_v60, %v391_v4  ;;  %v394_v61 = vld [vmem:[%s14177_s0 + $0x340] sm:$0xff]  ;;  %v407_v52 = vld [vmem:[%s14177_s0 + $0x3a8] sm:$0xff] }
  0x96   :  { %v10178_v0 = vld [vmem:[%s14179_s2 + $0x1c8] sm:$0xff]  }
  0x97   :  { %14546 = vst [vmem:[#allocation67_spill] sm:$0xff] %v10178_v0  ;;  %3112 = vmatpush2.bf16.msra.mxu1 %v10178_v0  ;;  %v419_v0 = vld [vmem:[%s14177_s0 + $0x408] sm:$0xff] }
  0x98   :  { %3113 = vmatprep.subr.bf16.mxu1 %v14542_v42 }
  0x9c   :  { %2337 = vmatmul.mubr.bf16.gmra.mxu0 %v7820_v50  ;;  %2626 = vmatmul.mubr.bf16.gmra.mxu1 %v7822_v18  ;;  %v7830_v50 = vcombine.low %v387_v60, %v391_v4  ;;  %v7837_v18 = vcombine.high %v394_v61, %v398_v59  ;;  %v10173_v60 = vld [vmem:[%s14179_s2 + $0x148] sm:$0xff]   ;;  %v7836_v4 = vcombine.low %v394_v61, %v398_v59  ;;  %v414_v61 = vld [vmem:[%s14177_s0 + $0x3e0] sm:$0xff] }
  0x9d   :  { %2344 = vmatprep.mubr.bf16.mxu0 %v7829_v43  ;;  %2633 = vmatprep.mubr.bf16.mxu1 %v7831_v22  ;;  %v7839_v43 = vcombine.high %v395_v47, %v399_v16  ;;  %v402_v22 = vld [vmem:[%s14177_s0 + $0x380] sm:$0xff]  ;;  %14545 = vst [vmem:[#allocation66_spill] sm:$0xff] %v10173_v60  ;;  %v411_v59 = vld [vmem:[%s14177_s0 + $0x3c8] sm:$0xff] }
  0x9e   :  { %2823 = vmatpush2.bf16.msra.mxu0 %v10173_v60  ;;  %v422_v60 = vld [vmem:[%s14177_s0 + $0x420] sm:$0xff] }
  0x9f   :  { %2824 = vmatprep.subr.bf16.mxu0 %v14542_v42 }
  0xa4   :  { %2345 = vmatmul.mubr.bf16.gmra.mxu0 %v7828_v17  ;;  %2634 = vmatmul.mubr.bf16.gmra.mxu1 %v7830_v50  ;;  %v7838_v17 = vcombine.low %v395_v47, %v399_v16  ;;  %v7845_v50 = vcombine.high %v402_v22, %v406_v54  ;;  %v415_v47 = vld [vmem:[%s14177_s0 + $0x3e8] sm:$0xff]  ;;  %v7844_v16 = vcombine.low %v402_v22, %v406_v54  ;;  %v10216_v22 = vld [vmem:[%s14179_s2 + $0x1c0] sm:$0xff]  }
  0xa5   :  { %2352 = vmatprep.mubr.bf16.mxu0 %v7837_v18  ;;  %2641 = vmatprep.mubr.bf16.mxu1 %v7839_v43  ;;  %v7847_v18 = vcombine.high %v403_v57, %v407_v52  ;;  %v410_v43 = vld [vmem:[%s14177_s0 + $0x3c0] sm:$0xff]  ;;  %v423_v54 = vld [vmem:[%s14177_s0 + $0x428] sm:$0xff]  ;;  %14548 = vst [vmem:[#allocation69_spill] sm:$0xff] %v10216_v22 }
  0xa6   :  { %3114 = vmatpush2.bf16.msra.mxu1 %v10216_v22 }
  0xac   :  { %2353 = vmatmul.mubr.bf16.gmra.mxu0 %v7836_v4  ;;  %2642 = vmatmul.mubr.bf16.gmra.mxu1 %v7838_v17  ;;  %v7846_v4 = vcombine.low %v403_v57, %v407_v52  ;;  %v7853_v17 = vcombine.high %v410_v43, %v414_v61  ;;  %v10211_v57 = vld [vmem:[%s14179_s2 + $0x140] sm:$0xff]   ;;  %v7852_v52 = vcombine.low %v410_v43, %v414_v61  ;;  %v427_v43 = vld [vmem:[%s14177_s0 + $0x448] sm:$0xff] }
  0xad   :  { %2360 = vmatprep.mubr.bf16.mxu0 %v7845_v50  ;;  %2649 = vmatprep.mubr.bf16.mxu1 %v7847_v18  ;;  %v7855_v50 = vcombine.high %v411_v59, %v415_v47  ;;  %v418_v18 = vld [vmem:[%s14177_s0 + $0x400] sm:$0xff]  ;;  %14547 = vst [vmem:[#allocation68_spill] sm:$0xff] %v10211_v57  ;;  %v431_v61 = vld [vmem:[%s14177_s0 + $0x468] sm:$0xff] }
  0xae   :  { %2825 = vmatpush2.bf16.msra.mxu0 %v10211_v57  ;;  %v435_v57 = vld [vmem:[%s14177_s0 + $0x488] sm:$0xff] }
  0xb4   :  { %2361 = vmatmul.mubr.bf16.gmra.mxu0 %v7844_v16  ;;  %2650 = vmatmul.mubr.bf16.gmra.mxu1 %v7846_v4  ;;  %v7854_v16 = vcombine.low %v411_v59, %v415_v47  ;;  %v7861_v4 = vcombine.high %v418_v18, %v422_v60  ;;  %v7860_v59 = vcombine.low %v418_v18, %v422_v60  ;;  %v439_v60 = vld [vmem:[%s14177_s0 + $0x4a8] sm:$0xff] }
  0xb5   :  { %2368 = vmatprep.mubr.bf16.mxu0 %v7853_v17  ;;  %2657 = vmatprep.mubr.bf16.mxu1 %v7855_v50  ;;  %v7863_v17 = vcombine.high %v419_v0, %v423_v54  ;;  %v426_v50 = vld [vmem:[%s14177_s0 + $0x440] sm:$0xff]  ;;  %v7862_v47 = vcombine.low %v419_v0, %v423_v54  ;;  %v7870_v18 = vcombine.low %v427_v43, %v431_v61 }
  0xb6   :  { %v7868_v0 = vcombine.low %v426_v50, %v430_v48 }
  0xbc   :  { %2369 = vmatmul.mubr.bf16.gmra.mxu0 %v7852_v52  ;;  %2658 = vmatmul.mubr.bf16.gmra.mxu1 %v7854_v16  ;;  %v7869_v52 = vcombine.high %v426_v50, %v430_v48  ;;  %v7871_v16 = vcombine.high %v427_v43, %v431_v61  ;;  %v447_v48 = vld [vmem:[%s14177_s0 + $0x4e8] sm:$0xff]  ;;  %v7878_v43 = vcombine.low %v435_v57, %v439_v60 }
  0xbd   :  { %2376 = vmatprep.mubr.bf16.mxu0 %v7861_v4  ;;  %2665 = vmatprep.mubr.bf16.mxu1 %v7863_v17  ;;  %v434_v4 = vld [vmem:[%s14177_s0 + $0x480] sm:$0xff] }
  0xbe   :  { %v438_v17 = vld [vmem:[%s14177_s0 + $0x4a0] sm:$0xff] }
  0xbf   :  { %v7877_v54 = vcombine.high %v434_v4, %v438_v17  ;;  %v7876_v50 = vcombine.low %v434_v4, %v438_v17 }
  0xc4   :  { %2377 = vmatmul.mubr.bf16.gmra.mxu0 %v7860_v59  ;;  %2666 = vmatmul.mubr.bf16.gmra.mxu1 %v7862_v47  ;;  %v7879_v59 = vcombine.high %v435_v57, %v439_v60  ;;  %v442_v47 = vld [vmem:[%s14177_s0 + $0x4c0] sm:$0xff]  ;;  %v455_v57 = vld [vmem:[%s14177_s0 + $0x528] sm:$0xff] }
  0xc5   :  { %2384 = vmatprep.mubr.bf16.mxu0 %v7869_v52  ;;  %2673 = vmatprep.mubr.bf16.mxu1 %v7871_v16  ;;  %v446_v52 = vld [vmem:[%s14177_s0 + $0x4e0] sm:$0xff]  ;;  %v443_v16 = vld [vmem:[%s14177_s0 + $0x4c8] sm:$0xff] }
  0xc6   :  { %v7885_v61 = vcombine.high %v442_v47, %v446_v52  ;;  %v7884_v4 = vcombine.low %v442_v47, %v446_v52  ;;  %v7886_v17 = vcombine.low %v443_v16, %v447_v48  ;;  %v463_v47 = vld [vmem:[%s14177_s0 + $0x568] sm:$0xff] }
  0xcc   :  { %2385 = vmatmul.mubr.bf16.gmra.mxu0 %v7868_v0  ;;  %2674 = vmatmul.mubr.bf16.gmra.mxu1 %v7870_v18  ;;  %v7887_v0 = vcombine.high %v443_v16, %v447_v48  ;;  %v450_v18 = vld [vmem:[%s14177_s0 + $0x500] sm:$0xff] }
  0xcd   :  { %2392 = vmatprep.mubr.bf16.mxu0 %v7877_v54  ;;  %2681 = vmatprep.mubr.bf16.mxu1 %v7879_v59  ;;  %v454_v54 = vld [vmem:[%s14177_s0 + $0x520] sm:$0xff]  ;;  %v451_v59 = vld [vmem:[%s14177_s0 + $0x508] sm:$0xff] }
  0xce   :  { %v7893_v60 = vcombine.high %v450_v18, %v454_v54  ;;  %v7892_v52 = vcombine.low %v450_v18, %v454_v54  ;;  %v7894_v16 = vcombine.low %v451_v59, %v455_v57  ;;  %v471_v18 = vld [vmem:[%s14177_s0 + $0x5a8] sm:$0xff] }
  0xd4   :  { %2393 = vmatmul.mubr.bf16.gmra.mxu0 %v7876_v50  ;;  %2682 = vmatmul.mubr.bf16.gmra.mxu1 %v7878_v43  ;;  %v7895_v50 = vcombine.high %v451_v59, %v455_v57  ;;  %v458_v43 = vld [vmem:[%s14177_s0 + $0x540] sm:$0xff] }
  0xd5   :  { %2400 = vmatprep.mubr.bf16.mxu0 %v7885_v61  ;;  %2689 = vmatprep.mubr.bf16.mxu1 %v7887_v0  ;;  %v462_v61 = vld [vmem:[%s14177_s0 + $0x560] sm:$0xff]  ;;  %v459_v0 = vld [vmem:[%s14177_s0 + $0x548] sm:$0xff] }
  0xd6   :  { %v7901_v48 = vcombine.high %v458_v43, %v462_v61  ;;  %v7900_v54 = vcombine.low %v458_v43, %v462_v61  ;;  %v7902_v59 = vcombine.low %v459_v0, %v463_v47  ;;  %v479_v43 = vld [vmem:[%s14177_s0 + $0x5e8] sm:$0xff] }
  0xdc   :  { %2401 = vmatmul.mubr.bf16.gmra.mxu0 %v7884_v4  ;;  %2690 = vmatmul.mubr.bf16.gmra.mxu1 %v7886_v17  ;;  %v7903_v4 = vcombine.high %v459_v0, %v463_v47  ;;  %v466_v17 = vld [vmem:[%s14177_s0 + $0x580] sm:$0xff] }
  0xdd   :  { %2408 = vmatprep.mubr.bf16.mxu0 %v7893_v60  ;;  %2697 = vmatprep.mubr.bf16.mxu1 %v7895_v50  ;;  %v470_v60 = vld [vmem:[%s14177_s0 + $0x5a0] sm:$0xff]  ;;  %v467_v50 = vld [vmem:[%s14177_s0 + $0x588] sm:$0xff] }
  0xde   :  { %v7909_v57 = vcombine.high %v466_v17, %v470_v60  ;;  %v7908_v61 = vcombine.low %v466_v17, %v470_v60  ;;  %v7910_v0 = vcombine.low %v467_v50, %v471_v18  ;;  %v487_v17 = vld [vmem:[%s14177_s0 + $0x628] sm:$0xff] }
  0xe4   :  { %2409 = vmatmul.mubr.bf16.gmra.mxu0 %v7892_v52  ;;  %2698 = vmatmul.mubr.bf16.gmra.mxu1 %v7894_v16  ;;  %v7911_v52 = vcombine.high %v467_v50, %v471_v18  ;;  %v474_v16 = vld [vmem:[%s14177_s0 + $0x5c0] sm:$0xff] }
  0xe5   :  { %2416 = vmatprep.mubr.bf16.mxu0 %v7901_v48  ;;  %2705 = vmatprep.mubr.bf16.mxu1 %v7903_v4  ;;  %v478_v48 = vld [vmem:[%s14177_s0 + $0x5e0] sm:$0xff]  ;;  %v475_v4 = vld [vmem:[%s14177_s0 + $0x5c8] sm:$0xff] }
  0xe6   :  { %v7917_v47 = vcombine.high %v474_v16, %v478_v48  ;;  %v7916_v60 = vcombine.low %v474_v16, %v478_v48  ;;  %v7918_v50 = vcombine.low %v475_v4, %v479_v43  ;;  %v495_v16 = vld [vmem:[%s14177_s0 + $0x668] sm:$0xff] }
  0xec   :  { %2417 = vmatmul.mubr.bf16.gmra.mxu0 %v7900_v54  ;;  %2706 = vmatmul.mubr.bf16.gmra.mxu1 %v7902_v59  ;;  %v7919_v54 = vcombine.high %v475_v4, %v479_v43  ;;  %v482_v59 = vld [vmem:[%s14177_s0 + $0x600] sm:$0xff] }
  0xed   :  { %2424 = vmatprep.mubr.bf16.mxu0 %v7909_v57  ;;  %2713 = vmatprep.mubr.bf16.mxu1 %v7911_v52  ;;  %v486_v57 = vld [vmem:[%s14177_s0 + $0x620] sm:$0xff]  ;;  %v483_v52 = vld [vmem:[%s14177_s0 + $0x608] sm:$0xff] }
  0xee   :  { %v7925_v18 = vcombine.high %v482_v59, %v486_v57  ;;  %v7924_v48 = vcombine.low %v482_v59, %v486_v57  ;;  %v7926_v4 = vcombine.low %v483_v52, %v487_v17  ;;  %v498_v59 = vld [vmem:[%s14177_s0 + $0x680] sm:$0xff] }
  0xef   :  { %v502_v57 = vld [vmem:[%s14177_s0 + $0x6a0] sm:$0xff] }
  0xf0   :  { %v7941_v55 = vcombine.high %v498_v59, %v502_v57 }
  0xf4   :  { %2425 = vmatmul.mubr.bf16.gmra.mxu0 %v7908_v61  ;;  %2714 = vmatmul.mubr.bf16.gmra.mxu1 %v7910_v0  ;;  %v7927_v61 = vcombine.high %v483_v52, %v487_v17  ;;  %v490_v0 = vld [vmem:[%s14177_s0 + $0x640] sm:$0xff] }
  0xf5   :  { %2432 = vmatprep.mubr.bf16.mxu0 %v7917_v47  ;;  %2721 = vmatprep.mubr.bf16.mxu1 %v7919_v54  ;;  %v494_v47 = vld [vmem:[%s14177_s0 + $0x660] sm:$0xff]  ;;  %v491_v54 = vld [vmem:[%s14177_s0 + $0x648] sm:$0xff] }
  0xf6   :  { %v7933_v43 = vcombine.high %v490_v0, %v494_v47  ;;  %v7934_v53 = vcombine.low %v491_v54, %v495_v16 }
  0xfc   :  { %2433 = vmatmul.mubr.bf16.gmra.mxu0 %v7916_v60  ;;  %2722 = vmatmul.mubr.bf16.gmra.mxu1 %v7918_v50  ;;  %v10331_v60 = vld [vmem:[%s14180_s3] ss:$0 sm:$0xff]  ;;  %v7935_v50 = vcombine.high %v491_v54, %v495_v16  ;;  %v507_v16 = vld [vmem:[%s14177_s0 + $0x6c8] sm:$0xff] }
  0xfd   :  { %2440 = vmatprep.mubr.bf16.mxu0 %v7925_v18  ;;  %2729 = vmatprep.mubr.bf16.mxu1 %v7927_v61 }
 0x104   :  { %v2250_v18 = vpop.f32.mrf.mxu0  ;;  %2441 = vmatmul.mubr.bf16.gmra.mxu0 %v7924_v48  ;;  %v2539_v22 = vpop.f32.mrf.mxu1  ;;  %2730 = vmatmul.mubr.bf16.gmra.mxu1 %v7926_v4  ;;  %v499_v48 = vld [vmem:[%s14177_s0 + $0x688] sm:$0xff] }
 0x105   :  { %v2251_v61 = vadd.f32 %v10331_v60, %v2250_v18  ;;  %2448 = vmatprep.mubr.bf16.mxu0 %v7933_v43  ;;  %2737 = vmatprep.mubr.bf16.mxu1 %v7935_v50  ;;  %v7932_v43 = vcombine.low %v490_v0, %v494_v47  ;;  %v506_v0 = vld [vmem:[%s14177_s0 + $0x6c0] sm:$0xff] }
 0x106   :  { %v2252_v44 = vpop.f32.mrf.mxu0  ;;  %v2541_v17 = vpop.f32.mrf.mxu1 }
 0x107   :  { %v10340_v52 = vadd.f32 %v2539_v22, %v2251_v61  ;;  %v503_v44 = vld [vmem:[%s14177_s0 + $0x6a8] sm:$0xff] }
 0x108   :  { %v2253_v4 = vpop.f32.mrf.mxu0  ;;  %v2542_v18 = vpop.f32.mrf.mxu1  ;;  %v7943_v46 = vcombine.high %v499_v48, %v503_v44 }
 0x109   :  { %v2254_v50 = vadd.f32 %v10331_v60, %v2253_v4 }
 0x10a   :  { %v2255_v45 = vpop.f32.mrf.mxu0  ;;  %v2544_v61 = vpop.f32.mrf.mxu1 }
 0x10b   :  { %v10349_v22 = vadd.f32 %v2542_v18, %v2254_v50  ;;  %v510_v45 = vld [vmem:[%s14177_s0 + $0x6e0] sm:$0xff] }
 0x10c   :  { %v2258_v17 = vpop.f32.mrf.mxu0  ;;  %2449 = vmatmul.mubr.bf16.gmra.mxu0 %v7932_v43  ;;  %v2547_v23 = vpop.f32.mrf.mxu1  ;;  %2738 = vmatmul.mubr.bf16.gmra.mxu1 %v7934_v53  ;;  %v7940_v53 = vcombine.low %v498_v59, %v502_v57  ;;  %v7942_v43 = vcombine.low %v499_v48, %v503_v44  ;;  %v7949_v50 = vcombine.high %v506_v0, %v510_v45  ;;  %v514_v59 = vld [vmem:[%s14177_s0 + $0x700] sm:$0xff] }
 0x10d   :  { %v2259_v19 = vadd.f32 %v10331_v60, %v2258_v17  ;;  %2456 = vmatprep.mubr.bf16.mxu0 %v7941_v55  ;;  %2745 = vmatprep.mubr.bf16.mxu1 %v7943_v46  ;;  %v518_v57 = vld [vmem:[%s14177_s0 + $0x720] sm:$0xff] }
 0x10e   :  { %v2260_v62 = vpop.f32.mrf.mxu0  ;;  %v2549_v54 = vpop.f32.mrf.mxu1 }
 0x10f   :  { %v10358_v47 = vadd.f32 %v2547_v23, %v2259_v19  ;;  %v511_v62 = vld [vmem:[%s14177_s0 + $0x6e8] sm:$0xff] }
 0x110   :  { %v2261_v46 = vpop.f32.mrf.mxu0  ;;  %v2550_v4 = vpop.f32.mrf.mxu1  ;;  %v7951_v61 = vcombine.high %v507_v16, %v511_v62 }
 0x111   :  { %v2262_v55 = vadd.f32 %v10331_v60, %v2261_v46  ;;  %v515_v46 = vld [vmem:[%s14177_s0 + $0x708] sm:$0xff] }
 0x112   :  { %v2263_v18 = vpop.f32.mrf.mxu0  ;;  %v2552_v23 = vpop.f32.mrf.mxu1 }
 0x113   :  { %v10367_v19 = vadd.f32 %v2550_v4, %v2262_v55  ;;  %v7948_v55 = vcombine.low %v506_v0, %v510_v45  ;;  %v7957_v18 = vcombine.high %v514_v59, %v518_v57  ;;  %v522_v0 = vld [vmem:[%s14177_s0 + $0x740] sm:$0xff] }
 0x114   :  { %v2266_v17 = vpop.f32.mrf.mxu0  ;;  %2457 = vmatmul.mubr.bf16.gmra.mxu0 %v7940_v53  ;;  %v2555_v63 = vpop.f32.mrf.mxu1  ;;  %2746 = vmatmul.mubr.bf16.gmra.mxu1 %v7942_v43  ;;  %v526_v45 = vld [vmem:[%s14177_s0 + $0x760] sm:$0xff] }
 0x115   :  { %v2267_v54 = vadd.f32 %v10331_v60, %v2266_v17  ;;  %2464 = vmatprep.mubr.bf16.mxu0 %v7949_v50  ;;  %2753 = vmatprep.mubr.bf16.mxu1 %v7951_v61  ;;  %v7950_v50 = vcombine.low %v507_v16, %v511_v62 }
 0x116   :  { %v2268_v56 = vpop.f32.mrf.mxu0  ;;  %v2557_v44 = vpop.f32.mrf.mxu1 }
 0x117   :  { %v10376_v48 = vadd.f32 %v2555_v63, %v2267_v54  ;;  %v519_v56 = vld [vmem:[%s14177_s0 + $0x728] sm:$0xff] }
 0x118   :  { %v2269_v53 = vpop.f32.mrf.mxu0  ;;  %v2558_v43 = vpop.f32.mrf.mxu1  ;;  %v7959_v23 = vcombine.high %v515_v46, %v519_v56 }
 0x119   :  { %v2270_v4 = vadd.f32 %v10331_v60, %v2269_v53  ;;  %v523_v53 = vld [vmem:[%s14177_s0 + $0x748] sm:$0xff] }
 0x11a   :  { %v2271_v61 = vpop.f32.mrf.mxu0  ;;  %v2560_v17 = vpop.f32.mrf.mxu1 }
 0x11b   :  { %v10385_v63 = vadd.f32 %v2558_v43, %v2270_v4  ;;  %v7956_v4 = vcombine.low %v514_v59, %v518_v57  ;;  %v7965_v61 = vcombine.high %v522_v0, %v526_v45  ;;  %v530_v59 = vld [vmem:[%s14177_s0 + $0x780] sm:$0xff] }
 0x11c   :  { %v2274_v54 = vpop.f32.mrf.mxu0  ;;  %2465 = vmatmul.mubr.bf16.gmra.mxu0 %v7948_v55  ;;  %v2563_v58 = vpop.f32.mrf.mxu1  ;;  %2754 = vmatmul.mubr.bf16.gmra.mxu1 %v7950_v50  ;;  %v534_v57 = vld [vmem:[%s14177_s0 + $0x7a0] sm:$0xff] }
 0x11d   :  { %v2275_v44 = vadd.f32 %v10331_v60, %v2274_v54  ;;  %2472 = vmatprep.mubr.bf16.mxu0 %v7957_v18  ;;  %2761 = vmatprep.mubr.bf16.mxu1 %v7959_v23  ;;  %v7958_v18 = vcombine.low %v515_v46, %v519_v56 }
 0x11e   :  { %v2276_v49 = vpop.f32.mrf.mxu0  ;;  %v2565_v62 = vpop.f32.mrf.mxu1 }
 0x11f   :  { %v10394_v16 = vadd.f32 %v2563_v58, %v2275_v44  ;;  %v527_v49 = vld [vmem:[%s14177_s0 + $0x768] sm:$0xff] }
 0x120   :  { %v2277_v55 = vpop.f32.mrf.mxu0  ;;  %v2566_v50 = vpop.f32.mrf.mxu1  ;;  %v7967_v17 = vcombine.high %v523_v53, %v527_v49 }
 0x121   :  { %v2278_v43 = vadd.f32 %v10331_v60, %v2277_v55  ;;  %v531_v55 = vld [vmem:[%s14177_s0 + $0x788] sm:$0xff] }
 0x122   :  { %v2279_v23 = vpop.f32.mrf.mxu0  ;;  %v2568_v54 = vpop.f32.mrf.mxu1 }
 0x123   :  { %v10403_v58 = vadd.f32 %v2566_v50, %v2278_v43  ;;  %v7964_v43 = vcombine.low %v522_v0, %v526_v45  ;;  %v7973_v23 = vcombine.high %v530_v59, %v534_v57  ;;  %v538_v0 = vld [vmem:[%s14177_s0 + $0x7c0] sm:$0xff] }
 0x124   :  { %v2282_v44 = vpop.f32.mrf.mxu0  ;;  %2473 = vmatmul.mubr.bf16.gmra.mxu0 %v7956_v4  ;;  %v2571_v51 = vpop.f32.mrf.mxu1  ;;  %2762 = vmatmul.mubr.bf16.gmra.mxu1 %v7958_v18  ;;  %v542_v45 = vld [vmem:[%s14177_s0 + $0x7e0] sm:$0xff] }
 0x125   :  { %v2283_v62 = vadd.f32 %v10331_v60, %v2282_v44  ;;  %2480 = vmatprep.mubr.bf16.mxu0 %v7965_v61  ;;  %2769 = vmatprep.mubr.bf16.mxu1 %v7967_v17  ;;  %v7966_v61 = vcombine.low %v523_v53, %v527_v49 }
 0x126   :  { %v2284_v40 = vpop.f32.mrf.mxu0  ;;  %v2573_v56 = vpop.f32.mrf.mxu1 }
 0x127   :  { %v10412_v46 = vadd.f32 %v2571_v51, %v2283_v62  ;;  %v535_v40 = vld [vmem:[%s14177_s0 + $0x7a8] sm:$0xff] }
 0x128   :  { %v2285_v4 = vpop.f32.mrf.mxu0  ;;  %v2574_v18 = vpop.f32.mrf.mxu1  ;;  %v7975_v54 = vcombine.high %v531_v55, %v535_v40 }
 0x129   :  { %v2286_v50 = vadd.f32 %v10331_v60, %v2285_v4  ;;  %v539_v4 = vld [vmem:[%s14177_s0 + $0x7c8] sm:$0xff] }
 0x12a   :  { %v2287_v17 = vpop.f32.mrf.mxu0  ;;  %v2576_v44 = vpop.f32.mrf.mxu1 }
 0x12b   :  { %v10421_v51 = vadd.f32 %v2574_v18, %v2286_v50  ;;  %v7972_v50 = vcombine.low %v530_v59, %v534_v57  ;;  %v7981_v17 = vcombine.high %v538_v0, %v542_v45  ;;  %v292_v59 = vld [vmem:[%s14177_s0 + $0x10] sm:$0xff] }
 0x12c   :  { %v2290_v62 = vpop.f32.mrf.mxu0  ;;  %2481 = vmatmul.mubr.bf16.gmra.mxu0 %v7964_v43  ;;  %v2579_v41 = vpop.f32.mrf.mxu1  ;;  %2770 = vmatmul.mubr.bf16.gmra.mxu1 %v7966_v61  ;;  %v296_v57 = vld [vmem:[%s14177_s0 + $0x30] sm:$0xff] }
 0x12d   :  { %v2291_v56 = vadd.f32 %v10331_v60, %v2290_v62  ;;  %2488 = vmatprep.mubr.bf16.mxu0 %v7973_v23  ;;  %2777 = vmatprep.mubr.bf16.mxu1 %v7975_v54  ;;  %v7974_v23 = vcombine.low %v531_v55, %v535_v40 }
 0x12e   :  { %v2292_v38 = vpop.f32.mrf.mxu0  ;;  %v2581_v49 = vpop.f32.mrf.mxu1 }
 0x12f   :  { %v10430_v53 = vadd.f32 %v2579_v41, %v2291_v56  ;;  %v543_v38 = vld [vmem:[%s14177_s0 + $0x7e8] sm:$0xff] }
 0x130   :  { %v2293_v43 = vpop.f32.mrf.mxu0  ;;  %v2582_v61 = vpop.f32.mrf.mxu1  ;;  %v7983_v44 = vcombine.high %v539_v4, %v543_v38 }
 0x131   :  { %v2294_v18 = vadd.f32 %v10331_v60, %v2293_v43  ;;  %v293_v43 = vld [vmem:[%s14177_s0 + $0x18] sm:$0xff] }
 0x132   :  { %v2295_v54 = vpop.f32.mrf.mxu0  ;;  %v2584_v62 = vpop.f32.mrf.mxu1 }
 0x133   :  { %v10439_v41 = vadd.f32 %v2582_v61, %v2294_v18  ;;  %v7980_v18 = vcombine.low %v538_v0, %v542_v45  ;;  %v7737_v54 = vcombine.high %v292_v59, %v296_v57  ;;  %v300_v0 = vld [vmem:[%s14177_s0 + $0x50] sm:$0xff] }
 0x134   :  { %v2298_v56 = vpop.f32.mrf.mxu0  ;;  %2489 = vmatmul.mubr.bf16.gmra.mxu0 %v7972_v50  ;;  %v2587_v39 = vpop.f32.mrf.mxu1  ;;  %2778 = vmatmul.mubr.bf16.gmra.mxu1 %v7974_v23  ;;  %v304_v45 = vld [vmem:[%s14177_s0 + $0x70] sm:$0xff] }
 0x135   :  { %v2299_v49 = vadd.f32 %v10331_v60, %v2298_v56  ;;  %2496 = vmatprep.mubr.bf16.mxu0 %v7981_v17  ;;  %2785 = vmatprep.mubr.bf16.mxu1 %v7983_v44  ;;  %v7982_v17 = vcombine.low %v539_v4, %v543_v38 }
 0x136   :  { %v2300_v36 = vpop.f32.mrf.mxu0  ;;  %v2589_v40 = vpop.f32.mrf.mxu1 }
 0x137   :  { %v10448_v55 = vadd.f32 %v2587_v39, %v2299_v49  ;;  %v297_v36 = vld [vmem:[%s14177_s0 + $0x38] sm:$0xff] }
 0x138   :  { %v2301_v50 = vpop.f32.mrf.mxu0  ;;  %v2590_v23 = vpop.f32.mrf.mxu1  ;;  %v7739_v62 = vcombine.high %v293_v43, %v297_v36 }
 0x139   :  { %v2302_v61 = vadd.f32 %v10331_v60, %v2301_v50  ;;  %v301_v50 = vld [vmem:[%s14177_s0 + $0x58] sm:$0xff] }
 0x13a   :  { %v2303_v44 = vpop.f32.mrf.mxu0  ;;  %v2592_v56 = vpop.f32.mrf.mxu1 }
 0x13b   :  { %v10457_v39 = vadd.f32 %v2590_v23, %v2302_v61  ;;  %v7736_v61 = vcombine.low %v292_v59, %v296_v57  ;;  %v7745_v44 = vcombine.high %v300_v0, %v304_v45  ;;  %v308_v59 = vld [vmem:[%s14177_s0 + $0x90] sm:$0xff] }
 0x13c   :  { %v2306_v49 = vpop.f32.mrf.mxu0  ;;  %2497 = vmatmul.mubr.bf16.gmra.mxu0 %v7980_v18  ;;  %v2595_v37 = vpop.f32.mrf.mxu1  ;;  %2786 = vmatmul.mubr.bf16.gmra.mxu1 %v7982_v17  ;;  %v312_v57 = vld [vmem:[%s14177_s0 + $0xb0] sm:$0xff] }
 0x13d   :  { %v2307_v40 = vadd.f32 %v10331_v60, %v2306_v49  ;;  %2826 = vmatprep.mubr.bf16.mxu0 %v7737_v54  ;;  %3115 = vmatprep.mubr.bf16.mxu1 %v7739_v62  ;;  %v7738_v54 = vcombine.low %v293_v43, %v297_v36 }
 0x13e   :  { %v2308_v34 = vpop.f32.mrf.mxu0  ;;  %v2597_v38 = vpop.f32.mrf.mxu1 }
 0x13f   :  { %v10466_v4 = vadd.f32 %v2595_v37, %v2307_v40  ;;  %v305_v34 = vld [vmem:[%s14177_s0 + $0x78] sm:$0xff] }
 0x140   :  { %v2309_v18 = vpop.f32.mrf.mxu0  ;;  %v2598_v17 = vpop.f32.mrf.mxu1  ;;  %v7747_v56 = vcombine.high %v301_v50, %v305_v34 }
 0x141   :  { %v2310_v23 = vadd.f32 %v10331_v60, %v2309_v18  ;;  %v309_v18 = vld [vmem:[%s14177_s0 + $0x98] sm:$0xff] }
 0x142   :  { %v2311_v62 = vpop.f32.mrf.mxu0  ;;  %v2600_v49 = vpop.f32.mrf.mxu1 }
 0x143   :  { %v10475_v37 = vadd.f32 %v2598_v17, %v2310_v23  ;;  %v7744_v23 = vcombine.low %v300_v0, %v304_v45  ;;  %v7753_v62 = vcombine.high %v308_v59, %v312_v57  ;;  %v316_v0 = vld [vmem:[%s14177_s0 + $0xd0] sm:$0xff] }
 0x144   :  { %v2314_v40 = vpop.f32.mrf.mxu0  ;;  %2827 = vmatmul.mubr.bf16.vlgmr.msra.gmra.mxu0 %v7736_v61  ;;  %v2603_v35 = vpop.f32.mrf.mxu1  ;;  %3116 = vmatmul.mubr.bf16.vlgmr.msra.gmra.mxu1 %v7738_v54  ;;  %v320_v45 = vld [vmem:[%s14177_s0 + $0xf0] sm:$0xff] }
 0x145   :  { %v2315_v38 = vadd.f32 %v10331_v60, %v2314_v40  ;;  %2834 = vmatprep.mubr.bf16.mxu0 %v7745_v44  ;;  %3123 = vmatprep.mubr.bf16.mxu1 %v7747_v56  ;;  %v7746_v44 = vcombine.low %v301_v50, %v305_v34 }
 0x146   :  { %v2316_v32 = vpop.f32.mrf.mxu0  ;;  %v2605_v36 = vpop.f32.mrf.mxu1 }
 0x147   :  { %v10484_v43 = vadd.f32 %v2603_v35, %v2315_v38  ;;  %v313_v32 = vld [vmem:[%s14177_s0 + $0xb8] sm:$0xff] }
 0x148   :  { %v2317_v61 = vpop.f32.mrf.mxu0  ;;  %v2606_v54 = vpop.f32.mrf.mxu1  ;;  %v7755_v49 = vcombine.high %v309_v18, %v313_v32 }
 0x149   :  { %v2318_v17 = vadd.f32 %v10331_v60, %v2317_v61  ;;  %v317_v61 = vld [vmem:[%s14177_s0 + $0xd8] sm:$0xff] }
 0x14a   :  { %v2319_v56 = vpop.f32.mrf.mxu0  ;;  %v2608_v40 = vpop.f32.mrf.mxu1 }
 0x14b   :  { %v10493_v35 = vadd.f32 %v2606_v54, %v2318_v17  ;;  %v7752_v17 = vcombine.low %v308_v59, %v312_v57  ;;  %v7761_v56 = vcombine.high %v316_v0, %v320_v45  ;;  %v324_v59 = vld [vmem:[%s14177_s0 + $0x110] sm:$0xff] }
 0x14c   :  { %v2322_v38 = vpop.f32.mrf.mxu0  ;;  %2835 = vmatmul.mubr.bf16.gmra.mxu0 %v7744_v23  ;;  %v2611_v33 = vpop.f32.mrf.mxu1  ;;  %3124 = vmatmul.mubr.bf16.gmra.mxu1 %v7746_v44  ;;  %v328_v57 = vld [vmem:[%s14177_s0 + $0x130] sm:$0xff] }
 0x14d   :  { %v2323_v36 = vadd.f32 %v10331_v60, %v2322_v38  ;;  %2842 = vmatprep.mubr.bf16.mxu0 %v7753_v62  ;;  %3131 = vmatprep.mubr.bf16.mxu1 %v7755_v49  ;;  %v7754_v62 = vcombine.low %v309_v18, %v313_v32 }
 0x14e   :  { %v2324_v30 = vpop.f32.mrf.mxu0  ;;  %v2613_v34 = vpop.f32.mrf.mxu1 }
 0x14f   :  { %v10502_v50 = vadd.f32 %v2611_v33, %v2323_v36  ;;  %v321_v30 = vld [vmem:[%s14177_s0 + $0xf8] sm:$0xff] }
 0x150   :  { %v2325_v23 = vpop.f32.mrf.mxu0  ;;  %v2614_v44 = vpop.f32.mrf.mxu1  ;;  %v7763_v40 = vcombine.high %v317_v61, %v321_v30 }
 0x151   :  { %v2326_v54 = vadd.f32 %v10331_v60, %v2325_v23  ;;  %v325_v23 = vld [vmem:[%s14177_s0 + $0x118] sm:$0xff] }
 0x152   :  { %v2327_v49 = vpop.f32.mrf.mxu0  ;;  %v2616_v38 = vpop.f32.mrf.mxu1 }
 0x153   :  { %v10511_v33 = vadd.f32 %v2614_v44, %v2326_v54  ;;  %v7760_v54 = vcombine.low %v316_v0, %v320_v45  ;;  %v7769_v49 = vcombine.high %v324_v59, %v328_v57  ;;  %v332_v0 = vld [vmem:[%s14177_s0 + $0x150] sm:$0xff] }
 0x154   :  { %v2330_v36 = vpop.f32.mrf.mxu0  ;;  %2843 = vmatmul.mubr.bf16.gmra.mxu0 %v7752_v17  ;;  %v2619_v31 = vpop.f32.mrf.mxu1  ;;  %3132 = vmatmul.mubr.bf16.gmra.mxu1 %v7754_v62  ;;  %v336_v45 = vld [vmem:[%s14177_s0 + $0x170] sm:$0xff] }
 0x155   :  { %v2331_v34 = vadd.f32 %v10331_v60, %v2330_v36  ;;  %2850 = vmatprep.mubr.bf16.mxu0 %v7761_v56  ;;  %3139 = vmatprep.mubr.bf16.mxu1 %v7763_v40  ;;  %v7762_v56 = vcombine.low %v317_v61, %v321_v30 }
 0x156   :  { %v2332_v28 = vpop.f32.mrf.mxu0  ;;  %v2621_v32 = vpop.f32.mrf.mxu1 }
 0x157   :  { %v10520_v18 = vadd.f32 %v2619_v31, %v2331_v34  ;;  %v329_v28 = vld [vmem:[%s14177_s0 + $0x138] sm:$0xff] }
 0x158   :  { %v2333_v17 = vpop.f32.mrf.mxu0  ;;  %v2622_v62 = vpop.f32.mrf.mxu1  ;;  %v7771_v38 = vcombine.high %v325_v23, %v329_v28 }
 0x159   :  { %v2334_v44 = vadd.f32 %v10331_v60, %v2333_v17  ;;  %v333_v17 = vld [vmem:[%s14177_s0 + $0x158] sm:$0xff] }
 0x15a   :  { %v2335_v40 = vpop.f32.mrf.mxu0  ;;  %v2624_v36 = vpop.f32.mrf.mxu1 }
 0x15b   :  { %v10529_v31 = vadd.f32 %v2622_v62, %v2334_v44  ;;  %v7768_v44 = vcombine.low %v324_v59, %v328_v57  ;;  %v7777_v40 = vcombine.high %v332_v0, %v336_v45  ;;  %v340_v59 = vld [vmem:[%s14177_s0 + $0x190] sm:$0xff] }
 0x15c   :  { %v2338_v34 = vpop.f32.mrf.mxu0  ;;  %2851 = vmatmul.mubr.bf16.gmra.mxu0 %v7760_v54  ;;  %v2627_v29 = vpop.f32.mrf.mxu1  ;;  %3140 = vmatmul.mubr.bf16.gmra.mxu1 %v7762_v56  ;;  %v344_v57 = vld [vmem:[%s14177_s0 + $0x1b0] sm:$0xff] }
 0x15d   :  { %v2339_v32 = vadd.f32 %v10331_v60, %v2338_v34  ;;  %2858 = vmatprep.mubr.bf16.mxu0 %v7769_v49  ;;  %3147 = vmatprep.mubr.bf16.mxu1 %v7771_v38  ;;  %v7770_v49 = vcombine.low %v325_v23, %v329_v28 }
 0x15e   :  { %v2340_v26 = vpop.f32.mrf.mxu0  ;;  %v2629_v30 = vpop.f32.mrf.mxu1 }
 0x15f   :  { %v10538_v61 = vadd.f32 %v2627_v29, %v2339_v32  ;;  %v337_v26 = vld [vmem:[%s14177_s0 + $0x178] sm:$0xff] }
 0x160   :  { %v2341_v54 = vpop.f32.mrf.mxu0  ;;  %v2630_v56 = vpop.f32.mrf.mxu1  ;;  %v7779_v36 = vcombine.high %v333_v17, %v337_v26 }
 0x161   :  { %v2342_v62 = vadd.f32 %v10331_v60, %v2341_v54  ;;  %v341_v54 = vld [vmem:[%s14177_s0 + $0x198] sm:$0xff] }
 0x162   :  { %v2343_v38 = vpop.f32.mrf.mxu0  ;;  %v2632_v34 = vpop.f32.mrf.mxu1 }
 0x163   :  { %v10547_v29 = vadd.f32 %v2630_v56, %v2342_v62  ;;  %v7776_v62 = vcombine.low %v332_v0, %v336_v45  ;;  %v7785_v38 = vcombine.high %v340_v59, %v344_v57  ;;  %v10571_v0 = vld [vmem:[%s14177_s0 + $0x1d0] sm:$0xff] }
 0x164   :  { %v2346_v32 = vpop.f32.mrf.mxu0  ;;  %2859 = vmatmul.mubr.bf16.gmra.mxu0 %v7768_v44  ;;  %v2635_v27 = vpop.f32.mrf.mxu1  ;;  %3148 = vmatmul.mubr.bf16.gmra.mxu1 %v7770_v49  ;;  %v10576_v45 = vld [vmem:[%s14177_s0 + $0x1f0] sm:$0xff] }
 0x165   :  { %v2347_v30 = vadd.f32 %v10331_v60, %v2346_v32  ;;  %2866 = vmatprep.mubr.bf16.mxu0 %v7777_v40  ;;  %3155 = vmatprep.mubr.bf16.mxu1 %v7779_v36  ;;  %v7778_v40 = vcombine.low %v333_v17, %v337_v26 }
 0x166   :  { %v2348_v24 = vpop.f32.mrf.mxu0  ;;  %v2637_v28 = vpop.f32.mrf.mxu1 }
 0x167   :  { %v10556_v23 = vadd.f32 %v2635_v27, %v2347_v30  ;;  %v345_v24 = vld [vmem:[%s14177_s0 + $0x1b8] sm:$0xff] }
 0x168   :  { %v2349_v44 = vpop.f32.mrf.mxu0  ;;  %v2638_v49 = vpop.f32.mrf.mxu1  ;;  %v7787_v34 = vcombine.high %v341_v54, %v345_v24 }
 0x169   :  { %v2350_v56 = vadd.f32 %v10331_v60, %v2349_v44  ;;  %v10583_v44 = vld [vmem:[%s14177_s0 + $0x1d8] sm:$0xff] }
 0x16a   :  { %v2351_v36 = vpop.f32.mrf.mxu0  ;;  %v2640_v32 = vpop.f32.mrf.mxu1 }
 0x16b   :  { %v10565_v27 = vadd.f32 %v2638_v49, %v2350_v56  ;;  %v7784_v56 = vcombine.low %v340_v59, %v344_v57  ;;  %v10596_v36 = vld [vmem:[%s14179_s2 + $0x78] sm:$0xff]  }
 0x16c   :  { %v2354_v30 = vpop.f32.mrf.mxu0  ;;  %2867 = vmatmul.mubr.bf16.gmra.mxu0 %v7776_v62  ;;  %v2643_v25 = vpop.f32.mrf.mxu1  ;;  %3156 = vmatmul.mubr.bf16.gmra.mxu1 %v7778_v40  ;;  %14549 = vst [vmem:[#allocation70_spill] sm:$0xff] %v10596_v36  ;;  %v10606_v57 = vld [vmem:[%s14179_s2 + $0x38] sm:$0xff]  }
 0x16d   :  { %v2355_v28 = vadd.f32 %v10331_v60, %v2354_v30  ;;  %2874 = vmatprep.mubr.bf16.mxu0 %v7785_v38  ;;  %3163 = vmatprep.mubr.bf16.mxu1 %v7787_v34  ;;  %v7786_v38 = vcombine.low %v341_v54, %v345_v24  ;;  %14550 = vst [vmem:[#allocation71_spill] sm:$0xff] %v10606_v57  ;;  %v14242_v54 = vunpack.c.h.bf16 %v10606_v57 }
 0x16e   :  { %v2356_v20 = vpop.f32.mrf.mxu0  ;;  %v2645_v26 = vpop.f32.mrf.mxu1 }
 0x16f   :  { %v10578_v17 = vadd.f32 %v2643_v25, %v2355_v28  ;;  %v10588_v20 = vld [vmem:[%s14177_s0 + $0x1f8] sm:$0xff]  ;;  %v7793_v25 = vcombine.high %v10571_v0, %v10576_v45 }
 0x170   :  { %v2357_v62 = vpop.f32.mrf.mxu0  ;;  %v2646_v40 = vpop.f32.mrf.mxu1  ;;  %v7795_v30 = vcombine.high %v10583_v44, %v10588_v20  ;;  %v7794_v14 = vcombine.low %v10583_v44, %v10588_v20 }
 0x171   :  { %v2358_v49 = vadd.f32 %v10331_v60, %v2357_v62  ;;  %v14238_v62 = vmov 0.0  }
 0x172   :  { %v2359_v32 = vpop.f32.mrf.mxu0  ;;  %v2648_v59 = vpop.f32.mrf.mxu1  ;;  %8625 = vmatprep.subr.mxu0 %v14238_v62  ;;  %8660 = vmatprep.subr.mxu1 %v14238_v62 }
 0x173   :  { %v10601_v28 = vadd.f32 %v2646_v40, %v2358_v49  ;;  %v10616_v40 = vld [vmem:[%s14179_s2 + $0x70] sm:$0xff]   ;;  %8661 = vmatpush3.msra.mxu1 %v14242_v54  ;;  %v14554_v59 = vunpack.c.l.bf16 %v10596_v36  ;;  %v14556_v54 = vunpack.c.l.bf16 %v10606_v57 }
 0x174   :  { %v2362_v26 = vpop.f32.mrf.mxu0  ;;  %2875 = vmatmul.mubr.bf16.gmra.mxu0 %v7784_v56  ;;  %v2651_v34 = vpop.f32.mrf.mxu1  ;;  %3164 = vmatmul.mubr.bf16.gmra.mxu1 %v7786_v38  ;;  %14551 = vst [vmem:[#allocation72_spill] sm:$0xff] %v10616_v40  ;;  %v10622_v56 = vld [vmem:[%s14177_s0 + $0x210] sm:$0xff] }
 0x175   :  { %v2363_v32 = vadd.f32 %v10331_v60, %v2362_v26  ;;  %2882 = vmatprep.mubr.bf16.mxu0 %v7793_v25  ;;  %3171 = vmatprep.mubr.bf16.mxu1 %v7795_v30  ;;  %v10627_v38 = vld [vmem:[%s14177_s0 + $0x230] sm:$0xff]  ;;  %v14552_v25 = vunpack.c.h.bf16 %v10596_v36  ;;  %v10636_v30 = vld [vmem:[%s14177_s0 + $0x218] sm:$0xff] }
 0x176   :  { %v2364_v24 = vpop.f32.mrf.mxu0  ;;  %v2653_v49 = vpop.f32.mrf.mxu1  ;;  %v7801_v15 = vcombine.high %v10622_v56, %v10627_v38  ;;  %v10693_v36 = vld [vmem:[%s14177_s0 + $0x250] sm:$0xff] }
 0x177   :  { %8626 = vmatpush3.msra.mxu0 %v14552_v25  ;;  %v10631_v26 = vadd.f32 %v2651_v34, %v2363_v32  ;;  %v10641_v24 = vld [vmem:[%s14177_s0 + $0x238] sm:$0xff]  ;;  %v10648_v34 = vld [vmem:[%s14179_s2 + $0x30] sm:$0xff]   ;;  %v7792_v25 = vcombine.low %v10571_v0, %v10576_v45  ;;  %v14555_v32 = vmov 0.0  }
 0x178   :  { %8627 = vmatprep.subr.mxu0 %v14238_v62  ;;  %14553 = vst [vmem:[#allocation73_spill] sm:$0xff] %v10648_v34  ;;  %v2365_v49 = vpop.f32.mrf.mxu0  ;;  %v2654_v62 = vpop.f32.mrf.mxu1  ;;  %8662 = vmatprep.subr.mxu1 %v14555_v32  ;;  %v7803_v45 = vcombine.high %v10636_v30, %v10641_v24  ;;  %v7802_v57 = vcombine.low %v10636_v30, %v10641_v24 }
 0x179   :  { %8628 = vmatpush3.msra.mxu0 %v14554_v59  ;;  %v2366_v21 = vadd.f32 %v10331_v60, %v2365_v49  ;;  %8663 = vmatpush3.msra.mxu1 %v14556_v54  ;;  %v14557_v59 = vunpack.c.h.bf16 %v10616_v40  ;;  %v14248_v49 = vunpack.c.l.bf16 %v10616_v40  ;;  %v10680_v54 = vld [vmem:[%s14179_s2 + $0x68] sm:$0xff]  }
 0x17a   :  { %8629 = vmatprep.subr.mxu0 %v14555_v32  ;;  %v2367_v0 = vpop.f32.mrf.mxu0  ;;  %v2656_v20 = vpop.f32.mrf.mxu1  ;;  %8664 = vmatprep.subr.mxu1 %v14555_v32  ;;  %14559 = vst [vmem:[#allocation74_spill] sm:$0xff] %v10680_v54  ;;  %v14562_v40 = vunpack.c.h.bf16 %v10680_v54 }
 0x17b   :  { %8630 = vmatpush3.msra.mxu0 %v14557_v59  ;;  %v10671_v44 = vadd.f32 %v2654_v62, %v2366_v21  ;;  %v14558_v0 = vunpack.c.h.bf16 %v10648_v34  ;;  %v10687_v20 = vld [vmem:[%s14179_s2 + $0x28] sm:$0xff]  }
 0x17c   :  { %v2370_v12 = vpop.f32.mrf.mxu0  ;;  %2883 = vmatmul.mubr.bf16.gmra.mxu0 %v7792_v25  ;;  %v2659_v62 = vpop.f32.mrf.mxu1  ;;  %3172 = vmatmul.mubr.bf16.gmra.mxu1 %v7794_v14  ;;  %14560 = vst [vmem:[#allocation75_spill] sm:$0xff] %v10687_v20 }
 0x17d   :  { %8665 = vmatpush3.msra.mxu1 %v14558_v0  ;;  %v2371_v21 = vadd.f32 %v10331_v60, %v2370_v12  ;;  %2890 = vmatprep.mubr.bf16.mxu0 %v7801_v15  ;;  %v10698_v12 = vld [vmem:[%s14177_s0 + $0x270] sm:$0xff] }
 0x17e   :  { %v2372_v0 = vpop.f32.mrf.mxu0  ;;  %3179 = vmatprep.mubr.bf16.mxu1 %v7803_v45  ;;  %8631 = vmatprep.subr.mxu0 %v14555_v32  ;;  %v2661_v59 = vpop.f32.mrf.mxu1  ;;  %v10707_v45 = vld [vmem:[%s14177_s0 + $0x258] sm:$0xff] }
 0x17f   :  { %v10702_v15 = vadd.f32 %v2659_v62, %v2371_v21  ;;  %v10712_v0 = vld [vmem:[%s14177_s0 + $0x278] sm:$0xff]  ;;  %8632 = vmatpush3.msra.mxu0 %v14248_v49  ;;  %8666 = vmatprep.subr.mxu1 %v14555_v32  ;;  %v7800_v21 = vcombine.low %v10622_v56, %v10627_v38  ;;  %v14561_v59 = vunpack.c.l.bf16 %v10648_v34  ;;  %v7809_v49 = vcombine.high %v10693_v36, %v10698_v12  ;;  %v10749_v56 = vld [vmem:[%s14179_s2 + $0x60] sm:$0xff]  }
 0x180   :  { %v2373_v25 = vpop.f32.mrf.mxu0  ;;  %8633 = vmatprep.subr.mxu0 %v14555_v32  ;;  %v2662_v14 = vpop.f32.mrf.mxu1  ;;  %v14564_v34 = vunpack.c.l.bf16 %v10680_v54  ;;  %14566 = vst [vmem:[#allocation77_spill] sm:$0xff] %v10749_v56 }
 0x181   :  { %8667 = vmatpush3.msra.mxu1 %v14561_v59  ;;  %v2374_v62 = vadd.f32 %v10331_v60, %v2373_v25  ;;  %8634 = vmatpush3.msra.mxu0 %v14562_v40  ;;  %v7811_v59 = vcombine.high %v10707_v45, %v10712_v0  ;;  %v14563_v25 = vunpack.c.h.bf16 %v10687_v20  ;;  %v10743_v40 = vld [vmem:[%s14179_s2 + $0x20] sm:$0xff]  }
 0x182   :  { %8668 = vmatprep.subr.mxu1 %v14555_v32  ;;  %v2375_v38 = vpop.f32.mrf.mxu0  ;;  %8635 = vmatprep.subr.mxu0 %v14555_v32  ;;  %v2664_v24 = vpop.f32.mrf.mxu1  ;;  %14565 = vst [vmem:[#allocation76_spill] sm:$0xff] %v10743_v40 }
 0x183   :  { %8669 = vmatpush3.msra.mxu1 %v14563_v25  ;;  %v10736_v30 = vadd.f32 %v2662_v14, %v2374_v62  ;;  %8636 = vmatpush3.msra.mxu0 %v14564_v34  ;;  %v14258_v25 = vunpack.c.h.bf16 %v10749_v56  ;;  %v7810_v38 = vcombine.low %v10707_v45, %v10712_v0  ;;  %v14570_v45 = vunpack.c.l.bf16 %v10749_v56 }
 0x184   :  { %v2378_v14 = vpop.f32.mrf.mxu0  ;;  %2891 = vmatmul.mubr.bf16.gmra.mxu0 %v7800_v21  ;;  %8670 = vmatprep.subr.mxu1 %v14555_v32  ;;  %v2667_v62 = vpop.f32.mrf.mxu1  ;;  %v10764_v21 = vld [vmem:[%s14177_s0 + $0x2b0] sm:$0xff]  ;;  %v14571_v0 = vunpack.c.l.bf16 %v10743_v40 }
 0x185   :  { %v2379_v34 = vadd.f32 %v10331_v60, %v2378_v14  ;;  %3180 = vmatmul.mubr.bf16.gmra.mxu1 %v7802_v57  ;;  %2898 = vmatprep.mubr.bf16.mxu0 %v7809_v49  ;;  %v14567_v14 = vunpack.c.l.bf16 %v10687_v20  ;;  %v7817_v20 = vcombine.high %v10759_v13, %v10764_v21 }
 0x186   :  { %v2380_v54 = vpop.f32.mrf.mxu0  ;;  %3187 = vmatprep.mubr.bf16.mxu1 %v7811_v59  ;;  %v2669_v49 = vpop.f32.mrf.mxu1  ;;  %v10778_v59 = vld [vmem:[%s14177_s0 + $0x2b8] sm:$0xff]  ;;  %8637 = vmatprep.subr.mxu0 %v14555_v32 }
 0x187   :  { %8671 = vmatpush3.msra.mxu1 %v14567_v14  ;;  %v10768_v57 = vadd.f32 %v2667_v62, %v2379_v34  ;;  %v10773_v54 = vld [vmem:[%s14177_s0 + $0x298] sm:$0xff]  ;;  %v7808_v34 = vcombine.low %v10693_v36, %v10698_v12  ;;  %8638 = vmatpush3.msra.mxu0 %v14258_v25  ;;  %v14568_v62 = vunpack.c.h.bf16 %v10743_v40 }
 0x188   :  { %8672 = vmatprep.subr.mxu1 %v14555_v32  ;;  %v2381_v24 = vpop.f32.mrf.mxu0  ;;  %v2670_v49 = vpop.f32.mrf.mxu1  ;;  %8639 = vmatprep.subr.mxu0 %v14555_v32  ;;  %v10798_v36 = vld [vmem:[%s14179_s2 + $0x58] sm:$0xff]   ;;  %v7818_v56 = vcombine.low %v10773_v54, %v10778_v59 }
 0x189   :  { %8673 = vmatpush3.msra.mxu1 %v14568_v62  ;;  %v2382_v14 = vadd.f32 %v10331_v60, %v2381_v24  ;;  %14569 = vst [vmem:[#allocation78_spill] sm:$0xff] %v10798_v36  ;;  %v7819_v24 = vcombine.high %v10773_v54, %v10778_v59  ;;  %8640 = vmatpush3.msra.mxu0 %v14570_v45  ;;  %v10810_v25 = vld [vmem:[%s14179_s2 + $0x18] sm:$0xff]  }
 0x18a   :  { %8674 = vmatprep.subr.mxu1 %v14555_v32  ;;  %v2383_v62 = vpop.f32.mrf.mxu0  ;;  %14572 = vst [vmem:[#allocation79_spill] sm:$0xff] %v10810_v25  ;;  %v14266_v10 = vunpack.c.h.bf16 %v10810_v25  ;;  %v2672_v12 = vpop.f32.mrf.mxu1  ;;  %8641 = vmatprep.subr.mxu0 %v14555_v32  ;;  %v10849_v45 = vld [vmem:[%s14177_s0 + $0x2d8] sm:$0xff]  ;;  %v14577_v9 = vunpack.c.l.bf16 %v10810_v25 }
 0x18b   :  { %8675 = vmatpush3.msra.mxu1 %v14571_v0  ;;  %v10813_v11 = vadd.f32 %v2670_v49, %v2382_v14  ;;  %v10823_v14 = vld [vmem:[%s14179_s2 + $0x50] sm:$0xff]   ;;  %v10854_v62 = vld [vmem:[%s14177_s0 + $0x2f8] sm:$0xff] }
 0x18c   :  { %v2386_v8 = vpop.f32.mrf.mxu0  ;;  %2899 = vmatmul.mubr.bf16.gmra.mxu0 %v7808_v34  ;;  %8676 = vmatprep.subr.mxu1 %v14555_v32  ;;  %v2675_v40 = vpop.f32.mrf.mxu1  ;;  %14573 = vst [vmem:[#allocation80_spill] sm:$0xff] %v10823_v14  ;;  %v10829_v34 = vld [vmem:[%s14177_s0 + $0x2d0] sm:$0xff] }
 0x18d   :  { %v2387_v0 = vadd.f32 %v10331_v60, %v2386_v8  ;;  %3188 = vmatmul.mubr.bf16.gmra.mxu1 %v7810_v38  ;;  %2906 = vmatprep.mubr.bf16.mxu0 %v7817_v20  ;;  %v10834_v8 = vld [vmem:[%s14177_s0 + $0x2f0] sm:$0xff]  ;;  %v14574_v20 = vunpack.c.h.bf16 %v10798_v36 }
 0x18e   :  { %v2388_v12 = vpop.f32.mrf.mxu0  ;;  %3195 = vmatprep.mubr.bf16.mxu1 %v7819_v24  ;;  %v10841_v38 = vld [vmem:[%s14179_s2 + $0x10] sm:$0xff]   ;;  %v2677_v49 = vpop.f32.mrf.mxu1  ;;  %8677 = vmatpush3.msra.mxu1 %v14266_v10  ;;  %v7825_v10 = vcombine.high %v10829_v34, %v10834_v8 }
 0x18f   :  { %8642 = vmatpush3.msra.mxu0 %v14574_v20  ;;  %14575 = vst [vmem:[#allocation81_spill] sm:$0xff] %v10841_v38  ;;  %v10844_v12 = vadd.f32 %v2675_v40, %v2387_v0  ;;  %v7816_v40 = vcombine.low %v10759_v13, %v10764_v21  ;;  %v14576_v0 = vunpack.c.l.bf16 %v10798_v36  ;;  %8678 = vmatprep.subr.mxu1 %v14555_v32  ;;  %v14579_v36 = vunpack.c.h.bf16 %v10841_v38 }
 0x190   :  { %8643 = vmatprep.subr.mxu0 %v14555_v32  ;;  %v2389_v20 = vpop.f32.mrf.mxu0  ;;  %v2678_v24 = vpop.f32.mrf.mxu1  ;;  %8679 = vmatpush3.msra.mxu1 %v14577_v9 }
 0x191   :  { %8644 = vmatpush3.msra.mxu0 %v14576_v0  ;;  %v2390_v49 = vadd.f32 %v10331_v60, %v2389_v20  ;;  %v7827_v0 = vcombine.high %v10849_v45, %v10854_v62  ;;  %v14578_v20 = vunpack.c.h.bf16 %v10823_v14  ;;  %8680 = vmatprep.subr.mxu1 %v14555_v32 }
 0x192   :  { %8645 = vmatprep.subr.mxu0 %v14555_v32  ;;  %v2391_v21 = vpop.f32.mrf.mxu0  ;;  %v2680_v59 = vpop.f32.mrf.mxu1  ;;  %8681 = vmatpush3.msra.mxu1 %v14579_v36  ;;  %v10894_v36 = vld [vmem:[%s14179_s2 + $0x8] sm:$0xff]  }
 0x193   :  { %8646 = vmatpush3.msra.mxu0 %v14578_v20  ;;  %v10878_v54 = vadd.f32 %v2678_v24, %v2390_v49  ;;  %v10886_v21 = vld [vmem:[%s14179_s2 + $0x48] sm:$0xff]   ;;  %14581 = vst [vmem:[#allocation83_spill] sm:$0xff] %v10894_v36  ;;  %8682 = vmatprep.subr.mxu1 %v14555_v32  ;;  %v7826_v59 = vcombine.low %v10849_v45, %v10854_v62  ;;  %v10952_v62 = vld [vmem:[%s14179_s2 + $0x40] sm:$0xff]  }
 0x194   :  { %14580 = vst [vmem:[#allocation82_spill] sm:$0xff] %v10886_v21  ;;  %v14274_v13 = vunpack.c.h.bf16 %v10886_v21  ;;  %v2394_v25 = vpop.f32.mrf.mxu0  ;;  %2907 = vmatmul.mubr.bf16.gmra.mxu0 %v7816_v40  ;;  %8647 = vmatprep.subr.mxu0 %v14555_v32  ;;  %v2683_v49 = vpop.f32.mrf.mxu1  ;;  %v10901_v40 = vld [vmem:[%s14177_s0 + $0x310] sm:$0xff]  ;;  %14586 = vst [vmem:[#allocation84_spill] sm:$0xff] %v10952_v62 }
 0x195   :  { %v2395_v24 = vadd.f32 %v10331_v60, %v2394_v25  ;;  %3196 = vmatmul.mubr.bf16.gmra.mxu1 %v7818_v56  ;;  %2914 = vmatprep.mubr.bf16.mxu0 %v7825_v10  ;;  %v10906_v10 = vld [vmem:[%s14177_s0 + $0x330] sm:$0xff]  ;;  %v14582_v60 = vunpack.c.l.bf16 %v10823_v14 }
 0x196   :  { %v2396_v9 = vpop.f32.mrf.mxu0  ;;  %3203 = vmatprep.mubr.bf16.mxu1 %v7827_v0  ;;  %v2685_v25 = vpop.f32.mrf.mxu1  ;;  %v10915_v0 = vld [vmem:[%s14177_s0 + $0x318] sm:$0xff] }
 0x197   :  { %8648 = vmatpush3.msra.mxu0 %v14582_v60  ;;  %v10910_v56 = vadd.f32 %v2683_v49, %v2395_v24  ;;  %v10920_v9 = vld [vmem:[%s14177_s0 + $0x338] sm:$0xff]  ;;  %v7824_v24 = vcombine.low %v10829_v34, %v10834_v8  ;;  %v14583_v49 = vunpack.c.l.bf16 %v10841_v38  ;;  %v10934_v25 = vld [vmem:[%s14180_s3] ss:$0 sm:$0xff]  ;;  %v7833_v34 = vcombine.high %v10901_v40, %v10906_v10 }
 0x198   :  { %8649 = vmatprep.subr.mxu0 %v14555_v32  ;;  %v2397_v60 = vpop.f32.mrf.mxu0  ;;  %v2686_v14 = vpop.f32.mrf.mxu1  ;;  %v7834_v7 = vcombine.low %v10915_v0, %v10920_v9 }
 0x199   :  { %8683 = vmatpush3.msra.mxu1 %v14583_v49  ;;  %8650 = vmatpush3.msra.mxu0 %v14274_v13  ;;  %v2398_v20 = vadd.f32 %v10934_v25, %v2397_v60  ;;  %v7835_v49 = vcombine.high %v10915_v0, %v10920_v9  ;;  %v14584_v13 = vunpack.c.h.bf16 %v10894_v36  ;;  %v14585_v60 = vunpack.c.l.bf16 %v10886_v21 }
 0x19a   :  { %8684 = vmatprep.subr.mxu1 %v14555_v32  ;;  %8651 = vmatprep.subr.mxu0 %v14555_v32  ;;  %v2399_v8 = vpop.f32.mrf.mxu0  ;;  %v2688_v6 = vpop.f32.mrf.mxu1  ;;  %v14588_v21 = vunpack.c.l.bf16 %v10894_v36 }
 0x19b   :  { %8685 = vmatpush3.msra.mxu1 %v14584_v13  ;;  %8652 = vmatpush3.msra.mxu0 %v14585_v60  ;;  %v10955_v38 = vadd.f32 %v2686_v14, %v2398_v20  ;;  %v10961_v8 = vld [vmem:[%s14179_s2] sm:$0xff]   ;;  %v396_v13 = vld [vmem:[%s14177_s0 + $0x350] sm:$0xff]  ;;  %v7832_v6 = vcombine.low %v10901_v40, %v10906_v10 }
 0x19c   :  { %8686 = vmatprep.subr.mxu1 %v14555_v32  ;;  %14587 = vst [vmem:[#allocation85_spill] sm:$0xff] %v10961_v8  ;;  %v2402_v60 = vpop.f32.mrf.mxu0  ;;  %2915 = vmatmul.mubr.bf16.gmra.mxu0 %v7824_v24  ;;  %v2691_v20 = vpop.f32.mrf.mxu1  ;;  %v400_v24 = vld [vmem:[%s14177_s0 + $0x370] sm:$0xff]  ;;  %v14592_v40 = vunpack.c.l.bf16 %v10961_v8 }
 0x19d   :  { %8687 = vmatpush3.msra.mxu1 %v14588_v21  ;;  %v2403_v14 = vadd.f32 %v10934_v25, %v2402_v60  ;;  %2922 = vmatprep.mubr.bf16.mxu0 %v7833_v34  ;;  %v401_v34 = vld [vmem:[%s14177_s0 + $0x378] sm:$0xff]  ;;  %v7841_v36 = vcombine.high %v396_v13, %v400_v24 }
 0x19e   :  { %3204 = vmatmul.mubr.bf16.gmra.mxu1 %v7826_v59  ;;  %v2404_v45 = vpop.f32.mrf.mxu0  ;;  %8653 = vmatprep.subr.mxu0 %v14555_v32  ;;  %v2693_v60 = vpop.f32.mrf.mxu1  ;;  %v397_v59 = vld [vmem:[%s14177_s0 + $0x358] sm:$0xff] }
 0x19f   :  { %3211 = vmatprep.mubr.bf16.mxu1 %v7835_v49  ;;  %v10976_v21 = vadd.f32 %v2691_v20, %v2403_v14  ;;  %v14589_v49 = vunpack.c.h.bf16 %v10952_v62  ;;  %8688 = vmatprep.subr.mxu1 %v14555_v32  ;;  %v14590_v14 = vunpack.c.h.bf16 %v10961_v8  ;;  %v7843_v5 = vcombine.high %v397_v59, %v401_v34 }
 0x1a0   :  { %v2405_v45 = vpop.f32.mrf.mxu0  ;;  %v2694_v60 = vpop.f32.mrf.mxu1 }
 0x1a1   :  { %8654 = vmatpush3.msra.mxu0 %v14589_v49  ;;  %8689 = vmatpush3.msra.mxu1 %v14590_v14  ;;  %v2406_v20 = vadd.f32 %v10934_v25, %v2405_v45  ;;  %v14591_v49 = vunpack.c.l.bf16 %v10952_v62 }
 0x1a2   :  { %8655 = vmatprep.subr.mxu0 %v14555_v32  ;;  %8690 = vmatprep.subr.mxu1 %v14555_v32  ;;  %v2407_v3 = vpop.f32.mrf.mxu0  ;;  %v2696_v45 = vpop.f32.mrf.mxu1 }
 0x1a3   :  { %8656 = vmatpush3.msra.mxu0 %v14591_v49  ;;  %8691 = vmatpush3.msra.mxu1 %v14592_v40  ;;  %v11001_v10 = vadd.f32 %v2694_v60, %v2406_v20  ;;  %v404_v3 = vld [vmem:[%s14177_s0 + $0x390] sm:$0xff] }
 0x1a4   :  { %8695 = vmatprep.subr.mxu0 %v14555_v32  ;;  %8730 = vmatprep.subr.mxu1 %v14555_v32  ;;  %v2410_v14 = vpop.f32.mrf.mxu0  ;;  %v2699_v9 = vpop.f32.mrf.mxu1  ;;  %v408_v20 = vld [vmem:[%s14177_s0 + $0x3b0] sm:$0xff] }
 0x1a5   :  { %14593 = vst [vmem:[#allocation86_spill] sm:$0xff] %v11001_v10  ;;  %2923 = vmatmul.mubr.bf16.gmra.mxu0 %v7832_v6  ;;  %v2411_v0 = vadd.f32 %v10934_v25, %v2410_v14  ;;  %v405_v6 = vld [vmem:[%s14177_s0 + $0x398] sm:$0xff]  ;;  %v7849_v8 = vcombine.high %v404_v3, %v408_v20 }
 0x1a6   :  { %3212 = vmatmul.mubr.bf16.gmra.mxu1 %v7834_v7  ;;  %2930 = vmatprep.mubr.bf16.mxu0 %v7841_v36  ;;  %v2412_v49 = vpop.f32.mrf.mxu0  ;;  %v2701_v40 = vpop.f32.mrf.mxu1  ;;  %v409_v7 = vld [vmem:[%s14177_s0 + $0x3b8] sm:$0xff]  ;;  %v7840_v36 = vcombine.low %v396_v13, %v400_v24  ;;  %v412_v13 = vld [vmem:[%s14177_s0 + $0x3d0] sm:$0xff] }
 0x1a7   :  { %3219 = vmatprep.mubr.bf16.mxu1 %v7843_v5  ;;  %v11011_v60 = vadd.f32 %v2699_v9, %v2411_v0  ;;  %v7842_v49 = vcombine.low %v397_v59, %v401_v34  ;;  %v7851_v1 = vcombine.high %v405_v6, %v409_v7  ;;  %v413_v34 = vld [vmem:[%s14177_s0 + $0x3d8] sm:$0xff] }
 0x1a8   :  { %v2413_v5 = vpop.f32.mrf.mxu0  ;;  %v2702_v14 = vpop.f32.mrf.mxu1 }
 0x1a9   :  { %14594 = vst [vmem:[#allocation87_spill] sm:$0xff] %v11011_v60  ;;  %v2414_v45 = vadd.f32 %v10934_v25, %v2413_v5 }
 0x1aa   :  { %v2415_v62 = vpop.f32.mrf.mxu0  ;;  %v2704_v9 = vpop.f32.mrf.mxu1 }
 0x1ab   :  { %v11020_v0 = vadd.f32 %v2702_v14, %v2414_v45  ;;  %v416_v62 = vld [vmem:[%s14177_s0 + $0x3f0] sm:$0xff]  ;;  %v7850_v45 = vcombine.low %v405_v6, %v409_v7 }
 0x1ac   :  { %v2418_v40 = vpop.f32.mrf.mxu0  ;;  %v2707_v42 = vpop.f32.mrf.mxu1  ;;  %v7857_v14 = vcombine.high %v412_v13, %v416_v62 }
 0x1ad   :  { %14595 = vst [vmem:[#allocation88_spill] sm:$0xff] %v11020_v0  ;;  %2931 = vmatmul.mubr.bf16.gmra.mxu0 %v7840_v36  ;;  %v2419_v2 = vadd.f32 %v10934_v25, %v2418_v40 }
 0x1ae   :  { %3220 = vmatmul.mubr.bf16.gmra.mxu1 %v7842_v49  ;;  %2938 = vmatprep.mubr.bf16.mxu0 %v7849_v8  ;;  %v2420_v60 = vpop.f32.mrf.mxu0  ;;  %v2709_v59 = vpop.f32.mrf.mxu1  ;;  %v417_v8 = vld [vmem:[%s14177_s0 + $0x3f8] sm:$0xff] }
 0x1af   :  { %3227 = vmatprep.mubr.bf16.mxu1 %v7851_v1  ;;  %v11029_v24 = vadd.f32 %v2707_v42, %v2419_v2  ;;  %v7848_v60 = vcombine.low %v404_v3, %v408_v20  ;;  %v7859_v9 = vcombine.high %v413_v34, %v417_v8  ;;  %v420_v3 = vld [vmem:[%s14177_s0 + $0x410] sm:$0xff] }
 0x1b0   :  { %v2421_v1 = vpop.f32.mrf.mxu0  ;;  %v2710_v36 = vpop.f32.mrf.mxu1  ;;  %v424_v20 = vld [vmem:[%s14177_s0 + $0x430] sm:$0xff] }
 0x1b1   :  { %14596 = vst [vmem:[#allocation89_spill] sm:$0xff] %v11029_v24  ;;  %v2422_v5 = vadd.f32 %v10934_v25, %v2421_v1  ;;  %v421_v1 = vld [vmem:[%s14177_s0 + $0x418] sm:$0xff] }
 0x1b2   :  { %v2423_v49 = vpop.f32.mrf.mxu0  ;;  %v2712_v42 = vpop.f32.mrf.mxu1 }
 0x1b3   :  { %v11038_v2 = vadd.f32 %v2710_v36, %v2422_v5  ;;  %v7856_v5 = vcombine.low %v412_v13, %v416_v62  ;;  %v7865_v49 = vcombine.high %v420_v3, %v424_v20  ;;  %v428_v13 = vld [vmem:[%s14177_s0 + $0x450] sm:$0xff] }
 0x1b4   :  { %v2426_v40 = vpop.f32.mrf.mxu0  ;;  %v2715_v24 = vpop.f32.mrf.mxu1  ;;  %v432_v62 = vld [vmem:[%s14177_s0 + $0x470] sm:$0xff] }
 0x1b5   :  { %14597 = vst [vmem:[#allocation90_spill] sm:$0xff] %v11038_v2  ;;  %2939 = vmatmul.mubr.bf16.gmra.mxu0 %v7848_v60  ;;  %v2427_v59 = vadd.f32 %v10934_v25, %v2426_v40 }
 0x1b6   :  { %3228 = vmatmul.mubr.bf16.gmra.mxu1 %v7850_v45  ;;  %2946 = vmatprep.mubr.bf16.mxu0 %v7857_v14  ;;  %v2428_v0 = vpop.f32.mrf.mxu0  ;;  %v2717_v7 = vpop.f32.mrf.mxu1  ;;  %v7858_v14 = vcombine.low %v413_v34, %v417_v8 }
 0x1b7   :  { %3235 = vmatprep.mubr.bf16.mxu1 %v7859_v9  ;;  %v11047_v6 = vadd.f32 %v2715_v24, %v2427_v59  ;;  %v425_v0 = vld [vmem:[%s14177_s0 + $0x438] sm:$0xff] }
 0x1b8   :  { %v2429_v60 = vpop.f32.mrf.mxu0  ;;  %v2718_v45 = vpop.f32.mrf.mxu1  ;;  %v7867_v42 = vcombine.high %v421_v1, %v425_v0 }
 0x1b9   :  { %14598 = vst [vmem:[#allocation91_spill] sm:$0xff] %v11047_v6  ;;  %v2430_v36 = vadd.f32 %v10934_v25, %v2429_v60  ;;  %v429_v60 = vld [vmem:[%s14177_s0 + $0x458] sm:$0xff] }
 0x1ba   :  { %v2431_v9 = vpop.f32.mrf.mxu0  ;;  %v2720_v40 = vpop.f32.mrf.mxu1 }
 0x1bb   :  { %v11056_v24 = vadd.f32 %v2718_v45, %v2430_v36  ;;  %v7864_v36 = vcombine.low %v420_v3, %v424_v20  ;;  %v7873_v9 = vcombine.high %v428_v13, %v432_v62  ;;  %v436_v3 = vld [vmem:[%s14177_s0 + $0x490] sm:$0xff] }
 0x1bc   :  { %v2434_v59 = vpop.f32.mrf.mxu0  ;;  %v2723_v6 = vpop.f32.mrf.mxu1  ;;  %v440_v20 = vld [vmem:[%s14177_s0 + $0x4b0] sm:$0xff] }
 0x1bd   :  { %14599 = vst [vmem:[#allocation92_spill] sm:$0xff] %v11056_v24  ;;  %2947 = vmatmul.mubr.bf16.gmra.mxu0 %v7856_v5  ;;  %v2435_v7 = vadd.f32 %v10934_v25, %v2434_v59 }
 0x1be   :  { %3236 = vmatmul.mubr.bf16.gmra.mxu1 %v7858_v14  ;;  %2954 = vmatprep.mubr.bf16.mxu0 %v7865_v49  ;;  %v2436_v2 = vpop.f32.mrf.mxu0  ;;  %v2725_v8 = vpop.f32.mrf.mxu1  ;;  %v7866_v49 = vcombine.low %v421_v1, %v425_v0 }
 0x1bf   :  { %3243 = vmatprep.mubr.bf16.mxu1 %v7867_v42  ;;  %v11065_v34 = vadd.f32 %v2723_v6, %v2435_v7  ;;  %v433_v2 = vld [vmem:[%s14177_s0 + $0x478] sm:$0xff] }
 0x1c0   :  { %v2437_v5 = vpop.f32.mrf.mxu0  ;;  %v2726_v14 = vpop.f32.mrf.mxu1  ;;  %v7875_v40 = vcombine.high %v429_v60, %v433_v2 }
 0x1c1   :  { %14600 = vst [vmem:[#allocation93_spill] sm:$0xff] %v11065_v34  ;;  %v2438_v45 = vadd.f32 %v10934_v25, %v2437_v5  ;;  %v437_v5 = vld [vmem:[%s14177_s0 + $0x498] sm:$0xff] }
 0x1c2   :  { %v2439_v42 = vpop.f32.mrf.mxu0  ;;  %v2728_v59 = vpop.f32.mrf.mxu1 }
 0x1c3   :  { %v11074_v6 = vadd.f32 %v2726_v14, %v2438_v45  ;;  %v7872_v45 = vcombine.low %v428_v13, %v432_v62  ;;  %v7881_v42 = vcombine.high %v436_v3, %v440_v20  ;;  %v444_v13 = vld [vmem:[%s14177_s0 + $0x4d0] sm:$0xff] }
 0x1c4   :  { %v2442_v7 = vpop.f32.mrf.mxu0  ;;  %v2731_v34 = vpop.f32.mrf.mxu1  ;;  %v448_v62 = vld [vmem:[%s14177_s0 + $0x4f0] sm:$0xff] }
 0x1c5   :  { %14601 = vst [vmem:[#allocation94_spill] sm:$0xff] %v11074_v6  ;;  %2955 = vmatmul.mubr.bf16.gmra.mxu0 %v7864_v36  ;;  %v2443_v8 = vadd.f32 %v10934_v25, %v2442_v7 }
 0x1c6   :  { %3244 = vmatmul.mubr.bf16.gmra.mxu1 %v7866_v49  ;;  %2962 = vmatprep.mubr.bf16.mxu0 %v7873_v9  ;;  %v2444_v24 = vpop.f32.mrf.mxu0  ;;  %v2733_v0 = vpop.f32.mrf.mxu1  ;;  %v7874_v9 = vcombine.low %v429_v60, %v433_v2 }
 0x1c7   :  { %3251 = vmatprep.mubr.bf16.mxu1 %v7875_v40  ;;  %v11083_v1 = vadd.f32 %v2731_v34, %v2443_v8  ;;  %v441_v24 = vld [vmem:[%s14177_s0 + $0x4b8] sm:$0xff] }
 0x1c8   :  { %v2445_v36 = vpop.f32.mrf.mxu0  ;;  %v2734_v49 = vpop.f32.mrf.mxu1  ;;  %v7883_v59 = vcombine.high %v437_v5, %v441_v24 }
 0x1c9   :  { %14602 = vst [vmem:[#allocation95_spill] sm:$0xff] %v11083_v1  ;;  %v2446_v14 = vadd.f32 %v10934_v25, %v2445_v36  ;;  %v445_v36 = vld [vmem:[%s14177_s0 + $0x4d8] sm:$0xff] }
 0x1ca   :  { %v2447_v40 = vpop.f32.mrf.mxu0  ;;  %v2736_v7 = vpop.f32.mrf.mxu1 }
 0x1cb   :  { %v11092_v34 = vadd.f32 %v2734_v49, %v2446_v14  ;;  %v7880_v14 = vcombine.low %v436_v3, %v440_v20  ;;  %v7889_v40 = vcombine.high %v444_v13, %v448_v62  ;;  %v452_v3 = vld [vmem:[%s14177_s0 + $0x510] sm:$0xff] }
 0x1cc   :  { %v2450_v8 = vpop.f32.mrf.mxu0  ;;  %v2739_v1 = vpop.f32.mrf.mxu1  ;;  %v456_v20 = vld [vmem:[%s14177_s0 + $0x530] sm:$0xff] }
 0x1cd   :  { %14603 = vst [vmem:[#allocation96_spill] sm:$0xff] %v11092_v34  ;;  %2963 = vmatmul.mubr.bf16.gmra.mxu0 %v7872_v45  ;;  %v2451_v0 = vadd.f32 %v10934_v25, %v2450_v8 }
 0x1ce   :  { %3252 = vmatmul.mubr.bf16.gmra.mxu1 %v7874_v9  ;;  %2970 = vmatprep.mubr.bf16.mxu0 %v7881_v42  ;;  %v2452_v6 = vpop.f32.mrf.mxu0  ;;  %v2741_v2 = vpop.f32.mrf.mxu1  ;;  %v7882_v42 = vcombine.low %v437_v5, %v441_v24 }
 0x1cf   :  { %3259 = vmatprep.mubr.bf16.mxu1 %v7883_v59  ;;  %v11101_v60 = vadd.f32 %v2739_v1, %v2451_v0  ;;  %v449_v6 = vld [vmem:[%s14177_s0 + $0x4f8] sm:$0xff] }
 0x1d0   :  { %v2453_v45 = vpop.f32.mrf.mxu0  ;;  %v2742_v9 = vpop.f32.mrf.mxu1  ;;  %v7891_v7 = vcombine.high %v445_v36, %v449_v6 }
 0x1d1   :  { %14604 = vst [vmem:[#allocation97_spill] sm:$0xff] %v11101_v60  ;;  %v2454_v49 = vadd.f32 %v10934_v25, %v2453_v45  ;;  %v453_v45 = vld [vmem:[%s14177_s0 + $0x518] sm:$0xff] }
 0x1d2   :  { %v2455_v59 = vpop.f32.mrf.mxu0  ;;  %v2744_v8 = vpop.f32.mrf.mxu1 }
 0x1d3   :  { %v11110_v1 = vadd.f32 %v2742_v9, %v2454_v49  ;;  %v7888_v49 = vcombine.low %v444_v13, %v448_v62  ;;  %v7897_v59 = vcombine.high %v452_v3, %v456_v20  ;;  %v460_v13 = vld [vmem:[%s14177_s0 + $0x550] sm:$0xff] }
 0x1d4   :  { %v2458_v0 = vpop.f32.mrf.mxu0  ;;  %v2747_v60 = vpop.f32.mrf.mxu1  ;;  %v464_v62 = vld [vmem:[%s14177_s0 + $0x570] sm:$0xff] }
 0x1d5   :  { %14605 = vst [vmem:[#allocation98_spill] sm:$0xff] %v11110_v1  ;;  %2971 = vmatmul.mubr.bf16.gmra.mxu0 %v7880_v14  ;;  %v2459_v2 = vadd.f32 %v10934_v25, %v2458_v0 }
 0x1d6   :  { %3260 = vmatmul.mubr.bf16.gmra.mxu1 %v7882_v42  ;;  %2978 = vmatprep.mubr.bf16.mxu0 %v7889_v40  ;;  %v2460_v34 = vpop.f32.mrf.mxu0  ;;  %v2749_v24 = vpop.f32.mrf.mxu1  ;;  %v7890_v40 = vcombine.low %v445_v36, %v449_v6 }
 0x1d7   :  { %3267 = vmatprep.mubr.bf16.mxu1 %v7891_v7  ;;  %v11119_v5 = vadd.f32 %v2747_v60, %v2459_v2  ;;  %v457_v34 = vld [vmem:[%s14177_s0 + $0x538] sm:$0xff] }
 0x1d8   :  { %v2461_v14 = vpop.f32.mrf.mxu0  ;;  %v2750_v42 = vpop.f32.mrf.mxu1  ;;  %v7899_v8 = vcombine.high %v453_v45, %v457_v34 }
 0x1d9   :  { %14606 = vst [vmem:[#allocation99_spill] sm:$0xff] %v11119_v5  ;;  %v2462_v9 = vadd.f32 %v10934_v25, %v2461_v14  ;;  %v461_v14 = vld [vmem:[%s14177_s0 + $0x558] sm:$0xff] }
 0x1da   :  { %v2463_v7 = vpop.f32.mrf.mxu0  ;;  %v2752_v0 = vpop.f32.mrf.mxu1 }
 0x1db   :  { %v11128_v60 = vadd.f32 %v2750_v42, %v2462_v9  ;;  %v7896_v9 = vcombine.low %v452_v3, %v456_v20  ;;  %v7905_v7 = vcombine.high %v460_v13, %v464_v62  ;;  %v468_v3 = vld [vmem:[%s14177_s0 + $0x590] sm:$0xff] }
 0x1dc   :  { %v2466_v2 = vpop.f32.mrf.mxu0  ;;  %v2755_v5 = vpop.f32.mrf.mxu1  ;;  %v472_v20 = vld [vmem:[%s14177_s0 + $0x5b0] sm:$0xff] }
 0x1dd   :  { %14607 = vst [vmem:[#allocation100_spill] sm:$0xff] %v11128_v60  ;;  %2979 = vmatmul.mubr.bf16.gmra.mxu0 %v7888_v49  ;;  %v2467_v24 = vadd.f32 %v10934_v25, %v2466_v2 }
 0x1de   :  { %3268 = vmatmul.mubr.bf16.gmra.mxu1 %v7890_v40  ;;  %2986 = vmatprep.mubr.bf16.mxu0 %v7897_v59  ;;  %v2468_v1 = vpop.f32.mrf.mxu0  ;;  %v2757_v6 = vpop.f32.mrf.mxu1  ;;  %v7898_v59 = vcombine.low %v453_v45, %v457_v34 }
 0x1df   :  { %3275 = vmatprep.mubr.bf16.mxu1 %v7899_v8  ;;  %v11137_v36 = vadd.f32 %v2755_v5, %v2467_v24  ;;  %v465_v1 = vld [vmem:[%s14177_s0 + $0x578] sm:$0xff] }
 0x1e0   :  { %v2469_v49 = vpop.f32.mrf.mxu0  ;;  %v2758_v40 = vpop.f32.mrf.mxu1  ;;  %v7907_v0 = vcombine.high %v461_v14, %v465_v1 }
 0x1e1   :  { %14608 = vst [vmem:[#allocation101_spill] sm:$0xff] %v11137_v36  ;;  %v2470_v42 = vadd.f32 %v10934_v25, %v2469_v49  ;;  %v469_v49 = vld [vmem:[%s14177_s0 + $0x598] sm:$0xff] }
 0x1e2   :  { %v2471_v8 = vpop.f32.mrf.mxu0  ;;  %v2760_v2 = vpop.f32.mrf.mxu1 }
 0x1e3   :  { %v11146_v5 = vadd.f32 %v2758_v40, %v2470_v42  ;;  %v7904_v42 = vcombine.low %v460_v13, %v464_v62  ;;  %v7913_v8 = vcombine.high %v468_v3, %v472_v20  ;;  %v476_v13 = vld [vmem:[%s14177_s0 + $0x5d0] sm:$0xff] }
 0x1e4   :  { %v2474_v24 = vpop.f32.mrf.mxu0  ;;  %v2763_v36 = vpop.f32.mrf.mxu1  ;;  %v480_v62 = vld [vmem:[%s14177_s0 + $0x5f0] sm:$0xff] }
 0x1e5   :  { %14609 = vst [vmem:[#allocation102_spill] sm:$0xff] %v11146_v5  ;;  %2987 = vmatmul.mubr.bf16.gmra.mxu0 %v7896_v9  ;;  %v2475_v6 = vadd.f32 %v10934_v25, %v2474_v24 }
 0x1e6   :  { %3276 = vmatmul.mubr.bf16.gmra.mxu1 %v7898_v59  ;;  %2994 = vmatprep.mubr.bf16.mxu0 %v7905_v7  ;;  %v2476_v60 = vpop.f32.mrf.mxu0  ;;  %v2765_v34 = vpop.f32.mrf.mxu1  ;;  %v7906_v7 = vcombine.low %v461_v14, %v465_v1 }
 0x1e7   :  { %3283 = vmatprep.mubr.bf16.mxu1 %v7907_v0  ;;  %v11155_v45 = vadd.f32 %v2763_v36, %v2475_v6  ;;  %v473_v60 = vld [vmem:[%s14177_s0 + $0x5b8] sm:$0xff] }
 0x1e8   :  { %v2477_v9 = vpop.f32.mrf.mxu0  ;;  %v2766_v59 = vpop.f32.mrf.mxu1  ;;  %v7915_v2 = vcombine.high %v469_v49, %v473_v60 }
 0x1e9   :  { %14610 = vst [vmem:[#allocation103_spill] sm:$0xff] %v11155_v45  ;;  %v2478_v40 = vadd.f32 %v10934_v25, %v2477_v9  ;;  %v477_v9 = vld [vmem:[%s14177_s0 + $0x5d8] sm:$0xff] }
 0x1ea   :  { %v2479_v0 = vpop.f32.mrf.mxu0  ;;  %v2768_v24 = vpop.f32.mrf.mxu1 }
 0x1eb   :  { %v11164_v36 = vadd.f32 %v2766_v59, %v2478_v40  ;;  %v7912_v40 = vcombine.low %v468_v3, %v472_v20  ;;  %v7921_v0 = vcombine.high %v476_v13, %v480_v62  ;;  %v484_v3 = vld [vmem:[%s14177_s0 + $0x610] sm:$0xff] }
 0x1ec   :  { %v2482_v6 = vpop.f32.mrf.mxu0  ;;  %v2771_v45 = vpop.f32.mrf.mxu1  ;;  %v488_v20 = vld [vmem:[%s14177_s0 + $0x630] sm:$0xff] }
 0x1ed   :  { %14611 = vst [vmem:[#allocation104_spill] sm:$0xff] %v11164_v36  ;;  %2995 = vmatmul.mubr.bf16.gmra.mxu0 %v7904_v42  ;;  %v2483_v34 = vadd.f32 %v10934_v25, %v2482_v6 }
 0x1ee   :  { %3284 = vmatmul.mubr.bf16.gmra.mxu1 %v7906_v7  ;;  %3002 = vmatprep.mubr.bf16.mxu0 %v7913_v8  ;;  %v2484_v5 = vpop.f32.mrf.mxu0  ;;  %v2773_v1 = vpop.f32.mrf.mxu1  ;;  %v7914_v8 = vcombine.low %v469_v49, %v473_v60 }
 0x1ef   :  { %3291 = vmatprep.mubr.bf16.mxu1 %v7915_v2  ;;  %v11173_v14 = vadd.f32 %v2771_v45, %v2483_v34  ;;  %v481_v5 = vld [vmem:[%s14177_s0 + $0x5f8] sm:$0xff] }
 0x1f0   :  { %v2485_v42 = vpop.f32.mrf.mxu0  ;;  %v2774_v7 = vpop.f32.mrf.mxu1  ;;  %v7923_v24 = vcombine.high %v477_v9, %v481_v5 }
 0x1f1   :  { %14612 = vst [vmem:[#allocation105_spill] sm:$0xff] %v11173_v14  ;;  %v2486_v59 = vadd.f32 %v10934_v25, %v2485_v42  ;;  %v485_v42 = vld [vmem:[%s14177_s0 + $0x618] sm:$0xff] }
 0x1f2   :  { %v2487_v2 = vpop.f32.mrf.mxu0  ;;  %v2776_v6 = vpop.f32.mrf.mxu1 }
 0x1f3   :  { %v11182_v45 = vadd.f32 %v2774_v7, %v2486_v59  ;;  %v7920_v59 = vcombine.low %v476_v13, %v480_v62  ;;  %v7929_v2 = vcombine.high %v484_v3, %v488_v20  ;;  %v492_v13 = vld [vmem:[%s14177_s0 + $0x650] sm:$0xff] }
 0x1f4   :  { %v2490_v34 = vpop.f32.mrf.mxu0  ;;  %v2779_v14 = vpop.f32.mrf.mxu1  ;;  %v496_v62 = vld [vmem:[%s14177_s0 + $0x670] sm:$0xff] }
 0x1f5   :  { %14613 = vst [vmem:[#allocation106_spill] sm:$0xff] %v11182_v45  ;;  %3003 = vmatmul.mubr.bf16.gmra.mxu0 %v7912_v40  ;;  %v2491_v1 = vadd.f32 %v10934_v25, %v2490_v34 }
 0x1f6   :  { %3292 = vmatmul.mubr.bf16.gmra.mxu1 %v7914_v8  ;;  %3010 = vmatprep.mubr.bf16.mxu0 %v7921_v0  ;;  %v2492_v36 = vpop.f32.mrf.mxu0  ;;  %v2781_v60 = vpop.f32.mrf.mxu1  ;;  %v7922_v0 = vcombine.low %v477_v9, %v481_v5 }
 0x1f7   :  { %3299 = vmatprep.mubr.bf16.mxu1 %v7923_v24  ;;  %v11191_v49 = vadd.f32 %v2779_v14, %v2491_v1  ;;  %v489_v36 = vld [vmem:[%s14177_s0 + $0x638] sm:$0xff] }
 0x1f8   :  { %v2493_v40 = vpop.f32.mrf.mxu0  ;;  %v2782_v8 = vpop.f32.mrf.mxu1  ;;  %v7931_v6 = vcombine.high %v485_v42, %v489_v36 }
 0x1f9   :  { %14614 = vst [vmem:[#allocation107_spill] sm:$0xff] %v11191_v49  ;;  %v2494_v7 = vadd.f32 %v10934_v25, %v2493_v40  ;;  %v493_v40 = vld [vmem:[%s14177_s0 + $0x658] sm:$0xff] }
 0x1fa   :  { %v2495_v24 = vpop.f32.mrf.mxu0  ;;  %v2784_v34 = vpop.f32.mrf.mxu1 }
 0x1fb   :  { %v11200_v14 = vadd.f32 %v2782_v8, %v2494_v7  ;;  %v7928_v7 = vcombine.low %v484_v3, %v488_v20  ;;  %v7937_v24 = vcombine.high %v492_v13, %v496_v62  ;;  %v504_v3 = vld [vmem:[%s14177_s0 + $0x6b0] sm:$0xff] }
 0x1fc   :  { %v2498_v1 = vpop.f32.mrf.mxu0  ;;  %v2787_v49 = vpop.f32.mrf.mxu1 }
 0x1fd   :  { %14615 = vst [vmem:[#allocation108_spill] sm:$0xff] %v11200_v14  ;;  %3011 = vmatmul.mubr.bf16.gmra.mxu0 %v7920_v59  ;;  %v2499_v60 = vadd.f32 %v10934_v25, %v2498_v1 }
 0x1fe   :  { %3300 = vmatmul.mubr.bf16.gmra.mxu1 %v7922_v0  ;;  %3018 = vmatprep.mubr.bf16.mxu0 %v7929_v2  ;;  %v2500_v45 = vpop.f32.mrf.mxu0  ;;  %v2789_v5 = vpop.f32.mrf.mxu1  ;;  %v7930_v2 = vcombine.low %v485_v42, %v489_v36  ;;  %v505_v36 = vld [vmem:[%s14177_s0 + $0x6b8] sm:$0xff] }
 0x1ff   :  { %3307 = vmatprep.mubr.bf16.mxu1 %v7931_v6  ;;  %v11209_v9 = vadd.f32 %v2787_v49, %v2499_v60  ;;  %v497_v45 = vld [vmem:[%s14177_s0 + $0x678] sm:$0xff] }
 0x200   :  { %v2501_v59 = vpop.f32.mrf.mxu0  ;;  %v2790_v0 = vpop.f32.mrf.mxu1  ;;  %v7939_v34 = vcombine.high %v493_v40, %v497_v45 }
 0x201   :  { %14616 = vst [vmem:[#allocation109_spill] sm:$0xff] %v11209_v9  ;;  %v2502_v8 = vadd.f32 %v10934_v25, %v2501_v59  ;;  %v500_v25 = vld [vmem:[%s14177_s0 + $0x690] sm:$0xff]  ;;  %v7936_v59 = vcombine.low %v492_v13, %v496_v62 }
 0x202   :  { %v2503_v6 = vpop.f32.mrf.mxu0  ;;  %v2792_v1 = vpop.f32.mrf.mxu1  ;;  %v512_v13 = vld [vmem:[%s14177_s0 + $0x6f0] sm:$0xff] }
 0x203   :  { %v11218_v49 = vadd.f32 %v2790_v0, %v2502_v8  ;;  %v7938_v0 = vcombine.low %v493_v40, %v497_v45  ;;  %v513_v45 = vld [vmem:[%s14177_s0 + $0x6f8] sm:$0xff] }
 0x204   :  { %v2828_v60 = vpop.f32.mrf.mxu0  ;;  %v3117_v9 = vpop.f32.mrf.mxu1 }
 0x205   :  { %14617 = vst [vmem:[#allocation110_spill] sm:$0xff] %v11218_v49  ;;  %3019 = vmatmul.mubr.bf16.gmra.mxu0 %v7928_v7  ;;  %v2829_v5 = vadd.f32 %v2828_v60, %v10340_v52  ;;  %v501_v52 = vld [vmem:[%s14177_s0 + $0x698] sm:$0xff] }
 0x206   :  { %3308 = vmatmul.mubr.bf16.gmra.mxu1 %v7930_v2  ;;  %3026 = vmatprep.mubr.bf16.mxu0 %v7937_v24  ;;  %v2830_v14 = vpop.f32.mrf.mxu0  ;;  %v3119_v42 = vpop.f32.mrf.mxu1  ;;  %v7945_v2 = vcombine.high %v500_v25, %v504_v3  ;;  %v7947_v6 = vcombine.high %v501_v52, %v505_v36 }
 0x207   :  { %3315 = vmatprep.mubr.bf16.mxu1 %v7939_v34  ;;  %v11227_v20 = vadd.f32 %v3117_v9, %v2829_v5 }
 0x208   :  { %v2831_v14 = vpop.f32.mrf.mxu0  ;;  %v3120_v8 = vpop.f32.mrf.mxu1 }
 0x209   :  { %v2832_v7 = vadd.f32 %v2831_v14, %v10349_v22  ;;  %v508_v22 = vld [vmem:[%s14177_s0 + $0x6d0] sm:$0xff] }
 0x20a   :  { %v2833_v24 = vpop.f32.mrf.mxu0  ;;  %v3122_v34 = vpop.f32.mrf.mxu1 }
 0x20b   :  { %v11236_v9 = vadd.f32 %v3120_v8, %v2832_v7 }
 0x20c   :  { %v2836_v1 = vpop.f32.mrf.mxu0  ;;  %v3125_v5 = vpop.f32.mrf.mxu1 }
 0x20d   :  { %3027 = vmatmul.mubr.bf16.gmra.mxu0 %v7936_v59  ;;  %v2837_v60 = vadd.f32 %v2836_v1, %v10358_v47  ;;  %v509_v47 = vld [vmem:[%s14177_s0 + $0x6d8] sm:$0xff]  ;;  %v7944_v59 = vcombine.low %v500_v25, %v504_v3  ;;  %v520_v25 = vld [vmem:[%s14177_s0 + $0x730] sm:$0xff]  ;;  %v3373_v49 = vmax.f32 %v11236_v9, 0.0 }
 0x20e   :  { %3316 = vmatmul.mubr.bf16.gmra.mxu1 %v7938_v0  ;;  %3034 = vmatprep.mubr.bf16.mxu0 %v7945_v2  ;;  %v2838_v42 = vpop.f32.mrf.mxu0  ;;  %v3127_v40 = vpop.f32.mrf.mxu1  ;;  %v7946_v0 = vcombine.low %v501_v52, %v505_v36  ;;  %v7953_v2 = vcombine.high %v508_v22, %v512_v13  ;;  %v521_v36 = vld [vmem:[%s14177_s0 + $0x738] sm:$0xff] }
 0x20f   :  { %3323 = vmatprep.mubr.bf16.mxu1 %v7947_v6  ;;  %v11245_v62 = vadd.f32 %v3125_v5, %v2837_v60  ;;  %v7955_v6 = vcombine.high %v509_v47, %v513_v45 }
 0x210   :  { %v2839_v14 = vpop.f32.mrf.mxu0  ;;  %v3128_v8 = vpop.f32.mrf.mxu1 }
 0x211   :  { %v2840_v7 = vadd.f32 %v2839_v14, %v10367_v19  ;;  %v516_v19 = vld [vmem:[%s14177_s0 + $0x710] sm:$0xff] }
 0x212   :  { %v2841_v24 = vpop.f32.mrf.mxu0  ;;  %v3130_v1 = vpop.f32.mrf.mxu1 }
 0x213   :  { %v11254_v34 = vadd.f32 %v3128_v8, %v2840_v7 }
 0x214   :  { %v2844_v60 = vpop.f32.mrf.mxu0  ;;  %v3133_v42 = vpop.f32.mrf.mxu1 }
 0x215   :  { %3035 = vmatmul.mubr.bf16.gmra.mxu0 %v7944_v59  ;;  %v2845_v5 = vadd.f32 %v2844_v60, %v10376_v48  ;;  %v517_v48 = vld [vmem:[%s14177_s0 + $0x718] sm:$0xff]  ;;  %v7952_v59 = vcombine.low %v508_v22, %v512_v13  ;;  %v528_v22 = vld [vmem:[%s14177_s0 + $0x770] sm:$0xff] }
 0x216   :  { %3324 = vmatmul.mubr.bf16.gmra.mxu1 %v7946_v0  ;;  %3042 = vmatprep.mubr.bf16.mxu0 %v7953_v2  ;;  %v2846_v40 = vpop.f32.mrf.mxu0  ;;  %v3135_v52 = vpop.f32.mrf.mxu1  ;;  %v7954_v0 = vcombine.low %v509_v47, %v513_v45  ;;  %v7961_v2 = vcombine.high %v516_v19, %v520_v25  ;;  %v529_v45 = vld [vmem:[%s14177_s0 + $0x778] sm:$0xff] }
 0x217   :  { %3331 = vmatprep.mubr.bf16.mxu1 %v7955_v6  ;;  %v11263_v3 = vadd.f32 %v3133_v42, %v2845_v5  ;;  %v7963_v6 = vcombine.high %v517_v48, %v521_v36 }
 0x218   :  { %v2847_v14 = vpop.f32.mrf.mxu0  ;;  %v3136_v8 = vpop.f32.mrf.mxu1 }
 0x219   :  { %v2848_v7 = vadd.f32 %v2847_v14, %v10385_v63  ;;  %v524_v63 = vld [vmem:[%s14177_s0 + $0x750] sm:$0xff] }
 0x21a   :  { %v2849_v24 = vpop.f32.mrf.mxu0  ;;  %v3138_v60 = vpop.f32.mrf.mxu1 }
 0x21b   :  { %v11272_v1 = vadd.f32 %v3136_v8, %v2848_v7 }
 0x21c   :  { %v2852_v5 = vpop.f32.mrf.mxu0  ;;  %v3141_v40 = vpop.f32.mrf.mxu1 }
 0x21d   :  { %3043 = vmatmul.mubr.bf16.gmra.mxu0 %v7952_v59  ;;  %v2853_v42 = vadd.f32 %v2852_v5, %v10394_v16  ;;  %v525_v16 = vld [vmem:[%s14177_s0 + $0x758] sm:$0xff]  ;;  %v7960_v59 = vcombine.low %v516_v19, %v520_v25  ;;  %v536_v19 = vld [vmem:[%s14177_s0 + $0x7b0] sm:$0xff] }
 0x21e   :  { %3332 = vmatmul.mubr.bf16.gmra.mxu1 %v7954_v0  ;;  %3050 = vmatprep.mubr.bf16.mxu0 %v7961_v2  ;;  %v2854_v52 = vpop.f32.mrf.mxu0  ;;  %v3143_v47 = vpop.f32.mrf.mxu1  ;;  %v7962_v0 = vcombine.low %v517_v48, %v521_v36  ;;  %v7969_v2 = vcombine.high %v524_v63, %v528_v22  ;;  %v533_v36 = vld [vmem:[%s14177_s0 + $0x798] sm:$0xff] }
 0x21f   :  { %3339 = vmatprep.mubr.bf16.mxu1 %v7963_v6  ;;  %v11281_v13 = vadd.f32 %v3141_v40, %v2853_v42  ;;  %v7971_v6 = vcombine.high %v525_v16, %v529_v45 }
 0x220   :  { %v2855_v14 = vpop.f32.mrf.mxu0  ;;  %v3144_v8 = vpop.f32.mrf.mxu1 }
 0x221   :  { %v2856_v7 = vadd.f32 %v2855_v14, %v10403_v58  ;;  %v532_v58 = vld [vmem:[%s14177_s0 + $0x790] sm:$0xff] }
 0x222   :  { %v2857_v24 = vpop.f32.mrf.mxu0  ;;  %v3146_v5 = vpop.f32.mrf.mxu1 }
 0x223   :  { %v11290_v60 = vadd.f32 %v3144_v8, %v2856_v7  ;;  %v7970_v7 = vcombine.low %v525_v16, %v529_v45  ;;  %v3372_v8 = vmax.f32 %v11227_v20, 0.0  ;;  %v544_v16 = vld [vmem:[%s14177_s0 + $0x7f0] sm:$0xff] }
 0x224   :  { %v2860_v42 = vpop.f32.mrf.mxu0  ;;  %v3149_v52 = vpop.f32.mrf.mxu1 }
 0x225   :  { %3051 = vmatmul.mubr.bf16.gmra.mxu0 %v7960_v59  ;;  %v2861_v40 = vadd.f32 %v2860_v42, %v10412_v46  ;;  %v537_v46 = vld [vmem:[%s14177_s0 + $0x7b8] sm:$0xff]  ;;  %v7968_v59 = vcombine.low %v524_v63, %v528_v22 }
 0x226   :  { %3340 = vmatmul.mubr.bf16.gmra.mxu1 %v7962_v0  ;;  %3058 = vmatprep.mubr.bf16.mxu0 %v7969_v2  ;;  %v2862_v47 = vpop.f32.mrf.mxu0  ;;  %v3151_v48 = vpop.f32.mrf.mxu1  ;;  %v7979_v42 = vcombine.high %v533_v36, %v537_v46 }
 0x227   :  { %3347 = vmatprep.mubr.bf16.mxu1 %v7971_v6  ;;  %v3150_v25 = vadd.f32 %v3149_v52, %v2861_v40  ;;  %v7977_v6 = vcombine.high %v532_v58, %v536_v19 }
 0x228   :  { %v2863_v14 = vpop.f32.mrf.mxu0  ;;  %v3152_v24 = vpop.f32.mrf.mxu1 }
 0x229   :  { %v3380_v0 = vmax.f32 %v3150_v25, 0.0  ;;  %v2864_v2 = vadd.f32 %v2863_v14, %v10421_v51  ;;  %v540_v51 = vld [vmem:[%s14177_s0 + $0x7d0] sm:$0xff]  ;;  %v545_v14 = vld [vmem:[%s14177_s0 + $0x7f8] sm:$0xff] }
 0x22a   :  { %v2865_v5 = vpop.f32.mrf.mxu0  ;;  %v3154_v47 = vpop.f32.mrf.mxu1 }
 0x22b   :  { %v11307_v40 = vmax.f32 %v3372_v8, %v3380_v0  ;;  %v3153_v52 = vadd.f32 %v3152_v24, %v2864_v2  ;;  %v7978_v8 = vcombine.low %v533_v36, %v537_v46  ;;  %v3374_v0 = vmax.f32 %v11245_v62, 0.0 }
 0x22c   :  { %v2868_v48 = vpop.f32.mrf.mxu0  ;;  %v3157_v22 = vpop.f32.mrf.mxu1 }
 0x22d   :  { %3059 = vmatmul.mubr.bf16.gmra.mxu0 %v7968_v59  ;;  %v3381_v10 = vmax.f32 %v3153_v52, 0.0  ;;  %v2869_v63 = vadd.f32 %v2868_v48, %v10430_v53  ;;  %v541_v53 = vld [vmem:[%s14177_s0 + $0x7d8] sm:$0xff] }
 0x22e   :  { %3348 = vmatmul.mubr.bf16.gmra.mxu1 %v7970_v7  ;;  %3066 = vmatprep.mubr.bf16.mxu0 %v7977_v6  ;;  %v2870_v20 = vpop.f32.mrf.mxu0  ;;  %v3159_v9 = vpop.f32.mrf.mxu1  ;;  %v7976_v7 = vcombine.low %v532_v58, %v536_v19  ;;  %v7987_v5 = vcombine.high %v541_v53, %v545_v14 }
 0x22f   :  { %3355 = vmatprep.mubr.bf16.mxu1 %v7979_v42  ;;  %v11317_v45 = vmax.f32 %v3373_v49, %v3381_v10  ;;  %v3158_v25 = vadd.f32 %v3157_v22, %v2869_v63  ;;  %v7985_v49 = vcombine.high %v540_v51, %v544_v16  ;;  %v3375_v63 = vmax.f32 %v11254_v34, 0.0 }
 0x230   :  { %v2871_v59 = vpop.f32.mrf.mxu0  ;;  %v3160_v10 = vpop.f32.mrf.mxu1  ;;  %v3376_v9 = vmax.f32 %v11263_v3, 0.0 }
 0x231   :  { %v3382_v2 = vmax.f32 %v3158_v25, 0.0  ;;  %v2872_v24 = vadd.f32 %v2871_v59, %v10439_v41  ;;  %v7984_v25 = vcombine.low %v540_v51, %v544_v16 }
 0x232   :  { %v2873_v6 = vpop.f32.mrf.mxu0  ;;  %v3162_v47 = vpop.f32.mrf.mxu1 }
 0x233   :  { %v11327_v42 = vmax.f32 %v3374_v0, %v3382_v2  ;;  %v3161_v52 = vadd.f32 %v3160_v10, %v2872_v24  ;;  %v7986_v0 = vcombine.low %v541_v53, %v545_v14  ;;  %v3378_v14 = vmax.f32 %v11281_v13, 0.0 }
 0x234   :  { %v2876_v48 = vpop.f32.mrf.mxu0  ;;  %v3165_v19 = vpop.f32.mrf.mxu1 }
 0x235   :  { %3067 = vmatmul.mubr.bf16.gmra.mxu0 %v7976_v7  ;;  %v3383_v22 = vmax.f32 %v3161_v52, 0.0  ;;  %v2877_v58 = vadd.f32 %v2876_v48, %v10448_v55 }
 0x236   :  { %3356 = vmatmul.mubr.bf16.gmra.mxu1 %v7978_v8  ;;  %3074 = vmatprep.mubr.bf16.mxu0 %v7985_v49  ;;  %v2878_v62 = vpop.f32.mrf.mxu0  ;;  %v3167_v46 = vpop.f32.mrf.mxu1  ;;  %v3377_v49 = vmax.f32 %v11272_v1, 0.0 }
 0x237   :  { %3363 = vmatprep.mubr.bf16.mxu1 %v7987_v5  ;;  %v11331_v41 = vmax.f32 %v3375_v63, %v3383_v22  ;;  %v3166_v36 = vadd.f32 %v3165_v19, %v2877_v58  ;;  %v3379_v62 = vmax.f32 %v11290_v60, 0.0 }
 0x238   :  { %v2879_v20 = vpop.f32.mrf.mxu0  ;;  %v3168_v34 = vpop.f32.mrf.mxu1 }
 0x239   :  { %v3384_v59 = vmax.f32 %v3166_v36, 0.0  ;;  %v2880_v7 = vadd.f32 %v2879_v20, %v10457_v39 }
 0x23a   :  { %v2881_v2 = vpop.f32.mrf.mxu0  ;;  %v3170_v24 = vpop.f32.mrf.mxu1 }
 0x23b   :  { %v11335_v55 = vmax.f32 %v3376_v9, %v3384_v59  ;;  %v3169_v8 = vadd.f32 %v3168_v34, %v2880_v7 }
 0x23c   :  { %v2884_v10 = vpop.f32.mrf.mxu0  ;;  %v3173_v51 = vpop.f32.mrf.mxu1 }
 0x23d   :  { %3075 = vmatmul.mubr.bf16.gmra.mxu0 %v7984_v25  ;;  %v3385_v6 = vmax.f32 %v3169_v8, 0.0  ;;  %v2885_v5 = vadd.f32 %v2884_v10, %v10466_v4 }
 0x23e   :  { %3364 = vmatmul.mubr.bf16.gmra.mxu1 %v7986_v0  ;;  %v2886_v3 = vpop.f32.mrf.mxu0  ;;  %v3175_v52 = vpop.f32.mrf.mxu1  ;;  %8657 = vmatprep.mubr.msk.f32.mxu0 %vm9502_vm0, %v14555_v32 }
 0x23f   :  { %v11339_v16 = vmax.f32 %v3377_v49, %v3385_v6  ;;  %v3174_v39 = vadd.f32 %v3173_v51, %v2885_v5  ;;  %8692 = vmatprep.mubr.msk.f32.mxu1 %vm9502_vm0, %v14555_v32 }
 0x240   :  { %v2887_v53 = vpop.f32.mrf.mxu0  ;;  %v3176_v63 = vpop.f32.mrf.mxu1 }
 0x241   :  { %v3386_v47 = vmax.f32 %v3174_v39, 0.0  ;;  %v2888_v48 = vadd.f32 %v2887_v53, %v10475_v37 }
 0x242   :  { %v2889_v22 = vpop.f32.mrf.mxu0  ;;  %v3178_v19 = vpop.f32.mrf.mxu1 }
 0x243   :  { %v11343_v58 = vmax.f32 %v3378_v14, %v3386_v47  ;;  %v3177_v1 = vadd.f32 %v3176_v63, %v2888_v48 }
 0x244   :  { %v2892_v4 = vpop.f32.mrf.mxu0 }
 0x245   :  { %v3387_v36 = vmax.f32 %v3177_v1, 0.0  ;;  %v2893_v46 = vadd.f32 %v2892_v4, %v10484_v43  ;;  %v3181_v20 = vpop.f32.mrf.mxu1 }
 0x246   :  { %v2894_v25 = vpop.f32.mrf.mxu0 }
 0x247   :  { %v11347_v9 = vmax.f32 %v3379_v62, %v3387_v36  ;;  %v3182_v13 = vadd.f32 %v3181_v20, %v2893_v46  ;;  %v3183_v59 = vpop.f32.mrf.mxu1 }
 0x248   :  { %v2895_v7 = vpop.f32.mrf.mxu0 }
 0x249   :  { %v3388_v37 = vmax.f32 %v3182_v13, 0.0  ;;  %v2896_v34 = vadd.f32 %v2895_v7, %v10493_v35  ;;  %v3184_v0 = vpop.f32.mrf.mxu1 }
 0x24a   :  { %v2897_v2 = vpop.f32.mrf.mxu0 }
 0x24b   :  { %v11351_v8 = vmax.f32 %v11307_v40, %v3388_v37  ;;  %v3185_v24 = vadd.f32 %v3184_v0, %v2896_v34  ;;  %v3186_v60 = vpop.f32.mrf.mxu1 }
 0x24c   :  { %v2900_v10 = vpop.f32.mrf.mxu0 }
 0x24d   :  { %v3389_v49 = vmax.f32 %v3185_v24, 0.0  ;;  %v2901_v43 = vadd.f32 %v2900_v10, %v10502_v50  ;;  %v3189_v6 = vpop.f32.mrf.mxu1 }
 0x24e   :  { %v2902_v5 = vpop.f32.mrf.mxu0 }
 0x24f   :  { %v11355_v51 = vmax.f32 %v11317_v45, %v3389_v49  ;;  %v3190_v3 = vadd.f32 %v3189_v6, %v2901_v43  ;;  %v3191_v39 = vpop.f32.mrf.mxu1 }
 0x250   :  { %v2903_v52 = vpop.f32.mrf.mxu0 }
 0x251   :  { %v3390_v35 = vmax.f32 %v3190_v3, 0.0  ;;  %v2904_v53 = vadd.f32 %v2903_v52, %v10511_v33  ;;  %v3192_v14 = vpop.f32.mrf.mxu1 }
 0x252   :  { %v2905_v40 = vpop.f32.mrf.mxu0 }
 0x253   :  { %v11359_v47 = vmax.f32 %v11327_v42, %v3390_v35  ;;  %v3193_v48 = vadd.f32 %v3192_v14, %v2904_v53  ;;  %v3194_v63 = vpop.f32.mrf.mxu1 }
 0x254   :  { %v2908_v22 = vpop.f32.mrf.mxu0 }
 0x255   :  { %v3391_v50 = vmax.f32 %v3193_v48, 0.0  ;;  %v2909_v1 = vadd.f32 %v2908_v22, %v10520_v18  ;;  %v3197_v19 = vpop.f32.mrf.mxu1 }
 0x256   :  { %v2910_v45 = vpop.f32.mrf.mxu0 }
 0x257   :  { %v11363_v4 = vmax.f32 %v11331_v41, %v3391_v50  ;;  %v3198_v62 = vadd.f32 %v3197_v19, %v2909_v1  ;;  %v3199_v36 = vpop.f32.mrf.mxu1 }
 0x258   :  { %v2911_v46 = vpop.f32.mrf.mxu0 }
 0x259   :  { %v3392_v33 = vmax.f32 %v3198_v62, 0.0  ;;  %v2912_v20 = vadd.f32 %v2911_v46, %v10529_v31  ;;  %v3200_v25 = vpop.f32.mrf.mxu1 }
 0x25a   :  { %v2913_v42 = vpop.f32.mrf.mxu0 }
 0x25b   :  { %v11367_v13 = vmax.f32 %v11335_v55, %v3392_v33  ;;  %v3201_v59 = vadd.f32 %v3200_v25, %v2912_v20  ;;  %v3202_v7 = vpop.f32.mrf.mxu1 }
 0x25c   :  { %v2916_v37 = vpop.f32.mrf.mxu0 }
 0x25d   :  { %v3393_v18 = vmax.f32 %v3201_v59, 0.0  ;;  %v2917_v34 = vadd.f32 %v2916_v37, %v10538_v61 }
 0x25e   :  { %v3205_v0 = vpop.f32.mrf.mxu1  ;;  %v2918_v41 = vpop.f32.mrf.mxu0 }
 0x25f   :  { %v11371_v2 = vmax.f32 %v11339_v16, %v3393_v18  ;;  %v3206_v24 = vadd.f32 %v3205_v0, %v2917_v34 }
 0x260   :  { %v3207_v60 = vpop.f32.mrf.mxu1  ;;  %v2919_v10 = vpop.f32.mrf.mxu0 }
 0x261   :  { %v3394_v31 = vmax.f32 %v3206_v24, 0.0  ;;  %v2920_v49 = vadd.f32 %v2919_v10, %v10547_v29 }
 0x262   :  { %v3208_v43 = vpop.f32.mrf.mxu1  ;;  %v2921_v55 = vpop.f32.mrf.mxu0 }
 0x263   :  { %v11375_v6 = vmax.f32 %v11343_v58, %v3394_v31  ;;  %v3209_v5 = vadd.f32 %v3208_v43, %v2920_v49 }
 0x264   :  { %v3210_v3 = vpop.f32.mrf.mxu1 }
 0x265   :  { %v2924_v39 = vpop.f32.mrf.mxu0  ;;  %v3395_v61 = vmax.f32 %v3209_v5, 0.0 }
 0x266   :  { %v2925_v52 = vadd.f32 %v2924_v39, %v10556_v23  ;;  %v3213_v35 = vpop.f32.mrf.mxu1 }
 0x267   :  { %v2926_v16 = vpop.f32.mrf.mxu0  ;;  %v11379_v53 = vmax.f32 %v11347_v9, %v3395_v61 }
 0x268   :  { %v3214_v14 = vadd.f32 %v3213_v35, %v2925_v52  ;;  %v3215_v40 = vpop.f32.mrf.mxu1 }
 0x269   :  { %v2927_v48 = vpop.f32.mrf.mxu0 }
 0x26a   :  { %v3396_v29 = vmax.f32 %v3214_v14, 0.0  ;;  %v2928_v63 = vadd.f32 %v2927_v48, %v10565_v27  ;;  %v3216_v22 = vpop.f32.mrf.mxu1 }
 0x26b   :  { %v2929_v58 = vpop.f32.mrf.mxu0 }
 0x26c   :  { %v11383_v50 = vmax.f32 %v11351_v8, %v3396_v29  ;;  %v3217_v1 = vadd.f32 %v3216_v22, %v2928_v63  ;;  %v3218_v19 = vpop.f32.mrf.mxu1 }
 0x26d   :  { %v2932_v45 = vpop.f32.mrf.mxu0 }
 0x26e   :  { %v3397_v23 = vmax.f32 %v3217_v1, 0.0  ;;  %v2933_v62 = vadd.f32 %v2932_v45, %v10578_v17  ;;  %v3221_v36 = vpop.f32.mrf.mxu1 }
 0x26f   :  { %v2934_v27 = vpop.f32.mrf.mxu0 }
 0x270   :  { %v11391_v9 = vmax.f32 %v11355_v51, %v3397_v23  ;;  %v3222_v8 = vadd.f32 %v3221_v36, %v2933_v62  ;;  %v3223_v46 = vpop.f32.mrf.mxu1 }
 0x271   :  { %v2935_v33 = vpop.f32.mrf.mxu0 }
 0x272   :  { %v3398_v20 = vmax.f32 %v3222_v8, 0.0  ;;  %v2936_v25 = vadd.f32 %v2935_v33, %v10601_v28  ;;  %v3224_v42 = vpop.f32.mrf.mxu1 }
 0x273   :  { %v2937_v17 = vpop.f32.mrf.mxu0 }
 0x274   :  { %v11395_v59 = vmax.f32 %v11359_v47, %v3398_v20  ;;  %v3225_v7 = vadd.f32 %v3224_v42, %v2936_v25  ;;  %v3226_v37 = vpop.f32.mrf.mxu1 }
 0x275   :  { %v2940_v18 = vpop.f32.mrf.mxu0 }
 0x276   :  { %v3399_v34 = vmax.f32 %v3225_v7, 0.0  ;;  %v2941_v0 = vadd.f32 %v2940_v18, %v10631_v26  ;;  %v3229_v41 = vpop.f32.mrf.mxu1 }
 0x277   :  { %v2942_v51 = vpop.f32.mrf.mxu0 }
 0x278   :  { %v11399_v24 = vmax.f32 %v11363_v4, %v3399_v34  ;;  %v3230_v60 = vadd.f32 %v3229_v41, %v2941_v0  ;;  %v3231_v10 = vpop.f32.mrf.mxu1 }
 0x279   :  { %v2943_v31 = vpop.f32.mrf.mxu0 }
 0x27a   :  { %v3400_v28 = vmax.f32 %v3230_v60, 0.0  ;;  %v2944_v49 = vadd.f32 %v2943_v31, %v10671_v44  ;;  %v3232_v43 = vpop.f32.mrf.mxu1 }
 0x27b   :  { %v2945_v47 = vpop.f32.mrf.mxu0 }
 0x27c   :  { %v11403_v55 = vmax.f32 %v11367_v13, %v3400_v28  ;;  %v3233_v5 = vadd.f32 %v3232_v43, %v2944_v49  ;;  %v3234_v3 = vpop.f32.mrf.mxu1 }
 0x27d   :  { %v2948_v39 = vpop.f32.mrf.mxu0 }
 0x27e   :  { %v3401_v26 = vmax.f32 %v3233_v5, 0.0  ;;  %v2949_v61 = vadd.f32 %v2948_v39, %v10702_v15  ;;  %v3237_v52 = vpop.f32.mrf.mxu1 }
 0x27f   :  { %v2950_v4 = vpop.f32.mrf.mxu0 }
 0x280   :  { %v11407_v35 = vmax.f32 %v11371_v2, %v3401_v26  ;;  %v3238_v16 = vadd.f32 %v3237_v52, %v2949_v61  ;;  %v3239_v14 = vpop.f32.mrf.mxu1 }
 0x281   :  { %v2951_v40 = vpop.f32.mrf.mxu0 }
 0x282   :  { %v3402_v44 = vmax.f32 %v3238_v16, 0.0  ;;  %v2952_v48 = vadd.f32 %v2951_v40, %v10736_v30  ;;  %v3240_v29 = vpop.f32.mrf.mxu1 }
 0x283   :  { %v2953_v13 = vpop.f32.mrf.mxu0 }
 0x284   :  { %v11411_v63 = vmax.f32 %v11375_v6, %v3402_v44  ;;  %v3241_v22 = vadd.f32 %v3240_v29, %v2952_v48  ;;  %v3242_v58 = vpop.f32.mrf.mxu1 }
 0x285   :  { %v2956_v1 = vpop.f32.mrf.mxu0  ;;  %v14618_v58 = vld [vmem:[#allocation86_spill] sm:$0xff] }
 0x286   :  { %v3403_v15 = vmax.f32 %v3241_v22, 0.0  ;;  %v2957_v19 = vadd.f32 %v2956_v1, %v10768_v57  ;;  %v3245_v45 = vpop.f32.mrf.mxu1 }
 0x287   :  { %v2958_v2 = vpop.f32.mrf.mxu0 }
 0x288   :  { %v11415_v23 = vmax.f32 %v11379_v53, %v3403_v15  ;;  %v3246_v62 = vadd.f32 %v3245_v45, %v2957_v19  ;;  %v3247_v36 = vpop.f32.mrf.mxu1 }
 0x289   :  { %v2959_v27 = vpop.f32.mrf.mxu0  ;;  %v14619_v36 = vld [vmem:[#allocation87_spill] sm:$0xff] }
 0x28a   :  { %v3404_v30 = vmax.f32 %v3246_v62, 0.0  ;;  %v2960_v8 = vadd.f32 %v2959_v27, %v10813_v11  ;;  %v3248_v46 = vpop.f32.mrf.mxu1 }
 0x28b   :  { %v2961_v6 = vpop.f32.mrf.mxu0 }
 0x28c   :  { %v11419_v33 = vmax.f32 %v11383_v50, %v3404_v30  ;;  %v3249_v20 = vadd.f32 %v3248_v46, %v2960_v8  ;;  %v3250_v25 = vpop.f32.mrf.mxu1 }
 0x28d   :  { %v2964_v42 = vpop.f32.mrf.mxu0 }
 0x28e   :  { %v3405_v57 = vmax.f32 %v3249_v20, 0.0  ;;  %v2965_v17 = vadd.f32 %v2964_v42, %v10844_v12  ;;  %v3253_v7 = vpop.f32.mrf.mxu1  ;;  %v14620_v42 = vld [vmem:[#allocation88_spill] sm:$0xff] }
 0x28f   :  { %v2966_v53 = vpop.f32.mrf.mxu0 }
 0x290   :  { %v11423_v37 = vmax.f32 %v11391_v9, %v3405_v57  ;;  %v3254_v18 = vadd.f32 %v3253_v7, %v2965_v17  ;;  %v3255_v34 = vpop.f32.mrf.mxu1 }
 0x291   :  { %v2967_v0 = vpop.f32.mrf.mxu0 }
 0x292   :  { %v3406_v11 = vmax.f32 %v3254_v18, 0.0  ;;  %v2968_v41 = vadd.f32 %v2967_v0, %v10878_v54  ;;  %v3256_v51 = vpop.f32.mrf.mxu1 }
 0x293   :  { %v2969_v50 = vpop.f32.mrf.mxu0 }
 0x294   :  { %v11427_v60 = vmax.f32 %v11395_v59, %v3406_v11  ;;  %v3257_v10 = vadd.f32 %v3256_v51, %v2968_v41  ;;  %v3258_v31 = vpop.f32.mrf.mxu1  ;;  %v14621_v11 = vld [vmem:[#allocation89_spill] sm:$0xff] }
 0x295   :  { %v2972_v28 = vpop.f32.mrf.mxu0 }
 0x296   :  { %v3407_v12 = vmax.f32 %v3257_v10, 0.0  ;;  %v2973_v49 = vadd.f32 %v2972_v28, %v10910_v56  ;;  %v3261_v43 = vpop.f32.mrf.mxu1 }
 0x297   :  { %v2974_v9 = vpop.f32.mrf.mxu0 }
 0x298   :  { %v11431_v47 = vmax.f32 %v11399_v24, %v3407_v12  ;;  %v3262_v5 = vadd.f32 %v3261_v43, %v2973_v49  ;;  %v3263_v3 = vpop.f32.mrf.mxu1  ;;  %v14622_v49 = vld [vmem:[#allocation90_spill] sm:$0xff] }
 0x299   :  { %v2975_v39 = vpop.f32.mrf.mxu0 }
 0x29a   :  { %v3408_v54 = vmax.f32 %v3262_v5, 0.0  ;;  %v2976_v26 = vadd.f32 %v2975_v39, %v10955_v38  ;;  %v3264_v61 = vpop.f32.mrf.mxu1 }
 0x29b   :  { %v2977_v59 = vpop.f32.mrf.mxu0 }
 0x29c   :  { %v11435_v52 = vmax.f32 %v11403_v55, %v3408_v54  ;;  %v3265_v4 = vadd.f32 %v3264_v61, %v2976_v26  ;;  %v3266_v16 = vpop.f32.mrf.mxu1  ;;  %v14623_v61 = vld [vmem:[#allocation91_spill] sm:$0xff] }
 0x29d   :  { %v2980_v14 = vpop.f32.mrf.mxu0 }
 0x29e   :  { %v3409_v56 = vmax.f32 %v3265_v4, 0.0  ;;  %v2981_v40 = vadd.f32 %v2980_v14, %v10976_v21  ;;  %v3269_v44 = vpop.f32.mrf.mxu1 }
 0x29f   :  { %v2982_v24 = vpop.f32.mrf.mxu0 }
 0x2a0   :  { %v11439_v48 = vmax.f32 %v11407_v35, %v3409_v56  ;;  %v3270_v29 = vadd.f32 %v3269_v44, %v2981_v40  ;;  %v3271_v13 = vpop.f32.mrf.mxu1  ;;  %v14624_v24 = vld [vmem:[#allocation92_spill] sm:$0xff] }
 0x2a1   :  { %v2983_v22 = vpop.f32.mrf.mxu0 }
 0x2a2   :  { %v3410_v38 = vmax.f32 %v3270_v29, 0.0  ;;  %v2984_v1 = vadd.f32 %v2983_v22, %v14618_v58  ;;  %v3272_v15 = vpop.f32.mrf.mxu1 }
 0x2a3   :  { %v2985_v55 = vpop.f32.mrf.mxu0 }
 0x2a4   :  { %v11443_v19 = vmax.f32 %v11411_v63, %v3410_v38  ;;  %v3273_v45 = vadd.f32 %v3272_v15, %v2984_v1  ;;  %v3274_v2 = vpop.f32.mrf.mxu1  ;;  %v14625_v55 = vld [vmem:[#allocation93_spill] sm:$0xff] }
 0x2a5   :  { %v2988_v62 = vpop.f32.mrf.mxu0 }
 0x2a6   :  { %v3411_v21 = vmax.f32 %v3273_v45, 0.0  ;;  %v2989_v27 = vadd.f32 %v2988_v62, %v14619_v36  ;;  %v3277_v30 = vpop.f32.mrf.mxu1 }
 0x2a7   :  { %v2990_v35 = vpop.f32.mrf.mxu0 }
 0x2a8   :  { %v11447_v8 = vmax.f32 %v11415_v23, %v3411_v21  ;;  %v3278_v46 = vadd.f32 %v3277_v30, %v2989_v27  ;;  %v3279_v6 = vpop.f32.mrf.mxu1  ;;  %v14626_v35 = vld [vmem:[#allocation94_spill] sm:$0xff] }
 0x2a9   :  { %v2991_v20 = vpop.f32.mrf.mxu0 }
 0x2aa   :  { %v3412_v25 = vmax.f32 %v3278_v46, 0.0  ;;  %v2992_v57 = vadd.f32 %v2991_v20, %v14620_v42  ;;  %v3280_v17 = vpop.f32.mrf.mxu1 }
 0x2ab   :  { %v2993_v63 = vpop.f32.mrf.mxu0 }
 0x2ac   :  { %v11451_v7 = vmax.f32 %v11419_v33, %v3412_v25  ;;  %v3281_v53 = vadd.f32 %v3280_v17, %v2992_v57  ;;  %v3282_v18 = vpop.f32.mrf.mxu1  ;;  %v14627_v63 = vld [vmem:[#allocation95_spill] sm:$0xff] }
 0x2ad   :  { %v2996_v34 = vpop.f32.mrf.mxu0 }
 0x2ae   :  { %v3413_v0 = vmax.f32 %v3281_v53, 0.0  ;;  %v2997_v41 = vadd.f32 %v2996_v34, %v14621_v11  ;;  %v3285_v51 = vpop.f32.mrf.mxu1 }
 0x2af   :  { %v2998_v23 = vpop.f32.mrf.mxu0 }
 0x2b0   :  { %v11455_v50 = vmax.f32 %v11423_v37, %v3413_v0  ;;  %v3286_v10 = vadd.f32 %v3285_v51, %v2997_v41  ;;  %v3287_v31 = vpop.f32.mrf.mxu1  ;;  %v14628_v23 = vld [vmem:[#allocation96_spill] sm:$0xff] }
 0x2b1   :  { %v2999_v28 = vpop.f32.mrf.mxu0 }
 0x2b2   :  { %v3414_v12 = vmax.f32 %v3286_v10, 0.0  ;;  %v3000_v43 = vadd.f32 %v2999_v28, %v14622_v49  ;;  %v3288_v9 = vpop.f32.mrf.mxu1 }
 0x2b3   :  { %v3001_v33 = vpop.f32.mrf.mxu0 }
 0x2b4   :  { %v11459_v5 = vmax.f32 %v11427_v60, %v3414_v12  ;;  %v3289_v3 = vadd.f32 %v3288_v9, %v3000_v43  ;;  %v3290_v39 = vpop.f32.mrf.mxu1  ;;  %v14629_v33 = vld [vmem:[#allocation97_spill] sm:$0xff] }
 0x2b5   :  { %v3004_v54 = vpop.f32.mrf.mxu0 }
 0x2b6   :  { %v3415_v26 = vmax.f32 %v3289_v3, 0.0  ;;  %v3005_v59 = vadd.f32 %v3004_v54, %v14623_v61  ;;  %v3293_v4 = vpop.f32.mrf.mxu1 }
 0x2b7   :  { %v3006_v37 = vpop.f32.mrf.mxu0 }
 0x2b8   :  { %v11463_v16 = vmax.f32 %v11431_v47, %v3415_v26  ;;  %v3294_v14 = vadd.f32 %v3293_v4, %v3005_v59  ;;  %v3295_v56 = vpop.f32.mrf.mxu1  ;;  %v14630_v37 = vld [vmem:[#allocation98_spill] sm:$0xff] }
 0x2b9   :  { %v3007_v40 = vpop.f32.mrf.mxu0 }
 0x2ba   :  { %v3416_v44 = vmax.f32 %v3294_v14, 0.0  ;;  %v3008_v29 = vadd.f32 %v3007_v40, %v14624_v24  ;;  %v3296_v13 = vpop.f32.mrf.mxu1 }
 0x2bb   :  { %v3009_v60 = vpop.f32.mrf.mxu0 }
 0x2bc   :  { %v11467_v22 = vmax.f32 %v11435_v52, %v3416_v44  ;;  %v3297_v38 = vadd.f32 %v3296_v13, %v3008_v29  ;;  %v3298_v58 = vpop.f32.mrf.mxu1  ;;  %v14631_v60 = vld [vmem:[#allocation99_spill] sm:$0xff] }
 0x2bd   :  { %v3012_v1 = vpop.f32.mrf.mxu0 }
 0x2be   :  { %v3417_v15 = vmax.f32 %v3297_v38, 0.0  ;;  %v3013_v45 = vadd.f32 %v3012_v1, %v14625_v55  ;;  %v3301_v2 = vpop.f32.mrf.mxu1 }
 0x2bf   :  { %v3014_v47 = vpop.f32.mrf.mxu0 }
 0x2c0   :  { %v11471_v62 = vmax.f32 %v11439_v48, %v3417_v15  ;;  %v3302_v21 = vadd.f32 %v3301_v2, %v3013_v45  ;;  %v3303_v36 = vpop.f32.mrf.mxu1  ;;  %v14632_v47 = vld [vmem:[#allocation100_spill] sm:$0xff] }
 0x2c1   :  { %v3015_v27 = vpop.f32.mrf.mxu0 }
 0x2c2   :  { %v3418_v30 = vmax.f32 %v3302_v21, 0.0  ;;  %v3016_v46 = vadd.f32 %v3015_v27, %v14626_v35  ;;  %v3304_v6 = vpop.f32.mrf.mxu1 }
 0x2c3   :  { %v3017_v52 = vpop.f32.mrf.mxu0 }
 0x2c4   :  { %v11475_v20 = vmax.f32 %v11443_v19, %v3418_v30  ;;  %v3305_v25 = vadd.f32 %v3304_v6, %v3016_v46  ;;  %v3306_v42 = vpop.f32.mrf.mxu1  ;;  %v14633_v52 = vld [vmem:[#allocation101_spill] sm:$0xff] }
 0x2c5   :  { %v3020_v57 = vpop.f32.mrf.mxu0 }
 0x2c6   :  { %v3419_v17 = vmax.f32 %v3305_v25, 0.0  ;;  %v3021_v53 = vadd.f32 %v3020_v57, %v14627_v63  ;;  %v3309_v18 = vpop.f32.mrf.mxu1 }
 0x2c7   :  { %v3022_v48 = vpop.f32.mrf.mxu0 }
 0x2c8   :  { %v11479_v34 = vmax.f32 %v11447_v8, %v3419_v17  ;;  %v3310_v0 = vadd.f32 %v3309_v18, %v3021_v53  ;;  %v3311_v11 = vpop.f32.mrf.mxu1  ;;  %v14634_v48 = vld [vmem:[#allocation102_spill] sm:$0xff] }
 0x2c9   :  { %v3023_v41 = vpop.f32.mrf.mxu0 }
 0x2ca   :  { %v3420_v51 = vmax.f32 %v3310_v0, 0.0  ;;  %v3024_v10 = vadd.f32 %v3023_v41, %v14628_v23  ;;  %v3312_v31 = vpop.f32.mrf.mxu1 }
 0x2cb   :  { %v3025_v19 = vpop.f32.mrf.mxu0 }
 0x2cc   :  { %v11483_v28 = vmax.f32 %v11451_v7, %v3420_v51  ;;  %v3313_v12 = vadd.f32 %v3312_v31, %v3024_v10  ;;  %v3314_v49 = vpop.f32.mrf.mxu1  ;;  %v14635_v19 = vld [vmem:[#allocation103_spill] sm:$0xff] }
 0x2cd   :  { %v3028_v43 = vpop.f32.mrf.mxu0 }
 0x2ce   :  { %v3421_v9 = vmax.f32 %v3313_v12, 0.0  ;;  %v3029_v3 = vadd.f32 %v3028_v43, %v14629_v33  ;;  %v3317_v39 = vpop.f32.mrf.mxu1 }
 0x2cf   :  { %v3030_v8 = vpop.f32.mrf.mxu0 }
 0x2d0   :  { %v11487_v54 = vmax.f32 %v11455_v50, %v3421_v9  ;;  %v3318_v26 = vadd.f32 %v3317_v39, %v3029_v3  ;;  %v3319_v61 = vpop.f32.mrf.mxu1  ;;  %v14636_v8 = vld [vmem:[#allocation104_spill] sm:$0xff] }
 0x2d1   :  { %v3031_v59 = vpop.f32.mrf.mxu0 }
 0x2d2   :  { %v3422_v4 = vmax.f32 %v3318_v26, 0.0  ;;  %v3032_v14 = vadd.f32 %v3031_v59, %v14630_v37  ;;  %v3320_v56 = vpop.f32.mrf.mxu1 }
 0x2d3   :  { %v3033_v7 = vpop.f32.mrf.mxu0 }
 0x2d4   :  { %v11491_v40 = vmax.f32 %v11459_v5, %v3422_v4  ;;  %v3321_v44 = vadd.f32 %v3320_v56, %v3032_v14  ;;  %v3322_v24 = vpop.f32.mrf.mxu1 }
 0x2d5   :  { %v3036_v29 = vpop.f32.mrf.mxu0  ;;  %v14638_v24 = vld [vmem:[#allocation105_spill] sm:$0xff] }
 0x2d6   :  { %v3423_v13 = vmax.f32 %v3321_v44, 0.0  ;;  %v3037_v38 = vadd.f32 %v3036_v29, %v14631_v60  ;;  %v3325_v58 = vpop.f32.mrf.mxu1  ;;  %v11526_v60 = vld [vmem:[%s14179_s2 + $0xb8] sm:$0xff]  }
 0x2d7   :  { %v3038_v50 = vpop.f32.mrf.mxu0  ;;  %14639 = vst [vmem:[#allocation87_spill] sm:$0xff] %v11526_v60 }
 0x2d8   :  { %v11495_v1 = vmax.f32 %v11463_v16, %v3423_v13  ;;  %v3326_v15 = vadd.f32 %v3325_v58, %v3037_v38  ;;  %v3327_v55 = vpop.f32.mrf.mxu1  ;;  %v14385_v38 = vunpack.c.h.bf16 %v11526_v60 }
 0x2d9   :  { %v3039_v45 = vpop.f32.mrf.mxu0 }
 0x2da   :  { %v3424_v2 = vmax.f32 %v3326_v15, 0.0  ;;  %v3040_v21 = vadd.f32 %v3039_v45, %v14632_v47  ;;  %v3328_v36 = vpop.f32.mrf.mxu1 }
 0x2db   :  { %v3041_v5 = vpop.f32.mrf.mxu0 }
 0x2dc   :  { %v11499_v27 = vmax.f32 %v11467_v22, %v3424_v2  ;;  %v3329_v30 = vadd.f32 %v3328_v36, %v3040_v21  ;;  %v3330_v35 = vpop.f32.mrf.mxu1  ;;  %v14382_v2 = vunpack.c.l.bf16 %v11526_v60  ;;  %v14641_v5 = vld [vmem:[#allocation106_spill] sm:$0xff] }
 0x2dd   :  { %v3044_v46 = vpop.f32.mrf.mxu0 }
 0x2de   :  { %v3425_v6 = vmax.f32 %v3329_v30, 0.0  ;;  %v3045_v25 = vadd.f32 %v3044_v46, %v14633_v52  ;;  %v3333_v42 = vpop.f32.mrf.mxu1 }
 0x2df   :  { %v3046_v16 = vpop.f32.mrf.mxu0 }
 0x2e0   :  { %v11503_v57 = vmax.f32 %v11471_v62, %v3425_v6  ;;  %v3334_v17 = vadd.f32 %v3333_v42, %v3045_v25  ;;  %v3335_v63 = vpop.f32.mrf.mxu1  ;;  %v11556_v6 = vld [vmem:[%s14179_s2 + $0xe8] sm:$0xff]  }
 0x2e1   :  { %v3047_v53 = vpop.f32.mrf.mxu0  ;;  %14643 = vst [vmem:[#allocation90_spill] sm:$0xff] %v11556_v6  ;;  %v14378_v52 = vunpack.c.h.bf16 %v11556_v6 }
 0x2e2   :  { %v3426_v18 = vmax.f32 %v3334_v17, 0.0  ;;  %v3048_v0 = vadd.f32 %v3047_v53, %v14634_v48  ;;  %v3336_v11 = vpop.f32.mrf.mxu1  ;;  %v14366_v53 = vunpack.c.l.bf16 %v11556_v6 }
 0x2e3   :  { %v3049_v22 = vpop.f32.mrf.mxu0 }
 0x2e4   :  { %v11507_v41 = vmax.f32 %v11475_v20, %v3426_v18  ;;  %v3337_v51 = vadd.f32 %v3336_v11, %v3048_v0  ;;  %v3338_v23 = vpop.f32.mrf.mxu1  ;;  %v11517_v20 = vld [vmem:[%s14179_s2 + $0xf8] sm:$0xff]   ;;  %v11580_v22 = vld [vmem:[%s14179_s2 + $0xa8] sm:$0xff]  }
 0x2e5   :  { %v3052_v10 = vpop.f32.mrf.mxu0  ;;  %14637 = vst [vmem:[#allocation86_spill] sm:$0xff] %v11517_v20  ;;  %v14387_v59 = vunpack.c.h.bf16 %v11517_v20  ;;  %v14386_v56 = vunpack.c.l.bf16 %v11517_v20  ;;  %14645 = vst [vmem:[#allocation91_spill] sm:$0xff] %v11580_v22  ;;  %v11586_v23 = vld [vmem:[%s14179_s2 + $0xe0] sm:$0xff]  }
 0x2e6   :  { %v3427_v31 = vmax.f32 %v3337_v51, 0.0  ;;  %v3053_v12 = vadd.f32 %v3052_v10, %v14635_v19  ;;  %v3341_v49 = vpop.f32.mrf.mxu1  ;;  %v14363_v51 = vunpack.c.h.bf16 %v11580_v22  ;;  %14646 = vst [vmem:[#allocation92_spill] sm:$0xff] %v11586_v23  ;;  %v14360_v10 = vunpack.c.h.bf16 %v11586_v23 }
 0x2e7   :  { %v3054_v62 = vpop.f32.mrf.mxu0 }
 0x2e8   :  { %v11511_v43 = vmax.f32 %v11479_v34, %v3427_v31  ;;  %v3342_v9 = vadd.f32 %v3341_v49, %v3053_v12  ;;  %v3343_v33 = vpop.f32.mrf.mxu1  ;;  %v14357_v62 = vunpack.c.l.bf16 %v11580_v22 }
 0x2e9   :  { %v3055_v3 = vpop.f32.mrf.mxu0 }
 0x2ea   :  { %v3428_v39 = vmax.f32 %v3342_v9, 0.0  ;;  %v3056_v26 = vadd.f32 %v3055_v3, %v14636_v8  ;;  %v3344_v61 = vpop.f32.mrf.mxu1  ;;  %v14354_v9 = vunpack.c.l.bf16 %v11586_v23 }
 0x2eb   :  { %v3057_v4 = vpop.f32.mrf.mxu0 }
 0x2ec   :  { %v3442_v37 = vmax.f32 %v11483_v28, %v3428_v39  ;;  %v3345_v14 = vadd.f32 %v3344_v61, %v3056_v26  ;;  %v3346_v34 = vpop.f32.mrf.mxu1  ;;  %v11532_v28 = vld [vmem:[%s14179_s2 + $0xf0] sm:$0xff]   ;;  %v11610_v26 = vld [vmem:[%s14179_s2 + $0xa0] sm:$0xff]   ;;  %v11616_v4 = vld [vmem:[%s14179_s2 + $0xd8] sm:$0xff]  }
 0x2ed   :  { %v3060_v7 = vpop.f32.mrf.mxu0  ;;  %14640 = vst [vmem:[#allocation88_spill] sm:$0xff] %v11532_v28  ;;  %v14384_v58 = vunpack.c.h.bf16 %v11532_v28  ;;  %v14381_v47 = vunpack.c.l.bf16 %v11532_v28  ;;  %14648 = vst [vmem:[#allocation93_spill] sm:$0xff] %v11610_v26  ;;  %v14351_v61 = vunpack.c.h.bf16 %v11610_v26 }
 0x2ee   :  { %v3429_v44 = vmax.f32 %v3345_v14, 0.0  ;;  %v3061_v29 = vadd.f32 %v3060_v7, %v14638_v24  ;;  %8693 = vmatmul.mubr.f32.vlgmr.msra.gmra.mxu1 %v3442_v37  ;;  %v3349_v13 = vpop.f32.mrf.mxu1  ;;  %14649 = vst [vmem:[#allocation94_spill] sm:$0xff] %v11616_v4  ;;  %v14348_v37 = vunpack.c.h.bf16 %v11616_v4  ;;  %v14345_v24 = vunpack.c.l.bf16 %v11610_v26 }
 0x2ef   :  { %8731 = vmatpush3.msra.mxu1 %v14387_v59  ;;  %v3062_v50 = vpop.f32.mrf.mxu0  ;;  %8762 = vmatprep.mubr.msk.f32.mxu1 %vm9502_vm0, %v14555_v32  ;;  %v4087_v59 = vld [vmem:[%s14178_s1 + $0xa8] sm:$0xff] }
 0x2f0   :  { %v3449_v15 = vmax.f32 %v11487_v54, %v3429_v44  ;;  %v3350_v55 = vadd.f32 %v3349_v13, %v3061_v29  ;;  %8732 = vmatprep.subr.mxu1 %v14555_v32  ;;  %v3351_v45 = vpop.f32.mrf.mxu1  ;;  %v11550_v54 = vld [vmem:[%s14179_s2 + $0xb0] sm:$0xff]   ;;  %v14342_v29 = vunpack.c.l.bf16 %v11616_v4 }
 0x2f1   :  { %8733 = vmatpush3.msra.mxu1 %v14386_v56  ;;  %v3063_v21 = vpop.f32.mrf.mxu0  ;;  %14642 = vst [vmem:[#allocation89_spill] sm:$0xff] %v11550_v54  ;;  %v14379_v46 = vunpack.c.h.bf16 %v11550_v54  ;;  %v14369_v63 = vunpack.c.l.bf16 %v11550_v54  ;;  %v11640_v45 = vld [vmem:[%s14179_s2 + $0x98] sm:$0xff]  }
 0x2f2   :  { %v3430_v36 = vmax.f32 %v3350_v55, 0.0  ;;  %v3064_v30 = vadd.f32 %v3063_v21, %v14641_v5  ;;  %8734 = vmatprep.subr.mxu1 %v14555_v32  ;;  %8658 = vmatmul.mubr.f32.vlgmr.msra.gmra.mxu0 %v3449_v15  ;;  %v3352_v35 = vpop.f32.mrf.mxu1  ;;  %14651 = vst [vmem:[#allocation95_spill] sm:$0xff] %v11640_v45  ;;  %v14339_v21 = vunpack.c.h.bf16 %v11640_v45  ;;  %v14723_v56 = vld [vmem:[#allocation36_spill] sm:$0xff] }
 0x2f3   :  { %8696 = vmatpush3.msra.mxu0 %v14385_v38  ;;  %8735 = vmatpush3.msra.mxu1 %v14384_v58  ;;  %v3065_v25 = vpop.f32.mrf.mxu0  ;;  %v14697_v58 = vld [vmem:[#allocation10_spill] sm:$0xff] }
 0x2f4   :  { %v11564_v42 = vmax.f32 %v11491_v40, %v3430_v36  ;;  %v3353_v16 = vadd.f32 %v3352_v35, %v3064_v30  ;;  %8697 = vmatprep.subr.mxu0 %v14555_v32  ;;  %8736 = vmatprep.subr.mxu1 %v14555_v32  ;;  %v3354_v17 = vpop.f32.mrf.mxu1  ;;  %v14644_v40 = vld [vmem:[#allocation107_spill] sm:$0xff] }
 0x2f5   :  { %8698 = vmatpush3.msra.mxu0 %v14382_v2  ;;  %8737 = vmatpush3.msra.mxu1 %v14381_v47  ;;  %v3068_v18 = vpop.f32.mrf.mxu0  ;;  %v11646_v36 = vld [vmem:[%s14179_s2 + $0xd0] sm:$0xff]   ;;  %v14333_v17 = vunpack.c.l.bf16 %v11640_v45  ;;  %v14693_v2 = vld [vmem:[#allocation6_spill] sm:$0xff] }
 0x2f6   :  { %v3431_v48 = vmax.f32 %v3353_v16, 0.0  ;;  %v3069_v0 = vadd.f32 %v3068_v18, %v14644_v40  ;;  %8699 = vmatprep.subr.mxu0 %v14555_v32  ;;  %8738 = vmatprep.subr.mxu1 %v14555_v32  ;;  %v3357_v11 = vpop.f32.mrf.mxu1  ;;  %14652 = vst [vmem:[#allocation96_spill] sm:$0xff] %v11646_v36  ;;  %v14337_v5 = vunpack.c.h.bf16 %v11646_v36  ;;  %v14330_v18 = vunpack.c.l.bf16 %v11646_v36 }
 0x2f7   :  { %8700 = vmatpush3.msra.mxu0 %v14379_v46  ;;  %8739 = vmatpush3.msra.mxu1 %v14378_v52  ;;  %v3070_v31 = vpop.f32.mrf.mxu0  ;;  %v12188_v52 = vld [vmem:[%s14178_s1] sm:$0xff]  ;;  %v14692_v46 = vld [vmem:[#allocation7_spill] sm:$0xff] }
 0x2f8   :  { %v11594_v19 = vmax.f32 %v11495_v1, %v3431_v48  ;;  %v3358_v12 = vadd.f32 %v3357_v11, %v3069_v0  ;;  %8701 = vmatprep.subr.mxu0 %v14555_v32  ;;  %8740 = vmatprep.subr.mxu1 %v14555_v32  ;;  %v3359_v49 = vpop.f32.mrf.mxu1  ;;  %v14647_v1 = vld [vmem:[#allocation108_spill] sm:$0xff] }
 0x2f9   :  { %8702 = vmatpush3.msra.mxu0 %v14369_v63  ;;  %8741 = vmatpush3.msra.mxu1 %v14366_v53  ;;  %v3071_v33 = vpop.f32.mrf.mxu0  ;;  %v11670_v31 = vld [vmem:[%s14179_s2 + $0x90] sm:$0xff]   ;;  %v11676_v49 = vld [vmem:[%s14179_s2 + $0xc8] sm:$0xff]  }
 0x2fa   :  { %v3432_v3 = vmax.f32 %v3358_v12, 0.0  ;;  %v3072_v39 = vadd.f32 %v3071_v33, %v14647_v1  ;;  %8703 = vmatprep.subr.mxu0 %v14555_v32  ;;  %8742 = vmatprep.subr.mxu1 %v14555_v32  ;;  %v3360_v8 = vpop.f32.mrf.mxu1  ;;  %14654 = vst [vmem:[#allocation97_spill] sm:$0xff] %v11670_v31  ;;  %v14323_v12 = vunpack.c.h.bf16 %v11670_v31  ;;  %14655 = vst [vmem:[#allocation98_spill] sm:$0xff] %v11676_v49  ;;  %v14320_v33 = vunpack.c.h.bf16 %v11676_v49  ;;  %v12130_v53 = vld [vmem:[%s14179_s2 + $0x188] sm:$0xff]  }
 0x2fb   :  { %8704 = vmatpush3.msra.mxu0 %v14363_v51  ;;  %8743 = vmatpush3.msra.mxu1 %v14360_v10  ;;  %v3073_v14 = vpop.f32.mrf.mxu0  ;;  %v12104_v10 = vld [vmem:[%s14179_s2 + $0x190] sm:$0xff]   ;;  %14688 = vst [vmem:[#allocation131_spill] sm:$0xff] %v12130_v53 }
 0x2fc   :  { %v11624_v34 = vmax.f32 %v11499_v27, %v3432_v3  ;;  %v3361_v7 = vadd.f32 %v3360_v8, %v3072_v39  ;;  %8705 = vmatprep.subr.mxu0 %v14555_v32  ;;  %8744 = vmatprep.subr.mxu1 %v14555_v32  ;;  %v3362_v44 = vpop.f32.mrf.mxu1  ;;  %v14650_v27 = vld [vmem:[#allocation109_spill] sm:$0xff]  ;;  %v14317_v14 = vunpack.c.l.bf16 %v11670_v31  ;;  %14686 = vst [vmem:[#allocation129_spill] sm:$0xff] %v12104_v10 }
 0x2fd   :  { %8706 = vmatpush3.msra.mxu0 %v14357_v62  ;;  %8745 = vmatpush3.msra.mxu1 %v14354_v9  ;;  %v3076_v13 = vpop.f32.mrf.mxu0  ;;  %v12078_v9 = vld [vmem:[%s14179_s2 + $0x198] sm:$0xff]  }
 0x2fe   :  { %v3433_v50 = vmax.f32 %v3361_v7, 0.0  ;;  %v3077_v15 = vadd.f32 %v3076_v13, %v14650_v27  ;;  %8707 = vmatprep.subr.mxu0 %v14555_v32  ;;  %8746 = vmatprep.subr.mxu1 %v14555_v32  ;;  %v3365_v55 = vpop.f32.mrf.mxu1  ;;  %v14314_v7 = vunpack.c.l.bf16 %v11676_v49  ;;  %14684 = vst [vmem:[#allocation127_spill] sm:$0xff] %v12078_v9 }
 0x2ff   :  { %8708 = vmatpush3.msra.mxu0 %v14351_v61  ;;  %8747 = vmatpush3.msra.mxu1 %v14348_v37  ;;  %v3078_v30 = vpop.f32.mrf.mxu0  ;;  %v12052_v37 = vld [vmem:[%s14179_s2 + $0x1a0] sm:$0xff]  }
 0x300   :  { %v11654_v35 = vmax.f32 %v11503_v57, %v3433_v50  ;;  %v3366_v25 = vadd.f32 %v3365_v55, %v3077_v15  ;;  %8709 = vmatprep.subr.mxu0 %v14555_v32  ;;  %8748 = vmatprep.subr.mxu1 %v14555_v32  ;;  %v3367_v16 = vpop.f32.mrf.mxu1  ;;  %v14653_v57 = vld [vmem:[#allocation110_spill] sm:$0xff]  ;;  %14682 = vst [vmem:[#allocation125_spill] sm:$0xff] %v12052_v37 }
 0x301   :  { %8710 = vmatpush3.msra.mxu0 %v14345_v24  ;;  %8749 = vmatpush3.msra.mxu1 %v14342_v29  ;;  %v3079_v48 = vpop.f32.mrf.mxu0  ;;  %v11705_v50 = vld [vmem:[%s14179_s2 + $0xc0] sm:$0xff]   ;;  %v11740_v16 = vld [vmem:[%s14179_s2 + $0x178] sm:$0xff]   ;;  %v12026_v29 = vld [vmem:[%s14179_s2 + $0x1a8] sm:$0xff]  }
 0x302   :  { %v3434_v40 = vmax.f32 %v3366_v25, 0.0  ;;  %v3080_v0 = vadd.f32 %v3079_v48, %v14653_v57  ;;  %8711 = vmatprep.subr.mxu0 %v14555_v32  ;;  %8750 = vmatprep.subr.mxu1 %v14555_v32  ;;  %v3368_v11 = vpop.f32.mrf.mxu1  ;;  %14657 = vst [vmem:[#allocation100_spill] sm:$0xff] %v11705_v50  ;;  %v14308_v27 = vunpack.c.h.bf16 %v11705_v50  ;;  %v14302_v30 = vunpack.c.l.bf16 %v11705_v50  ;;  %14659 = vst [vmem:[#allocation102_spill] sm:$0xff] %v11740_v16 }
 0x303   :  { %8712 = vmatpush3.msra.mxu0 %v14339_v21  ;;  %8751 = vmatpush3.msra.mxu1 %v14337_v5  ;;  %v3081_v3 = vpop.f32.mrf.mxu0  ;;  %v14296_v48 = vunpack.c.h.bf16 %v11740_v16  ;;  %v14292_v57 = vunpack.c.l.bf16 %v11740_v16  ;;  %v12000_v5 = vld [vmem:[%s14179_s2 + $0x1b0] sm:$0xff]   ;;  %14680 = vst [vmem:[#allocation123_spill] sm:$0xff] %v12026_v29 }
 0x304   :  { %v11684_v1 = vmax.f32 %v11507_v41, %v3434_v40  ;;  %v3369_v39 = vadd.f32 %v3368_v11, %v3080_v0  ;;  %8713 = vmatprep.subr.mxu0 %v14555_v32  ;;  %8752 = vmatprep.subr.mxu1 %v14555_v32  ;;  %v3370_v8 = vpop.f32.mrf.mxu1  ;;  %v11699_v41 = vld [vmem:[%s14179_s2 + $0x88] sm:$0xff]   ;;  %v11760_v0 = vld [vmem:[%s14179_s2 + $0x138] sm:$0xff]   ;;  %14678 = vst [vmem:[#allocation121_spill] sm:$0xff] %v12000_v5 }
 0x305   :  { %8714 = vmatpush3.msra.mxu0 %v14333_v17  ;;  %8753 = vmatpush3.msra.mxu1 %v14330_v18  ;;  %14656 = vst [vmem:[#allocation99_spill] sm:$0xff] %v11699_v41  ;;  %v14311_v13 = vunpack.c.h.bf16 %v11699_v41  ;;  %v14305_v55 = vunpack.c.l.bf16 %v11699_v41  ;;  %14660 = vst [vmem:[#allocation103_spill] sm:$0xff] %v11760_v0  ;;  %v14294_v11 = vunpack.c.h.bf16 %v11760_v0 }
 0x306   :  { %v3435_v44 = vmax.f32 %v3369_v39, 0.0  ;;  %8715 = vmatprep.subr.mxu0 %v14555_v32  ;;  %8754 = vmatprep.subr.mxu1 %v14555_v32  ;;  %v14297_v39 = vunpack.c.l.bf16 %v11760_v0 }
 0x307   :  { %8716 = vmatpush3.msra.mxu0 %v14323_v12  ;;  %8755 = vmatpush3.msra.mxu1 %v14320_v33  ;;  %v11916_v33 = vld [vmem:[%s14179_s2 + $0x108] sm:$0xff]  }
 0x308   :  { %v11713_v15 = vmax.f32 %v11511_v43, %v3435_v44  ;;  %8717 = vmatprep.subr.mxu0 %v14555_v32  ;;  %8756 = vmatprep.subr.mxu1 %v14555_v32  ;;  %v11728_v43 = vld [vmem:[%s14179_s2 + $0x80] sm:$0xff]   ;;  %v11786_v44 = vld [vmem:[%s14179_s2 + $0x130] sm:$0xff]   ;;  %14672 = vst [vmem:[#allocation115_spill] sm:$0xff] %v11916_v33 }
 0x309   :  { %8718 = vmatpush3.msra.mxu0 %v14317_v14  ;;  %8757 = vmatpush3.msra.mxu1 %v14314_v7  ;;  %14658 = vst [vmem:[#allocation101_spill] sm:$0xff] %v11728_v43  ;;  %v14299_v25 = vunpack.c.h.bf16 %v11728_v43  ;;  %v14293_v40 = vunpack.c.l.bf16 %v11728_v43  ;;  %14662 = vst [vmem:[#allocation105_spill] sm:$0xff] %v11786_v44  ;;  %v11890_v7 = vld [vmem:[%s14179_s2 + $0x110] sm:$0xff]   ;;  %v4133_v43 = vld [vmem:[%s14178_s1 + $0x218] sm:$0xff] }
 0x30a   :  { %8719 = vmatprep.subr.mxu0 %v14555_v32  ;;  %8758 = vmatprep.subr.mxu1 %v14555_v32  ;;  %14670 = vst [vmem:[#allocation113_spill] sm:$0xff] %v11890_v7 }
 0x30b   :  { %8720 = vmatpush3.msra.mxu0 %v14311_v13  ;;  %8759 = vmatpush3.msra.mxu1 %v14308_v27  ;;  %v11864_v27 = vld [vmem:[%s14179_s2 + $0x118] sm:$0xff]  }
 0x30c   :  { %8721 = vmatprep.subr.mxu0 %v14555_v32  ;;  %8760 = vmatprep.subr.mxu1 %v14555_v32  ;;  %14668 = vst [vmem:[#allocation111_spill] sm:$0xff] %v11864_v27 }
 0x30d   :  { %8722 = vmatpush3.msra.mxu0 %v14305_v55  ;;  %8761 = vmatpush3.msra.mxu1 %v14302_v30  ;;  %v11838_v30 = vld [vmem:[%s14179_s2 + $0x120] sm:$0xff]  }
 0x30e   :  { %8723 = vmatprep.subr.mxu0 %v14555_v32  ;;  %8763 = vmatmul.mubr.f32.vlgmr.msra.gmra.mxu1 %v11594_v19  ;;  %v11769_v19 = vld [vmem:[%s14179_s2 + $0x170] sm:$0xff]   ;;  %14666 = vst [vmem:[#allocation109_spill] sm:$0xff] %v11838_v30 }
 0x30f   :  { %8800 = vmatprep.subr.mxu1 %v14555_v32  ;;  %8724 = vmatpush3.msra.mxu0 %v14299_v25  ;;  %14661 = vst [vmem:[#allocation104_spill] sm:$0xff] %v11769_v19  ;;  %v14295_v3 = vunpack.c.h.bf16 %v11769_v19  ;;  %v14298_v8 = vunpack.c.l.bf16 %v11769_v19  ;;  %v4116_v19 = vld [vmem:[%s14178_s1 + $0x190] sm:$0xff] }
 0x310   :  { %8801 = vmatpush3.msra.mxu1 %v14296_v48  ;;  %8725 = vmatprep.subr.mxu0 %v14555_v32  ;;  %v11812_v48 = vld [vmem:[%s14179_s2 + $0x128] sm:$0xff]  }
 0x311   :  { %8802 = vmatprep.subr.mxu1 %v14555_v32  ;;  %8726 = vmatpush3.msra.mxu0 %v14293_v40  ;;  %14664 = vst [vmem:[#allocation107_spill] sm:$0xff] %v11812_v48 }
 0x312   :  { %8727 = vmatprep.mubr.msk.f32.mxu0 %vm9502_vm0, %v14555_v32  ;;  %8803 = vmatpush3.msra.mxu1 %v14292_v57  ;;  %v14300_v57 = vunpack.c.h.bf16 %v11786_v44 }
 0x313   :  { %8728 = vmatmul.mubr.f32.vlgmr.msra.gmra.mxu0 %v11564_v42  ;;  %8765 = vmatprep.subr.mxu0 %v14555_v32  ;;  %v11795_v42 = vld [vmem:[%s14179_s2 + $0x168] sm:$0xff]  }
 0x314   :  { %8804 = vmatprep.subr.mxu1 %v14555_v32  ;;  %8766 = vmatpush3.msra.mxu0 %v14294_v11  ;;  %14663 = vst [vmem:[#allocation106_spill] sm:$0xff] %v11795_v42  ;;  %v14301_v40 = vunpack.c.h.bf16 %v11795_v42  ;;  %v14303_v11 = vunpack.c.l.bf16 %v11786_v44 }
 0x315   :  { %8805 = vmatpush3.msra.mxu1 %v14295_v3  ;;  %8767 = vmatprep.subr.mxu0 %v14555_v32  ;;  %v14304_v3 = vunpack.c.l.bf16 %v11795_v42 }
 0x316   :  { %8806 = vmatprep.subr.mxu1 %v14555_v32  ;;  %8768 = vmatpush3.msra.mxu0 %v14297_v39  ;;  %v14306_v39 = vunpack.c.h.bf16 %v11812_v48 }
 0x317   :  { %8807 = vmatpush3.msra.mxu1 %v14298_v8  ;;  %8769 = vmatprep.subr.mxu0 %v14555_v32  ;;  %v11821_v8 = vld [vmem:[%s14179_s2 + $0x160] sm:$0xff]  }
 0x318   :  { %8808 = vmatprep.subr.mxu1 %v14555_v32  ;;  %8770 = vmatpush3.msra.mxu0 %v14300_v57  ;;  %14665 = vst [vmem:[#allocation108_spill] sm:$0xff] %v11821_v8  ;;  %v14307_v25 = vunpack.c.h.bf16 %v11821_v8  ;;  %v14309_v57 = vunpack.c.l.bf16 %v11812_v48 }
 0x319   :  { %8809 = vmatpush3.msra.mxu1 %v14301_v40  ;;  %8771 = vmatprep.subr.mxu0 %v14555_v32  ;;  %v14310_v40 = vunpack.c.l.bf16 %v11821_v8  ;;  %v14774_v8 = vld [vmem:[#allocation77_spill] sm:$0xff] }
 0x31a   :  { %8810 = vmatprep.subr.mxu1 %v14555_v32  ;;  %8772 = vmatpush3.msra.mxu0 %v14303_v11  ;;  %v14312_v11 = vunpack.c.h.bf16 %v11838_v30 }
 0x31b   :  { %8811 = vmatpush3.msra.mxu1 %v14304_v3  ;;  %8773 = vmatprep.subr.mxu0 %v14555_v32  ;;  %v11847_v3 = vld [vmem:[%s14179_s2 + $0x158] sm:$0xff]  }
 0x31c   :  { %8812 = vmatprep.subr.mxu1 %v14555_v32  ;;  %8774 = vmatpush3.msra.mxu0 %v14306_v39  ;;  %14667 = vst [vmem:[#allocation110_spill] sm:$0xff] %v11847_v3  ;;  %v14313_v55 = vunpack.c.h.bf16 %v11847_v3  ;;  %v14315_v39 = vunpack.c.l.bf16 %v11838_v30 }
 0x31d   :  { %8813 = vmatpush3.msra.mxu1 %v14307_v25  ;;  %8775 = vmatprep.subr.mxu0 %v14555_v32  ;;  %v14316_v25 = vunpack.c.l.bf16 %v11847_v3  ;;  %v14765_v3 = vld [vmem:[#allocation72_spill] sm:$0xff] }
 0x31e   :  { %8814 = vmatprep.subr.mxu1 %v14555_v32  ;;  %8776 = vmatpush3.msra.mxu0 %v14309_v57  ;;  %v14318_v57 = vunpack.c.h.bf16 %v11864_v27 }
 0x31f   :  { %8815 = vmatpush3.msra.mxu1 %v14310_v40  ;;  %8777 = vmatprep.subr.mxu0 %v14555_v32  ;;  %v11873_v40 = vld [vmem:[%s14179_s2 + $0x150] sm:$0xff]  }
 0x320   :  { %8816 = vmatprep.subr.mxu1 %v14555_v32  ;;  %8778 = vmatpush3.msra.mxu0 %v14312_v11  ;;  %14669 = vst [vmem:[#allocation112_spill] sm:$0xff] %v11873_v40  ;;  %v14319_v13 = vunpack.c.h.bf16 %v11873_v40  ;;  %v14321_v11 = vunpack.c.l.bf16 %v11864_v27  ;;  %v12795_v27 = vld [vmem:[%s14178_s1 + $0x98] sm:$0xff] }
 0x321   :  { %8817 = vmatpush3.msra.mxu1 %v14313_v55  ;;  %8779 = vmatprep.subr.mxu0 %v14555_v32  ;;  %v14322_v55 = vunpack.c.l.bf16 %v11873_v40 }
 0x322   :  { %8818 = vmatprep.subr.mxu1 %v14555_v32  ;;  %8780 = vmatpush3.msra.mxu0 %v14315_v39  ;;  %v14324_v39 = vunpack.c.h.bf16 %v11890_v7 }
 0x323   :  { %8819 = vmatpush3.msra.mxu1 %v14316_v25  ;;  %8781 = vmatprep.subr.mxu0 %v14555_v32  ;;  %v11899_v25 = vld [vmem:[%s14179_s2 + $0x148] sm:$0xff]  }
 0x324   :  { %8820 = vmatprep.subr.mxu1 %v14555_v32  ;;  %8782 = vmatpush3.msra.mxu0 %v14318_v57  ;;  %14671 = vst [vmem:[#allocation114_spill] sm:$0xff] %v11899_v25  ;;  %v14325_v14 = vunpack.c.h.bf16 %v11899_v25  ;;  %v14326_v57 = vunpack.c.l.bf16 %v11890_v7 }
 0x325   :  { %8821 = vmatpush3.msra.mxu1 %v14319_v13  ;;  %8783 = vmatprep.subr.mxu0 %v14555_v32  ;;  %v14327_v13 = vunpack.c.l.bf16 %v11899_v25 }
 0x326   :  { %8822 = vmatprep.subr.mxu1 %v14555_v32  ;;  %8784 = vmatpush3.msra.mxu0 %v14321_v11  ;;  %v14328_v11 = vunpack.c.h.bf16 %v11916_v33 }
 0x327   :  { %8823 = vmatpush3.msra.mxu1 %v14322_v55  ;;  %8785 = vmatprep.subr.mxu0 %v14555_v32  ;;  %v11925_v55 = vld [vmem:[%s14179_s2 + $0x140] sm:$0xff]  }
 0x328   :  { %8824 = vmatprep.subr.mxu1 %v14555_v32  ;;  %8786 = vmatpush3.msra.mxu0 %v14324_v39  ;;  %14673 = vst [vmem:[#allocation116_spill] sm:$0xff] %v11925_v55  ;;  %v14329_v12 = vunpack.c.h.bf16 %v11925_v55  ;;  %v14331_v39 = vunpack.c.l.bf16 %v11916_v33 }
 0x329   :  { %8825 = vmatpush3.msra.mxu1 %v14325_v14  ;;  %8787 = vmatprep.subr.mxu0 %v14555_v32  ;;  %v14332_v14 = vunpack.c.l.bf16 %v11925_v55 }
 0x32a   :  { %8826 = vmatprep.subr.mxu1 %v14555_v32  ;;  %8788 = vmatpush3.msra.mxu0 %v14326_v57  ;;  %v11945_v57 = vld [vmem:[%s14179_s2 + $0x100] sm:$0xff]  }
 0x32b   :  { %8827 = vmatpush3.msra.mxu1 %v14327_v13  ;;  %8789 = vmatprep.subr.mxu0 %v14555_v32  ;;  %14674 = vst [vmem:[#allocation117_spill] sm:$0xff] %v11945_v57  ;;  %v14335_v13 = vunpack.c.h.bf16 %v11945_v57  ;;  %v14336_v18 = vunpack.c.l.bf16 %v11945_v57 }
 0x32c   :  { %8828 = vmatprep.subr.mxu1 %v14555_v32  ;;  %8790 = vmatpush3.msra.mxu0 %v14328_v11  ;;  %v11954_v11 = vld [vmem:[%s14179_s2 + $0x1f8] sm:$0xff]  }
 0x32d   :  { %8829 = vmatpush3.msra.mxu1 %v14329_v12  ;;  %8791 = vmatprep.subr.mxu0 %v14555_v32  ;;  %14675 = vst [vmem:[#allocation118_spill] sm:$0xff] %v11954_v11  ;;  %v14334_v12 = vunpack.c.h.bf16 %v11954_v11 }
 0x32e   :  { %8830 = vmatprep.subr.mxu1 %v14555_v32  ;;  %8792 = vmatpush3.msra.mxu0 %v14331_v39  ;;  %v14338_v39 = vunpack.c.l.bf16 %v11954_v11 }
 0x32f   :  { %8831 = vmatpush3.msra.mxu1 %v14332_v14  ;;  %8832 = vmatprep.mubr.msk.f32.mxu1 %vm9502_vm0, %v14555_v32  ;;  %v11974_v14 = vld [vmem:[%s14179_s2 + $0x1b8] sm:$0xff]  }
 0x330   :  { %8793 = vmatprep.subr.mxu0 %v14555_v32  ;;  %8833 = vmatmul.mubr.f32.vlgmr.msra.gmra.mxu1 %v11654_v35  ;;  %14676 = vst [vmem:[#allocation119_spill] sm:$0xff] %v11974_v14  ;;  %v14340_v17 = vunpack.c.h.bf16 %v11974_v14  ;;  %v11983_v35 = vld [vmem:[%s14179_s2 + $0x1f0] sm:$0xff]  }
 0x331   :  { %8870 = vmatprep.subr.mxu1 %v14555_v32  ;;  %8794 = vmatpush3.msra.mxu0 %v14335_v13  ;;  %14677 = vst [vmem:[#allocation120_spill] sm:$0xff] %v11983_v35  ;;  %v14343_v13 = vunpack.c.l.bf16 %v11974_v14 }
 0x332   :  { %8871 = vmatpush3.msra.mxu1 %v14334_v12  ;;  %8795 = vmatprep.subr.mxu0 %v14555_v32  ;;  %v14341_v12 = vunpack.c.h.bf16 %v11983_v35 }
 0x333   :  { %8872 = vmatprep.subr.mxu1 %v14555_v32  ;;  %8796 = vmatpush3.msra.mxu0 %v14336_v18  ;;  %v14344_v18 = vunpack.c.l.bf16 %v11983_v35 }
 0x334   :  { %8797 = vmatprep.mubr.msk.f32.mxu0 %vm9502_vm0, %v14555_v32  ;;  %8873 = vmatpush3.msra.mxu1 %v14338_v39  ;;  %v14346_v39 = vunpack.c.h.bf16 %v12000_v5 }
 0x335   :  { %8798 = vmatmul.mubr.f32.vlgmr.msra.gmra.mxu0 %v11624_v34  ;;  %8835 = vmatprep.subr.mxu0 %v14555_v32  ;;  %v12009_v34 = vld [vmem:[%s14179_s2 + $0x1e8] sm:$0xff]  }
 0x336   :  { %8874 = vmatprep.subr.mxu1 %v14555_v32  ;;  %8836 = vmatpush3.msra.mxu0 %v14340_v17  ;;  %14679 = vst [vmem:[#allocation122_spill] sm:$0xff] %v12009_v34  ;;  %v14347_v21 = vunpack.c.h.bf16 %v12009_v34  ;;  %v14349_v17 = vunpack.c.l.bf16 %v12000_v5 }
 0x337   :  { %8875 = vmatpush3.msra.mxu1 %v14341_v12  ;;  %8837 = vmatprep.subr.mxu0 %v14555_v32  ;;  %v14350_v12 = vunpack.c.l.bf16 %v12009_v34 }
 0x338   :  { %8876 = vmatprep.subr.mxu1 %v14555_v32  ;;  %8838 = vmatpush3.msra.mxu0 %v14343_v13  ;;  %v14352_v13 = vunpack.c.h.bf16 %v12026_v29 }
 0x339   :  { %8877 = vmatpush3.msra.mxu1 %v14344_v18  ;;  %8839 = vmatprep.subr.mxu0 %v14555_v32  ;;  %v12035_v18 = vld [vmem:[%s14179_s2 + $0x1e0] sm:$0xff]  }
 0x33a   :  { %8878 = vmatprep.subr.mxu1 %v14555_v32  ;;  %8840 = vmatpush3.msra.mxu0 %v14346_v39  ;;  %14681 = vst [vmem:[#allocation124_spill] sm:$0xff] %v12035_v18  ;;  %v14353_v24 = vunpack.c.h.bf16 %v12035_v18  ;;  %v14355_v39 = vunpack.c.l.bf16 %v12026_v29 }
 0x33b   :  { %8879 = vmatpush3.msra.mxu1 %v14347_v21  ;;  %8841 = vmatprep.subr.mxu0 %v14555_v32  ;;  %v14356_v21 = vunpack.c.l.bf16 %v12035_v18 }
 0x33c   :  { %8880 = vmatprep.subr.mxu1 %v14555_v32  ;;  %8842 = vmatpush3.msra.mxu0 %v14349_v17  ;;  %v14358_v17 = vunpack.c.h.bf16 %v12052_v37 }
 0x33d   :  { %8881 = vmatpush3.msra.mxu1 %v14350_v12  ;;  %8843 = vmatprep.subr.mxu0 %v14555_v32  ;;  %v12061_v12 = vld [vmem:[%s14179_s2 + $0x1d8] sm:$0xff]  }
 0x33e   :  { %8882 = vmatprep.subr.mxu1 %v14555_v32  ;;  %8844 = vmatpush3.msra.mxu0 %v14352_v13  ;;  %14683 = vst [vmem:[#allocation126_spill] sm:$0xff] %v12061_v12  ;;  %v14359_v61 = vunpack.c.h.bf16 %v12061_v12  ;;  %v14361_v13 = vunpack.c.l.bf16 %v12052_v37 }
 0x33f   :  { %8883 = vmatpush3.msra.mxu1 %v14353_v24  ;;  %8845 = vmatprep.subr.mxu0 %v14555_v32  ;;  %v14362_v24 = vunpack.c.l.bf16 %v12061_v12 }
 0x340   :  { %8884 = vmatprep.subr.mxu1 %v14555_v32  ;;  %8846 = vmatpush3.msra.mxu0 %v14355_v39  ;;  %v14364_v39 = vunpack.c.h.bf16 %v12078_v9 }
 0x341   :  { %8885 = vmatpush3.msra.mxu1 %v14356_v21  ;;  %8847 = vmatprep.subr.mxu0 %v14555_v32  ;;  %v12087_v21 = vld [vmem:[%s14179_s2 + $0x1d0] sm:$0xff]  }
 0x342   :  { %8886 = vmatprep.subr.mxu1 %v14555_v32  ;;  %8848 = vmatpush3.msra.mxu0 %v14358_v17  ;;  %14685 = vst [vmem:[#allocation128_spill] sm:$0xff] %v12087_v21  ;;  %v14365_v62 = vunpack.c.h.bf16 %v12087_v21  ;;  %v14367_v17 = vunpack.c.l.bf16 %v12078_v9 }
 0x343   :  { %8887 = vmatpush3.msra.mxu1 %v14359_v61  ;;  %8849 = vmatprep.subr.mxu0 %v14555_v32  ;;  %v14368_v61 = vunpack.c.l.bf16 %v12087_v21 }
 0x344   :  { %8888 = vmatprep.subr.mxu1 %v14555_v32  ;;  %8850 = vmatpush3.msra.mxu0 %v14361_v13  ;;  %v14370_v13 = vunpack.c.h.bf16 %v12104_v10 }
 0x345   :  { %8889 = vmatpush3.msra.mxu1 %v14362_v24  ;;  %8851 = vmatprep.subr.mxu0 %v14555_v32  ;;  %v12113_v24 = vld [vmem:[%s14179_s2 + $0x1c8] sm:$0xff]  }
 0x346   :  { %8890 = vmatprep.subr.mxu1 %v14555_v32  ;;  %8852 = vmatpush3.msra.mxu0 %v14364_v39  ;;  %14687 = vst [vmem:[#allocation130_spill] sm:$0xff] %v12113_v24  ;;  %v14371_v51 = vunpack.c.h.bf16 %v12113_v24  ;;  %v14372_v39 = vunpack.c.l.bf16 %v12104_v10 }
 0x347   :  { %8891 = vmatpush3.msra.mxu1 %v14365_v62  ;;  %8853 = vmatprep.subr.mxu0 %v14555_v32  ;;  %v14373_v62 = vunpack.c.l.bf16 %v12113_v24 }
 0x348   :  { %8892 = vmatprep.subr.mxu1 %v14555_v32  ;;  %8854 = vmatpush3.msra.mxu0 %v14367_v17  ;;  %v14375_v17 = vunpack.c.h.bf16 %v12130_v53 }
 0x349   :  { %8893 = vmatpush3.msra.mxu1 %v14368_v61  ;;  %8855 = vmatprep.subr.mxu0 %v14555_v32  ;;  %v12139_v61 = vld [vmem:[%s14179_s2 + $0x1c0] sm:$0xff]  }
 0x34a   :  { %8894 = vmatprep.subr.mxu1 %v14555_v32  ;;  %8856 = vmatpush3.msra.mxu0 %v14370_v13  ;;  %14689 = vst [vmem:[#allocation132_spill] sm:$0xff] %v12139_v61  ;;  %v14374_v63 = vunpack.c.h.bf16 %v12139_v61  ;;  %v14376_v13 = vunpack.c.l.bf16 %v12130_v53 }
 0x34b   :  { %8895 = vmatpush3.msra.mxu1 %v14371_v51  ;;  %8857 = vmatprep.subr.mxu0 %v14555_v32  ;;  %v14377_v51 = vunpack.c.l.bf16 %v12139_v61  ;;  %v4110_v61 = vld [vmem:[%s14178_s1 + $0x160] sm:$0xff] }
 0x34c   :  { %8896 = vmatprep.subr.mxu1 %v14555_v32  ;;  %8858 = vmatpush3.msra.mxu0 %v14372_v39  ;;  %v12159_v39 = vld [vmem:[%s14179_s2 + $0x180] sm:$0xff]  }
 0x34d   :  { %8897 = vmatpush3.msra.mxu1 %v14373_v62  ;;  %8859 = vmatprep.subr.mxu0 %v14555_v32  ;;  %14690 = vst [vmem:[#allocation133_spill] sm:$0xff] %v12159_v39  ;;  %v14380_v62 = vunpack.c.h.bf16 %v12159_v39 }
 0x34e   :  { %8898 = vmatprep.subr.mxu1 %v14555_v32  ;;  %8860 = vmatpush3.msra.mxu0 %v14375_v17  ;;  %v12175_v17 = vld [vmem:[%s14178_s1 + $0x8] sm:$0xff] }
 0x34f   :  { %8899 = vmatpush3.msra.mxu1 %v14374_v63  ;;  %8861 = vmatprep.subr.mxu0 %v14555_v32  ;;  %v14383_v63 = vunpack.c.l.bf16 %v12159_v39  ;;  %v14728_v39 = vld [vmem:[#allocation43_spill] sm:$0xff] }
 0x350   :  { %8900 = vmatprep.subr.mxu1 %v14555_v32  ;;  %8862 = vmatpush3.msra.mxu0 %v14376_v13  ;;  %v12180_v13 = vld [vmem:[%s14178_s1 + $0x28] sm:$0xff] }
 0x351   :  { %8901 = vmatpush3.msra.mxu1 %v14377_v51  ;;  %8902 = vmatprep.mubr.msk.f32.mxu1 %vm9502_vm0, %v14555_v32  ;;  %v14691_v51 = vmov 0  }
 0x352   :  { %8863 = vmatprep.subr.mxu0 %v14555_v32  ;;  %8903 = vmatmul.mubr.f32.vlgmr.msra.gmra.mxu1 %v11713_v15  ;;  %v12193_v15 = vld [vmem:[%s14178_s1 + $0x20] sm:$0xff] }
 0x353   :  { %8864 = vmatpush3.msra.mxu0 %v14380_v62  ;;  %5891 = vmatprep.subr.bf16.mxu1 %v14691_v51  ;;  %v8055_v62 = vcombine.high %v12175_v17, %v12180_v13  ;;  %v8053_v47 = vcombine.high %v12188_v52, %v12193_v15 }
 0x354   :  { %8865 = vmatprep.subr.mxu0 %v14555_v32  ;;  %5892 = vmatpush1.bf16.msra.mxu1 %v14692_v46  ;;  %v14694_v46 = vld [vmem:[#allocation9_spill] sm:$0xff] }
 0x355   :  { %8866 = vmatpush3.msra.mxu0 %v14383_v63  ;;  %8867 = vmatprep.mubr.msk.f32.mxu0 %vm9502_vm0, %v14555_v32  ;;  %v14695_v63 = vld [vmem:[#allocation8_spill] sm:$0xff] }
 0x356   :  { %8868 = vmatmul.mubr.f32.vlgmr.msra.gmra.mxu0 %v11684_v1  ;;  %5602 = vmatprep.subr.bf16.mxu0 %v14691_v51  ;;  %v14696_v1 = vld [vmem:[#allocation11_spill] sm:$0xff] }
 0x357   :  { %5603 = vmatpush1.bf16.msra.mxu0 %v14693_v2  ;;  %5893 = vmatprep.subr.bf16.mxu1 %v14691_v51  ;;  %v14698_v2 = vld [vmem:[#allocation13_spill] sm:$0xff] }
 0x358   :  { %5894 = vmatpush1.bf16.msra.mxu1 %v14694_v46  ;;  %5604 = vmatprep.subr.bf16.mxu0 %v14691_v51  ;;  %v14699_v46 = vld [vmem:[#allocation12_spill] sm:$0xff] }
 0x359   :  { %5895 = vmatprep.subr.bf16.mxu1 %v14691_v51  ;;  %5923 = vmatprep.mubr.bf16.mxu1 %v8055_v62  ;;  %v14700_v62 = vld [vmem:[#allocation15_spill] sm:$0xff] }
 0x35a   :  { %5634 = vmatprep.mubr.bf16.mxu0 %v8053_v47  ;;  %v14701_v47 = vld [vmem:[#allocation14_spill] sm:$0xff] }
 0x35b   :  { %5605 = vmatpush1.bf16.msra.mxu0 %v14695_v63  ;;  %v14702_v63 = vld [vmem:[#allocation17_spill] sm:$0xff] }
 0x35c   :  { %5896 = vmatpush1.bf16.msra.mxu1 %v14696_v1  ;;  %5606 = vmatprep.subr.bf16.mxu0 %v14691_v51  ;;  %v14704_v1 = vld [vmem:[#allocation19_spill] sm:$0xff] }
 0x35d   :  { %5897 = vmatprep.subr.bf16.mxu1 %v14691_v51 }
 0x35f   :  { %5607 = vmatpush1.bf16.msra.mxu0 %v14697_v58  ;;  %v14703_v58 = vld [vmem:[#allocation16_spill] sm:$0xff] }
 0x360   :  { %5898 = vmatpush1.bf16.msra.mxu1 %v14698_v2  ;;  %5608 = vmatprep.subr.bf16.mxu0 %v14691_v51  ;;  %v14705_v2 = vld [vmem:[#allocation18_spill] sm:$0xff] }
 0x361   :  { %5899 = vmatprep.subr.bf16.mxu1 %v14691_v51 }
 0x363   :  { %5609 = vmatpush1.bf16.msra.mxu0 %v14699_v46  ;;  %v14706_v46 = vld [vmem:[#allocation21_spill] sm:$0xff] }
 0x364   :  { %5900 = vmatpush1.bf16.msra.mxu1 %v14700_v62  ;;  %5610 = vmatprep.subr.bf16.mxu0 %v14691_v51  ;;  %v14707_v62 = vld [vmem:[#allocation20_spill] sm:$0xff] }
 0x365   :  { %5901 = vmatprep.subr.bf16.mxu1 %v14691_v51 }
 0x367   :  { %5611 = vmatpush1.bf16.msra.mxu0 %v14701_v47  ;;  %v14708_v47 = vld [vmem:[#allocation23_spill] sm:$0xff] }
 0x368   :  { %5902 = vmatpush1.bf16.msra.mxu1 %v14702_v63  ;;  %5612 = vmatprep.subr.bf16.mxu0 %v14691_v51  ;;  %v14709_v63 = vld [vmem:[#allocation22_spill] sm:$0xff] }
 0x369   :  { %5903 = vmatprep.subr.bf16.mxu1 %v14691_v51 }
 0x36b   :  { %5613 = vmatpush1.bf16.msra.mxu0 %v14703_v58  ;;  %v14710_v58 = vld [vmem:[#allocation25_spill] sm:$0xff] }
 0x36c   :  { %5904 = vmatpush1.bf16.msra.mxu1 %v14704_v1  ;;  %5614 = vmatprep.subr.bf16.mxu0 %v14691_v51  ;;  %v14711_v1 = vld [vmem:[#allocation24_spill] sm:$0xff] }
 0x36d   :  { %5905 = vmatprep.subr.bf16.mxu1 %v14691_v51 }
 0x36f   :  { %5615 = vmatpush1.bf16.msra.mxu0 %v14705_v2  ;;  %v14712_v2 = vld [vmem:[#allocation27_spill] sm:$0xff] }
 0x370   :  { %5906 = vmatpush1.bf16.msra.mxu1 %v14706_v46  ;;  %5616 = vmatprep.subr.bf16.mxu0 %v14691_v51  ;;  %v14713_v46 = vld [vmem:[#allocation26_spill] sm:$0xff] }
 0x371   :  { %5907 = vmatprep.subr.bf16.mxu1 %v14691_v51 }
 0x373   :  { %5617 = vmatpush1.bf16.msra.mxu0 %v14707_v62  ;;  %v14714_v62 = vld [vmem:[#allocation29_spill] sm:$0xff] }
 0x374   :  { %5908 = vmatpush2.bf16.msra.mxu1 %v14708_v47  ;;  %5618 = vmatprep.subr.bf16.mxu0 %v14691_v51  ;;  %v14715_v47 = vld [vmem:[#allocation28_spill] sm:$0xff] }
 0x375   :  { %5909 = vmatprep.subr.bf16.mxu1 %v14691_v51 }
 0x377   :  { %5619 = vmatpush2.bf16.msra.mxu0 %v14709_v63  ;;  %v14716_v63 = vld [vmem:[#allocation31_spill] sm:$0xff] }
 0x378   :  { %5910 = vmatpush2.bf16.msra.mxu1 %v14710_v58  ;;  %5620 = vmatprep.subr.bf16.mxu0 %v14691_v51  ;;  %v14717_v58 = vld [vmem:[#allocation30_spill] sm:$0xff] }
 0x379   :  { %5911 = vmatprep.subr.bf16.mxu1 %v14691_v51 }
 0x37b   :  { %5621 = vmatpush2.bf16.msra.mxu0 %v14711_v1  ;;  %v14718_v1 = vld [vmem:[#allocation33_spill] sm:$0xff] }
 0x37c   :  { %5912 = vmatpush2.bf16.msra.mxu1 %v14712_v2  ;;  %5622 = vmatprep.subr.bf16.mxu0 %v14691_v51  ;;  %v14719_v2 = vld [vmem:[#allocation32_spill] sm:$0xff] }
 0x37d   :  { %5913 = vmatprep.subr.bf16.mxu1 %v14691_v51 }
 0x37f   :  { %5623 = vmatpush2.bf16.msra.mxu0 %v14713_v46  ;;  %v14720_v46 = vld [vmem:[#allocation35_spill] sm:$0xff] }
 0x380   :  { %5914 = vmatpush2.bf16.msra.mxu1 %v14714_v62  ;;  %5624 = vmatprep.subr.bf16.mxu0 %v14691_v51  ;;  %v4075_v62 = vld [vmem:[%s14178_s1 + $0x48] sm:$0xff] }
 0x381   :  { %5915 = vmatprep.subr.bf16.mxu1 %v14691_v51 }
 0x383   :  { %5625 = vmatpush2.bf16.msra.mxu0 %v14715_v47  ;;  %v4079_v47 = vld [vmem:[%s14178_s1 + $0x68] sm:$0xff] }
 0x384   :  { %5916 = vmatpush2.bf16.msra.mxu1 %v14716_v63  ;;  %5626 = vmatprep.subr.bf16.mxu0 %v14691_v51  ;;  %v14721_v63 = vld [vmem:[#allocation34_spill] sm:$0xff]  ;;  %v8063_v38 = vcombine.high %v4075_v62, %v4079_v47 }
 0x385   :  { %5917 = vmatprep.subr.bf16.mxu1 %v14691_v51 }
 0x387   :  { %5627 = vmatpush2.bf16.msra.mxu0 %v14717_v58  ;;  %v8054_v58 = vcombine.low %v12175_v17, %v12180_v13  ;;  %v14724_v13 = vld [vmem:[#allocation39_spill] sm:$0xff] }
 0x388   :  { %5918 = vmatpush2.bf16.msra.mxu1 %v14718_v1  ;;  %5628 = vmatprep.subr.bf16.mxu0 %v14691_v51  ;;  %v14722_v1 = vld [vmem:[#allocation37_spill] sm:$0xff] }
 0x389   :  { %5919 = vmatprep.subr.bf16.mxu1 %v14691_v51 }
 0x38b   :  { %5629 = vmatpush2.bf16.msra.mxu0 %v14719_v2  ;;  %v4074_v2 = vld [vmem:[%s14178_s1 + $0x40] sm:$0xff] }
 0x38c   :  { %5920 = vmatpush2.bf16.msra.mxu1 %v14720_v46  ;;  %5630 = vmatprep.subr.bf16.mxu0 %v14691_v51  ;;  %v4078_v46 = vld [vmem:[%s14178_s1 + $0x60] sm:$0xff] }
 0x38d   :  { %5921 = vmatprep.subr.bf16.mxu1 %v14691_v51  ;;  %v8061_v17 = vcombine.high %v4074_v2, %v4078_v46 }
 0x38f   :  { %5631 = vmatpush2.bf16.msra.mxu0 %v14721_v63  ;;  %v8052_v63 = vcombine.low %v12188_v52, %v12193_v15  ;;  %v14725_v52 = vld [vmem:[#allocation38_spill] sm:$0xff] }
 0x390   :  { %5922 = vmatpush2.bf16.msra.mxu1 %v14722_v1  ;;  %5632 = vmatprep.subr.bf16.mxu0 %v14691_v51  ;;  %v4083_v1 = vld [vmem:[%s14178_s1 + $0x88] sm:$0xff] }
 0x391   :  { %6469 = vmatprep.subr.bf16.mxu1 %v14691_v51  ;;  %v8071_v15 = vcombine.high %v4083_v1, %v4087_v59 }
 0x393   :  { %5633 = vmatpush2.bf16.msra.mxu0 %v14723_v56  ;;  %5924 = vmatmul.mubr.bf16.vlgmr.msra.gmra.mxu1 %v8054_v58  ;;  %v8062_v56 = vcombine.low %v4075_v62, %v4079_v47  ;;  %v4086_v58 = vld [vmem:[%s14178_s1 + $0xa0] sm:$0xff]  ;;  %v14727_v62 = vld [vmem:[#allocation40_spill] sm:$0xff]  ;;  %v4091_v47 = vld [vmem:[%s14178_s1 + $0xc8] sm:$0xff] }
 0x394   :  { %6180 = vmatprep.subr.bf16.mxu0 %v14691_v51  ;;  %6470 = vmatpush1.bf16.msra.mxu1 %v14724_v13  ;;  %v14726_v13 = vld [vmem:[#allocation41_spill] sm:$0xff] }
 0x395   :  { %5931 = vmatprep.mubr.bf16.mxu1 %v8063_v38  ;;  %6471 = vmatprep.subr.bf16.mxu1 %v14691_v51  ;;  %v4082_v38 = vld [vmem:[%s14178_s1 + $0x80] sm:$0xff] }
 0x396   :  { %5635 = vmatmul.mubr.bf16.vlgmr.msra.gmra.mxu0 %v8052_v63  ;;  %v8060_v63 = vcombine.low %v4074_v2, %v4078_v46  ;;  %v8070_v2 = vcombine.low %v4083_v1, %v4087_v59  ;;  %v14729_v46 = vld [vmem:[#allocation42_spill] sm:$0xff]  ;;  %v14731_v1 = vld [vmem:[#allocation44_spill] sm:$0xff] }
 0x397   :  { %6181 = vmatpush1.bf16.msra.mxu0 %v14725_v52  ;;  %5642 = vmatprep.mubr.bf16.mxu0 %v8061_v17  ;;  %v8069_v52 = vcombine.high %v4082_v38, %v4086_v58  ;;  %v4095_v17 = vld [vmem:[%s14178_s1 + $0xe8] sm:$0xff] }
 0x398   :  { %6182 = vmatprep.subr.bf16.mxu0 %v14691_v51  ;;  %6472 = vmatpush1.bf16.msra.mxu1 %v14726_v13  ;;  %v4094_v13 = vld [vmem:[%s14178_s1 + $0xe0] sm:$0xff] }
 0x399   :  { %6473 = vmatprep.subr.bf16.mxu1 %v14691_v51 }
 0x39b   :  { %5932 = vmatmul.mubr.bf16.gmra.mxu1 %v8062_v56  ;;  %6183 = vmatpush1.bf16.msra.mxu0 %v14727_v62  ;;  %v8079_v56 = vcombine.high %v4091_v47, %v4095_v17  ;;  %v14730_v62 = vld [vmem:[#allocation45_spill] sm:$0xff] }
 0x39c   :  { %5939 = vmatprep.mubr.bf16.mxu1 %v8071_v15  ;;  %6184 = vmatprep.subr.bf16.mxu0 %v14691_v51  ;;  %v4090_v15 = vld [vmem:[%s14178_s1 + $0xc0] sm:$0xff] }
 0x39d   :  { %6474 = vmatpush1.bf16.msra.mxu1 %v14728_v39  ;;  %v8068_v39 = vcombine.low %v4082_v38, %v4086_v58  ;;  %v8077_v59 = vcombine.high %v4090_v15, %v4094_v13  ;;  %v8078_v38 = vcombine.low %v4091_v47, %v4095_v17  ;;  %v14733_v58 = vld [vmem:[#allocation46_spill] sm:$0xff]  ;;  %v14735_v17 = vld [vmem:[#allocation48_spill] sm:$0xff] }
 0x39e   :  { %5643 = vmatmul.mubr.bf16.gmra.mxu0 %v8060_v63  ;;  %6475 = vmatprep.subr.bf16.mxu1 %v14691_v51  ;;  %v4099_v63 = vld [vmem:[%s14178_s1 + $0x108] sm:$0xff] }
 0x39f   :  { %5650 = vmatprep.mubr.bf16.mxu0 %v8069_v52  ;;  %6185 = vmatpush1.bf16.msra.mxu0 %v14729_v46  ;;  %v4103_v52 = vld [vmem:[%s14178_s1 + $0x128] sm:$0xff] }
 0x3a0   :  { %6186 = vmatprep.subr.bf16.mxu0 %v14691_v51  ;;  %v14732_v46 = vld [vmem:[#allocation47_spill] sm:$0xff] }
 0x3a1   :  { %6476 = vmatpush1.bf16.msra.mxu1 %v14730_v62  ;;  %v4102_v62 = vld [vmem:[%s14178_s1 + $0x120] sm:$0xff] }
 0x3a2   :  { %6477 = vmatprep.subr.bf16.mxu1 %v14691_v51 }
 0x3a3   :  { %5940 = vmatmul.mubr.bf16.gmra.mxu1 %v8070_v2  ;;  %6187 = vmatpush1.bf16.msra.mxu0 %v14731_v1  ;;  %v8087_v2 = vcombine.high %v4099_v63, %v4103_v52  ;;  %v14734_v1 = vld [vmem:[#allocation49_spill] sm:$0xff] }
 0x3a4   :  { %5947 = vmatprep.mubr.bf16.mxu1 %v8079_v56  ;;  %6188 = vmatprep.subr.bf16.mxu0 %v14691_v51  ;;  %v4098_v56 = vld [vmem:[%s14178_s1 + $0x100] sm:$0xff] }
 0x3a5   :  { %6478 = vmatpush1.bf16.msra.mxu1 %v14732_v46  ;;  %v8085_v47 = vcombine.high %v4098_v56, %v4102_v62  ;;  %v4111_v46 = vld [vmem:[%s14178_s1 + $0x168] sm:$0xff] }
 0x3a6   :  { %5651 = vmatmul.mubr.bf16.gmra.mxu0 %v8068_v39  ;;  %6479 = vmatprep.subr.bf16.mxu1 %v14691_v51  ;;  %v8076_v39 = vcombine.low %v4090_v15, %v4094_v13  ;;  %v8086_v13 = vcombine.low %v4099_v63, %v4103_v52 }
 0x3a7   :  { %5658 = vmatprep.mubr.bf16.mxu0 %v8077_v59  ;;  %6189 = vmatpush1.bf16.msra.mxu0 %v14733_v58  ;;  %v4107_v59 = vld [vmem:[%s14178_s1 + $0x148] sm:$0xff] }
 0x3a8   :  { %6190 = vmatprep.subr.bf16.mxu0 %v14691_v51  ;;  %v14736_v58 = vld [vmem:[#allocation51_spill] sm:$0xff] }
 0x3a9   :  { %6480 = vmatpush1.bf16.msra.mxu1 %v14734_v1  ;;  %v8095_v1 = vcombine.high %v4107_v59, %v4111_v46 }
 0x3aa   :  { %6481 = vmatprep.subr.bf16.mxu1 %v14691_v51 }
 0x3ab   :  { %5948 = vmatmul.mubr.bf16.gmra.mxu1 %v8078_v38  ;;  %6191 = vmatpush1.bf16.msra.mxu0 %v14735_v17  ;;  %v14737_v38 = vld [vmem:[#allocation50_spill] sm:$0xff] }
 0x3ac   :  { %5955 = vmatprep.mubr.bf16.mxu1 %v8087_v2  ;;  %6192 = vmatprep.subr.bf16.mxu0 %v14691_v51  ;;  %v4106_v17 = vld [vmem:[%s14178_s1 + $0x140] sm:$0xff] }
 0x3ad   :  { %6482 = vmatpush1.bf16.msra.mxu1 %v14736_v58  ;;  %v8084_v58 = vcombine.low %v4098_v56, %v4102_v62  ;;  %v8093_v52 = vcombine.high %v4106_v17, %v4110_v61  ;;  %v4119_v56 = vld [vmem:[%s14178_s1 + $0x1a8] sm:$0xff] }
 0x3ae   :  { %5659 = vmatmul.mubr.bf16.gmra.mxu0 %v8076_v39  ;;  %v3628_v15 = vpop.f32.mrf.mxu1  ;;  %6483 = vmatprep.subr.bf16.mxu1 %v14691_v51  ;;  %v14738_v39 = vld [vmem:[#allocation53_spill] sm:$0xff]  ;;  %v14740_v62 = vld [vmem:[#allocation55_spill] sm:$0xff] }
 0x3af   :  { %5666 = vmatprep.mubr.bf16.mxu0 %v8085_v47  ;;  %6193 = vmatpush1.bf16.msra.mxu0 %v14737_v38  ;;  %v14739_v47 = vld [vmem:[#allocation52_spill] sm:$0xff] }
 0x3b0   :  { %v8694_v2 = vpop.f32.mrf.mxu1  ;;  %6194 = vmatprep.subr.bf16.mxu0 %v14691_v51 }
 0x3b1   :  { %6484 = vmatpush1.bf16.msra.mxu1 %v14738_v39  ;;  %v4115_v2 = vld [vmem:[%s14178_s1 + $0x188] sm:$0xff]  ;;  %v4118_v39 = vld [vmem:[%s14178_s1 + $0x1a0] sm:$0xff] }
 0x3b2   :  { %v3558_v53 = vpop.f32.mrf.mxu0  ;;  %6485 = vmatprep.subr.bf16.mxu1 %v14691_v51 }
 0x3b3   :  { %5956 = vmatmul.mubr.bf16.gmra.mxu1 %v8086_v13  ;;  %v12364_v63 = vadd.f32 %v3628_v15, %v3558_v53  ;;  %6195 = vmatpush1.bf16.msra.mxu0 %v14739_v47  ;;  %v8094_v53 = vcombine.low %v4107_v59, %v4111_v46  ;;  %v14741_v15 = vld [vmem:[#allocation54_spill] sm:$0xff]  ;;  %v8103_v13 = vcombine.high %v4115_v2, %v4119_v56  ;;  %v14742_v47 = vld [vmem:[#allocation57_spill] sm:$0xff]  ;;  %v14743_v46 = vld [vmem:[#allocation56_spill] sm:$0xff] }
 0x3b4   :  { %v8659_v38 = vpop.f32.mrf.mxu0  ;;  %5963 = vmatprep.mubr.bf16.mxu1 %v8095_v1  ;;  %6196 = vmatprep.subr.bf16.mxu0 %v14691_v51  ;;  %v4114_v1 = vld [vmem:[%s14178_s1 + $0x180] sm:$0xff] }
 0x3b5   :  { %6486 = vmatpush2.bf16.msra.mxu1 %v14740_v62  ;;  %v8101_v59 = vcombine.high %v4114_v1, %v4118_v39  ;;  %v4127_v38 = vld [vmem:[%s14178_s1 + $0x1e8] sm:$0xff] }
 0x3b6   :  { %5667 = vmatmul.mubr.bf16.gmra.mxu0 %v8084_v58  ;;  %6487 = vmatprep.subr.bf16.mxu1 %v14691_v51  ;;  %v8092_v58 = vcombine.low %v4106_v17, %v4110_v61  ;;  %v14744_v62 = vld [vmem:[#allocation59_spill] sm:$0xff]  ;;  %v8102_v61 = vcombine.low %v4115_v2, %v4119_v56  ;;  %v14745_v17 = vld [vmem:[#allocation58_spill] sm:$0xff]  ;;  %v14747_v56 = vld [vmem:[#allocation60_spill] sm:$0xff] }
 0x3b7   :  { %5674 = vmatprep.mubr.bf16.mxu0 %v8093_v52  ;;  %6197 = vmatpush2.bf16.msra.mxu0 %v14741_v15  ;;  %v4123_v52 = vld [vmem:[%s14178_s1 + $0x1c8] sm:$0xff]  ;;  %v4122_v15 = vld [vmem:[%s14178_s1 + $0x1c0] sm:$0xff] }
 0x3b8   :  { %6198 = vmatprep.subr.bf16.mxu0 %v14691_v51 }
 0x3b9   :  { %6488 = vmatpush2.bf16.msra.mxu1 %v14742_v47  ;;  %v14746_v47 = vld [vmem:[#allocation61_spill] sm:$0xff] }
 0x3ba   :  { %6489 = vmatprep.subr.bf16.mxu1 %v14691_v51 }
 0x3bb   :  { %5964 = vmatmul.mubr.bf16.gmra.mxu1 %v8094_v53  ;;  %6199 = vmatpush2.bf16.msra.mxu0 %v14743_v46  ;;  %v8111_v53 = vcombine.high %v4123_v52, %v4127_v38  ;;  %v4135_v46 = vld [vmem:[%s14178_s1 + $0x228] sm:$0xff] }
 0x3bc   :  { %5971 = vmatprep.mubr.bf16.mxu1 %v8103_v13  ;;  %6200 = vmatprep.subr.bf16.mxu0 %v14691_v51  ;;  %v4126_v13 = vld [vmem:[%s14178_s1 + $0x1e0] sm:$0xff] }
 0x3bd   :  { %6490 = vmatpush2.bf16.msra.mxu1 %v14744_v62  ;;  %v8109_v2 = vcombine.high %v4122_v15, %v4126_v13  ;;  %v14748_v62 = vld [vmem:[#allocation63_spill] sm:$0xff] }
 0x3be   :  { %5675 = vmatmul.mubr.bf16.gmra.mxu0 %v8092_v58  ;;  %6491 = vmatprep.subr.bf16.mxu1 %v14691_v51  ;;  %v8100_v58 = vcombine.low %v4114_v1, %v4118_v39  ;;  %v8110_v1 = vcombine.low %v4123_v52, %v4127_v38  ;;  %v14749_v39 = vld [vmem:[#allocation62_spill] sm:$0xff]  ;;  %v14751_v38 = vld [vmem:[#allocation64_spill] sm:$0xff] }
 0x3bf   :  { %5682 = vmatprep.mubr.bf16.mxu0 %v8101_v59  ;;  %6201 = vmatpush2.bf16.msra.mxu0 %v14745_v17  ;;  %v4131_v59 = vld [vmem:[%s14178_s1 + $0x208] sm:$0xff]  ;;  %v4130_v17 = vld [vmem:[%s14178_s1 + $0x200] sm:$0xff] }
 0x3c0   :  { %6202 = vmatprep.subr.bf16.mxu0 %v14691_v51 }
 0x3c1   :  { %6492 = vmatpush2.bf16.msra.mxu1 %v14746_v47  ;;  %v14750_v47 = vld [vmem:[#allocation65_spill] sm:$0xff] }
 0x3c2   :  { %6493 = vmatprep.subr.bf16.mxu1 %v14691_v51 }
 0x3c3   :  { %5972 = vmatmul.mubr.bf16.gmra.mxu1 %v8102_v61  ;;  %6203 = vmatpush2.bf16.msra.mxu0 %v14747_v56  ;;  %v8119_v61 = vcombine.high %v4131_v59, %v4135_v46  ;;  %v4143_v56 = vld [vmem:[%s14178_s1 + $0x268] sm:$0xff] }
 0x3c4   :  { %5979 = vmatprep.mubr.bf16.mxu1 %v8111_v53  ;;  %6204 = vmatprep.subr.bf16.mxu0 %v14691_v51  ;;  %v4134_v53 = vld [vmem:[%s14178_s1 + $0x220] sm:$0xff] }
 0x3c5   :  { %6494 = vmatpush2.bf16.msra.mxu1 %v14748_v62  ;;  %v8117_v52 = vcombine.high %v4130_v17, %v4134_v53  ;;  %v14752_v62 = vld [vmem:[#allocation67_spill] sm:$0xff] }
 0x3c6   :  { %5683 = vmatmul.mubr.bf16.gmra.mxu0 %v8100_v58  ;;  %6495 = vmatprep.subr.bf16.mxu1 %v14691_v51  ;;  %v8108_v58 = vcombine.low %v4122_v15, %v4126_v13  ;;  %v8118_v13 = vcombine.low %v4131_v59, %v4135_v46 }
 0x3c7   :  { %5690 = vmatprep.mubr.bf16.mxu0 %v8109_v2  ;;  %6205 = vmatpush2.bf16.msra.mxu0 %v14749_v39  ;;  %v4139_v2 = vld [vmem:[%s14178_s1 + $0x248] sm:$0xff] }
 0x3c8   :  { %6206 = vmatprep.subr.bf16.mxu0 %v14691_v51 }
 0x3c9   :  { %6496 = vmatpush2.bf16.msra.mxu1 %v14750_v47  ;;  %v4138_v47 = vld [vmem:[%s14178_s1 + $0x240] sm:$0xff] }
 0x3ca   :  { %6497 = vmatprep.subr.bf16.mxu1 %v14691_v51 }
 0x3cb   :  { %5980 = vmatmul.mubr.bf16.gmra.mxu1 %v8110_v1  ;;  %6207 = vmatpush2.bf16.msra.mxu0 %v14751_v38  ;;  %v14753_v1 = vld [vmem:[#allocation66_spill] sm:$0xff] }
 0x3cc   :  { %5987 = vmatprep.mubr.bf16.mxu1 %v8119_v61  ;;  %6208 = vmatprep.subr.bf16.mxu0 %v14691_v51  ;;  %v8127_v61 = vcombine.high %v4139_v2, %v4143_v56  ;;  %v4142_v38 = vld [vmem:[%s14178_s1 + $0x260] sm:$0xff] }
 0x3cd   :  { %6498 = vmatpush2.bf16.msra.mxu1 %v14752_v62  ;;  %v8116_v62 = vcombine.low %v4130_v17, %v4134_v53  ;;  %v8125_v46 = vcombine.high %v4138_v47, %v4142_v38  ;;  %v4151_v17 = vld [vmem:[%s14178_s1 + $0x2a8] sm:$0xff] }
 0x3ce   :  { %5691 = vmatmul.mubr.bf16.gmra.mxu0 %v8108_v58  ;;  %v3769_v15 = vpop.f32.mrf.mxu1  ;;  %6499 = vmatprep.subr.bf16.mxu1 %v14691_v51  ;;  %v14754_v58 = vld [vmem:[#allocation69_spill] sm:$0xff] }
 0x3cf   :  { %5698 = vmatprep.mubr.bf16.mxu0 %v8117_v52  ;;  %6209 = vmatpush2.bf16.msra.mxu0 %v14753_v1  ;;  %v14755_v52 = vld [vmem:[#allocation68_spill] sm:$0xff] }
 0x3d0   :  { %v8764_v39 = vpop.f32.mrf.mxu1  ;;  %6210 = vmatprep.subr.bf16.mxu0 %v14691_v51  ;;  %v4147_v51 = vld [vmem:[%s14178_s1 + $0x288] sm:$0xff] }
 0x3d1   :  { %6500 = vmatpush2.bf16.msra.mxu1 %v14754_v58  ;;  %v8135_v58 = vcombine.high %v4147_v51, %v4151_v17 }
 0x3d2   :  { %8940 = vmatprep.subr.mxu1 %v14555_v32 }
 0x3d3   :  { %5988 = vmatmul.mubr.bf16.gmra.mxu1 %v8118_v13  ;;  %v3698_v59 = vpop.f32.mrf.mxu0  ;;  %6211 = vmatpush2.bf16.msra.mxu0 %v14755_v52  ;;  %v8126_v13 = vcombine.low %v4139_v2, %v4143_v56  ;;  %v4159_v2 = vld [vmem:[%s14178_s1 + $0x2e8] sm:$0xff]  ;;  %v8134_v56 = vcombine.low %v4147_v51, %v4151_v17 }
 0x3d4   :  { %v3702_v1 = vadd.f32 %v3698_v59, %v12364_v63  ;;  %5995 = vmatprep.mubr.bf16.mxu1 %v8127_v61  ;;  %8905 = vmatprep.subr.mxu0 %v14555_v32  ;;  %v4146_v63 = vld [vmem:[%s14178_s1 + $0x280] sm:$0xff]  ;;  %v8124_v59 = vcombine.low %v4138_v47, %v4142_v38  ;;  %v4167_v51 = vld [vmem:[%s14178_s1 + $0x328] sm:$0xff] }
 0x3d5   :  { %v8729_v39 = vpop.f32.mrf.mxu0  ;;  %v4150_v61 = vld [vmem:[%s14178_s1 + $0x2a0] sm:$0xff] }
 0x3d6   :  { %5699 = vmatmul.mubr.bf16.gmra.mxu0 %v8116_v62  ;;  %v3773_v53 = vadd.f32 %v3769_v15, %v3702_v1  ;;  %v8133_v52 = vcombine.high %v4146_v63, %v4150_v61  ;;  %v4155_v62 = vld [vmem:[%s14178_s1 + $0x2c8] sm:$0xff]  ;;  %v4158_v47 = vld [vmem:[%s14178_s1 + $0x2e0] sm:$0xff]  ;;  %v8132_v38 = vcombine.low %v4146_v63, %v4150_v61 }
 0x3d7   :  { %5706 = vmatprep.mubr.bf16.mxu0 %v8125_v46  ;;  %v8143_v15 = vcombine.high %v4155_v62, %v4159_v2  ;;  %v4154_v46 = vld [vmem:[%s14178_s1 + $0x2c0] sm:$0xff]  ;;  %v4163_v39 = vld [vmem:[%s14178_s1 + $0x308] sm:$0xff]  ;;  %v8142_v17 = vcombine.low %v4155_v62, %v4159_v2 }
 0x3d8   :  { %v8141_v1 = vcombine.high %v4154_v46, %v4158_v47  ;;  %v4166_v63 = vld [vmem:[%s14178_s1 + $0x320] sm:$0xff]  ;;  %v8140_v61 = vcombine.low %v4154_v46, %v4158_v47  ;;  %v4175_v62 = vld [vmem:[%s14178_s1 + $0x368] sm:$0xff]  ;;  %v8150_v2 = vcombine.low %v4163_v39, %v4167_v51 }
 0x3d9   :  { %v4170_v46 = vld [vmem:[%s14178_s1 + $0x340] sm:$0xff] }
 0x3da   :  { %v4174_v47 = vld [vmem:[%s14178_s1 + $0x360] sm:$0xff] }
 0x3db   :  { %5996 = vmatmul.mubr.bf16.gmra.mxu1 %v8126_v13  ;;  %v8151_v13 = vcombine.high %v4163_v39, %v4167_v51  ;;  %v4179_v39 = vld [vmem:[%s14178_s1 + $0x388] sm:$0xff] }
 0x3dc   :  { %6003 = vmatprep.mubr.bf16.mxu1 %v8135_v58  ;;  %v4162_v58 = vld [vmem:[%s14178_s1 + $0x300] sm:$0xff]  ;;  %v4183_v51 = vld [vmem:[%s14178_s1 + $0x3a8] sm:$0xff] }
 0x3dd   :  { %v8167_v10 = vcombine.high %v4179_v39, %v4183_v51 }
 0x3de   :  { %5707 = vmatmul.mubr.bf16.gmra.mxu0 %v8124_v59  ;;  %v8149_v59 = vcombine.high %v4162_v58, %v4166_v63 }
 0x3df   :  { %5714 = vmatprep.mubr.bf16.mxu0 %v8133_v52  ;;  %v4171_v52 = vld [vmem:[%s14178_s1 + $0x348] sm:$0xff] }
 0x3e0   :  { %v8158_v24 = vcombine.low %v4171_v52, %v4175_v62 }
 0x3e3   :  { %6004 = vmatmul.mubr.bf16.gmra.mxu1 %v8134_v56 }
 0x3e4   :  { %6011 = vmatprep.mubr.bf16.mxu1 %v8143_v15  ;;  %v8159_v15 = vcombine.high %v4171_v52, %v4175_v62  ;;  %v4191_v52 = vld [vmem:[%s14178_s1 + $0x3e8] sm:$0xff]  ;;  %v8166_v62 = vcombine.low %v4179_v39, %v4183_v51  ;;  %v4194_v51 = vld [vmem:[%s14178_s1 + $0x400] sm:$0xff] }
 0x3e6   :  { %5715 = vmatmul.mubr.bf16.gmra.mxu0 %v8132_v38 }
 0x3e7   :  { %5722 = vmatprep.mubr.bf16.mxu0 %v8141_v1  ;;  %v8148_v1 = vcombine.low %v4162_v58, %v4166_v63  ;;  %v4178_v58 = vld [vmem:[%s14178_s1 + $0x380] sm:$0xff] }
 0x3e8   :  { %v4182_v63 = vld [vmem:[%s14178_s1 + $0x3a0] sm:$0xff] }
 0x3eb   :  { %6012 = vmatmul.mubr.bf16.gmra.mxu1 %v8142_v17  ;;  %v8157_v17 = vcombine.high %v4170_v46, %v4174_v47 }
 0x3ec   :  { %6019 = vmatprep.mubr.bf16.mxu1 %v8151_v13 }
 0x3ee   :  { %5723 = vmatmul.mubr.bf16.gmra.mxu0 %v8140_v61 }
 0x3ef   :  { %5730 = vmatprep.mubr.bf16.mxu0 %v8149_v59 }
 0x3f0   :  { %v3911_v56 = vpop.f32.mrf.mxu1 }
 0x3f2   :  { %v8834_v38 = vpop.f32.mrf.mxu1 }
 0x3f3   :  { %6020 = vmatmul.mubr.bf16.gmra.mxu1 %v8150_v2  ;;  %v8165_v38 = vcombine.high %v4178_v58, %v4182_v63 }
 0x3f4   :  { %6027 = vmatprep.mubr.bf16.mxu1 %v8159_v15  ;;  %v8156_v15 = vcombine.low %v4170_v46, %v4174_v47  ;;  %v4195_v47 = vld [vmem:[%s14178_s1 + $0x408] sm:$0xff] }
 0x3f5   :  { %v3840_v13 = vpop.f32.mrf.mxu0 }
 0x3f6   :  { %v3844_v61 = vadd.f32 %v3840_v13, %v3773_v53  ;;  %5731 = vmatmul.mubr.bf16.gmra.mxu0 %v8148_v1  ;;  %v4187_v53 = vld [vmem:[%s14178_s1 + $0x3c8] sm:$0xff] }
 0x3f7   :  { %v8799_v59 = vpop.f32.mrf.mxu0  ;;  %5738 = vmatprep.mubr.bf16.mxu0 %v8157_v17  ;;  %v8175_v1 = vcombine.high %v4187_v53, %v4191_v52  ;;  %v4199_v17 = vld [vmem:[%s14178_s1 + $0x428] sm:$0xff]  ;;  %v8174_v13 = vcombine.low %v4187_v53, %v4191_v52  ;;  %v4202_v52 = vld [vmem:[%s14178_s1 + $0x440] sm:$0xff] }
 0x3f8   :  { %v3915_v2 = vadd.f32 %v3911_v56, %v3844_v61  ;;  %v4186_v56 = vld [vmem:[%s14178_s1 + $0x3c0] sm:$0xff]  ;;  %v8183_v39 = vcombine.high %v4195_v47, %v4199_v17 }
 0x3f9   :  { %v4198_v61 = vld [vmem:[%s14178_s1 + $0x420] sm:$0xff] }
 0x3fb   :  { %6028 = vmatmul.mubr.bf16.gmra.mxu1 %v8158_v24  ;;  %v8164_v24 = vcombine.low %v4178_v58, %v4182_v63  ;;  %v8181_v58 = vcombine.high %v4194_v51, %v4198_v61  ;;  %v4203_v63 = vld [vmem:[%s14178_s1 + $0x448] sm:$0xff] }
 0x3fc   :  { %6035 = vmatprep.mubr.bf16.mxu1 %v8167_v10  ;;  %v4190_v10 = vld [vmem:[%s14178_s1 + $0x3e0] sm:$0xff] }
 0x3fd   :  { %v8173_v46 = vcombine.high %v4186_v56, %v4190_v10  ;;  %v8172_v59 = vcombine.low %v4186_v56, %v4190_v10  ;;  %v8180_v56 = vcombine.low %v4194_v51, %v4198_v61  ;;  %v4210_v51 = vld [vmem:[%s14178_s1 + $0x480] sm:$0xff] }
 0x3fe   :  { %5739 = vmatmul.mubr.bf16.gmra.mxu0 %v8156_v15  ;;  %v4207_v15 = vld [vmem:[%s14178_s1 + $0x468] sm:$0xff]  ;;  %v4214_v61 = vld [vmem:[%s14178_s1 + $0x4a0] sm:$0xff] }
 0x3ff   :  { %5746 = vmatprep.mubr.bf16.mxu0 %v8165_v38  ;;  %v8182_v38 = vcombine.low %v4195_v47, %v4199_v17  ;;  %v8191_v53 = vcombine.high %v4203_v63, %v4207_v15  ;;  %v4215_v47 = vld [vmem:[%s14178_s1 + $0x4a8] sm:$0xff] }
 0x403   :  { %6036 = vmatmul.mubr.bf16.gmra.mxu1 %v8166_v62  ;;  %v4206_v62 = vld [vmem:[%s14178_s1 + $0x460] sm:$0xff] }
 0x404   :  { %6043 = vmatprep.mubr.bf16.mxu1 %v8175_v1  ;;  %v8189_v10 = vcombine.high %v4202_v52, %v4206_v62 }
 0x406   :  { %5747 = vmatmul.mubr.bf16.gmra.mxu0 %v8164_v24 }
 0x407   :  { %5754 = vmatprep.mubr.bf16.mxu0 %v8173_v46  ;;  %v4211_v46 = vld [vmem:[%s14178_s1 + $0x488] sm:$0xff] }
 0x40b   :  { %6044 = vmatmul.mubr.bf16.gmra.mxu1 %v8174_v13 }
 0x40c   :  { %6051 = vmatprep.mubr.bf16.mxu1 %v8183_v39  ;;  %v8190_v39 = vcombine.low %v4203_v63, %v4207_v15  ;;  %v4223_v63 = vld [vmem:[%s14178_s1 + $0x4e8] sm:$0xff]  ;;  %v8198_v15 = vcombine.low %v4211_v46, %v4215_v47 }
 0x40e   :  { %5755 = vmatmul.mubr.bf16.gmra.mxu0 %v8172_v59 }
 0x40f   :  { %5762 = vmatprep.mubr.bf16.mxu0 %v8181_v58  ;;  %v8199_v58 = vcombine.high %v4211_v46, %v4215_v47  ;;  %v4231_v46 = vld [vmem:[%s14178_s1 + $0x528] sm:$0xff] }
 0x412   :  { %v4053_v1 = vpop.f32.mrf.mxu1 }
 0x413   :  { %6052 = vmatmul.mubr.bf16.gmra.mxu1 %v8182_v38 }
 0x414   :  { %v8904_v24 = vpop.f32.mrf.mxu1  ;;  %6059 = vmatprep.mubr.bf16.mxu1 %v8191_v53  ;;  %v8188_v53 = vcombine.low %v4202_v52, %v4206_v62  ;;  %v4222_v52 = vld [vmem:[%s14178_s1 + $0x4e0] sm:$0xff]  ;;  %v8196_v62 = vcombine.low %v4210_v51, %v4214_v61 }
 0x415   :  { %v8197_v24 = vcombine.high %v4210_v51, %v4214_v61  ;;  %v4235_v61 = vld [vmem:[%s14178_s1 + $0x548] sm:$0xff] }
 0x416   :  { %v3982_v17 = vpop.f32.mrf.mxu0  ;;  %5763 = vmatmul.mubr.bf16.gmra.mxu0 %v8180_v56 }
 0x417   :  { %v3986_v13 = vadd.f32 %v3982_v17, %v3915_v2  ;;  %5770 = vmatprep.mubr.bf16.mxu0 %v8189_v10  ;;  %v4219_v2 = vld [vmem:[%s14178_s1 + $0x4c8] sm:$0xff] }
 0x418   :  { %v8869_v59 = vpop.f32.mrf.mxu0  ;;  %v8207_v56 = vcombine.high %v4219_v2, %v4223_v63  ;;  %v4227_v17 = vld [vmem:[%s14178_s1 + $0x508] sm:$0xff]  ;;  %v8206_v47 = vcombine.low %v4219_v2, %v4223_v63  ;;  %v4234_v63 = vld [vmem:[%s14178_s1 + $0x540] sm:$0xff] }
 0x419   :  { %v12557_v38 = vadd.f32 %v4053_v1, %v3986_v13  ;;  %v4218_v1 = vld [vmem:[%s14178_s1 + $0x4c0] sm:$0xff]  ;;  %v8215_v13 = vcombine.high %v4227_v17, %v4231_v46 }
 0x41a   :  { %v8205_v10 = vcombine.high %v4218_v1, %v4222_v52  ;;  %v4230_v59 = vld [vmem:[%s14178_s1 + $0x520] sm:$0xff] }
 0x41b   :  { %14756 = vst [vmem:[#allocation7_spill] sm:$0xff] %v12557_v38  ;;  %6060 = vmatmul.mubr.bf16.gmra.mxu1 %v8190_v39  ;;  %v4226_v39 = vld [vmem:[%s14178_s1 + $0x500] sm:$0xff] }
 0x41c   :  { %6067 = vmatprep.mubr.bf16.mxu1 %v8199_v58  ;;  %v8204_v58 = vcombine.low %v4218_v1, %v4222_v52  ;;  %v8213_v51 = vcombine.high %v4226_v39, %v4230_v59  ;;  %v4243_v52 = vld [vmem:[%s14178_s1 + $0x588] sm:$0xff] }
 0x41e   :  { %5771 = vmatmul.mubr.bf16.gmra.mxu0 %v8188_v53  ;;  %v4239_v53 = vld [vmem:[%s14178_s1 + $0x568] sm:$0xff] }
 0x41f   :  { %5778 = vmatprep.mubr.bf16.mxu0 %v8197_v24  ;;  %v8214_v24 = vcombine.low %v4227_v17, %v4231_v46  ;;  %v8223_v2 = vcombine.high %v4235_v61, %v4239_v53  ;;  %v4242_v46 = vld [vmem:[%s14178_s1 + $0x580] sm:$0xff] }
 0x423   :  { %6068 = vmatmul.mubr.bf16.gmra.mxu1 %v8198_v15  ;;  %v4238_v15 = vld [vmem:[%s14178_s1 + $0x560] sm:$0xff] }
 0x424   :  { %6075 = vmatprep.mubr.bf16.mxu1 %v8207_v56  ;;  %v8212_v56 = vcombine.low %v4226_v39, %v4230_v59  ;;  %v8221_v1 = vcombine.high %v4234_v63, %v4238_v15  ;;  %v4251_v59 = vld [vmem:[%s14178_s1 + $0x5c8] sm:$0xff] }
 0x426   :  { %5779 = vmatmul.mubr.bf16.gmra.mxu0 %v8196_v62  ;;  %v4247_v62 = vld [vmem:[%s14178_s1 + $0x5a8] sm:$0xff] }
 0x427   :  { %5786 = vmatprep.mubr.bf16.mxu0 %v8205_v10  ;;  %v8222_v10 = vcombine.low %v4235_v61, %v4239_v53  ;;  %v8231_v17 = vcombine.high %v4243_v52, %v4247_v62  ;;  %v4250_v53 = vld [vmem:[%s14178_s1 + $0x5c0] sm:$0xff] }
 0x42b   :  { %6076 = vmatmul.mubr.bf16.gmra.mxu1 %v8206_v47  ;;  %v4246_v47 = vld [vmem:[%s14178_s1 + $0x5a0] sm:$0xff] }
 0x42c   :  { %6083 = vmatprep.mubr.bf16.mxu1 %v8215_v13  ;;  %v8220_v13 = vcombine.low %v4234_v63, %v4238_v15  ;;  %v8229_v39 = vcombine.high %v4242_v46, %v4246_v47  ;;  %v4259_v15 = vld [vmem:[%s14178_s1 + $0x608] sm:$0xff] }
 0x42e   :  { %5787 = vmatmul.mubr.bf16.gmra.mxu0 %v8204_v58  ;;  %v4255_v58 = vld [vmem:[%s14178_s1 + $0x5e8] sm:$0xff] }
 0x42f   :  { %5794 = vmatprep.mubr.bf16.mxu0 %v8213_v51  ;;  %v8230_v51 = vcombine.low %v4243_v52, %v4247_v62  ;;  %v8239_v61 = vcombine.high %v4251_v59, %v4255_v58  ;;  %v4258_v62 = vld [vmem:[%s14178_s1 + $0x600] sm:$0xff] }
 0x433   :  { %6084 = vmatmul.mubr.bf16.gmra.mxu1 %v8214_v24  ;;  %v4254_v24 = vld [vmem:[%s14178_s1 + $0x5e0] sm:$0xff] }
 0x434   :  { %6091 = vmatprep.mubr.bf16.mxu1 %v8223_v2  ;;  %v8228_v2 = vcombine.low %v4242_v46, %v4246_v47  ;;  %v8237_v63 = vcombine.high %v4250_v53, %v4254_v24  ;;  %v4267_v47 = vld [vmem:[%s14178_s1 + $0x648] sm:$0xff] }
 0x436   :  { %5795 = vmatmul.mubr.bf16.gmra.mxu0 %v8212_v56  ;;  %v4263_v56 = vld [vmem:[%s14178_s1 + $0x628] sm:$0xff] }
 0x437   :  { %5802 = vmatprep.mubr.bf16.mxu0 %v8221_v1  ;;  %v8238_v1 = vcombine.low %v4251_v59, %v4255_v58  ;;  %v8247_v52 = vcombine.high %v4259_v15, %v4263_v56  ;;  %v4266_v58 = vld [vmem:[%s14178_s1 + $0x640] sm:$0xff] }
 0x43b   :  { %6092 = vmatmul.mubr.bf16.gmra.mxu1 %v8222_v10  ;;  %v4262_v10 = vld [vmem:[%s14178_s1 + $0x620] sm:$0xff] }
 0x43c   :  { %6099 = vmatprep.mubr.bf16.mxu1 %v8231_v17  ;;  %v8236_v17 = vcombine.low %v4250_v53, %v4254_v24  ;;  %v8245_v46 = vcombine.high %v4258_v62, %v4262_v10 }
 0x43e   :  { %5803 = vmatmul.mubr.bf16.gmra.mxu0 %v8220_v13  ;;  %v4271_v13 = vld [vmem:[%s14178_s1 + $0x668] sm:$0xff] }
 0x43f   :  { %5810 = vmatprep.mubr.bf16.mxu0 %v8229_v39  ;;  %v8246_v39 = vcombine.low %v4259_v15, %v4263_v56  ;;  %v8255_v59 = vcombine.high %v4267_v47, %v4271_v13  ;;  %v4279_v15 = vld [vmem:[%s14178_s1 + $0x6a8] sm:$0xff] }
 0x443   :  { %6100 = vmatmul.mubr.bf16.gmra.mxu1 %v8230_v51  ;;  %v4270_v51 = vld [vmem:[%s14178_s1 + $0x660] sm:$0xff] }
 0x444   :  { %6107 = vmatprep.mubr.bf16.mxu1 %v8239_v61  ;;  %v8244_v61 = vcombine.low %v4258_v62, %v4262_v10  ;;  %v8253_v24 = vcombine.high %v4266_v58, %v4270_v51  ;;  %v8254_v10 = vcombine.low %v4267_v47, %v4271_v13  ;;  %v8252_v21 = vcombine.low %v4266_v58, %v4270_v51 }
 0x446   :  { %5811 = vmatmul.mubr.bf16.gmra.mxu0 %v8228_v2 }
 0x447   :  { %5818 = vmatprep.mubr.bf16.mxu0 %v8237_v63  ;;  %v4275_v63 = vld [vmem:[%s14178_s1 + $0x688] sm:$0xff] }
 0x448   :  { %v8262_v51 = vcombine.low %v4275_v63, %v4279_v15 }
 0x44b   :  { %6108 = vmatmul.mubr.bf16.gmra.mxu1 %v8238_v1  ;;  %v12652_v1 = vld [vmem:[%s14180_s3] ss:$0 sm:$0xff] }
 0x44c   :  { %6115 = vmatprep.mubr.bf16.mxu1 %v8247_v52 }
 0x44e   :  { %5819 = vmatmul.mubr.bf16.gmra.mxu0 %v8236_v17 }
 0x44f   :  { %5826 = vmatprep.mubr.bf16.mxu0 %v8245_v46  ;;  %v8263_v46 = vcombine.high %v4275_v63, %v4279_v15 }
 0x453   :  { %v5925_v53 = vpop.f32.mrf.mxu1  ;;  %6116 = vmatmul.mubr.bf16.gmra.mxu1 %v8246_v39  ;;  %v4274_v39 = vld [vmem:[%s14178_s1 + $0x680] sm:$0xff] }
 0x454   :  { %6123 = vmatprep.mubr.bf16.mxu1 %v8255_v59  ;;  %v4278_v59 = vld [vmem:[%s14178_s1 + $0x6a0] sm:$0xff] }
 0x455   :  { %v5927_v2 = vpop.f32.mrf.mxu1  ;;  %v8261_v47 = vcombine.high %v4274_v39, %v4278_v59 }
 0x456   :  { %v5636_v56 = vpop.f32.mrf.mxu0  ;;  %5827 = vmatmul.mubr.bf16.gmra.mxu0 %v8244_v61 }
 0x457   :  { %v5637_v52 = vadd.f32 %v12652_v1, %v5636_v56  ;;  %v5928_v62 = vpop.f32.mrf.mxu1  ;;  %5834 = vmatprep.mubr.bf16.mxu0 %v8253_v24 }
 0x458   :  { %v5638_v17 = vpop.f32.mrf.mxu0 }
 0x459   :  { %v5930_v61 = vpop.f32.mrf.mxu1  ;;  %v12661_v2 = vadd.f32 %v5925_v53, %v5637_v52  ;;  %v4283_v17 = vld [vmem:[%s14178_s1 + $0x6c8] sm:$0xff] }
 0x45a   :  { %v5639_v38 = vpop.f32.mrf.mxu0  ;;  %v4287_v61 = vld [vmem:[%s14178_s1 + $0x6e8] sm:$0xff] }
 0x45b   :  { %v5640_v56 = vadd.f32 %v12652_v1, %v5639_v38  ;;  %v5933_v9 = vpop.f32.mrf.mxu1  ;;  %6124 = vmatmul.mubr.bf16.gmra.mxu1 %v8254_v10 }
 0x45c   :  { %v5641_v13 = vpop.f32.mrf.mxu0  ;;  %6131 = vmatprep.mubr.bf16.mxu1 %v8263_v46  ;;  %v8271_v46 = vcombine.high %v4283_v17, %v4287_v61 }
 0x45d   :  { %v5935_v24 = vpop.f32.mrf.mxu1  ;;  %v12670_v53 = vadd.f32 %v5928_v62, %v5640_v56  ;;  %v4282_v13 = vld [vmem:[%s14178_s1 + $0x6c0] sm:$0xff] }
 0x45e   :  { %v5644_v52 = vpop.f32.mrf.mxu0  ;;  %5835 = vmatmul.mubr.bf16.gmra.mxu0 %v8252_v21  ;;  %v4286_v24 = vld [vmem:[%s14178_s1 + $0x6e0] sm:$0xff]  ;;  %v8260_v21 = vcombine.low %v4274_v39, %v4278_v59 }
 0x45f   :  { %v5645_v38 = vadd.f32 %v12652_v1, %v5644_v52  ;;  %v5936_v58 = vpop.f32.mrf.mxu1  ;;  %5842 = vmatprep.mubr.bf16.mxu0 %v8261_v47  ;;  %v8269_v63 = vcombine.high %v4282_v13, %v4286_v24 }
 0x460   :  { %v5646_v10 = vpop.f32.mrf.mxu0 }
 0x461   :  { %v5938_v12 = vpop.f32.mrf.mxu1  ;;  %v12679_v62 = vadd.f32 %v5933_v9, %v5645_v38  ;;  %v4291_v10 = vld [vmem:[%s14178_s1 + $0x708] sm:$0xff] }
 0x462   :  { %v5647_v56 = vpop.f32.mrf.mxu0  ;;  %v4295_v12 = vld [vmem:[%s14178_s1 + $0x728] sm:$0xff] }
 0x463   :  { %v5648_v52 = vadd.f32 %v12652_v1, %v5647_v56  ;;  %v5941_v37 = vpop.f32.mrf.mxu1  ;;  %6132 = vmatmul.mubr.bf16.gmra.mxu1 %v8262_v51  ;;  %v8270_v51 = vcombine.low %v4283_v17, %v4287_v61 }
 0x464   :  { %v5649_v15 = vpop.f32.mrf.mxu0  ;;  %6139 = vmatprep.mubr.bf16.mxu1 %v8271_v46  ;;  %v8279_v46 = vcombine.high %v4291_v10, %v4295_v12 }
 0x465   :  { %v5943_v47 = vpop.f32.mrf.mxu1  ;;  %v12688_v9 = vadd.f32 %v5936_v58, %v5648_v52  ;;  %v4290_v15 = vld [vmem:[%s14178_s1 + $0x700] sm:$0xff] }
 0x466   :  { %v5652_v38 = vpop.f32.mrf.mxu0  ;;  %5843 = vmatmul.mubr.bf16.gmra.mxu0 %v8260_v21  ;;  %v4294_v47 = vld [vmem:[%s14178_s1 + $0x720] sm:$0xff]  ;;  %v8268_v21 = vcombine.low %v4282_v13, %v4286_v24 }
 0x467   :  { %v5653_v39 = vadd.f32 %v12652_v1, %v5652_v38  ;;  %v5944_v59 = vpop.f32.mrf.mxu1  ;;  %5850 = vmatprep.mubr.bf16.mxu0 %v8269_v63  ;;  %v8277_v17 = vcombine.high %v4290_v15, %v4294_v47 }
 0x468   :  { %v5654_v56 = vpop.f32.mrf.mxu0 }
 0x469   :  { %v5946_v18 = vpop.f32.mrf.mxu1  ;;  %v12697_v58 = vadd.f32 %v5941_v37, %v5653_v39  ;;  %v4299_v56 = vld [vmem:[%s14178_s1 + $0x748] sm:$0xff] }
 0x46a   :  { %v5655_v52 = vpop.f32.mrf.mxu0  ;;  %v4303_v18 = vld [vmem:[%s14178_s1 + $0x768] sm:$0xff] }
 0x46b   :  { %v5656_v38 = vadd.f32 %v12652_v1, %v5655_v52  ;;  %v5949_v29 = vpop.f32.mrf.mxu1  ;;  %6140 = vmatmul.mubr.bf16.gmra.mxu1 %v8270_v51  ;;  %v8278_v51 = vcombine.low %v4291_v10, %v4295_v12 }
 0x46c   :  { %v5657_v61 = vpop.f32.mrf.mxu0  ;;  %6147 = vmatprep.mubr.bf16.mxu1 %v8279_v46  ;;  %v8287_v46 = vcombine.high %v4299_v56, %v4303_v18 }
 0x46d   :  { %v5951_v63 = vpop.f32.mrf.mxu1  ;;  %v12706_v37 = vadd.f32 %v5944_v59, %v5656_v38  ;;  %v4298_v61 = vld [vmem:[%s14178_s1 + $0x740] sm:$0xff] }
 0x46e   :  { %v5660_v39 = vpop.f32.mrf.mxu0  ;;  %5851 = vmatmul.mubr.bf16.gmra.mxu0 %v8268_v21  ;;  %v4302_v63 = vld [vmem:[%s14178_s1 + $0x760] sm:$0xff]  ;;  %v8276_v21 = vcombine.low %v4290_v15, %v4294_v47 }
 0x46f   :  { %v5661_v13 = vadd.f32 %v12652_v1, %v5660_v39  ;;  %v5952_v24 = vpop.f32.mrf.mxu1  ;;  %5858 = vmatprep.mubr.bf16.mxu0 %v8277_v17  ;;  %v8285_v10 = vcombine.high %v4298_v61, %v4302_v63 }
 0x470   :  { %v5662_v52 = vpop.f32.mrf.mxu0 }
 0x471   :  { %v5954_v34 = vpop.f32.mrf.mxu1  ;;  %v12715_v59 = vadd.f32 %v5949_v29, %v5661_v13  ;;  %v4307_v52 = vld [vmem:[%s14178_s1 + $0x788] sm:$0xff] }
 0x472   :  { %v5663_v38 = vpop.f32.mrf.mxu0  ;;  %v4311_v34 = vld [vmem:[%s14178_s1 + $0x7a8] sm:$0xff] }
 0x473   :  { %v5664_v39 = vadd.f32 %v12652_v1, %v5663_v38  ;;  %v5957_v5 = vpop.f32.mrf.mxu1  ;;  %6148 = vmatmul.mubr.bf16.gmra.mxu1 %v8278_v51  ;;  %v8286_v51 = vcombine.low %v4299_v56, %v4303_v18 }
 0x474   :  { %v5665_v12 = vpop.f32.mrf.mxu0  ;;  %6155 = vmatprep.mubr.bf16.mxu1 %v8287_v46  ;;  %v8295_v46 = vcombine.high %v4307_v52, %v4311_v34 }
 0x475   :  { %v5959_v17 = vpop.f32.mrf.mxu1  ;;  %v12724_v29 = vadd.f32 %v5952_v24, %v5664_v39  ;;  %v4306_v12 = vld [vmem:[%s14178_s1 + $0x780] sm:$0xff] }
 0x476   :  { %v5668_v13 = vpop.f32.mrf.mxu0  ;;  %5859 = vmatmul.mubr.bf16.gmra.mxu0 %v8276_v21  ;;  %v4310_v17 = vld [vmem:[%s14178_s1 + $0x7a0] sm:$0xff]  ;;  %v8284_v21 = vcombine.low %v4298_v61, %v4302_v63 }
 0x477   :  { %v5669_v15 = vadd.f32 %v12652_v1, %v5668_v13  ;;  %v5960_v47 = vpop.f32.mrf.mxu1  ;;  %5866 = vmatprep.mubr.bf16.mxu0 %v8285_v10  ;;  %v8293_v56 = vcombine.high %v4306_v12, %v4310_v17 }
 0x478   :  { %v5670_v38 = vpop.f32.mrf.mxu0 }
 0x479   :  { %v5962_v35 = vpop.f32.mrf.mxu1  ;;  %v12733_v24 = vadd.f32 %v5957_v5, %v5669_v15  ;;  %v4315_v38 = vld [vmem:[%s14178_s1 + $0x7c8] sm:$0xff] }
 0x47a   :  { %v5671_v39 = vpop.f32.mrf.mxu0  ;;  %v4319_v35 = vld [vmem:[%s14178_s1 + $0x7e8] sm:$0xff] }
 0x47b   :  { %v5672_v13 = vadd.f32 %v12652_v1, %v5671_v39  ;;  %v5965_v14 = vpop.f32.mrf.mxu1  ;;  %6156 = vmatmul.mubr.bf16.gmra.mxu1 %v8286_v51  ;;  %v8294_v51 = vcombine.low %v4307_v52, %v4311_v34 }
 0x47c   :  { %v5673_v18 = vpop.f32.mrf.mxu0  ;;  %6163 = vmatprep.mubr.bf16.mxu1 %v8295_v46  ;;  %v8303_v46 = vcombine.high %v4315_v38, %v4319_v35 }
 0x47d   :  { %v5967_v10 = vpop.f32.mrf.mxu1  ;;  %v12742_v5 = vadd.f32 %v5960_v47, %v5672_v13  ;;  %v4314_v18 = vld [vmem:[%s14178_s1 + $0x7c0] sm:$0xff] }
 0x47e   :  { %v5676_v15 = vpop.f32.mrf.mxu0  ;;  %5867 = vmatmul.mubr.bf16.gmra.mxu0 %v8284_v21  ;;  %v4318_v10 = vld [vmem:[%s14178_s1 + $0x7e0] sm:$0xff]  ;;  %v8292_v21 = vcombine.low %v4306_v12, %v4310_v17 }
 0x47f   :  { %v5677_v61 = vadd.f32 %v12652_v1, %v5676_v15  ;;  %v5968_v63 = vpop.f32.mrf.mxu1  ;;  %5874 = vmatprep.mubr.bf16.mxu0 %v8293_v56  ;;  %v8301_v52 = vcombine.high %v4314_v18, %v4318_v10 }
 0x480   :  { %v5678_v39 = vpop.f32.mrf.mxu0 }
 0x481   :  { %v5970_v11 = vpop.f32.mrf.mxu1  ;;  %v12751_v47 = vadd.f32 %v5965_v14, %v5677_v61  ;;  %v4069_v39 = vld [vmem:[%s14178_s1 + $0x18] sm:$0xff] }
 0x482   :  { %v5679_v13 = vpop.f32.mrf.mxu0  ;;  %v4073_v11 = vld [vmem:[%s14178_s1 + $0x38] sm:$0xff] }
 0x483   :  { %v5680_v15 = vadd.f32 %v12652_v1, %v5679_v13  ;;  %v5973_v57 = vpop.f32.mrf.mxu1  ;;  %6164 = vmatmul.mubr.bf16.gmra.mxu1 %v8294_v51  ;;  %v8302_v51 = vcombine.low %v4315_v38, %v4319_v35 }
 0x484   :  { %v5681_v34 = vpop.f32.mrf.mxu0  ;;  %6171 = vmatprep.mubr.bf16.mxu1 %v8303_v46  ;;  %v8059_v46 = vcombine.high %v4069_v39, %v4073_v11 }
 0x485   :  { %v5975_v56 = vpop.f32.mrf.mxu1  ;;  %v12760_v14 = vadd.f32 %v5968_v63, %v5680_v15  ;;  %v4068_v34 = vld [vmem:[%s14178_s1 + $0x10] sm:$0xff] }
 0x486   :  { %v5684_v61 = vpop.f32.mrf.mxu0  ;;  %5875 = vmatmul.mubr.bf16.gmra.mxu0 %v8292_v21  ;;  %v4072_v56 = vld [vmem:[%s14178_s1 + $0x30] sm:$0xff]  ;;  %v8300_v21 = vcombine.low %v4314_v18, %v4318_v10 }
 0x487   :  { %v5685_v12 = vadd.f32 %v12652_v1, %v5684_v61  ;;  %v5976_v17 = vpop.f32.mrf.mxu1  ;;  %5882 = vmatprep.mubr.bf16.mxu0 %v8301_v52  ;;  %v8057_v38 = vcombine.high %v4068_v34, %v4072_v56 }
 0x488   :  { %v5686_v13 = vpop.f32.mrf.mxu0 }
 0x489   :  { %v5978_v55 = vpop.f32.mrf.mxu1  ;;  %v12769_v63 = vadd.f32 %v5973_v57, %v5685_v12  ;;  %v4077_v13 = vld [vmem:[%s14178_s1 + $0x58] sm:$0xff] }
 0x48a   :  { %v5687_v15 = vpop.f32.mrf.mxu0  ;;  %v4081_v55 = vld [vmem:[%s14178_s1 + $0x78] sm:$0xff] }
 0x48b   :  { %v5688_v61 = vadd.f32 %v12652_v1, %v5687_v15  ;;  %v5981_v33 = vpop.f32.mrf.mxu1  ;;  %6172 = vmatmul.mubr.bf16.gmra.mxu1 %v8302_v51  ;;  %v8058_v51 = vcombine.low %v4069_v39, %v4073_v11 }
 0x48c   :  { %v5689_v35 = vpop.f32.mrf.mxu0  ;;  %6501 = vmatprep.mubr.bf16.mxu1 %v8059_v46  ;;  %v8067_v46 = vcombine.high %v4077_v13, %v4081_v55 }
 0x48d   :  { %v5983_v52 = vpop.f32.mrf.mxu1  ;;  %v12778_v57 = vadd.f32 %v5976_v17, %v5688_v61  ;;  %v4076_v35 = vld [vmem:[%s14178_s1 + $0x50] sm:$0xff] }
 0x48e   :  { %v5692_v12 = vpop.f32.mrf.mxu0  ;;  %5883 = vmatmul.mubr.bf16.gmra.mxu0 %v8300_v21  ;;  %v4080_v52 = vld [vmem:[%s14178_s1 + $0x70] sm:$0xff]  ;;  %v8056_v21 = vcombine.low %v4068_v34, %v4072_v56 }
 0x48f   :  { %v5693_v18 = vadd.f32 %v12652_v1, %v5692_v12  ;;  %v5984_v10 = vpop.f32.mrf.mxu1  ;;  %6212 = vmatprep.mubr.bf16.mxu0 %v8057_v38  ;;  %v8065_v39 = vcombine.high %v4076_v35, %v4080_v52  ;;  %v14757_v38 = vld [vmem:[#allocation71_spill] sm:$0xff] }
 0x490   :  { %v5694_v15 = vpop.f32.mrf.mxu0  ;;  %v14759_v56 = vunpack.c.l.bf16 %v14757_v38 }
 0x491   :  { %v5986_v25 = vpop.f32.mrf.mxu1  ;;  %v12787_v17 = vadd.f32 %v5981_v33, %v5693_v18  ;;  %v14758_v15 = vunpack.c.h.bf16 %v14757_v38  ;;  %v12800_v33 = vld [vmem:[%s14178_s1 + $0xb8] sm:$0xff] }
 0x492   :  { %v5695_v61 = vpop.f32.mrf.mxu0 }
 0x493   :  { %v5696_v12 = vadd.f32 %v12652_v1, %v5695_v61  ;;  %v5989_v7 = vpop.f32.mrf.mxu1  ;;  %6502 = vmatmul.mubr.bf16.vlgmr.msra.gmra.mxu1 %v8058_v51  ;;  %v8066_v51 = vcombine.low %v4077_v13, %v4081_v55 }
 0x494   :  { %v5697_v11 = vpop.f32.mrf.mxu0  ;;  %6509 = vmatprep.mubr.bf16.mxu1 %v8067_v46  ;;  %8941 = vmatpush3.msra.mxu1 %v14758_v15  ;;  %v14760_v46 = vld [vmem:[#allocation70_spill] sm:$0xff]  ;;  %v8075_v15 = vcombine.high %v12795_v27, %v12800_v33 }
 0x495   :  { %v5991_v40 = vpop.f32.mrf.mxu1  ;;  %8942 = vmatprep.subr.mxu1 %v14555_v32  ;;  %v12803_v25 = vadd.f32 %v5984_v10, %v5696_v12  ;;  %v14761_v61 = vunpack.c.h.bf16 %v14760_v46  ;;  %v12815_v10 = vld [vmem:[%s14178_s1 + $0x90] sm:$0xff]  ;;  %v14762_v55 = vunpack.c.l.bf16 %v14760_v46  ;;  %v14763_v12 = vld [vmem:[#allocation73_spill] sm:$0xff]  ;;  %v14766_v46 = vunpack.c.h.bf16 %v14765_v3 }
 0x496   :  { %v5700_v34 = vpop.f32.mrf.mxu0  ;;  %6213 = vmatmul.mubr.bf16.vlgmr.msra.gmra.mxu0 %v8056_v21  ;;  %8943 = vmatpush3.msra.mxu1 %v14759_v56  ;;  %v4088_v21 = vld [vmem:[%s14178_s1 + $0xb0] sm:$0xff]  ;;  %v8064_v56 = vcombine.low %v4076_v35, %v4080_v52  ;;  %v12838_v35 = vld [vmem:[%s14178_s1 + $0xd8] sm:$0xff] }
 0x497   :  { %v5701_v40 = vadd.f32 %v12652_v1, %v5700_v34  ;;  %v5992_v18 = vpop.f32.mrf.mxu1  ;;  %6220 = vmatprep.mubr.bf16.mxu0 %v8065_v39  ;;  %8906 = vmatpush3.msra.mxu0 %v14761_v61  ;;  %v14764_v39 = vunpack.c.h.bf16 %v14763_v12  ;;  %v12843_v52 = vld [vmem:[%s14178_s1 + $0xf8] sm:$0xff] }
 0x498   :  { %v5702_v11 = vpop.f32.mrf.mxu0  ;;  %8907 = vmatprep.subr.mxu0 %v14555_v32  ;;  %8944 = vmatprep.subr.mxu1 %v14555_v32 }
 0x499   :  { %v5994_v13 = vpop.f32.mrf.mxu1  ;;  %8908 = vmatpush3.msra.mxu0 %v14762_v55  ;;  %8945 = vmatpush3.msra.mxu1 %v14764_v39  ;;  %v12826_v38 = vadd.f32 %v5989_v7, %v5701_v40  ;;  %v14767_v40 = vunpack.c.l.bf16 %v14765_v3 }
 0x49a   :  { %v5703_v34 = vpop.f32.mrf.mxu0  ;;  %8909 = vmatprep.subr.mxu0 %v14555_v32  ;;  %8946 = vmatprep.subr.mxu1 %v14555_v32  ;;  %v8073_v13 = vcombine.high %v12815_v10, %v4088_v21 }
 0x49b   :  { %v5704_v61 = vadd.f32 %v12652_v1, %v5703_v34  ;;  %v5997_v11 = vpop.f32.mrf.mxu1  ;;  %6510 = vmatmul.mubr.bf16.gmra.mxu1 %v8066_v51  ;;  %8910 = vmatpush3.msra.mxu0 %v14766_v46  ;;  %v14768_v51 = vunpack.c.l.bf16 %v14763_v12  ;;  %v8083_v12 = vcombine.high %v12838_v35, %v12843_v52 }
 0x49c   :  { %v5705_v55 = vpop.f32.mrf.mxu0  ;;  %6517 = vmatprep.mubr.bf16.mxu1 %v8075_v15  ;;  %8911 = vmatprep.subr.mxu0 %v14555_v32 }
 0x49d   :  { %v5999_v7 = vpop.f32.mrf.mxu1  ;;  %8912 = vmatpush3.msra.mxu0 %v14767_v40  ;;  %8947 = vmatpush3.msra.mxu1 %v14768_v51  ;;  %v12849_v15 = vadd.f32 %v5992_v18, %v5704_v61  ;;  %v8074_v55 = vcombine.low %v12795_v27, %v12800_v33  ;;  %v12862_v18 = vld [vmem:[%s14178_s1 + $0xd0] sm:$0xff]  ;;  %v8072_v51 = vcombine.low %v12815_v10, %v4088_v21  ;;  %v12887_v10 = vld [vmem:[%s14178_s1 + $0x118] sm:$0xff] }
 0x49e   :  { %v5708_v39 = vpop.f32.mrf.mxu0  ;;  %6221 = vmatmul.mubr.bf16.gmra.mxu0 %v8064_v56  ;;  %8913 = vmatprep.subr.mxu0 %v14555_v32  ;;  %v14769_v7 = vld [vmem:[#allocation74_spill] sm:$0xff]  ;;  %v4096_v56 = vld [vmem:[%s14178_s1 + $0xf0] sm:$0xff]  ;;  %v12892_v21 = vld [vmem:[%s14178_s1 + $0x138] sm:$0xff] }
 0x49f   :  { %v5709_v34 = vadd.f32 %v12652_v1, %v5708_v39  ;;  %v6000_v46 = vpop.f32.mrf.mxu1  ;;  %6228 = vmatprep.mubr.bf16.mxu0 %v8073_v13  ;;  %v14770_v30 = vunpack.c.h.bf16 %v14769_v7  ;;  %8948 = vmatprep.subr.mxu1 %v14555_v32  ;;  %v14771_v33 = vld [vmem:[#allocation75_spill] sm:$0xff]  ;;  %v14773_v61 = vunpack.c.l.bf16 %v14769_v7 }
 0x4a0   :  { %v5710_v3 = vpop.f32.mrf.mxu0 }
 0x4a1   :  { %8914 = vmatpush3.msra.mxu0 %v14770_v30  ;;  %v6002_v27 = vpop.f32.mrf.mxu1  ;;  %v14772_v30 = vunpack.c.h.bf16 %v14771_v33  ;;  %v12873_v13 = vadd.f32 %v5997_v11, %v5709_v34  ;;  %v14776_v11 = vunpack.c.l.bf16 %v14771_v33  ;;  %v14777_v33 = vld [vmem:[#allocation76_spill] sm:$0xff] }
 0x4a2   :  { %8915 = vmatprep.subr.mxu0 %v14555_v32  ;;  %v5711_v40 = vpop.f32.mrf.mxu0  ;;  %v8081_v27 = vcombine.high %v12862_v18, %v4096_v56 }
 0x4a3   :  { %8949 = vmatpush3.msra.mxu1 %v14772_v30  ;;  %8916 = vmatpush3.msra.mxu0 %v14773_v61  ;;  %v5712_v39 = vadd.f32 %v12652_v1, %v5711_v40  ;;  %v6005_v3 = vpop.f32.mrf.mxu1  ;;  %v14775_v30 = vunpack.c.h.bf16 %v14774_v8  ;;  %v14778_v61 = vunpack.c.h.bf16 %v14777_v33 }
 0x4a4   :  { %8950 = vmatprep.subr.mxu1 %v14555_v32  ;;  %8917 = vmatprep.subr.mxu0 %v14555_v32  ;;  %v5713_v7 = vpop.f32.mrf.mxu0 }
 0x4a5   :  { %6518 = vmatmul.mubr.bf16.gmra.mxu1 %v8074_v55  ;;  %8918 = vmatpush3.msra.mxu0 %v14775_v30  ;;  %v6007_v34 = vpop.f32.mrf.mxu1  ;;  %v12894_v55 = vadd.f32 %v6000_v46, %v5712_v39  ;;  %v8082_v7 = vcombine.low %v12838_v35, %v12843_v52  ;;  %v8091_v39 = vcombine.high %v12887_v10, %v12892_v21  ;;  %v14780_v52 = vunpack.c.l.bf16 %v14777_v33 }
 0x4a6   :  { %6525 = vmatprep.mubr.bf16.mxu1 %v8083_v12  ;;  %8951 = vmatpush3.msra.mxu1 %v14776_v11  ;;  %v5716_v12 = vpop.f32.mrf.mxu0  ;;  %v14779_v11 = vunpack.c.l.bf16 %v14774_v8  ;;  %v4104_v34 = vld [vmem:[%s14178_s1 + $0x130] sm:$0xff] }
 0x4a7   :  { %8952 = vmatprep.subr.mxu1 %v14555_v32  ;;  %8919 = vmatprep.subr.mxu0 %v14555_v32  ;;  %v5717_v40 = vadd.f32 %v12652_v1, %v5716_v12  ;;  %v6008_v30 = vpop.f32.mrf.mxu1 }
 0x4a8   :  { %6229 = vmatmul.mubr.bf16.gmra.mxu0 %v8072_v51  ;;  %8953 = vmatpush3.msra.mxu1 %v14778_v61  ;;  %v5718_v46 = vpop.f32.mrf.mxu0  ;;  %v12910_v51 = vld [vmem:[%s14178_s1 + $0x110] sm:$0xff] }
 0x4a9   :  { %6236 = vmatprep.mubr.bf16.mxu0 %v8081_v27  ;;  %8920 = vmatpush3.msra.mxu0 %v14779_v11  ;;  %v6010_v35 = vpop.f32.mrf.mxu1  ;;  %v12917_v8 = vadd.f32 %v6005_v3, %v5717_v40  ;;  %v14781_v27 = vld [vmem:[#allocation78_spill] sm:$0xff]  ;;  %v8080_v11 = vcombine.low %v12862_v18, %v4096_v56  ;;  %v8089_v3 = vcombine.high %v12910_v51, %v4104_v34  ;;  %v12935_v18 = vld [vmem:[%s14178_s1 + $0x158] sm:$0xff] }
 0x4aa   :  { %8954 = vmatprep.subr.mxu1 %v14555_v32  ;;  %8921 = vmatprep.subr.mxu0 %v14555_v32  ;;  %v14782_v12 = vunpack.c.h.bf16 %v14781_v27  ;;  %v5719_v61 = vpop.f32.mrf.mxu0  ;;  %v14783_v40 = vunpack.c.l.bf16 %v14781_v27  ;;  %v14784_v35 = vld [vmem:[#allocation79_spill] sm:$0xff]  ;;  %v12940_v56 = vld [vmem:[%s14178_s1 + $0x178] sm:$0xff] }
 0x4ab   :  { %8955 = vmatpush3.msra.mxu1 %v14780_v52  ;;  %v5720_v46 = vadd.f32 %v12652_v1, %v5719_v61  ;;  %v6013_v48 = vpop.f32.mrf.mxu1  ;;  %v14785_v52 = vunpack.c.h.bf16 %v14784_v35  ;;  %v14786_v27 = vunpack.c.l.bf16 %v14784_v35  ;;  %v4112_v35 = vld [vmem:[%s14178_s1 + $0x170] sm:$0xff] }
 0x4ac   :  { %8922 = vmatpush3.msra.mxu0 %v14782_v12  ;;  %8956 = vmatprep.subr.mxu1 %v14555_v32  ;;  %v5721_v33 = vpop.f32.mrf.mxu0 }
 0x4ad   :  { %8923 = vmatprep.subr.mxu0 %v14555_v32  ;;  %6526 = vmatmul.mubr.bf16.gmra.mxu1 %v8082_v7  ;;  %v6015_v12 = vpop.f32.mrf.mxu1  ;;  %v12942_v7 = vadd.f32 %v6008_v30, %v5720_v46  ;;  %v8090_v33 = vcombine.low %v12887_v10, %v12892_v21  ;;  %v8099_v46 = vcombine.high %v12935_v18, %v12940_v56 }
 0x4ae   :  { %8924 = vmatpush3.msra.mxu0 %v14783_v40  ;;  %6533 = vmatprep.mubr.bf16.mxu1 %v8091_v39  ;;  %v5724_v39 = vpop.f32.mrf.mxu0 }
 0x4af   :  { %8957 = vmatpush3.msra.mxu1 %v14785_v52  ;;  %8925 = vmatprep.subr.mxu0 %v14555_v32  ;;  %v5725_v61 = vadd.f32 %v12652_v1, %v5724_v39  ;;  %v6016_v40 = vpop.f32.mrf.mxu1  ;;  %v14787_v52 = vld [vmem:[#allocation80_spill] sm:$0xff] }
 0x4b0   :  { %8958 = vmatprep.subr.mxu1 %v14555_v32  ;;  %6237 = vmatmul.mubr.bf16.gmra.mxu0 %v8080_v11  ;;  %v14788_v12 = vunpack.c.h.bf16 %v14787_v52  ;;  %v5726_v30 = vpop.f32.mrf.mxu0  ;;  %v12958_v11 = vld [vmem:[%s14178_s1 + $0x150] sm:$0xff] }
 0x4b1   :  { %8959 = vmatpush3.msra.mxu1 %v14786_v27  ;;  %6244 = vmatprep.mubr.bf16.mxu0 %v8089_v3  ;;  %v6018_v10 = vpop.f32.mrf.mxu1  ;;  %v12965_v21 = vadd.f32 %v6013_v48, %v5725_v61  ;;  %v14789_v3 = vld [vmem:[#allocation81_spill] sm:$0xff]  ;;  %v14791_v27 = vunpack.c.l.bf16 %v14787_v52  ;;  %v8088_v30 = vcombine.low %v12910_v51, %v4104_v34  ;;  %v8097_v48 = vcombine.high %v12958_v11, %v4112_v35  ;;  %v14792_v61 = vld [vmem:[#allocation82_spill] sm:$0xff] }
 0x4b2   :  { %8926 = vmatpush3.msra.mxu0 %v14788_v12  ;;  %8960 = vmatprep.subr.mxu1 %v14555_v32  ;;  %v14790_v39 = vunpack.c.h.bf16 %v14789_v3  ;;  %v5727_v12 = vpop.f32.mrf.mxu0  ;;  %v14793_v10 = vunpack.c.h.bf16 %v14792_v61  ;;  %v14794_v52 = vunpack.c.l.bf16 %v14789_v3  ;;  %v4117_v51 = vld [vmem:[%s14178_s1 + $0x198] sm:$0xff] }
 0x4b3   :  { %8927 = vmatprep.subr.mxu0 %v14555_v32  ;;  %v5728_v42 = vadd.f32 %v12652_v1, %v5727_v12  ;;  %v6021_v44 = vpop.f32.mrf.mxu1  ;;  %v4121_v34 = vld [vmem:[%s14178_s1 + $0x1b8] sm:$0xff] }
 0x4b4   :  { %8961 = vmatpush3.msra.mxu1 %v14790_v39  ;;  %8928 = vmatpush3.msra.mxu0 %v14791_v27  ;;  %v5729_v39 = vpop.f32.mrf.mxu0 }
 0x4b5   :  { %8962 = vmatprep.subr.mxu1 %v14555_v32  ;;  %8929 = vmatprep.subr.mxu0 %v14555_v32  ;;  %v6023_v27 = vpop.f32.mrf.mxu1 }
 0x4b6   :  { %6534 = vmatmul.mubr.bf16.gmra.mxu1 %v8090_v33  ;;  %8930 = vmatpush3.msra.mxu0 %v14793_v10  ;;  %v12986_v33 = vadd.f32 %v6016_v40, %v5728_v42  ;;  %v5732_v12 = vpop.f32.mrf.mxu0  ;;  %v14797_v27 = vunpack.c.l.bf16 %v14792_v61  ;;  %v8107_v40 = vcombine.high %v4117_v51, %v4121_v34 }
 0x4b7   :  { %6541 = vmatprep.mubr.bf16.mxu1 %v8099_v46  ;;  %8963 = vmatpush3.msra.mxu1 %v14794_v52  ;;  %v14795_v46 = vld [vmem:[#allocation83_spill] sm:$0xff]  ;;  %v5733_v10 = vadd.f32 %v12652_v1, %v5732_v12  ;;  %v6024_v39 = vpop.f32.mrf.mxu1  ;;  %v8098_v52 = vcombine.low %v12935_v18, %v12940_v56 }
 0x4b8   :  { %8964 = vmatprep.subr.mxu1 %v14555_v32  ;;  %8931 = vmatprep.subr.mxu0 %v14555_v32  ;;  %v14796_v3 = vunpack.c.h.bf16 %v14795_v46  ;;  %v5734_v42 = vpop.f32.mrf.mxu0  ;;  %v14798_v56 = vunpack.c.l.bf16 %v14795_v46 }
 0x4b9   :  { %6245 = vmatmul.mubr.bf16.gmra.mxu0 %v8088_v30  ;;  %v4120_v30 = vld [vmem:[%s14178_s1 + $0x1b0] sm:$0xff]  ;;  %v6026_v12 = vpop.f32.mrf.mxu1  ;;  %v13005_v18 = vadd.f32 %v6021_v44, %v5733_v10  ;;  %v14802_v10 = vld [vmem:[#allocation85_spill] sm:$0xff] }
 0x4ba   :  { %8965 = vmatpush3.msra.mxu1 %v14796_v3  ;;  %6252 = vmatprep.mubr.bf16.mxu0 %v8097_v48  ;;  %v14799_v48 = vld [vmem:[#allocation84_spill] sm:$0xff]  ;;  %v5735_v3 = vpop.f32.mrf.mxu0  ;;  %v8105_v12 = vcombine.high %v4116_v19, %v4120_v30 }
 0x4bb   :  { %8932 = vmatpush3.msra.mxu0 %v14797_v27  ;;  %8966 = vmatprep.subr.mxu1 %v14555_v32  ;;  %v14800_v61 = vunpack.c.h.bf16 %v14799_v48  ;;  %v8096_v27 = vcombine.low %v12958_v11, %v4112_v35  ;;  %v5736_v42 = vadd.f32 %v12652_v1, %v5735_v3  ;;  %v6029_v0 = vpop.f32.mrf.mxu1  ;;  %v14801_v44 = vunpack.c.l.bf16 %v14799_v48  ;;  %v4125_v11 = vld [vmem:[%s14178_s1 + $0x1d8] sm:$0xff] }
 0x4bc   :  { %8933 = vmatprep.subr.mxu0 %v14555_v32  ;;  %8967 = vmatpush3.msra.mxu1 %v14798_v56  ;;  %v5737_v46 = vpop.f32.mrf.mxu0  ;;  %v14803_v56 = vunpack.c.h.bf16 %v14802_v10  ;;  %v4129_v35 = vld [vmem:[%s14178_s1 + $0x1f8] sm:$0xff] }
 0x4bd   :  { %8934 = vmatpush3.msra.mxu0 %v14800_v61  ;;  %8968 = vmatprep.subr.mxu1 %v14555_v32  ;;  %v6031_v61 = vpop.f32.mrf.mxu1  ;;  %v13025_v3 = vadd.f32 %v6024_v39, %v5736_v42  ;;  %v8106_v46 = vcombine.low %v4117_v51, %v4121_v34  ;;  %v4124_v39 = vld [vmem:[%s14178_s1 + $0x1d0] sm:$0xff] }
 0x4be   :  { %8935 = vmatprep.subr.mxu0 %v14555_v32  ;;  %6542 = vmatmul.mubr.bf16.gmra.mxu1 %v8098_v52  ;;  %v5740_v52 = vpop.f32.mrf.mxu0  ;;  %v8115_v61 = vcombine.high %v4125_v11, %v4129_v35 }
 0x4bf   :  { %8936 = vmatpush3.msra.mxu0 %v14801_v44  ;;  %6549 = vmatprep.mubr.bf16.mxu1 %v8107_v40  ;;  %v14804_v40 = vunpack.c.l.bf16 %v14802_v10  ;;  %v5741_v48 = vadd.f32 %v12652_v1, %v5740_v52  ;;  %v6032_v44 = vpop.f32.mrf.mxu1  ;;  %v8104_v52 = vcombine.low %v4116_v19, %v4120_v30 }
 0x4c0   :  { %8969 = vmatpush3.msra.mxu1 %v14803_v56  ;;  %8975 = vmatprep.subr.mxu0 %v14555_v32  ;;  %v5742_v56 = vpop.f32.mrf.mxu0 }
 0x4c1   :  { %8970 = vmatprep.subr.mxu1 %v14555_v32  ;;  %6253 = vmatmul.mubr.bf16.gmra.mxu0 %v8096_v27  ;;  %v4128_v27 = vld [vmem:[%s14178_s1 + $0x1f0] sm:$0xff]  ;;  %v6034_v42 = vpop.f32.mrf.mxu1  ;;  %v13039_v10 = vadd.f32 %v6029_v0, %v5741_v48 }
 0x4c2   :  { %8971 = vmatpush3.msra.mxu1 %v14804_v40  ;;  %6260 = vmatprep.mubr.bf16.mxu0 %v8105_v12  ;;  %v5743_v40 = vpop.f32.mrf.mxu0  ;;  %v8113_v12 = vcombine.high %v4124_v39, %v4128_v27  ;;  %v4137_v42 = vld [vmem:[%s14178_s1 + $0x238] sm:$0xff] }
 0x4c3   :  { %9010 = vmatprep.subr.mxu1 %v14555_v32  ;;  %v5744_v51 = vadd.f32 %v12652_v1, %v5743_v40  ;;  %v6037_v34 = vpop.f32.mrf.mxu1 }
 0x4c4   :  { %v5745_v56 = vpop.f32.mrf.mxu0 }
 0x4c5   :  { %v6039_v16 = vpop.f32.mrf.mxu1  ;;  %v13048_v0 = vadd.f32 %v6032_v44, %v5744_v51  ;;  %v4136_v56 = vld [vmem:[%s14178_s1 + $0x230] sm:$0xff] }
 0x4c6   :  { %6550 = vmatmul.mubr.bf16.gmra.mxu1 %v8106_v46  ;;  %v5748_v48 = vpop.f32.mrf.mxu0  ;;  %v8114_v46 = vcombine.low %v4125_v11, %v4129_v35  ;;  %v4132_v16 = vld [vmem:[%s14178_s1 + $0x210] sm:$0xff] }
 0x4c7   :  { %6557 = vmatprep.mubr.bf16.mxu1 %v8115_v61  ;;  %v5749_v19 = vadd.f32 %v12652_v1, %v5748_v48  ;;  %v6040_v30 = vpop.f32.mrf.mxu1  ;;  %v8123_v61 = vcombine.high %v4133_v43, %v4137_v42  ;;  %v8121_v11 = vcombine.high %v4132_v16, %v4136_v56 }
 0x4c8   :  { %v5750_v40 = vpop.f32.mrf.mxu0 }
 0x4c9   :  { %6261 = vmatmul.mubr.bf16.gmra.mxu0 %v8104_v52  ;;  %v6042_v50 = vpop.f32.mrf.mxu1  ;;  %v13057_v44 = vadd.f32 %v6037_v34, %v5749_v19  ;;  %v8112_v52 = vcombine.low %v4124_v39, %v4128_v27  ;;  %v4141_v40 = vld [vmem:[%s14178_s1 + $0x258] sm:$0xff] }
 0x4ca   :  { %6268 = vmatprep.mubr.bf16.mxu0 %v8113_v12  ;;  %v5751_v51 = vpop.f32.mrf.mxu0  ;;  %v4145_v50 = vld [vmem:[%s14178_s1 + $0x278] sm:$0xff] }
 0x4cb   :  { %v5752_v48 = vadd.f32 %v12652_v1, %v5751_v51  ;;  %v6045_v41 = vpop.f32.mrf.mxu1 }
 0x4cc   :  { %v5753_v35 = vpop.f32.mrf.mxu0 }
 0x4cd   :  { %v6047_v12 = vpop.f32.mrf.mxu1  ;;  %v13066_v34 = vadd.f32 %v6040_v30, %v5752_v48  ;;  %v4140_v35 = vld [vmem:[%s14178_s1 + $0x250] sm:$0xff] }
 0x4ce   :  { %6558 = vmatmul.mubr.bf16.gmra.mxu1 %v8114_v46  ;;  %v5756_v19 = vpop.f32.mrf.mxu0  ;;  %v8122_v46 = vcombine.low %v4133_v43, %v4137_v42  ;;  %v4144_v12 = vld [vmem:[%s14178_s1 + $0x270] sm:$0xff] }
 0x4cf   :  { %6565 = vmatprep.mubr.bf16.mxu1 %v8123_v61  ;;  %v5757_v39 = vadd.f32 %v12652_v1, %v5756_v19  ;;  %v6048_v27 = vpop.f32.mrf.mxu1  ;;  %v8131_v61 = vcombine.high %v4141_v40, %v4145_v50  ;;  %v8129_v43 = vcombine.high %v4140_v35, %v4144_v12 }
 0x4d0   :  { %v5758_v51 = vpop.f32.mrf.mxu0 }
 0x4d1   :  { %6269 = vmatmul.mubr.bf16.gmra.mxu0 %v8112_v52  ;;  %v6050_v49 = vpop.f32.mrf.mxu1  ;;  %v13075_v30 = vadd.f32 %v6045_v41, %v5757_v39  ;;  %v8120_v52 = vcombine.low %v4132_v16, %v4136_v56  ;;  %v4149_v51 = vld [vmem:[%s14178_s1 + $0x298] sm:$0xff] }
 0x4d2   :  { %6276 = vmatprep.mubr.bf16.mxu0 %v8121_v11  ;;  %v5759_v48 = vpop.f32.mrf.mxu0  ;;  %v4153_v49 = vld [vmem:[%s14178_s1 + $0x2b8] sm:$0xff] }
 0x4d3   :  { %v5760_v19 = vadd.f32 %v12652_v1, %v5759_v48  ;;  %v6053_v31 = vpop.f32.mrf.mxu1 }
 0x4d4   :  { %v5761_v42 = vpop.f32.mrf.mxu0 }
 0x4d5   :  { %v6055_v11 = vpop.f32.mrf.mxu1  ;;  %v13084_v41 = vadd.f32 %v6048_v27, %v5760_v19  ;;  %v4148_v42 = vld [vmem:[%s14178_s1 + $0x290] sm:$0xff] }
 0x4d6   :  { %6566 = vmatmul.mubr.bf16.gmra.mxu1 %v8122_v46  ;;  %v5764_v39 = vpop.f32.mrf.mxu0  ;;  %v8130_v46 = vcombine.low %v4141_v40, %v4145_v50  ;;  %v4152_v11 = vld [vmem:[%s14178_s1 + $0x2b0] sm:$0xff] }
 0x4d7   :  { %6573 = vmatprep.mubr.bf16.mxu1 %v8131_v61  ;;  %v5765_v16 = vadd.f32 %v12652_v1, %v5764_v39  ;;  %v6056_v56 = vpop.f32.mrf.mxu1  ;;  %v8139_v61 = vcombine.high %v4149_v51, %v4153_v49  ;;  %v8137_v40 = vcombine.high %v4148_v42, %v4152_v11 }
 0x4d8   :  { %v5766_v48 = vpop.f32.mrf.mxu0 }
 0x4d9   :  { %6277 = vmatmul.mubr.bf16.gmra.mxu0 %v8120_v52  ;;  %v6058_v36 = vpop.f32.mrf.mxu1  ;;  %v13093_v27 = vadd.f32 %v6053_v31, %v5765_v16  ;;  %v8128_v52 = vcombine.low %v4140_v35, %v4144_v12  ;;  %v4157_v48 = vld [vmem:[%s14178_s1 + $0x2d8] sm:$0xff] }
 0x4da   :  { %6284 = vmatprep.mubr.bf16.mxu0 %v8129_v43  ;;  %v5767_v19 = vpop.f32.mrf.mxu0  ;;  %v4161_v36 = vld [vmem:[%s14178_s1 + $0x2f8] sm:$0xff] }
 0x4db   :  { %v5768_v39 = vadd.f32 %v12652_v1, %v5767_v19  ;;  %v6061_v45 = vpop.f32.mrf.mxu1 }
 0x4dc   :  { %v5769_v50 = vpop.f32.mrf.mxu0 }
 0x4dd   :  { %v6063_v43 = vpop.f32.mrf.mxu1  ;;  %v13102_v31 = vadd.f32 %v6056_v56, %v5768_v39  ;;  %v4156_v50 = vld [vmem:[%s14178_s1 + $0x2d0] sm:$0xff] }
 0x4de   :  { %6574 = vmatmul.mubr.bf16.gmra.mxu1 %v8130_v46  ;;  %v5772_v16 = vpop.f32.mrf.mxu0  ;;  %v8138_v46 = vcombine.low %v4149_v51, %v4153_v49  ;;  %v4160_v43 = vld [vmem:[%s14178_s1 + $0x2f0] sm:$0xff] }
 0x4df   :  { %6581 = vmatprep.mubr.bf16.mxu1 %v8139_v61  ;;  %v5773_v35 = vadd.f32 %v12652_v1, %v5772_v16  ;;  %v6064_v12 = vpop.f32.mrf.mxu1  ;;  %v8147_v61 = vcombine.high %v4157_v48, %v4161_v36  ;;  %v8145_v51 = vcombine.high %v4156_v50, %v4160_v43 }
 0x4e0   :  { %v5774_v19 = vpop.f32.mrf.mxu0 }
 0x4e1   :  { %6285 = vmatmul.mubr.bf16.gmra.mxu0 %v8128_v52  ;;  %v6066_v4 = vpop.f32.mrf.mxu1  ;;  %v13111_v56 = vadd.f32 %v6061_v45, %v5773_v35  ;;  %v8136_v52 = vcombine.low %v4148_v42, %v4152_v11  ;;  %v4165_v19 = vld [vmem:[%s14178_s1 + $0x318] sm:$0xff] }
 0x4e2   :  { %6292 = vmatprep.mubr.bf16.mxu0 %v8137_v40  ;;  %v5775_v39 = vpop.f32.mrf.mxu0  ;;  %v4169_v4 = vld [vmem:[%s14178_s1 + $0x338] sm:$0xff] }
 0x4e3   :  { %v5776_v16 = vadd.f32 %v12652_v1, %v5775_v39  ;;  %v6069_v26 = vpop.f32.mrf.mxu1 }
 0x4e4   :  { %v5777_v49 = vpop.f32.mrf.mxu0 }
 0x4e5   :  { %v6071_v40 = vpop.f32.mrf.mxu1  ;;  %v13120_v45 = vadd.f32 %v6064_v12, %v5776_v16  ;;  %v4164_v49 = vld [vmem:[%s14178_s1 + $0x310] sm:$0xff] }
 0x4e6   :  { %6582 = vmatmul.mubr.bf16.gmra.mxu1 %v8138_v46  ;;  %v5780_v35 = vpop.f32.mrf.mxu0  ;;  %v8146_v46 = vcombine.low %v4157_v48, %v4161_v36  ;;  %v4168_v40 = vld [vmem:[%s14178_s1 + $0x330] sm:$0xff] }
 0x4e7   :  { %6589 = vmatprep.mubr.bf16.mxu1 %v8147_v61  ;;  %v5781_v42 = vadd.f32 %v12652_v1, %v5780_v35  ;;  %v6072_v11 = vpop.f32.mrf.mxu1  ;;  %v8155_v61 = vcombine.high %v4165_v19, %v4169_v4  ;;  %v8153_v48 = vcombine.high %v4164_v49, %v4168_v40  ;;  %v8152_v6 = vcombine.low %v4164_v49, %v4168_v40 }
 0x4e8   :  { %v5782_v39 = vpop.f32.mrf.mxu0 }
 0x4e9   :  { %6293 = vmatmul.mubr.bf16.gmra.mxu0 %v8136_v52  ;;  %v6074_v23 = vpop.f32.mrf.mxu1  ;;  %v13129_v12 = vadd.f32 %v6069_v26, %v5781_v42  ;;  %v8144_v52 = vcombine.low %v4156_v50, %v4160_v43  ;;  %v4173_v39 = vld [vmem:[%s14178_s1 + $0x358] sm:$0xff] }
 0x4ea   :  { %6300 = vmatprep.mubr.bf16.mxu0 %v8145_v51  ;;  %v5783_v16 = vpop.f32.mrf.mxu0  ;;  %v4177_v23 = vld [vmem:[%s14178_s1 + $0x378] sm:$0xff] }
 0x4eb   :  { %v5784_v35 = vadd.f32 %v12652_v1, %v5783_v16  ;;  %v6077_v22 = vpop.f32.mrf.mxu1  ;;  %v13143_v1 = vld [vmem:[%s14180_s3] ss:$0 sm:$0xff]  ;;  %v8163_v16 = vcombine.high %v4173_v39, %v4177_v23 }
 0x4ec   :  { %v5785_v36 = vpop.f32.mrf.mxu0 }
 0x4ed   :  { %v6079_v51 = vpop.f32.mrf.mxu1  ;;  %v13138_v26 = vadd.f32 %v6072_v11, %v5784_v35  ;;  %v4172_v36 = vld [vmem:[%s14178_s1 + $0x350] sm:$0xff] }
 0x4ee   :  { %6590 = vmatmul.mubr.bf16.gmra.mxu1 %v8146_v46  ;;  %v5788_v42 = vpop.f32.mrf.mxu0  ;;  %v8154_v46 = vcombine.low %v4165_v19, %v4169_v4  ;;  %v4176_v11 = vld [vmem:[%s14178_s1 + $0x370] sm:$0xff] }
 0x4ef   :  { %6597 = vmatprep.mubr.bf16.mxu1 %v8155_v61  ;;  %v5789_v50 = vadd.f32 %v13143_v1, %v5788_v42  ;;  %v6080_v43 = vpop.f32.mrf.mxu1  ;;  %v8161_v19 = vcombine.high %v4172_v36, %v4176_v11 }
 0x4f0   :  { %v5790_v61 = vpop.f32.mrf.mxu0 }
 0x4f1   :  { %6301 = vmatmul.mubr.bf16.gmra.mxu0 %v8144_v52  ;;  %v6082_v52 = vpop.f32.mrf.mxu1  ;;  %v13152_v35 = vadd.f32 %v6077_v22, %v5789_v50  ;;  %v4181_v61 = vld [vmem:[%s14178_s1 + $0x398] sm:$0xff] }
 0x4f2   :  { %6308 = vmatprep.mubr.bf16.mxu0 %v8153_v48  ;;  %v5791_v51 = vpop.f32.mrf.mxu0  ;;  %v4185_v52 = vld [vmem:[%s14178_s1 + $0x3b8] sm:$0xff] }
 0x4f3   :  { %v5792_v42 = vadd.f32 %v13143_v1, %v5791_v51  ;;  %v6085_v54 = vpop.f32.mrf.mxu1 }
 0x4f4   :  { %v5793_v4 = vpop.f32.mrf.mxu0 }
 0x4f5   :  { %v6087_v48 = vpop.f32.mrf.mxu1  ;;  %v13161_v22 = vadd.f32 %v6080_v43, %v5792_v42  ;;  %v4180_v4 = vld [vmem:[%s14178_s1 + $0x390] sm:$0xff] }
 0x4f6   :  { %6598 = vmatmul.mubr.bf16.gmra.mxu1 %v8154_v46  ;;  %v5796_v50 = vpop.f32.mrf.mxu0  ;;  %v8162_v46 = vcombine.low %v4173_v39, %v4177_v23  ;;  %v4184_v48 = vld [vmem:[%s14178_s1 + $0x3b0] sm:$0xff] }
 0x4f7   :  { %6605 = vmatprep.mubr.bf16.mxu1 %v8163_v16  ;;  %v5797_v49 = vadd.f32 %v13143_v1, %v5796_v50  ;;  %v6088_v40 = vpop.f32.mrf.mxu1  ;;  %v8171_v16 = vcombine.high %v4181_v61, %v4185_v52  ;;  %v8169_v39 = vcombine.high %v4180_v4, %v4184_v48 }
 0x4f8   :  { %v5798_v51 = vpop.f32.mrf.mxu0 }
 0x4f9   :  { %6309 = vmatmul.mubr.bf16.gmra.mxu0 %v8152_v6  ;;  %v6090_v28 = vpop.f32.mrf.mxu1  ;;  %v13170_v43 = vadd.f32 %v6085_v54, %v5797_v49  ;;  %v8160_v6 = vcombine.low %v4172_v36, %v4176_v11  ;;  %v4189_v51 = vld [vmem:[%s14178_s1 + $0x3d8] sm:$0xff] }
 0x4fa   :  { %6316 = vmatprep.mubr.bf16.mxu0 %v8161_v19  ;;  %v5799_v42 = vpop.f32.mrf.mxu0  ;;  %v4193_v28 = vld [vmem:[%s14178_s1 + $0x3f8] sm:$0xff] }
 0x4fb   :  { %14805 = vst [vmem:[#allocation6_spill] sm:$0xff] %v13170_v43  ;;  %v5800_v50 = vadd.f32 %v13143_v1, %v5799_v42  ;;  %v6093_v60 = vpop.f32.mrf.mxu1 }
 0x4fc   :  { %v5801_v23 = vpop.f32.mrf.mxu0 }
 0x4fd   :  { %v6095_v19 = vpop.f32.mrf.mxu1  ;;  %v13179_v54 = vadd.f32 %v6088_v40, %v5800_v50  ;;  %v4188_v23 = vld [vmem:[%s14178_s1 + $0x3d0] sm:$0xff] }
 0x4fe   :  { %6606 = vmatmul.mubr.bf16.gmra.mxu1 %v8162_v46  ;;  %v5804_v49 = vpop.f32.mrf.mxu0  ;;  %v8170_v46 = vcombine.low %v4181_v61, %v4185_v52  ;;  %v4192_v19 = vld [vmem:[%s14178_s1 + $0x3f0] sm:$0xff] }
 0x4ff   :  { %6613 = vmatprep.mubr.bf16.mxu1 %v8171_v16  ;;  %14806 = vst [vmem:[#allocation9_spill] sm:$0xff] %v13179_v54  ;;  %v5805_v36 = vadd.f32 %v13143_v1, %v5804_v49  ;;  %v6096_v11 = vpop.f32.mrf.mxu1  ;;  %v8179_v16 = vcombine.high %v4189_v51, %v4193_v28  ;;  %v8177_v61 = vcombine.high %v4188_v23, %v4192_v19 }
 0x500   :  { %v5806_v42 = vpop.f32.mrf.mxu0 }
 0x501   :  { %6317 = vmatmul.mubr.bf16.gmra.mxu0 %v8160_v6  ;;  %v6098_v20 = vpop.f32.mrf.mxu1  ;;  %v13188_v40 = vadd.f32 %v6093_v60, %v5805_v36  ;;  %v8168_v6 = vcombine.low %v4180_v4, %v4184_v48  ;;  %v4197_v42 = vld [vmem:[%s14178_s1 + $0x418] sm:$0xff] }
 0x502   :  { %6324 = vmatprep.mubr.bf16.mxu0 %v8169_v39  ;;  %v5807_v50 = vpop.f32.mrf.mxu0  ;;  %v4201_v20 = vld [vmem:[%s14178_s1 + $0x438] sm:$0xff] }
 0x503   :  { %14807 = vst [vmem:[#allocation8_spill] sm:$0xff] %v13188_v40  ;;  %v5808_v49 = vadd.f32 %v13143_v1, %v5807_v50  ;;  %v6101_v54 = vpop.f32.mrf.mxu1 }
 0x504   :  { %v5809_v52 = vpop.f32.mrf.mxu0 }
 0x505   :  { %v6103_v39 = vpop.f32.mrf.mxu1  ;;  %v13197_v60 = vadd.f32 %v6096_v11, %v5808_v49  ;;  %v4196_v52 = vld [vmem:[%s14178_s1 + $0x410] sm:$0xff] }
 0x506   :  { %6614 = vmatmul.mubr.bf16.gmra.mxu1 %v8170_v46  ;;  %v5812_v36 = vpop.f32.mrf.mxu0  ;;  %v8178_v46 = vcombine.low %v4189_v51, %v4193_v28  ;;  %v4200_v39 = vld [vmem:[%s14178_s1 + $0x430] sm:$0xff] }
 0x507   :  { %6621 = vmatprep.mubr.bf16.mxu1 %v8179_v16  ;;  %14808 = vst [vmem:[#allocation11_spill] sm:$0xff] %v13197_v60  ;;  %v5813_v4 = vadd.f32 %v13143_v1, %v5812_v36  ;;  %v6104_v48 = vpop.f32.mrf.mxu1  ;;  %v8187_v16 = vcombine.high %v4197_v42, %v4201_v20  ;;  %v8185_v51 = vcombine.high %v4196_v52, %v4200_v39 }
 0x508   :  { %v5814_v50 = vpop.f32.mrf.mxu0 }
 0x509   :  { %6325 = vmatmul.mubr.bf16.gmra.mxu0 %v8168_v6  ;;  %v6106_v40 = vpop.f32.mrf.mxu1  ;;  %v13206_v11 = vadd.f32 %v6101_v54, %v5813_v4  ;;  %v8176_v6 = vcombine.low %v4188_v23, %v4192_v19  ;;  %v4205_v50 = vld [vmem:[%s14178_s1 + $0x458] sm:$0xff] }
 0x50a   :  { %6332 = vmatprep.mubr.bf16.mxu0 %v8177_v61  ;;  %v5815_v49 = vpop.f32.mrf.mxu0  ;;  %v4209_v40 = vld [vmem:[%s14178_s1 + $0x478] sm:$0xff] }
 0x50b   :  { %14809 = vst [vmem:[#allocation10_spill] sm:$0xff] %v13206_v11  ;;  %v5816_v36 = vadd.f32 %v13143_v1, %v5815_v49  ;;  %v6109_v60 = vpop.f32.mrf.mxu1 }
 0x50c   :  { %v5817_v28 = vpop.f32.mrf.mxu0 }
 0x50d   :  { %v6111_v61 = vpop.f32.mrf.mxu1  ;;  %v13215_v54 = vadd.f32 %v6104_v48, %v5816_v36  ;;  %v4204_v28 = vld [vmem:[%s14178_s1 + $0x450] sm:$0xff] }
 0x50e   :  { %6622 = vmatmul.mubr.bf16.gmra.mxu1 %v8178_v46  ;;  %v5820_v4 = vpop.f32.mrf.mxu0  ;;  %v8186_v46 = vcombine.low %v4197_v42, %v4201_v20  ;;  %v4208_v61 = vld [vmem:[%s14178_s1 + $0x470] sm:$0xff] }
 0x50f   :  { %6629 = vmatprep.mubr.bf16.mxu1 %v8187_v16  ;;  %14810 = vst [vmem:[#allocation13_spill] sm:$0xff] %v13215_v54  ;;  %v5821_v23 = vadd.f32 %v13143_v1, %v5820_v4  ;;  %v6112_v19 = vpop.f32.mrf.mxu1  ;;  %v8195_v16 = vcombine.high %v4205_v50, %v4209_v40  ;;  %v8193_v42 = vcombine.high %v4204_v28, %v4208_v61 }
 0x510   :  { %v5822_v49 = vpop.f32.mrf.mxu0 }
 0x511   :  { %6333 = vmatmul.mubr.bf16.gmra.mxu0 %v8176_v6  ;;  %v6114_v11 = vpop.f32.mrf.mxu1  ;;  %v13224_v48 = vadd.f32 %v6109_v60, %v5821_v23  ;;  %v8184_v6 = vcombine.low %v4196_v52, %v4200_v39  ;;  %v4213_v49 = vld [vmem:[%s14178_s1 + $0x498] sm:$0xff] }
 0x512   :  { %6340 = vmatprep.mubr.bf16.mxu0 %v8185_v51  ;;  %v5823_v36 = vpop.f32.mrf.mxu0  ;;  %v4217_v11 = vld [vmem:[%s14178_s1 + $0x4b8] sm:$0xff] }
 0x513   :  { %14811 = vst [vmem:[#allocation12_spill] sm:$0xff] %v13224_v48  ;;  %v5824_v4 = vadd.f32 %v13143_v1, %v5823_v36  ;;  %v6117_v54 = vpop.f32.mrf.mxu1 }
 0x514   :  { %v5825_v20 = vpop.f32.mrf.mxu0 }
 0x515   :  { %v6119_v51 = vpop.f32.mrf.mxu1  ;;  %v13233_v60 = vadd.f32 %v6112_v19, %v5824_v4  ;;  %v4212_v20 = vld [vmem:[%s14178_s1 + $0x490] sm:$0xff] }
 0x516   :  { %6630 = vmatmul.mubr.bf16.gmra.mxu1 %v8186_v46  ;;  %v5828_v23 = vpop.f32.mrf.mxu0  ;;  %v8194_v46 = vcombine.low %v4205_v50, %v4209_v40  ;;  %v4216_v51 = vld [vmem:[%s14178_s1 + $0x4b0] sm:$0xff] }
 0x517   :  { %6637 = vmatprep.mubr.bf16.mxu1 %v8195_v16  ;;  %14812 = vst [vmem:[#allocation15_spill] sm:$0xff] %v13233_v60  ;;  %v5829_v52 = vadd.f32 %v13143_v1, %v5828_v23  ;;  %v6120_v39 = vpop.f32.mrf.mxu1  ;;  %v8203_v16 = vcombine.high %v4213_v49, %v4217_v11  ;;  %v8201_v50 = vcombine.high %v4212_v20, %v4216_v51 }
 0x518   :  { %v5830_v36 = vpop.f32.mrf.mxu0 }
 0x519   :  { %6341 = vmatmul.mubr.bf16.gmra.mxu0 %v8184_v6  ;;  %v6122_v48 = vpop.f32.mrf.mxu1  ;;  %v13242_v19 = vadd.f32 %v6117_v54, %v5829_v52  ;;  %v8192_v6 = vcombine.low %v4204_v28, %v4208_v61  ;;  %v4221_v36 = vld [vmem:[%s14178_s1 + $0x4d8] sm:$0xff] }
 0x51a   :  { %6348 = vmatprep.mubr.bf16.mxu0 %v8193_v42  ;;  %v5831_v4 = vpop.f32.mrf.mxu0  ;;  %v4225_v48 = vld [vmem:[%s14178_s1 + $0x4f8] sm:$0xff] }
 0x51b   :  { %14813 = vst [vmem:[#allocation14_spill] sm:$0xff] %v13242_v19  ;;  %v5832_v23 = vadd.f32 %v13143_v1, %v5831_v4  ;;  %v6125_v60 = vpop.f32.mrf.mxu1 }
 0x51c   :  { %v5833_v40 = vpop.f32.mrf.mxu0 }
 0x51d   :  { %v6127_v42 = vpop.f32.mrf.mxu1  ;;  %v13251_v54 = vadd.f32 %v6120_v39, %v5832_v23  ;;  %v4220_v40 = vld [vmem:[%s14178_s1 + $0x4d0] sm:$0xff] }
 0x51e   :  { %6638 = vmatmul.mubr.bf16.gmra.mxu1 %v8194_v46  ;;  %v5836_v52 = vpop.f32.mrf.mxu0  ;;  %v8202_v46 = vcombine.low %v4213_v49, %v4217_v11  ;;  %v4224_v42 = vld [vmem:[%s14178_s1 + $0x4f0] sm:$0xff] }
 0x51f   :  { %6645 = vmatprep.mubr.bf16.mxu1 %v8203_v16  ;;  %14814 = vst [vmem:[#allocation17_spill] sm:$0xff] %v13251_v54  ;;  %v5837_v28 = vadd.f32 %v13143_v1, %v5836_v52  ;;  %v6128_v61 = vpop.f32.mrf.mxu1  ;;  %v8211_v16 = vcombine.high %v4221_v36, %v4225_v48  ;;  %v8209_v49 = vcombine.high %v4220_v40, %v4224_v42 }
 0x520   :  { %v5838_v4 = vpop.f32.mrf.mxu0 }
 0x521   :  { %6349 = vmatmul.mubr.bf16.gmra.mxu0 %v8192_v6  ;;  %v6130_v19 = vpop.f32.mrf.mxu1  ;;  %v13260_v39 = vadd.f32 %v6125_v60, %v5837_v28  ;;  %v8200_v6 = vcombine.low %v4212_v20, %v4216_v51  ;;  %v4229_v4 = vld [vmem:[%s14178_s1 + $0x518] sm:$0xff] }
 0x522   :  { %6356 = vmatprep.mubr.bf16.mxu0 %v8201_v50  ;;  %v5839_v23 = vpop.f32.mrf.mxu0  ;;  %v4233_v19 = vld [vmem:[%s14178_s1 + $0x538] sm:$0xff] }
 0x523   :  { %14815 = vst [vmem:[#allocation16_spill] sm:$0xff] %v13260_v39  ;;  %v5840_v52 = vadd.f32 %v13143_v1, %v5839_v23  ;;  %v6133_v54 = vpop.f32.mrf.mxu1 }
 0x524   :  { %v5841_v11 = vpop.f32.mrf.mxu0 }
 0x525   :  { %v6135_v50 = vpop.f32.mrf.mxu1  ;;  %v13269_v60 = vadd.f32 %v6128_v61, %v5840_v52  ;;  %v4228_v11 = vld [vmem:[%s14178_s1 + $0x510] sm:$0xff] }
 0x526   :  { %6646 = vmatmul.mubr.bf16.gmra.mxu1 %v8202_v46  ;;  %v5844_v28 = vpop.f32.mrf.mxu0  ;;  %v8210_v46 = vcombine.low %v4221_v36, %v4225_v48  ;;  %v4232_v50 = vld [vmem:[%s14178_s1 + $0x530] sm:$0xff] }
 0x527   :  { %6653 = vmatprep.mubr.bf16.mxu1 %v8211_v16  ;;  %14816 = vst [vmem:[#allocation19_spill] sm:$0xff] %v13269_v60  ;;  %v5845_v20 = vadd.f32 %v13143_v1, %v5844_v28  ;;  %v6136_v51 = vpop.f32.mrf.mxu1  ;;  %v8219_v16 = vcombine.high %v4229_v4, %v4233_v19  ;;  %v8217_v36 = vcombine.high %v4228_v11, %v4232_v50 }
 0x528   :  { %v5846_v23 = vpop.f32.mrf.mxu0 }
 0x529   :  { %6357 = vmatmul.mubr.bf16.gmra.mxu0 %v8200_v6  ;;  %v6138_v39 = vpop.f32.mrf.mxu1  ;;  %v13278_v61 = vadd.f32 %v6133_v54, %v5845_v20  ;;  %v8208_v6 = vcombine.low %v4220_v40, %v4224_v42  ;;  %v4237_v23 = vld [vmem:[%s14178_s1 + $0x558] sm:$0xff] }
 0x52a   :  { %6364 = vmatprep.mubr.bf16.mxu0 %v8209_v49  ;;  %v5847_v52 = vpop.f32.mrf.mxu0  ;;  %v4241_v39 = vld [vmem:[%s14178_s1 + $0x578] sm:$0xff] }
 0x52b   :  { %14817 = vst [vmem:[#allocation18_spill] sm:$0xff] %v13278_v61  ;;  %v5848_v28 = vadd.f32 %v13143_v1, %v5847_v52  ;;  %v6141_v60 = vpop.f32.mrf.mxu1 }
 0x52c   :  { %v5849_v48 = vpop.f32.mrf.mxu0 }
 0x52d   :  { %v6143_v49 = vpop.f32.mrf.mxu1  ;;  %v13287_v54 = vadd.f32 %v6136_v51, %v5848_v28  ;;  %v4236_v48 = vld [vmem:[%s14178_s1 + $0x550] sm:$0xff] }
 0x52e   :  { %6654 = vmatmul.mubr.bf16.gmra.mxu1 %v8210_v46  ;;  %v5852_v20 = vpop.f32.mrf.mxu0  ;;  %v8218_v46 = vcombine.low %v4229_v4, %v4233_v19  ;;  %v4240_v49 = vld [vmem:[%s14178_s1 + $0x570] sm:$0xff] }
 0x52f   :  { %6661 = vmatprep.mubr.bf16.mxu1 %v8219_v16  ;;  %14818 = vst [vmem:[#allocation21_spill] sm:$0xff] %v13287_v54  ;;  %v5853_v40 = vadd.f32 %v13143_v1, %v5852_v20  ;;  %v6144_v42 = vpop.f32.mrf.mxu1  ;;  %v8227_v16 = vcombine.high %v4237_v23, %v4241_v39  ;;  %v8225_v4 = vcombine.high %v4236_v48, %v4240_v49 }
 0x530   :  { %v5854_v52 = vpop.f32.mrf.mxu0 }
 0x531   :  { %6365 = vmatmul.mubr.bf16.gmra.mxu0 %v8208_v6  ;;  %v6146_v61 = vpop.f32.mrf.mxu1  ;;  %v13296_v51 = vadd.f32 %v6141_v60, %v5853_v40  ;;  %v8216_v6 = vcombine.low %v4228_v11, %v4232_v50  ;;  %v4245_v52 = vld [vmem:[%s14178_s1 + $0x598] sm:$0xff] }
 0x532   :  { %6372 = vmatprep.mubr.bf16.mxu0 %v8217_v36  ;;  %v5855_v28 = vpop.f32.mrf.mxu0  ;;  %v4249_v61 = vld [vmem:[%s14178_s1 + $0x5b8] sm:$0xff] }
 0x533   :  { %14819 = vst [vmem:[#allocation20_spill] sm:$0xff] %v13296_v51  ;;  %v5856_v20 = vadd.f32 %v13143_v1, %v5855_v28  ;;  %v6149_v54 = vpop.f32.mrf.mxu1 }
 0x534   :  { %v5857_v19 = vpop.f32.mrf.mxu0 }
 0x535   :  { %v6151_v36 = vpop.f32.mrf.mxu1  ;;  %v13305_v60 = vadd.f32 %v6144_v42, %v5856_v20  ;;  %v4244_v19 = vld [vmem:[%s14178_s1 + $0x590] sm:$0xff] }
 0x536   :  { %6662 = vmatmul.mubr.bf16.gmra.mxu1 %v8218_v46  ;;  %v5860_v40 = vpop.f32.mrf.mxu0  ;;  %v8226_v46 = vcombine.low %v4237_v23, %v4241_v39  ;;  %v4248_v36 = vld [vmem:[%s14178_s1 + $0x5b0] sm:$0xff] }
 0x537   :  { %6669 = vmatprep.mubr.bf16.mxu1 %v8227_v16  ;;  %14820 = vst [vmem:[#allocation23_spill] sm:$0xff] %v13305_v60  ;;  %v5861_v11 = vadd.f32 %v13143_v1, %v5860_v40  ;;  %v6152_v50 = vpop.f32.mrf.mxu1  ;;  %v8235_v16 = vcombine.high %v4245_v52, %v4249_v61  ;;  %v8233_v23 = vcombine.high %v4244_v19, %v4248_v36 }
 0x538   :  { %v5862_v28 = vpop.f32.mrf.mxu0 }
 0x539   :  { %6373 = vmatmul.mubr.bf16.gmra.mxu0 %v8216_v6  ;;  %v6154_v51 = vpop.f32.mrf.mxu1  ;;  %v13314_v42 = vadd.f32 %v6149_v54, %v5861_v11  ;;  %v8224_v6 = vcombine.low %v4236_v48, %v4240_v49  ;;  %v4253_v28 = vld [vmem:[%s14178_s1 + $0x5d8] sm:$0xff] }
 0x53a   :  { %6380 = vmatprep.mubr.bf16.mxu0 %v8225_v4  ;;  %v5863_v20 = vpop.f32.mrf.mxu0  ;;  %v4257_v51 = vld [vmem:[%s14178_s1 + $0x5f8] sm:$0xff] }
 0x53b   :  { %14821 = vst [vmem:[#allocation22_spill] sm:$0xff] %v13314_v42  ;;  %v5864_v40 = vadd.f32 %v13143_v1, %v5863_v20  ;;  %v6157_v60 = vpop.f32.mrf.mxu1 }
 0x53c   :  { %v5865_v39 = vpop.f32.mrf.mxu0 }
 0x53d   :  { %v6159_v4 = vpop.f32.mrf.mxu1  ;;  %v13323_v54 = vadd.f32 %v6152_v50, %v5864_v40  ;;  %v4252_v39 = vld [vmem:[%s14178_s1 + $0x5d0] sm:$0xff] }
 0x53e   :  { %6670 = vmatmul.mubr.bf16.gmra.mxu1 %v8226_v46  ;;  %v5868_v11 = vpop.f32.mrf.mxu0  ;;  %v8234_v46 = vcombine.low %v4245_v52, %v4249_v61  ;;  %v4256_v4 = vld [vmem:[%s14178_s1 + $0x5f0] sm:$0xff] }
 0x53f   :  { %6677 = vmatprep.mubr.bf16.mxu1 %v8235_v16  ;;  %14822 = vst [vmem:[#allocation25_spill] sm:$0xff] %v13323_v54  ;;  %v5869_v48 = vadd.f32 %v13143_v1, %v5868_v11  ;;  %v6160_v49 = vpop.f32.mrf.mxu1  ;;  %v8243_v16 = vcombine.high %v4253_v28, %v4257_v51  ;;  %v8241_v52 = vcombine.high %v4252_v39, %v4256_v4 }
 0x540   :  { %v5870_v20 = vpop.f32.mrf.mxu0 }
 0x541   :  { %6381 = vmatmul.mubr.bf16.gmra.mxu0 %v8224_v6  ;;  %v6162_v42 = vpop.f32.mrf.mxu1  ;;  %v13332_v50 = vadd.f32 %v6157_v60, %v5869_v48  ;;  %v8232_v6 = vcombine.low %v4244_v19, %v4248_v36  ;;  %v4261_v20 = vld [vmem:[%s14178_s1 + $0x618] sm:$0xff] }
 0x542   :  { %6388 = vmatprep.mubr.bf16.mxu0 %v8233_v23  ;;  %v5871_v40 = vpop.f32.mrf.mxu0  ;;  %v4265_v42 = vld [vmem:[%s14178_s1 + $0x638] sm:$0xff] }
 0x543   :  { %14823 = vst [vmem:[#allocation24_spill] sm:$0xff] %v13332_v50  ;;  %v5872_v11 = vadd.f32 %v13143_v1, %v5871_v40  ;;  %v6165_v54 = vpop.f32.mrf.mxu1 }
 0x544   :  { %v5873_v61 = vpop.f32.mrf.mxu0 }
 0x545   :  { %v6167_v23 = vpop.f32.mrf.mxu1  ;;  %v13341_v60 = vadd.f32 %v6160_v49, %v5872_v11  ;;  %v4260_v61 = vld [vmem:[%s14178_s1 + $0x610] sm:$0xff] }
 0x546   :  { %6678 = vmatmul.mubr.bf16.gmra.mxu1 %v8234_v46  ;;  %v5876_v48 = vpop.f32.mrf.mxu0  ;;  %v8242_v46 = vcombine.low %v4253_v28, %v4257_v51  ;;  %v4264_v23 = vld [vmem:[%s14178_s1 + $0x630] sm:$0xff] }
 0x547   :  { %6685 = vmatprep.mubr.bf16.mxu1 %v8243_v16  ;;  %14824 = vst [vmem:[#allocation27_spill] sm:$0xff] %v13341_v60  ;;  %v5877_v19 = vadd.f32 %v13143_v1, %v5876_v48  ;;  %v6168_v36 = vpop.f32.mrf.mxu1  ;;  %v8251_v16 = vcombine.high %v4261_v20, %v4265_v42  ;;  %v8249_v28 = vcombine.high %v4260_v61, %v4264_v23 }
 0x548   :  { %v5878_v40 = vpop.f32.mrf.mxu0 }
 0x549   :  { %6389 = vmatmul.mubr.bf16.gmra.mxu0 %v8232_v6  ;;  %v6170_v50 = vpop.f32.mrf.mxu1  ;;  %v13350_v49 = vadd.f32 %v6165_v54, %v5877_v19  ;;  %v8240_v6 = vcombine.low %v4252_v39, %v4256_v4  ;;  %v4269_v40 = vld [vmem:[%s14178_s1 + $0x658] sm:$0xff] }
 0x54a   :  { %6396 = vmatprep.mubr.bf16.mxu0 %v8241_v52  ;;  %v5879_v11 = vpop.f32.mrf.mxu0  ;;  %v4273_v50 = vld [vmem:[%s14178_s1 + $0x678] sm:$0xff] }
 0x54b   :  { %14825 = vst [vmem:[#allocation26_spill] sm:$0xff] %v13350_v49  ;;  %v5880_v48 = vadd.f32 %v13143_v1, %v5879_v11  ;;  %v6173_v60 = vpop.f32.mrf.mxu1 }
 0x54c   :  { %v5881_v51 = vpop.f32.mrf.mxu0 }
 0x54d   :  { %v6175_v52 = vpop.f32.mrf.mxu1  ;;  %v13359_v54 = vadd.f32 %v6168_v36, %v5880_v48  ;;  %v4268_v51 = vld [vmem:[%s14178_s1 + $0x650] sm:$0xff] }
 0x54e   :  { %6686 = vmatmul.mubr.bf16.gmra.mxu1 %v8242_v46  ;;  %v5884_v19 = vpop.f32.mrf.mxu0  ;;  %v8250_v46 = vcombine.low %v4261_v20, %v4265_v42  ;;  %v4272_v52 = vld [vmem:[%s14178_s1 + $0x670] sm:$0xff] }
 0x54f   :  { %6693 = vmatprep.mubr.bf16.mxu1 %v8251_v16  ;;  %14826 = vst [vmem:[#allocation29_spill] sm:$0xff] %v13359_v54  ;;  %v5885_v39 = vadd.f32 %v13143_v1, %v5884_v19  ;;  %v6176_v4 = vpop.f32.mrf.mxu1  ;;  %v8259_v16 = vcombine.high %v4269_v40, %v4273_v50  ;;  %v8257_v20 = vcombine.high %v4268_v51, %v4272_v52 }
 0x550   :  { %v5886_v11 = vpop.f32.mrf.mxu0 }
 0x551   :  { %6397 = vmatmul.mubr.bf16.gmra.mxu0 %v8240_v6  ;;  %v6178_v49 = vpop.f32.mrf.mxu1  ;;  %v13368_v36 = vadd.f32 %v6173_v60, %v5885_v39  ;;  %v8248_v6 = vcombine.low %v4260_v61, %v4264_v23  ;;  %v4277_v11 = vld [vmem:[%s14178_s1 + $0x698] sm:$0xff]  ;;  %v8258_v23 = vcombine.low %v4269_v40, %v4273_v50 }
 0x552   :  { %6404 = vmatprep.mubr.bf16.mxu0 %v8249_v28  ;;  %v5887_v48 = vpop.f32.mrf.mxu0  ;;  %v4281_v49 = vld [vmem:[%s14178_s1 + $0x6b8] sm:$0xff] }
 0x553   :  { %14827 = vst [vmem:[#allocation28_spill] sm:$0xff] %v13368_v36  ;;  %v5888_v19 = vadd.f32 %v13143_v1, %v5887_v48  ;;  %v6503_v54 = vpop.f32.mrf.mxu1  ;;  %v4276_v48 = vld [vmem:[%s14178_s1 + $0x690] sm:$0xff] }
 0x554   :  { %v5889_v42 = vpop.f32.mrf.mxu0 }
 0x555   :  { %v6505_v28 = vpop.f32.mrf.mxu1  ;;  %v13377_v60 = vadd.f32 %v6176_v4, %v5888_v19  ;;  %v4280_v42 = vld [vmem:[%s14178_s1 + $0x6b0] sm:$0xff] }
 0x556   :  { %6694 = vmatmul.mubr.bf16.gmra.mxu1 %v8250_v46  ;;  %v6214_v39 = vpop.f32.mrf.mxu0  ;;  %v8265_v40 = vcombine.high %v4276_v48, %v4280_v42 }
 0x557   :  { %6701 = vmatprep.mubr.bf16.mxu1 %v8259_v16  ;;  %14828 = vst [vmem:[#allocation31_spill] sm:$0xff] %v13377_v60  ;;  %v6215_v1 = vadd.f32 %v6214_v39, %v12661_v2  ;;  %v6506_v61 = vpop.f32.mrf.mxu1  ;;  %v8267_v16 = vcombine.high %v4277_v11, %v4281_v49  ;;  %v4285_v60 = vld [vmem:[%s14178_s1 + $0x6d8] sm:$0xff] }
 0x558   :  { %v6216_v46 = vpop.f32.mrf.mxu0 }
 0x559   :  { %6405 = vmatmul.mubr.bf16.gmra.mxu0 %v8248_v6  ;;  %v13386_v28 = vadd.f32 %v6503_v54, %v6215_v1  ;;  %v6508_v4 = vpop.f32.mrf.mxu1  ;;  %v8256_v6 = vcombine.low %v4268_v51, %v4272_v52  ;;  %v4289_v54 = vld [vmem:[%s14178_s1 + $0x6f8] sm:$0xff]  ;;  %v8266_v52 = vcombine.low %v4277_v11, %v4281_v49 }
 0x55a   :  { %6412 = vmatprep.mubr.bf16.mxu0 %v8257_v20  ;;  %v6217_v19 = vpop.f32.mrf.mxu0  ;;  %v4288_v4 = vld [vmem:[%s14178_s1 + $0x6f0] sm:$0xff] }
 0x55b   :  { %v6218_v2 = vadd.f32 %v6217_v19, %v12670_v53  ;;  %v6511_v39 = vpop.f32.mrf.mxu1 }
 0x55c   :  { %v6219_v50 = vpop.f32.mrf.mxu0 }
 0x55d   :  { %v13389_v20 = vadd.f32 %v6506_v61, %v6218_v2  ;;  %v6513_v46 = vpop.f32.mrf.mxu1  ;;  %v4284_v61 = vld [vmem:[%s14178_s1 + $0x6d0] sm:$0xff] }
 0x55e   :  { %6702 = vmatmul.mubr.bf16.gmra.mxu1 %v8258_v23  ;;  %v6222_v1 = vpop.f32.mrf.mxu0  ;;  %v8273_v11 = vcombine.high %v4284_v61, %v4288_v4 }
 0x55f   :  { %6709 = vmatprep.mubr.bf16.mxu1 %v8267_v16  ;;  %v6223_v53 = vadd.f32 %v6222_v1, %v12679_v62  ;;  %v6514_v51 = vpop.f32.mrf.mxu1  ;;  %v8275_v16 = vcombine.high %v4285_v60, %v4289_v54 }
 0x560   :  { %v6224_v23 = vpop.f32.mrf.mxu0 }
 0x561   :  { %6413 = vmatmul.mubr.bf16.gmra.mxu0 %v8256_v6  ;;  %v13404_v19 = vadd.f32 %v6511_v39, %v6223_v53  ;;  %v6516_v2 = vpop.f32.mrf.mxu1  ;;  %v8264_v6 = vcombine.low %v4276_v48, %v4280_v42  ;;  %v4293_v23 = vld [vmem:[%s14178_s1 + $0x718] sm:$0xff]  ;;  %v8274_v42 = vcombine.low %v4285_v60, %v4289_v54 }
 0x562   :  { %6420 = vmatprep.mubr.bf16.mxu0 %v8265_v40  ;;  %v6225_v50 = vpop.f32.mrf.mxu0  ;;  %v4297_v39 = vld [vmem:[%s14178_s1 + $0x738] sm:$0xff]  ;;  %v4296_v2 = vld [vmem:[%s14178_s1 + $0x730] sm:$0xff] }
 0x563   :  { %v6226_v62 = vadd.f32 %v6225_v50, %v12688_v9 }
 0x564   :  { %v6227_v49 = vpop.f32.mrf.mxu0 }
 0x565   :  { %v6519_v46 = vpop.f32.mrf.mxu1  ;;  %v13407_v40 = vadd.f32 %v6514_v51, %v6226_v62  ;;  %v4292_v51 = vld [vmem:[%s14178_s1 + $0x710] sm:$0xff] }
 0x566   :  { %6710 = vmatmul.mubr.bf16.gmra.mxu1 %v8266_v52  ;;  %v8281_v60 = vcombine.high %v4292_v51, %v4296_v2 }
 0x567   :  { %6717 = vmatprep.mubr.bf16.mxu1 %v8275_v16  ;;  %v6521_v1 = vpop.f32.mrf.mxu1  ;;  %v8283_v16 = vcombine.high %v4293_v23, %v4297_v39 }
 0x568   :  { %v6230_v53 = vpop.f32.mrf.mxu0 }
 0x569   :  { %6421 = vmatmul.mubr.bf16.gmra.mxu0 %v8264_v6  ;;  %v6231_v9 = vadd.f32 %v6230_v53, %v12697_v58  ;;  %v6522_v48 = vpop.f32.mrf.mxu1  ;;  %v8272_v6 = vcombine.low %v4284_v61, %v4288_v4  ;;  %v8282_v4 = vcombine.low %v4293_v23, %v4297_v39 }
 0x56a   :  { %6428 = vmatprep.mubr.bf16.mxu0 %v8273_v11  ;;  %v6232_v52 = vpop.f32.mrf.mxu0 }
 0x56b   :  { %v13422_v50 = vadd.f32 %v6519_v46, %v6231_v9  ;;  %v6524_v62 = vpop.f32.mrf.mxu1  ;;  %v4301_v52 = vld [vmem:[%s14178_s1 + $0x758] sm:$0xff] }
 0x56c   :  { %v6233_v49 = vpop.f32.mrf.mxu0  ;;  %v4305_v46 = vld [vmem:[%s14178_s1 + $0x778] sm:$0xff] }
 0x56d   :  { %v6234_v58 = vadd.f32 %v6233_v49, %v12706_v37  ;;  %v6527_v1 = vpop.f32.mrf.mxu1  ;;  %v8291_v62 = vcombine.high %v4301_v52, %v4305_v46 }
 0x56e   :  { %6718 = vmatmul.mubr.bf16.gmra.mxu1 %v8274_v42  ;;  %v6235_v54 = vpop.f32.mrf.mxu0 }
 0x56f   :  { %6725 = vmatprep.mubr.bf16.mxu1 %v8283_v16  ;;  %v13425_v11 = vadd.f32 %v6522_v48, %v6234_v58  ;;  %v6529_v53 = vpop.f32.mrf.mxu1  ;;  %v4300_v48 = vld [vmem:[%s14178_s1 + $0x750] sm:$0xff] }
 0x570   :  { %v6238_v9 = vpop.f32.mrf.mxu0  ;;  %v4304_v16 = vld [vmem:[%s14178_s1 + $0x770] sm:$0xff] }
 0x571   :  { %6429 = vmatmul.mubr.bf16.gmra.mxu0 %v8272_v6  ;;  %v6239_v37 = vadd.f32 %v6238_v9, %v12715_v59  ;;  %v6530_v61 = vpop.f32.mrf.mxu1  ;;  %v8280_v6 = vcombine.low %v4292_v51, %v4296_v2  ;;  %v8289_v23 = vcombine.high %v4300_v48, %v4304_v16  ;;  %v8290_v2 = vcombine.low %v4301_v52, %v4305_v46 }
 0x572   :  { %6436 = vmatprep.mubr.bf16.mxu0 %v8281_v60  ;;  %v6240_v42 = vpop.f32.mrf.mxu0 }
 0x573   :  { %v13440_v49 = vadd.f32 %v6527_v1, %v6239_v37  ;;  %v6532_v58 = vpop.f32.mrf.mxu1  ;;  %v4309_v42 = vld [vmem:[%s14178_s1 + $0x798] sm:$0xff] }
 0x574   :  { %v6241_v54 = vpop.f32.mrf.mxu0  ;;  %v4313_v1 = vld [vmem:[%s14178_s1 + $0x7b8] sm:$0xff] }
 0x575   :  { %v6242_v59 = vadd.f32 %v6241_v54, %v12724_v29  ;;  %v8299_v58 = vcombine.high %v4309_v42, %v4313_v1 }
 0x576   :  { %v6535_v53 = vpop.f32.mrf.mxu1  ;;  %6726 = vmatmul.mubr.bf16.gmra.mxu1 %v8282_v4  ;;  %v6243_v39 = vpop.f32.mrf.mxu0 }
 0x577   :  { %6733 = vmatprep.mubr.bf16.mxu1 %v8291_v62  ;;  %v13443_v60 = vadd.f32 %v6530_v61, %v6242_v59  ;;  %v4308_v61 = vld [vmem:[%s14178_s1 + $0x790] sm:$0xff] }
 0x578   :  { %v6537_v9 = vpop.f32.mrf.mxu1  ;;  %v4312_v62 = vld [vmem:[%s14178_s1 + $0x7b0] sm:$0xff] }
 0x579   :  { %v6246_v37 = vpop.f32.mrf.mxu0  ;;  %6437 = vmatmul.mubr.bf16.gmra.mxu0 %v8280_v6  ;;  %v8288_v9 = vcombine.low %v4300_v48, %v4304_v16  ;;  %v6758_v6 = vmax.f32 %v13386_v28, 0.0  ;;  %v8297_v46 = vcombine.high %v4308_v61, %v4312_v62  ;;  %v4321_v28 = vld [vmem:[%s14178_s1 + $0x7f8] sm:$0xff] }
 0x57a   :  { %v6247_v29 = vadd.f32 %v6246_v37, %v12733_v24  ;;  %v6538_v51 = vpop.f32.mrf.mxu1  ;;  %6444 = vmatprep.mubr.bf16.mxu0 %v8289_v23 }
 0x57b   :  { %v6248_v4 = vpop.f32.mrf.mxu0 }
 0x57c   :  { %v6536_v54 = vadd.f32 %v6535_v53, %v6247_v29  ;;  %v6540_v59 = vpop.f32.mrf.mxu1  ;;  %v4317_v53 = vld [vmem:[%s14178_s1 + $0x7d8] sm:$0xff] }
 0x57d   :  { %v6249_v39 = vpop.f32.mrf.mxu0  ;;  %v8307_v59 = vcombine.high %v4317_v53, %v4321_v28 }
 0x57e   :  { %v6766_v24 = vmax.f32 %v6536_v54, 0.0  ;;  %v6250_v23 = vadd.f32 %v6249_v39, %v12742_v5  ;;  %v6543_v52 = vpop.f32.mrf.mxu1  ;;  %6734 = vmatmul.mubr.bf16.gmra.mxu1 %v8290_v2  ;;  %v6759_v5 = vmax.f32 %v13389_v20, 0.0  ;;  %v4320_v54 = vld [vmem:[%s14178_s1 + $0x7f0] sm:$0xff] }
 0x57f   :  { %v6251_v37 = vpop.f32.mrf.mxu0  ;;  %6741 = vmatprep.mubr.bf16.mxu1 %v8299_v58  ;;  %v8298_v58 = vcombine.low %v4309_v42, %v4313_v1 }
 0x580   :  { %v13460_v4 = vmax.f32 %v6758_v6, %v6766_v24  ;;  %v6539_v36 = vadd.f32 %v6538_v51, %v6250_v23  ;;  %v6545_v43 = vpop.f32.mrf.mxu1  ;;  %v8296_v6 = vcombine.low %v4308_v61, %v4312_v62  ;;  %v8306_v62 = vcombine.low %v4317_v53, %v4321_v28 }
 0x581   :  { %v6254_v48 = vpop.f32.mrf.mxu0  ;;  %6445 = vmatmul.mubr.bf16.gmra.mxu0 %v8288_v9  ;;  %v4316_v43 = vld [vmem:[%s14178_s1 + $0x7d0] sm:$0xff] }
 0x582   :  { %v6767_v16 = vmax.f32 %v6539_v36, 0.0  ;;  %v6255_v29 = vadd.f32 %v6254_v48, %v12751_v47  ;;  %v6546_v2 = vpop.f32.mrf.mxu1  ;;  %6452 = vmatprep.mubr.bf16.mxu0 %v8297_v46  ;;  %v6760_v47 = vmax.f32 %v13404_v19, 0.0  ;;  %v8305_v23 = vcombine.high %v4316_v43, %v4320_v54 }
 0x583   :  { %v6256_v51 = vpop.f32.mrf.mxu0 }
 0x584   :  { %v13476_v39 = vmax.f32 %v6759_v5, %v6767_v16  ;;  %v6544_v9 = vadd.f32 %v6543_v52, %v6255_v29  ;;  %v6548_v20 = vpop.f32.mrf.mxu1  ;;  %v6761_v52 = vmax.f32 %v13407_v40, 0.0 }
 0x585   :  { %v6257_v36 = vpop.f32.mrf.mxu0  ;;  %v8304_v20 = vcombine.low %v4316_v43, %v4320_v54 }
 0x586   :  { %v6768_v24 = vmax.f32 %v6544_v9, 0.0  ;;  %v6258_v42 = vadd.f32 %v6257_v36, %v12760_v14  ;;  %v6551_v1 = vpop.f32.mrf.mxu1  ;;  %6742 = vmatmul.mubr.bf16.gmra.mxu1 %v8298_v58 }
 0x587   :  { %v6259_v46 = vpop.f32.mrf.mxu0  ;;  %6749 = vmatprep.mubr.bf16.mxu1 %v8307_v59 }
 0x588   :  { %v13480_v37 = vmax.f32 %v6760_v47, %v6768_v24  ;;  %v6547_v48 = vadd.f32 %v6546_v2, %v6258_v42  ;;  %v6553_v51 = vpop.f32.mrf.mxu1  ;;  %v6762_v2 = vmax.f32 %v13422_v50, 0.0  ;;  %v6763_v42 = vmax.f32 %v13425_v11, 0.0 }
 0x589   :  { %v6262_v5 = vpop.f32.mrf.mxu0  ;;  %6453 = vmatmul.mubr.bf16.gmra.mxu0 %v8296_v6  ;;  %v6764_v51 = vmax.f32 %v13440_v49, 0.0 }
 0x58a   :  { %v6769_v16 = vmax.f32 %v6547_v48, 0.0  ;;  %v6263_v61 = vadd.f32 %v6262_v5, %v12769_v63  ;;  %v6554_v19 = vpop.f32.mrf.mxu1  ;;  %6460 = vmatprep.mubr.bf16.mxu0 %v8305_v23 }
 0x58b   :  { %v6264_v14 = vpop.f32.mrf.mxu0 }
 0x58c   :  { %v13484_v29 = vmax.f32 %v6761_v52, %v6769_v16  ;;  %v6552_v58 = vadd.f32 %v6551_v1, %v6263_v61  ;;  %v6556_v9 = vpop.f32.mrf.mxu1  ;;  %v6765_v14 = vmax.f32 %v13443_v60, 0.0 }
 0x58d   :  { %v6265_v59 = vpop.f32.mrf.mxu0 }
 0x58e   :  { %v6770_v36 = vmax.f32 %v6552_v58, 0.0  ;;  %v6266_v6 = vadd.f32 %v6265_v59, %v12778_v57  ;;  %v6559_v47 = vpop.f32.mrf.mxu1  ;;  %6750 = vmatmul.mubr.bf16.gmra.mxu1 %v8306_v62 }
 0x58f   :  { %v6267_v40 = vpop.f32.mrf.mxu0  ;;  %8972 = vmatprep.mubr.msk.f32.mxu1 %vm9502_vm0, %v14555_v32 }
 0x590   :  { %v13490_v63 = vmax.f32 %v6762_v2, %v6770_v36  ;;  %v6555_v53 = vadd.f32 %v6554_v19, %v6266_v6  ;;  %v6561_v28 = vpop.f32.mrf.mxu1 }
 0x591   :  { %v6270_v24 = vpop.f32.mrf.mxu0  ;;  %6461 = vmatmul.mubr.bf16.gmra.mxu0 %v8304_v20 }
 0x592   :  { %v6771_v43 = vmax.f32 %v6555_v53, 0.0  ;;  %v6271_v50 = vadd.f32 %v6270_v24, %v12787_v17  ;;  %v6562_v54 = vpop.f32.mrf.mxu1  ;;  %8937 = vmatprep.mubr.msk.f32.mxu0 %vm9502_vm0, %v14555_v32 }
 0x593   :  { %v6272_v57 = vpop.f32.mrf.mxu0 }
 0x594   :  { %v13496_v1 = vmax.f32 %v6763_v42, %v6771_v43  ;;  %v6560_v23 = vadd.f32 %v6559_v47, %v6271_v50  ;;  %v6564_v46 = vpop.f32.mrf.mxu1 }
 0x595   :  { %v6273_v48 = vpop.f32.mrf.mxu0 }
 0x596   :  { %v6772_v5 = vmax.f32 %v6560_v23, 0.0  ;;  %v6274_v52 = vadd.f32 %v6273_v48, %v12803_v25  ;;  %v6567_v16 = vpop.f32.mrf.mxu1 }
 0x597   :  { %v6275_v11 = vpop.f32.mrf.mxu0 }
 0x598   :  { %v13500_v61 = vmax.f32 %v6764_v51, %v6772_v5  ;;  %v6563_v17 = vadd.f32 %v6562_v54, %v6274_v52  ;;  %v6569_v19 = vpop.f32.mrf.mxu1 }
 0x599   :  { %v6278_v62 = vpop.f32.mrf.mxu0 }
 0x59a   :  { %v6773_v58 = vmax.f32 %v6563_v17, 0.0  ;;  %v6279_v9 = vadd.f32 %v6278_v62, %v12826_v38  ;;  %v6570_v59 = vpop.f32.mrf.mxu1 }
 0x59b   :  { %v6280_v20 = vpop.f32.mrf.mxu0 }
 0x59c   :  { %v13504_v2 = vmax.f32 %v6765_v14, %v6773_v58  ;;  %v6568_v49 = vadd.f32 %v6567_v16, %v6279_v9  ;;  %v6572_v36 = vpop.f32.mrf.mxu1 }
 0x59d   :  { %v6281_v6 = vpop.f32.mrf.mxu0 }
 0x59e   :  { %v6774_v25 = vmax.f32 %v6568_v49, 0.0  ;;  %v6282_v47 = vadd.f32 %v6281_v6, %v12849_v15  ;;  %v6575_v40 = vpop.f32.mrf.mxu1 }
 0x59f   :  { %v6283_v53 = vpop.f32.mrf.mxu0 }
 0x5a0   :  { %v13508_v28 = vmax.f32 %v13460_v4, %v6774_v25  ;;  %v6571_v24 = vadd.f32 %v6570_v59, %v6282_v47  ;;  %v6577_v60 = vpop.f32.mrf.mxu1 }
 0x5a1   :  { %v6286_v42 = vpop.f32.mrf.mxu0 }
 0x5a2   :  { %v6775_v43 = vmax.f32 %v6571_v24, 0.0  ;;  %v6287_v38 = vadd.f32 %v6286_v42, %v12873_v13  ;;  %v6578_v50 = vpop.f32.mrf.mxu1 }
 0x5a3   :  { %v6288_v54 = vpop.f32.mrf.mxu0 }
 0x5a4   :  { %v13512_v57 = vmax.f32 %v13476_v39, %v6775_v43  ;;  %v6576_v23 = vadd.f32 %v6575_v40, %v6287_v38  ;;  %v6580_v46 = vpop.f32.mrf.mxu1 }
 0x5a5   :  { %v6289_v48 = vpop.f32.mrf.mxu0 }
 0x5a6   :  { %v6776_v15 = vmax.f32 %v6576_v23, 0.0  ;;  %v6290_v51 = vadd.f32 %v6289_v48, %v12894_v55  ;;  %v6583_v5 = vpop.f32.mrf.mxu1 }
 0x5a7   :  { %v6291_v4 = vpop.f32.mrf.mxu0 }
 0x5a8   :  { %v13516_v52 = vmax.f32 %v13480_v37, %v6776_v15  ;;  %v6579_v16 = vadd.f32 %v6578_v50, %v6290_v51  ;;  %v6585_v11 = vpop.f32.mrf.mxu1 }
 0x5a9   :  { %v6294_v17 = vpop.f32.mrf.mxu0 }
 0x5aa   :  { %v6777_v13 = vmax.f32 %v6579_v16, 0.0  ;;  %v6295_v19 = vadd.f32 %v6294_v17, %v12917_v8  ;;  %v6586_v62 = vpop.f32.mrf.mxu1 }
 0x5ab   :  { %v6296_v39 = vpop.f32.mrf.mxu0 }
 0x5ac   :  { %v13520_v14 = vmax.f32 %v13484_v29, %v6777_v13  ;;  %v6584_v58 = vadd.f32 %v6583_v5, %v6295_v19  ;;  %v6588_v9 = vpop.f32.mrf.mxu1 }
 0x5ad   :  { %v6297_v59 = vpop.f32.mrf.mxu0 }
 0x5ae   :  { %v6778_v55 = vmax.f32 %v6584_v58, 0.0  ;;  %v6298_v20 = vadd.f32 %v6297_v59, %v12942_v7  ;;  %v6591_v49 = vpop.f32.mrf.mxu1 }
 0x5af   :  { %v6299_v37 = vpop.f32.mrf.mxu0 }
 0x5b0   :  { %v13524_v36 = vmax.f32 %v13490_v63, %v6778_v55  ;;  %v6587_v6 = vadd.f32 %v6586_v62, %v6298_v20  ;;  %v6593_v25 = vpop.f32.mrf.mxu1 }
 0x5b1   :  { %v6302_v47 = vpop.f32.mrf.mxu0 }
 0x5b2   :  { %v6779_v8 = vmax.f32 %v6587_v6, 0.0  ;;  %v6303_v40 = vadd.f32 %v6302_v47, %v12965_v21  ;;  %v6594_v53 = vpop.f32.mrf.mxu1 }
 0x5b3   :  { %v6304_v29 = vpop.f32.mrf.mxu0 }
 0x5b4   :  { %v13528_v24 = vmax.f32 %v13496_v1, %v6779_v8  ;;  %v6592_v60 = vadd.f32 %v6591_v49, %v6303_v40  ;;  %v6596_v42 = vpop.f32.mrf.mxu1 }
 0x5b5   :  { %v6305_v43 = vpop.f32.mrf.mxu0 }
 0x5b6   :  { %v6780_v7 = vmax.f32 %v6592_v60, 0.0  ;;  %v6306_v38 = vadd.f32 %v6305_v43, %v12986_v33  ;;  %v6599_v50 = vpop.f32.mrf.mxu1 }
 0x5b7   :  { %v6307_v63 = vpop.f32.mrf.mxu0 }
 0x5b8   :  { %v13532_v54 = vmax.f32 %v13500_v61, %v6780_v7  ;;  %v6595_v23 = vadd.f32 %v6594_v53, %v6306_v38  ;;  %v6601_v46 = vpop.f32.mrf.mxu1 }
 0x5b9   :  { %v6310_v48 = vpop.f32.mrf.mxu0 }
 0x5ba   :  { %v6781_v21 = vmax.f32 %v6595_v23, 0.0  ;;  %v6311_v15 = vadd.f32 %v6310_v48, %v13005_v18  ;;  %v6602_v51 = vpop.f32.mrf.mxu1 }
 0x5bb   :  { %v6312_v1 = vpop.f32.mrf.mxu0 }
 0x5bc   :  { %v13536_v5 = vmax.f32 %v13504_v2, %v6781_v21  ;;  %v6600_v4 = vadd.f32 %v6599_v50, %v6311_v15  ;;  %v6604_v16 = vpop.f32.mrf.mxu1 }
 0x5bd   :  { %v6313_v11 = vpop.f32.mrf.mxu0 }
 0x5be   :  { %v6782_v33 = vmax.f32 %v6600_v4, 0.0  ;;  %v6314_v17 = vadd.f32 %v6313_v11, %v13025_v3  ;;  %v6607_v13 = vpop.f32.mrf.mxu1 }
 0x5bf   :  { %v6315_v61 = vpop.f32.mrf.mxu0 }
 0x5c0   :  { %v13540_v19 = vmax.f32 %v13508_v28, %v6782_v33  ;;  %v6603_v62 = vadd.f32 %v6602_v51, %v6314_v17  ;;  %v6609_v39 = vpop.f32.mrf.mxu1 }
 0x5c1   :  { %v6318_v58 = vpop.f32.mrf.mxu0 }
 0x5c2   :  { %v6783_v18 = vmax.f32 %v6603_v62, 0.0  ;;  %v6319_v9 = vadd.f32 %v6318_v58, %v13039_v10  ;;  %v6610_v59 = vpop.f32.mrf.mxu1 }
 0x5c3   :  { %v6320_v2 = vpop.f32.mrf.mxu0 }
 0x5c4   :  { %v13544_v55 = vmax.f32 %v13512_v57, %v6783_v18  ;;  %v6608_v20 = vadd.f32 %v6607_v13, %v6319_v9  ;;  %v6612_v49 = vpop.f32.mrf.mxu1 }
 0x5c5   :  { %v6321_v37 = vpop.f32.mrf.mxu0 }
 0x5c6   :  { %v6784_v3 = vmax.f32 %v6608_v20, 0.0  ;;  %v6322_v6 = vadd.f32 %v6321_v37, %v13048_v0  ;;  %v6615_v25 = vpop.f32.mrf.mxu1 }
 0x5c7   :  { %v6323_v28 = vpop.f32.mrf.mxu0 }
 0x5c8   :  { %v13548_v47 = vmax.f32 %v13516_v52, %v6784_v3  ;;  %v6611_v8 = vadd.f32 %v6610_v59, %v6322_v6  ;;  %v6617_v40 = vpop.f32.mrf.mxu1 }
 0x5c9   :  { %v6326_v53 = vpop.f32.mrf.mxu0 }
 0x5ca   :  { %v6785_v10 = vmax.f32 %v6611_v8, 0.0  ;;  %v6327_v29 = vadd.f32 %v6326_v53, %v13057_v44  ;;  %v6618_v60 = vpop.f32.mrf.mxu1 }
 0x5cb   :  { %v6328_v57 = vpop.f32.mrf.mxu0 }
 0x5cc   :  { %v13552_v42 = vmax.f32 %v13520_v14, %v6785_v10  ;;  %v6616_v43 = vadd.f32 %v6615_v25, %v6327_v29  ;;  %v6620_v7 = vpop.f32.mrf.mxu1 }
 0x5cd   :  { %v6329_v38 = vpop.f32.mrf.mxu0 }
 0x5ce   :  { %v6786_v0 = vmax.f32 %v6616_v43, 0.0  ;;  %v6330_v50 = vadd.f32 %v6329_v38, %v13066_v34  ;;  %v6623_v63 = vpop.f32.mrf.mxu1 }
 0x5cf   :  { %v6331_v52 = vpop.f32.mrf.mxu0 }
 0x5d0   :  { %v13556_v23 = vmax.f32 %v13524_v36, %v6786_v0  ;;  %v6619_v46 = vadd.f32 %v6618_v60, %v6330_v50  ;;  %v6625_v48 = vpop.f32.mrf.mxu1 }
 0x5d1   :  { %v6334_v21 = vpop.f32.mrf.mxu0 }
 0x5d2   :  { %v6787_v44 = vmax.f32 %v6619_v46, 0.0  ;;  %v6335_v15 = vadd.f32 %v6334_v21, %v13075_v30  ;;  %v6626_v51 = vpop.f32.mrf.mxu1 }
 0x5d3   :  { %v6336_v14 = vpop.f32.mrf.mxu0 }
 0x5d4   :  { %v13560_v1 = vmax.f32 %v13528_v24, %v6787_v44  ;;  %v6624_v4 = vadd.f32 %v6623_v63, %v6335_v15  ;;  %v6628_v16 = vpop.f32.mrf.mxu1 }
 0x5d5   :  { %v6337_v11 = vpop.f32.mrf.mxu0 }
 0x5d6   :  { %v6788_v34 = vmax.f32 %v6624_v4, 0.0  ;;  %v6338_v33 = vadd.f32 %v6337_v11, %v13084_v41  ;;  %v6631_v17 = vpop.f32.mrf.mxu1 }
 0x5d7   :  { %v6339_v36 = vpop.f32.mrf.mxu0 }
 0x5d8   :  { %v13564_v13 = vmax.f32 %v13532_v54, %v6788_v34  ;;  %v6627_v61 = vadd.f32 %v6626_v51, %v6338_v33  ;;  %v6633_v62 = vpop.f32.mrf.mxu1 }
 0x5d9   :  { %v6342_v39 = vpop.f32.mrf.mxu0 }
 0x5da   :  { %v6789_v30 = vmax.f32 %v6627_v61, 0.0  ;;  %v6343_v58 = vadd.f32 %v6342_v39, %v13093_v27  ;;  %v6634_v18 = vpop.f32.mrf.mxu1 }
 0x5db   :  { %v6344_v24 = vpop.f32.mrf.mxu0 }
 0x5dc   :  { %v13568_v9 = vmax.f32 %v13536_v5, %v6789_v30  ;;  %v6632_v59 = vadd.f32 %v6631_v17, %v6343_v58  ;;  %v6636_v2 = vpop.f32.mrf.mxu1 }
 0x5dd   :  { %v6345_v20 = vpop.f32.mrf.mxu0  ;;  %v14829_v2 = vld [vmem:[#allocation6_spill] sm:$0xff] }
 0x5de   :  { %v6790_v41 = vmax.f32 %v6632_v59, 0.0  ;;  %v6346_v49 = vadd.f32 %v6345_v20, %v13102_v31  ;;  %v6639_v37 = vpop.f32.mrf.mxu1 }
 0x5df   :  { %v6347_v54 = vpop.f32.mrf.mxu0 }
 0x5e0   :  { %v13572_v3 = vmax.f32 %v13540_v19, %v6790_v41  ;;  %v6635_v6 = vadd.f32 %v6634_v18, %v6346_v49  ;;  %v6641_v25 = vpop.f32.mrf.mxu1 }
 0x5e1   :  { %v6350_v28 = vpop.f32.mrf.mxu0  ;;  %v14830_v25 = vld [vmem:[#allocation9_spill] sm:$0xff] }
 0x5e2   :  { %v6791_v27 = vmax.f32 %v6635_v6, 0.0  ;;  %v6351_v8 = vadd.f32 %v6350_v28, %v13111_v56  ;;  %v6642_v40 = vpop.f32.mrf.mxu1 }
 0x5e3   :  { %v6352_v5 = vpop.f32.mrf.mxu0 }
 0x5e4   :  { %v13576_v53 = vmax.f32 %v13544_v55, %v6791_v27  ;;  %v6640_v10 = vadd.f32 %v6639_v37, %v6351_v8  ;;  %v6644_v29 = vpop.f32.mrf.mxu1 }
 0x5e5   :  { %v6353_v60 = vpop.f32.mrf.mxu0 }
 0x5e6   :  { %v6792_v31 = vmax.f32 %v6640_v10, 0.0  ;;  %v6354_v57 = vadd.f32 %v6353_v60, %v13120_v45  ;;  %v6647_v43 = vpop.f32.mrf.mxu1  ;;  %v14831_v60 = vld [vmem:[#allocation8_spill] sm:$0xff] }
 0x5e7   :  { %v6355_v19 = vpop.f32.mrf.mxu0 }
 0x5e8   :  { %v13580_v7 = vmax.f32 %v13548_v47, %v6792_v31  ;;  %v6643_v38 = vadd.f32 %v6642_v40, %v6354_v57  ;;  %v6649_v0 = vpop.f32.mrf.mxu1 }
 0x5e9   :  { %v6358_v50 = vpop.f32.mrf.mxu0 }
 0x5ea   :  { %v6793_v56 = vmax.f32 %v6643_v38, 0.0  ;;  %v6359_v63 = vadd.f32 %v6358_v50, %v13129_v12  ;;  %v6650_v52 = vpop.f32.mrf.mxu1 }
 0x5eb   :  { %v6360_v55 = vpop.f32.mrf.mxu0 }
 0x5ec   :  { %v13584_v46 = vmax.f32 %v13552_v42, %v6793_v56  ;;  %v6648_v48 = vadd.f32 %v6647_v43, %v6359_v63  ;;  %v6652_v21 = vpop.f32.mrf.mxu1  ;;  %v14832_v56 = vld [vmem:[#allocation11_spill] sm:$0xff] }
 0x5ed   :  { %v6361_v44 = vpop.f32.mrf.mxu0 }
 0x5ee   :  { %v6794_v45 = vmax.f32 %v6648_v48, 0.0  ;;  %v6362_v15 = vadd.f32 %v6361_v44, %v13138_v26  ;;  %v6655_v51 = vpop.f32.mrf.mxu1 }
 0x5ef   :  { %v6363_v47 = vpop.f32.mrf.mxu0 }
 0x5f0   :  { %v13588_v14 = vmax.f32 %v13556_v23, %v6794_v45  ;;  %v6651_v4 = vadd.f32 %v6650_v52, %v6362_v15  ;;  %v6657_v16 = vpop.f32.mrf.mxu1  ;;  %v14833_v15 = vld [vmem:[#allocation10_spill] sm:$0xff] }
 0x5f1   :  { %v6366_v11 = vpop.f32.mrf.mxu0 }
 0x5f2   :  { %v6795_v12 = vmax.f32 %v6651_v4, 0.0  ;;  %v6367_v34 = vadd.f32 %v6366_v11, %v13152_v35  ;;  %v6658_v33 = vpop.f32.mrf.mxu1 }
 0x5f3   :  { %v6368_v42 = vpop.f32.mrf.mxu0 }
 0x5f4   :  { %v13592_v17 = vmax.f32 %v13560_v1, %v6795_v12  ;;  %v6656_v36 = vadd.f32 %v6655_v51, %v6367_v34  ;;  %v6660_v61 = vpop.f32.mrf.mxu1 }
 0x5f5   :  { %v6369_v62 = vpop.f32.mrf.mxu0 }
 0x5f6   :  { %v6796_v26 = vmax.f32 %v6656_v36, 0.0  ;;  %v6370_v39 = vadd.f32 %v6369_v62, %v13161_v22  ;;  %v6663_v30 = vpop.f32.mrf.mxu1 }
 0x5f7   :  { %v6371_v23 = vpop.f32.mrf.mxu0 }
 0x5f8   :  { %v13596_v58 = vmax.f32 %v13564_v13, %v6796_v26  ;;  %v6659_v18 = vadd.f32 %v6658_v33, %v6370_v39  ;;  %v6665_v24 = vpop.f32.mrf.mxu1  ;;  %v14834_v33 = vld [vmem:[#allocation13_spill] sm:$0xff]  ;;  %v14835_v23 = vld [vmem:[#allocation12_spill] sm:$0xff] }
 0x5f9   :  { %v6374_v59 = vpop.f32.mrf.mxu0 }
 0x5fa   :  { %v6797_v35 = vmax.f32 %v6659_v18, 0.0  ;;  %v6375_v20 = vadd.f32 %v6374_v59, %v14829_v2  ;;  %v6666_v41 = vpop.f32.mrf.mxu1 }
 0x5fb   :  { %v6376_v1 = vpop.f32.mrf.mxu0 }
 0x5fc   :  { %v13600_v49 = vmax.f32 %v13568_v9, %v6797_v35  ;;  %v6664_v37 = vadd.f32 %v6663_v30, %v6375_v20  ;;  %v6668_v54 = vpop.f32.mrf.mxu1  ;;  %v14836_v1 = vld [vmem:[#allocation15_spill] sm:$0xff] }
 0x5fd   :  { %v6377_v6 = vpop.f32.mrf.mxu0 }
 0x5fe   :  { %v6798_v22 = vmax.f32 %v6664_v37, 0.0  ;;  %v6378_v28 = vadd.f32 %v6377_v6, %v14830_v25  ;;  %v6671_v27 = vpop.f32.mrf.mxu1 }
 0x5ff   :  { %v6379_v13 = vpop.f32.mrf.mxu0 }
 0x600   :  { %v13604_v8 = vmax.f32 %v13572_v3, %v6798_v22  ;;  %v6667_v40 = vadd.f32 %v6666_v41, %v6378_v28  ;;  %v6673_v5 = vpop.f32.mrf.mxu1  ;;  %v14837_v13 = vld [vmem:[#allocation14_spill] sm:$0xff] }
 0x601   :  { %v6382_v10 = vpop.f32.mrf.mxu0 }
 0x602   :  { %v6799_v29 = vmax.f32 %v6667_v40, 0.0  ;;  %v6383_v31 = vadd.f32 %v6382_v10, %v14831_v60  ;;  %v6674_v57 = vpop.f32.mrf.mxu1 }
 0x603   :  { %v6384_v9 = vpop.f32.mrf.mxu0 }
 0x604   :  { %v13608_v43 = vmax.f32 %v13576_v53, %v6799_v29  ;;  %v6672_v19 = vadd.f32 %v6671_v27, %v6383_v31  ;;  %v6676_v38 = vpop.f32.mrf.mxu1  ;;  %v14838_v9 = vld [vmem:[#allocation17_spill] sm:$0xff] }
 0x605   :  { %v6385_v0 = vpop.f32.mrf.mxu0 }
 0x606   :  { %v6800_v50 = vmax.f32 %v6672_v19, 0.0  ;;  %v6386_v63 = vadd.f32 %v6385_v0, %v14832_v56  ;;  %v6679_v52 = vpop.f32.mrf.mxu1 }
 0x607   :  { %v6387_v3 = vpop.f32.mrf.mxu0 }
 0x608   :  { %v13612_v55 = vmax.f32 %v13580_v7, %v6800_v50  ;;  %v6675_v48 = vadd.f32 %v6674_v57, %v6386_v63  ;;  %v6681_v21 = vpop.f32.mrf.mxu1  ;;  %v14839_v3 = vld [vmem:[#allocation16_spill] sm:$0xff] }
 0x609   :  { %v6390_v44 = vpop.f32.mrf.mxu0 }
 0x60a   :  { %v6801_v45 = vmax.f32 %v6675_v48, 0.0  ;;  %v6391_v51 = vadd.f32 %v6390_v44, %v14833_v15  ;;  %v6682_v47 = vpop.f32.mrf.mxu1 }
 0x60b   :  { %v6392_v53 = vpop.f32.mrf.mxu0 }
 0x60c   :  { %v13616_v4 = vmax.f32 %v13584_v46, %v6801_v45  ;;  %v6680_v16 = vadd.f32 %v6679_v52, %v6391_v51  ;;  %v6684_v11 = vpop.f32.mrf.mxu1  ;;  %v14840_v53 = vld [vmem:[#allocation19_spill] sm:$0xff] }
 0x60d   :  { %v6393_v12 = vpop.f32.mrf.mxu0 }
 0x60e   :  { %v6802_v34 = vmax.f32 %v6680_v16, 0.0  ;;  %v6394_v42 = vadd.f32 %v6393_v12, %v14834_v33  ;;  %v6687_v36 = vpop.f32.mrf.mxu1 }
 0x60f   :  { %v6395_v7 = vpop.f32.mrf.mxu0 }
 0x610   :  { %v13620_v61 = vmax.f32 %v13588_v14, %v6802_v34  ;;  %v6683_v62 = vadd.f32 %v6682_v47, %v6394_v42  ;;  %v6689_v26 = vpop.f32.mrf.mxu1  ;;  %v14841_v7 = vld [vmem:[#allocation18_spill] sm:$0xff] }
 0x611   :  { %v6398_v39 = vpop.f32.mrf.mxu0 }
 0x612   :  { %v6803_v30 = vmax.f32 %v6683_v62, 0.0  ;;  %v6399_v18 = vadd.f32 %v6398_v39, %v14835_v23  ;;  %v6690_v24 = vpop.f32.mrf.mxu1 }
 0x613   :  { %v6400_v46 = vpop.f32.mrf.mxu0 }
 0x614   :  { %v13624_v59 = vmax.f32 %v13592_v17, %v6803_v30  ;;  %v6688_v35 = vadd.f32 %v6687_v36, %v6399_v18  ;;  %v6692_v2 = vpop.f32.mrf.mxu1  ;;  %v14842_v46 = vld [vmem:[#allocation21_spill] sm:$0xff] }
 0x615   :  { %v6401_v20 = vpop.f32.mrf.mxu0 }
 0x616   :  { %v6804_v41 = vmax.f32 %v6688_v35, 0.0  ;;  %v6402_v37 = vadd.f32 %v6401_v20, %v14836_v1  ;;  %v6695_v54 = vpop.f32.mrf.mxu1 }
 0x617   :  { %v6403_v14 = vpop.f32.mrf.mxu0 }
 0x618   :  { %v13628_v6 = vmax.f32 %v13596_v58, %v6804_v41  ;;  %v6691_v22 = vadd.f32 %v6690_v24, %v6402_v37  ;;  %v6697_v25 = vpop.f32.mrf.mxu1  ;;  %v14843_v14 = vld [vmem:[#allocation20_spill] sm:$0xff] }
 0x619   :  { %v6406_v28 = vpop.f32.mrf.mxu0 }
 0x61a   :  { %v6805_v27 = vmax.f32 %v6691_v22, 0.0  ;;  %v6407_v40 = vadd.f32 %v6406_v28, %v14837_v13  ;;  %v6698_v5 = vpop.f32.mrf.mxu1 }
 0x61b   :  { %v6408_v17 = vpop.f32.mrf.mxu0 }
 0x61c   :  { %v13632_v10 = vmax.f32 %v13600_v49, %v6805_v27  ;;  %v6696_v29 = vadd.f32 %v6695_v54, %v6407_v40  ;;  %v6700_v60 = vpop.f32.mrf.mxu1  ;;  %v14844_v17 = vld [vmem:[#allocation23_spill] sm:$0xff] }
 0x61d   :  { %v6409_v31 = vpop.f32.mrf.mxu0 }
 0x61e   :  { %v6806_v57 = vmax.f32 %v6696_v29, 0.0  ;;  %v6410_v19 = vadd.f32 %v6409_v31, %v14838_v9  ;;  %v6703_v38 = vpop.f32.mrf.mxu1 }
 0x61f   :  { %v6411_v58 = vpop.f32.mrf.mxu0 }
 0x620   :  { %v13636_v0 = vmax.f32 %v13604_v8, %v6806_v57  ;;  %v6699_v50 = vadd.f32 %v6698_v5, %v6410_v19  ;;  %v6705_v56 = vpop.f32.mrf.mxu1  ;;  %v14845_v58 = vld [vmem:[#allocation22_spill] sm:$0xff] }
 0x621   :  { %v6414_v63 = vpop.f32.mrf.mxu0 }
 0x622   :  { %v6807_v52 = vmax.f32 %v6699_v50, 0.0  ;;  %v6415_v48 = vadd.f32 %v6414_v63, %v14839_v3  ;;  %v6706_v21 = vpop.f32.mrf.mxu1 }
 0x623   :  { %v6416_v49 = vpop.f32.mrf.mxu0 }
 0x624   :  { %v13640_v44 = vmax.f32 %v13608_v43, %v6807_v52  ;;  %v6704_v45 = vadd.f32 %v6703_v38, %v6415_v48  ;;  %v6708_v15 = vpop.f32.mrf.mxu1  ;;  %v14846_v49 = vld [vmem:[#allocation25_spill] sm:$0xff] }
 0x625   :  { %v6417_v51 = vpop.f32.mrf.mxu0 }
 0x626   :  { %v6808_v47 = vmax.f32 %v6704_v45, 0.0  ;;  %v6418_v16 = vadd.f32 %v6417_v51, %v14840_v53  ;;  %v6711_v11 = vpop.f32.mrf.mxu1 }
 0x627   :  { %v6419_v8 = vpop.f32.mrf.mxu0 }
 0x628   :  { %v6707_v12 = vadd.f32 %v6706_v21, %v6418_v16  ;;  %v6713_v34 = vpop.f32.mrf.mxu1  ;;  %v13644_v33 = vmax.f32 %v13612_v55, %v6808_v47  ;;  %v14847_v8 = vld [vmem:[#allocation24_spill] sm:$0xff] }
 0x629   :  { %v6422_v42 = vpop.f32.mrf.mxu0 }
 0x62a   :  { %v6809_v36 = vmax.f32 %v6707_v12, 0.0  ;;  %v6423_v62 = vadd.f32 %v6422_v42, %v14841_v7  ;;  %v6714_v26 = vpop.f32.mrf.mxu1  ;;  %v14848_v42 = vld [vmem:[#allocation86_spill] sm:$0xff] }
 0x62b   :  { %v6424_v43 = vpop.f32.mrf.mxu0 }
 0x62c   :  { %v6712_v39 = vadd.f32 %v6711_v11, %v6423_v62  ;;  %v6716_v30 = vpop.f32.mrf.mxu1  ;;  %v13648_v23 = vmax.f32 %v13616_v4, %v6809_v36  ;;  %v14849_v36 = vunpack.c.h.bf16 %v14848_v42 }
 0x62d   :  { %v6425_v18 = vpop.f32.mrf.mxu0  ;;  %v14851_v30 = vld [vmem:[#allocation27_spill] sm:$0xff] }
 0x62e   :  { %v6810_v24 = vmax.f32 %v6712_v39, 0.0  ;;  %v6426_v35 = vadd.f32 %v6425_v18, %v14842_v46  ;;  %v6719_v2 = vpop.f32.mrf.mxu1  ;;  %v14852_v46 = vld [vmem:[#allocation87_spill] sm:$0xff] }
 0x62f   :  { %v6427_v20 = vpop.f32.mrf.mxu0 }
 0x630   :  { %v6715_v41 = vadd.f32 %v6714_v26, %v6426_v35  ;;  %v6721_v55 = vpop.f32.mrf.mxu1  ;;  %v13652_v1 = vmax.f32 %v13620_v61, %v6810_v24  ;;  %v14850_v26 = vunpack.c.l.bf16 %v14848_v42  ;;  %v14853_v35 = vunpack.c.h.bf16 %v14852_v46 }
 0x631   :  { %v6430_v37 = vpop.f32.mrf.mxu0 }
 0x632   :  { %v6811_v54 = vmax.f32 %v6715_v41, 0.0  ;;  %v6431_v22 = vadd.f32 %v6430_v37, %v14843_v14  ;;  %v6722_v25 = vpop.f32.mrf.mxu1 }
 0x633   :  { %v6432_v28 = vpop.f32.mrf.mxu0 }
 0x634   :  { %v6720_v27 = vadd.f32 %v6719_v2, %v6431_v22  ;;  %v6724_v4 = vpop.f32.mrf.mxu1  ;;  %v13656_v13 = vmax.f32 %v13624_v59, %v6811_v54  ;;  %v14854_v2 = vld [vmem:[#allocation88_spill] sm:$0xff]  ;;  %v14856_v54 = vunpack.c.l.bf16 %v14852_v46  ;;  %v14858_v28 = vld [vmem:[#allocation26_spill] sm:$0xff] }
 0x635   :  { %v6433_v40 = vpop.f32.mrf.mxu0  ;;  %v14857_v14 = vunpack.c.l.bf16 %v14854_v2  ;;  %v14859_v4 = vld [vmem:[#allocation89_spill] sm:$0xff]  ;;  %v14882_v46 = vld [vmem:[#allocation96_spill] sm:$0xff] }
 0x636   :  { %v6812_v5 = vmax.f32 %v6720_v27, 0.0  ;;  %v6434_v29 = vadd.f32 %v6433_v40, %v14844_v17  ;;  %v6727_v60 = vpop.f32.mrf.mxu1  ;;  %v14860_v40 = vunpack.c.h.bf16 %v14859_v4 }
 0x637   :  { %v6435_v31 = vpop.f32.mrf.mxu0 }
 0x638   :  { %v6723_v57 = vadd.f32 %v6722_v25, %v6434_v29  ;;  %v6729_v61 = vpop.f32.mrf.mxu1  ;;  %v13660_v9 = vmax.f32 %v13628_v6, %v6812_v5  ;;  %v14861_v5 = vld [vmem:[#allocation90_spill] sm:$0xff] }
 0x639   :  { %v6438_v19 = vpop.f32.mrf.mxu0  ;;  %v14862_v17 = vunpack.c.h.bf16 %v14861_v5  ;;  %v14863_v61 = vunpack.c.l.bf16 %v14859_v4  ;;  %v14892_v4 = vld [vmem:[#allocation99_spill] sm:$0xff] }
 0x63a   :  { %v6813_v38 = vmax.f32 %v6723_v57, 0.0  ;;  %v6439_v50 = vadd.f32 %v6438_v19, %v14845_v58  ;;  %v6730_v56 = vpop.f32.mrf.mxu1  ;;  %v14864_v19 = vunpack.c.l.bf16 %v14861_v5  ;;  %v14894_v5 = vld [vmem:[#allocation100_spill] sm:$0xff] }
 0x63b   :  { %v6440_v63 = vpop.f32.mrf.mxu0 }
 0x63c   :  { %v6728_v52 = vadd.f32 %v6727_v60, %v6439_v50  ;;  %v6732_v59 = vpop.f32.mrf.mxu1  ;;  %v13664_v3 = vmax.f32 %v13632_v10, %v6813_v38  ;;  %v14865_v50 = vld [vmem:[#allocation29_spill] sm:$0xff]  ;;  %v14866_v63 = vld [vmem:[#allocation91_spill] sm:$0xff] }
 0x63d   :  { %v6441_v48 = vpop.f32.mrf.mxu0  ;;  %v14868_v59 = vld [vmem:[#allocation92_spill] sm:$0xff] }
 0x63e   :  { %v6814_v21 = vmax.f32 %v6728_v52, 0.0  ;;  %v6442_v45 = vadd.f32 %v6441_v48, %v14846_v49  ;;  %v6735_v15 = vpop.f32.mrf.mxu1  ;;  %v14867_v52 = vunpack.c.h.bf16 %v14866_v63  ;;  %v14869_v48 = vunpack.c.h.bf16 %v14868_v59 }
 0x63f   :  { %v6443_v51 = vpop.f32.mrf.mxu0 }
 0x640   :  { %v6828_v6 = vmax.f32 %v13636_v0, %v6814_v21  ;;  %v6731_v47 = vadd.f32 %v6730_v56, %v6442_v45  ;;  %v6737_v53 = vpop.f32.mrf.mxu1  ;;  %v14870_v51 = vunpack.c.l.bf16 %v14866_v63 }
 0x641   :  { %v6446_v16 = vpop.f32.mrf.mxu0 }
 0x642   :  { %v6815_v11 = vmax.f32 %v6731_v47, 0.0  ;;  %v6447_v12 = vadd.f32 %v6446_v16, %v14847_v8  ;;  %8973 = vmatmul.mubr.f32.vlgmr.msra.gmra.mxu1 %v6828_v6  ;;  %v6738_v34 = vpop.f32.mrf.mxu1  ;;  %v14871_v6 = vunpack.c.l.bf16 %v14868_v59  ;;  %v14872_v16 = vld [vmem:[#allocation28_spill] sm:$0xff]  ;;  %v14873_v8 = vld [vmem:[#allocation93_spill] sm:$0xff] }
 0x643   :  { %9011 = vmatpush3.msra.mxu1 %v14849_v36  ;;  %v6448_v10 = vpop.f32.mrf.mxu0  ;;  %9042 = vmatprep.mubr.msk.f32.mxu1 %vm9502_vm0, %v14555_v32 }
 0x644   :  { %v6835_v7 = vmax.f32 %v13640_v44, %v6815_v11  ;;  %v6736_v62 = vadd.f32 %v6735_v15, %v6447_v12  ;;  %9012 = vmatprep.subr.mxu1 %v14555_v32  ;;  %v6740_v0 = vpop.f32.mrf.mxu1  ;;  %v14855_v44 = vunpack.c.h.bf16 %v14854_v2  ;;  %v14874_v12 = vunpack.c.h.bf16 %v14873_v8 }
 0x645   :  { %9013 = vmatpush3.msra.mxu1 %v14850_v26  ;;  %v6449_v43 = vpop.f32.mrf.mxu0  ;;  %v14877_v0 = vunpack.c.l.bf16 %v14873_v8 }
 0x646   :  { %v6816_v39 = vmax.f32 %v6736_v62, 0.0  ;;  %v6450_v18 = vadd.f32 %v6449_v43, %v14851_v30  ;;  %9014 = vmatprep.subr.mxu1 %v14555_v32  ;;  %8938 = vmatmul.mubr.f32.vlgmr.msra.gmra.mxu0 %v6835_v7  ;;  %v6743_v24 = vpop.f32.mrf.mxu1  ;;  %v14879_v30 = vld [vmem:[#allocation31_spill] sm:$0xff] }
 0x647   :  { %8976 = vmatpush3.msra.mxu0 %v14853_v35  ;;  %9015 = vmatpush3.msra.mxu1 %v14855_v44  ;;  %v6451_v20 = vpop.f32.mrf.mxu0  ;;  %v14883_v35 = vunpack.c.h.bf16 %v14882_v46 }
 0x648   :  { %v13684_v41 = vmax.f32 %v13644_v33, %v6816_v39  ;;  %v6739_v55 = vadd.f32 %v6738_v34, %v6450_v18  ;;  %8977 = vmatprep.subr.mxu0 %v14555_v32  ;;  %9016 = vmatprep.subr.mxu1 %v14555_v32  ;;  %v6745_v37 = vpop.f32.mrf.mxu1  ;;  %v14875_v34 = vld [vmem:[#allocation94_spill] sm:$0xff] }
 0x649   :  { %8978 = vmatpush3.msra.mxu0 %v14856_v54  ;;  %9017 = vmatpush3.msra.mxu1 %v14857_v14  ;;  %v6454_v22 = vpop.f32.mrf.mxu0  ;;  %v14876_v42 = vunpack.c.h.bf16 %v14875_v34  ;;  %v14878_v26 = vunpack.c.l.bf16 %v14875_v34  ;;  %v14885_v37 = vunpack.c.l.bf16 %v14882_v46  ;;  %v14886_v14 = vld [vmem:[#allocation97_spill] sm:$0xff] }
 0x64a   :  { %v6817_v25 = vmax.f32 %v6739_v55, 0.0  ;;  %v6455_v27 = vadd.f32 %v6454_v22, %v14858_v28  ;;  %8979 = vmatprep.subr.mxu0 %v14555_v32  ;;  %9018 = vmatprep.subr.mxu1 %v14555_v32  ;;  %v6746_v33 = vpop.f32.mrf.mxu1  ;;  %v14887_v22 = vunpack.c.h.bf16 %v14886_v14 }
 0x64b   :  { %8980 = vmatpush3.msra.mxu0 %v14860_v40  ;;  %9019 = vmatpush3.msra.mxu1 %v14862_v17  ;;  %v6456_v29 = vpop.f32.mrf.mxu0  ;;  %v14893_v40 = vunpack.c.h.bf16 %v14892_v4  ;;  %v14896_v17 = vunpack.c.l.bf16 %v14892_v4  ;;  %v14952_v4 = vld [vmem:[#allocation119_spill] sm:$0xff] }
 0x64c   :  { %v13700_v60 = vmax.f32 %v13648_v23, %v6817_v25  ;;  %v6744_v31 = vadd.f32 %v6743_v24, %v6455_v27  ;;  %8981 = vmatprep.subr.mxu0 %v14555_v32  ;;  %9020 = vmatprep.subr.mxu1 %v14555_v32  ;;  %v6748_v57 = vpop.f32.mrf.mxu1  ;;  %v14890_v27 = vunpack.c.l.bf16 %v14886_v14  ;;  %v14897_v29 = vunpack.c.l.bf16 %v14894_v5 }
 0x64d   :  { %8982 = vmatpush3.msra.mxu0 %v14863_v61  ;;  %9021 = vmatpush3.msra.mxu1 %v14864_v19  ;;  %v6457_v38 = vpop.f32.mrf.mxu0  ;;  %v14900_v61 = vld [vmem:[#allocation102_spill] sm:$0xff] }
 0x64e   :  { %v6818_v58 = vmax.f32 %v6744_v31, 0.0  ;;  %v6458_v56 = vadd.f32 %v6457_v38, %v14865_v50  ;;  %8983 = vmatprep.subr.mxu0 %v14555_v32  ;;  %9022 = vmatprep.subr.mxu1 %v14555_v32  ;;  %v6751_v23 = vpop.f32.mrf.mxu1  ;;  %v14898_v31 = vld [vmem:[#allocation101_spill] sm:$0xff]  ;;  %v14901_v19 = vunpack.c.h.bf16 %v14900_v61 }
 0x64f   :  { %8984 = vmatpush3.msra.mxu0 %v14867_v52  ;;  %9023 = vmatpush3.msra.mxu1 %v14869_v48  ;;  %v6459_v21 = vpop.f32.mrf.mxu0  ;;  %v14899_v57 = vunpack.c.h.bf16 %v14898_v31  ;;  %v14902_v38 = vunpack.c.l.bf16 %v14898_v31  ;;  %v14912_v48 = vld [vmem:[#allocation106_spill] sm:$0xff] }
 0x650   :  { %v13716_v49 = vmax.f32 %v13652_v1, %v6818_v58  ;;  %v6747_v45 = vadd.f32 %v6746_v33, %v6458_v56  ;;  %8985 = vmatprep.subr.mxu0 %v14555_v32  ;;  %9024 = vmatprep.subr.mxu1 %v14555_v32  ;;  %v6753_v15 = vpop.f32.mrf.mxu1  ;;  %v14904_v58 = vld [vmem:[#allocation103_spill] sm:$0xff]  ;;  %v14906_v56 = vld [vmem:[#allocation104_spill] sm:$0xff]  ;;  %v14913_v21 = vunpack.c.h.bf16 %v14912_v48 }
 0x651   :  { %8986 = vmatpush3.msra.mxu0 %v14870_v51  ;;  %9025 = vmatpush3.msra.mxu1 %v14871_v6  ;;  %v6462_v47 = vpop.f32.mrf.mxu0  ;;  %v14905_v50 = vunpack.c.h.bf16 %v14904_v58  ;;  %v14908_v63 = vunpack.c.l.bf16 %v14904_v58  ;;  %v14909_v52 = vunpack.c.l.bf16 %v14906_v56  ;;  %v14915_v15 = vunpack.c.l.bf16 %v14912_v48  ;;  %v14916_v51 = vld [vmem:[#allocation107_spill] sm:$0xff] }
 0x652   :  { %v6819_v53 = vmax.f32 %v6747_v45, 0.0  ;;  %v6463_v11 = vadd.f32 %v6462_v47, %v14872_v16  ;;  %8987 = vmatprep.subr.mxu0 %v14555_v32  ;;  %9026 = vmatprep.subr.mxu1 %v14555_v32  ;;  %v6754_v1 = vpop.f32.mrf.mxu1  ;;  %v14917_v6 = vunpack.c.h.bf16 %v14916_v51  ;;  %v14918_v47 = vld [vmem:[#allocation108_spill] sm:$0xff]  ;;  %v14920_v16 = vunpack.c.l.bf16 %v14916_v51 }
 0x653   :  { %8988 = vmatpush3.msra.mxu0 %v14874_v12  ;;  %9027 = vmatpush3.msra.mxu1 %v14876_v42  ;;  %v6464_v36 = vpop.f32.mrf.mxu0  ;;  %v14924_v12 = vld [vmem:[#allocation110_spill] sm:$0xff] }
 0x654   :  { %v13732_v10 = vmax.f32 %v13656_v13, %v6819_v53  ;;  %v6752_v7 = vadd.f32 %v6751_v23, %v6463_v11  ;;  %8989 = vmatprep.subr.mxu0 %v14555_v32  ;;  %9028 = vmatprep.subr.mxu1 %v14555_v32  ;;  %v6756_v62 = vpop.f32.mrf.mxu1  ;;  %v14880_v13 = vld [vmem:[#allocation95_spill] sm:$0xff]  ;;  %v14907_v23 = vunpack.c.h.bf16 %v14906_v56  ;;  %v14919_v53 = vunpack.c.h.bf16 %v14918_v47 }
 0x655   :  { %8990 = vmatpush3.msra.mxu0 %v14877_v0  ;;  %9029 = vmatpush3.msra.mxu1 %v14878_v26  ;;  %v6465_v43 = vpop.f32.mrf.mxu0  ;;  %v14881_v24 = vunpack.c.h.bf16 %v14880_v13  ;;  %v14884_v55 = vunpack.c.l.bf16 %v14880_v13  ;;  %v14921_v11 = vunpack.c.l.bf16 %v14918_v47  ;;  %v14925_v34 = vunpack.c.h.bf16 %v14924_v12  ;;  %v14930_v0 = vld [vmem:[#allocation112_spill] sm:$0xff]  ;;  %v14936_v13 = vld [vmem:[#allocation114_spill] sm:$0xff] }
 0x656   :  { %v6820_v39 = vmax.f32 %v6752_v7, 0.0  ;;  %v6466_v18 = vadd.f32 %v6465_v43, %v14879_v30  ;;  %8991 = vmatprep.subr.mxu0 %v14555_v32  ;;  %9030 = vmatprep.subr.mxu1 %v14555_v32  ;;  %v14927_v36 = vunpack.c.l.bf16 %v14924_v12  ;;  %v14928_v7 = vld [vmem:[#allocation111_spill] sm:$0xff]  ;;  %v14931_v26 = vunpack.c.h.bf16 %v14930_v0  ;;  %v14934_v30 = vld [vmem:[#allocation113_spill] sm:$0xff] }
 0x657   :  { %8992 = vmatpush3.msra.mxu0 %v14881_v24  ;;  %9031 = vmatpush3.msra.mxu1 %v14883_v35  ;;  %v6467_v2 = vpop.f32.mrf.mxu0  ;;  %v14929_v62 = vunpack.c.h.bf16 %v14928_v7  ;;  %v14932_v43 = vunpack.c.l.bf16 %v14928_v7  ;;  %v14937_v24 = vunpack.c.h.bf16 %v14936_v13  ;;  %v14938_v46 = vunpack.c.l.bf16 %v14934_v30 }
 0x658   :  { %v13748_v44 = vmax.f32 %v13660_v9, %v6820_v39  ;;  %v6755_v20 = vadd.f32 %v6754_v1, %v6466_v18  ;;  %8993 = vmatprep.subr.mxu0 %v14555_v32  ;;  %9032 = vmatprep.subr.mxu1 %v14555_v32  ;;  %v14888_v9 = vld [vmem:[#allocation98_spill] sm:$0xff]  ;;  %v14922_v1 = vld [vmem:[#allocation109_spill] sm:$0xff]  ;;  %v14933_v39 = vunpack.c.l.bf16 %v14930_v0  ;;  %v14935_v18 = vunpack.c.h.bf16 %v14934_v30  ;;  %v14940_v2 = vld [vmem:[#allocation115_spill] sm:$0xff] }
 0x659   :  { %8994 = vmatpush3.msra.mxu0 %v14884_v55  ;;  %9033 = vmatpush3.msra.mxu1 %v14885_v37  ;;  %v14889_v25 = vunpack.c.h.bf16 %v14888_v9  ;;  %v14891_v33 = vunpack.c.l.bf16 %v14888_v9  ;;  %v14923_v8 = vunpack.c.h.bf16 %v14922_v1  ;;  %v14926_v42 = vunpack.c.l.bf16 %v14922_v1  ;;  %v14942_v55 = vld [vmem:[#allocation116_spill] sm:$0xff]  ;;  %v14994_v30 = vld [vmem:[#allocation133_spill] sm:$0xff] }
 0x65a   :  { %v6821_v54 = vmax.f32 %v6755_v20, 0.0  ;;  %8995 = vmatprep.subr.mxu0 %v14555_v32  ;;  %9034 = vmatprep.subr.mxu1 %v14555_v32  ;;  %v14939_v35 = vunpack.c.l.bf16 %v14936_v13  ;;  %v14941_v20 = vunpack.c.h.bf16 %v14940_v2  ;;  %v14943_v37 = vunpack.c.h.bf16 %v14942_v55  ;;  %v7466_v13 = vld [vmem:[%s14181_s4 + $0x70] sm:$0xff] }
 0x65b   :  { %8996 = vmatpush3.msra.mxu0 %v14887_v22  ;;  %9035 = vmatpush3.msra.mxu1 %v14889_v25  ;;  %v14945_v14 = vunpack.c.l.bf16 %v14942_v55  ;;  %v14946_v22 = vld [vmem:[#allocation117_spill] sm:$0xff]  ;;  %v14948_v25 = vld [vmem:[#allocation118_spill] sm:$0xff] }
 0x65c   :  { %v13763_v28 = vmax.f32 %v13664_v3, %v6821_v54  ;;  %8997 = vmatprep.subr.mxu0 %v14555_v32  ;;  %9036 = vmatprep.subr.mxu1 %v14555_v32  ;;  %v14895_v3 = vunpack.c.h.bf16 %v14894_v5  ;;  %v14944_v54 = vunpack.c.l.bf16 %v14940_v2  ;;  %v14947_v9 = vunpack.c.h.bf16 %v14946_v22  ;;  %v14954_v5 = vld [vmem:[#allocation120_spill] sm:$0xff]  ;;  %v7465_v2 = vld [vmem:[%s14181_s4 + $0x68] sm:$0xff] }
 0x65d   :  { %8998 = vmatpush3.msra.mxu0 %v14890_v27  ;;  %9037 = vmatpush3.msra.mxu1 %v14891_v33  ;;  %v14949_v27 = vunpack.c.h.bf16 %v14948_v25  ;;  %v14950_v33 = vunpack.c.l.bf16 %v14946_v22  ;;  %v7460_v22 = vld [vmem:[%s14181_s4 + $0x40] sm:$0xff] }
 0x65e   :  { %8999 = vmatprep.subr.mxu0 %v14555_v32  ;;  %9038 = vmatprep.subr.mxu1 %v14555_v32 }
 0x65f   :  { %9000 = vmatpush3.msra.mxu0 %v14893_v40  ;;  %9039 = vmatpush3.msra.mxu1 %v14895_v3  ;;  %v14953_v40 = vunpack.c.h.bf16 %v14952_v4  ;;  %v14955_v3 = vunpack.c.h.bf16 %v14954_v5 }
 0x660   :  { %9001 = vmatprep.subr.mxu0 %v14555_v32  ;;  %9040 = vmatprep.subr.mxu1 %v14555_v32 }
 0x661   :  { %9002 = vmatpush3.msra.mxu0 %v14896_v17  ;;  %9041 = vmatpush3.msra.mxu1 %v14897_v29  ;;  %v14956_v17 = vunpack.c.l.bf16 %v14952_v4  ;;  %v14957_v29 = vunpack.c.l.bf16 %v14954_v5  ;;  %v7456_v4 = vld [vmem:[%s14181_s4 + $0x20] sm:$0xff]  ;;  %v7455_v5 = vld [vmem:[%s14181_s4 + $0x18] sm:$0xff] }
 0x662   :  { %9003 = vmatprep.subr.mxu0 %v14555_v32  ;;  %9043 = vmatmul.mubr.f32.vlgmr.msra.gmra.mxu1 %v13700_v60  ;;  %v14903_v60 = vunpack.c.l.bf16 %v14900_v61 }
 0x663   :  { %9080 = vmatprep.subr.mxu1 %v14555_v32  ;;  %9004 = vmatpush3.msra.mxu0 %v14899_v57  ;;  %v14960_v57 = vld [vmem:[#allocation122_spill] sm:$0xff] }
 0x664   :  { %9081 = vmatpush3.msra.mxu1 %v14901_v19  ;;  %9005 = vmatprep.subr.mxu0 %v14555_v32  ;;  %v14961_v61 = vunpack.c.h.bf16 %v14960_v57 }
 0x665   :  { %9082 = vmatprep.subr.mxu1 %v14555_v32  ;;  %9006 = vmatpush3.msra.mxu0 %v14902_v38  ;;  %v14963_v38 = vunpack.c.l.bf16 %v14960_v57  ;;  %v7483_v57 = vld [vmem:[%s14181_s4 + $0xf8] sm:$0xff] }
 0x666   :  { %9007 = vmatprep.mubr.msk.f32.mxu0 %vm9502_vm0, %v14555_v32  ;;  %9083 = vmatpush3.msra.mxu1 %v14903_v60  ;;  %v14964_v60 = vld [vmem:[#allocation123_spill] sm:$0xff] }
 0x667   :  { %9008 = vmatmul.mubr.f32.vlgmr.msra.gmra.mxu0 %v13684_v41  ;;  %9045 = vmatprep.subr.mxu0 %v14555_v32  ;;  %v14910_v41 = vld [vmem:[#allocation105_spill] sm:$0xff]  ;;  %v14965_v58 = vunpack.c.h.bf16 %v14964_v60 }
 0x668   :  { %9084 = vmatprep.subr.mxu1 %v14555_v32  ;;  %9046 = vmatpush3.msra.mxu0 %v14905_v50  ;;  %v14911_v59 = vunpack.c.h.bf16 %v14910_v41  ;;  %v14914_v45 = vunpack.c.l.bf16 %v14910_v41  ;;  %v14966_v50 = vld [vmem:[#allocation124_spill] sm:$0xff] }
 0x669   :  { %9085 = vmatpush3.msra.mxu1 %v14907_v23  ;;  %9047 = vmatprep.subr.mxu0 %v14555_v32  ;;  %v14967_v56 = vunpack.c.h.bf16 %v14966_v50  ;;  %v14968_v23 = vunpack.c.l.bf16 %v14964_v60  ;;  %v7479_v60 = vld [vmem:[%s14181_s4 + $0xd8] sm:$0xff] }
 0x66a   :  { %9086 = vmatprep.subr.mxu1 %v14555_v32  ;;  %9048 = vmatpush3.msra.mxu0 %v14908_v63  ;;  %v14969_v63 = vunpack.c.l.bf16 %v14966_v50  ;;  %v7477_v50 = vld [vmem:[%s14181_s4 + $0xc8] sm:$0xff] }
 0x66b   :  { %9087 = vmatpush3.msra.mxu1 %v14909_v52  ;;  %9049 = vmatprep.subr.mxu0 %v14555_v32  ;;  %v14970_v52 = vld [vmem:[#allocation125_spill] sm:$0xff] }
 0x66c   :  { %9088 = vmatprep.subr.mxu1 %v14555_v32  ;;  %9050 = vmatpush3.msra.mxu0 %v14911_v59  ;;  %v14971_v41 = vunpack.c.h.bf16 %v14970_v52  ;;  %v14972_v59 = vld [vmem:[#allocation126_spill] sm:$0xff] }
 0x66d   :  { %9089 = vmatpush3.msra.mxu1 %v14913_v21  ;;  %9051 = vmatprep.subr.mxu0 %v14555_v32  ;;  %v14973_v48 = vunpack.c.h.bf16 %v14972_v59  ;;  %v14974_v21 = vunpack.c.l.bf16 %v14970_v52  ;;  %v7473_v52 = vld [vmem:[%s14181_s4 + $0xa8] sm:$0xff] }
 0x66e   :  { %9090 = vmatprep.subr.mxu1 %v14555_v32  ;;  %9052 = vmatpush3.msra.mxu0 %v14914_v45  ;;  %v14975_v45 = vunpack.c.l.bf16 %v14972_v59  ;;  %v7471_v59 = vld [vmem:[%s14181_s4 + $0x98] sm:$0xff] }
 0x66f   :  { %9091 = vmatpush3.msra.mxu1 %v14915_v15  ;;  %9053 = vmatprep.subr.mxu0 %v14555_v32  ;;  %v14976_v15 = vld [vmem:[#allocation127_spill] sm:$0xff] }
 0x670   :  { %9092 = vmatprep.subr.mxu1 %v14555_v32  ;;  %9054 = vmatpush3.msra.mxu0 %v14917_v6  ;;  %v14977_v51 = vunpack.c.h.bf16 %v14976_v15  ;;  %v14978_v6 = vld [vmem:[#allocation128_spill] sm:$0xff] }
 0x671   :  { %9093 = vmatpush3.msra.mxu1 %v14919_v53  ;;  %9055 = vmatprep.subr.mxu0 %v14555_v32  ;;  %v14979_v47 = vunpack.c.h.bf16 %v14978_v6  ;;  %v14980_v53 = vunpack.c.l.bf16 %v14976_v15 }
 0x672   :  { %9094 = vmatprep.subr.mxu1 %v14555_v32  ;;  %9056 = vmatpush3.msra.mxu0 %v14920_v16  ;;  %v14981_v16 = vunpack.c.l.bf16 %v14978_v6 }
 0x673   :  { %9095 = vmatpush3.msra.mxu1 %v14921_v11  ;;  %9057 = vmatprep.subr.mxu0 %v14555_v32  ;;  %v14982_v11 = vld [vmem:[#allocation129_spill] sm:$0xff] }
 0x674   :  { %9096 = vmatprep.subr.mxu1 %v14555_v32  ;;  %9058 = vmatpush3.msra.mxu0 %v14923_v8  ;;  %v14983_v1 = vunpack.c.h.bf16 %v14982_v11  ;;  %v14984_v8 = vld [vmem:[#allocation130_spill] sm:$0xff] }
 0x675   :  { %9097 = vmatpush3.msra.mxu1 %v14925_v34  ;;  %9059 = vmatprep.subr.mxu0 %v14555_v32  ;;  %v14985_v12 = vunpack.c.h.bf16 %v14984_v8  ;;  %v14986_v34 = vunpack.c.l.bf16 %v14982_v11 }
 0x676   :  { %9098 = vmatprep.subr.mxu1 %v14555_v32  ;;  %9060 = vmatpush3.msra.mxu0 %v14926_v42  ;;  %v14987_v42 = vunpack.c.l.bf16 %v14984_v8 }
 0x677   :  { %9099 = vmatpush3.msra.mxu1 %v14927_v36  ;;  %9061 = vmatprep.subr.mxu0 %v14555_v32  ;;  %v14988_v36 = vld [vmem:[#allocation131_spill] sm:$0xff] }
 0x678   :  { %9100 = vmatprep.subr.mxu1 %v14555_v32  ;;  %9062 = vmatpush3.msra.mxu0 %v14929_v62  ;;  %v14989_v7 = vunpack.c.h.bf16 %v14988_v36  ;;  %v14990_v62 = vld [vmem:[#allocation132_spill] sm:$0xff] }
 0x679   :  { %9101 = vmatpush3.msra.mxu1 %v14931_v26  ;;  %9063 = vmatprep.subr.mxu0 %v14555_v32  ;;  %v14991_v0 = vunpack.c.h.bf16 %v14990_v62  ;;  %v14992_v26 = vunpack.c.l.bf16 %v14988_v36 }
 0x67a   :  { %9102 = vmatprep.subr.mxu1 %v14555_v32  ;;  %9064 = vmatpush3.msra.mxu0 %v14932_v43  ;;  %v14993_v43 = vunpack.c.l.bf16 %v14990_v62 }
 0x67b   :  { %9103 = vmatpush3.msra.mxu1 %v14933_v39  ;;  %9065 = vmatprep.subr.mxu0 %v14555_v32  ;;  %v7467_v39 = vld [vmem:[%s14181_s4 + $0x78] sm:$0xff] }
 0x67c   :  { %9104 = vmatprep.subr.mxu1 %v14555_v32  ;;  %9066 = vmatpush3.msra.mxu0 %v14935_v18  ;;  %v14995_v18 = vunpack.c.h.bf16 %v14994_v30 }
 0x67d   :  { %9105 = vmatpush3.msra.mxu1 %v14937_v24  ;;  %9067 = vmatprep.subr.mxu0 %v14555_v32  ;;  %v14002_v24 = vld [vmem:[%s14180_s3] ss:$0 sm:$0xff] }
 0x67e   :  { %9106 = vmatprep.subr.mxu1 %v14555_v32  ;;  %9068 = vmatpush3.msra.mxu0 %v14938_v46  ;;  %v14996_v46 = vld [vmem:[#allocation7_spill] sm:$0xff] }
 0x67f   :  { %9107 = vmatpush3.msra.mxu1 %v14939_v35  ;;  %9069 = vmatprep.subr.mxu0 %v14555_v32  ;;  %v14997_v35 = vunpack.c.l.bf16 %v14994_v30 }
 0x680   :  { %9108 = vmatprep.subr.mxu1 %v14555_v32  ;;  %9070 = vmatpush3.msra.mxu0 %v14941_v20  ;;  %v7464_v20 = vld [vmem:[%s14181_s4 + $0x60] sm:$0xff] }
 0x681   :  { %9109 = vmatpush3.msra.mxu1 %v14943_v37  ;;  %9071 = vmatprep.subr.mxu0 %v14555_v32  ;;  %v7463_v37 = vld [vmem:[%s14181_s4 + $0x58] sm:$0xff] }
 0x682   :  { %9110 = vmatprep.subr.mxu1 %v14555_v32  ;;  %9072 = vmatpush3.msra.mxu0 %v14944_v54 }
 0x683   :  { %9111 = vmatpush3.msra.mxu1 %v14945_v14  ;;  %9112 = vmatprep.mubr.msk.f32.mxu1 %vm9502_vm0, %v14555_v32  ;;  %v7461_v14 = vld [vmem:[%s14181_s4 + $0x48] sm:$0xff] }
 0x684   :  { %9073 = vmatprep.subr.mxu0 %v14555_v32  ;;  %9113 = vmatmul.mubr.f32.vlgmr.msra.gmra.mxu1 %v13732_v10  ;;  %v14951_v10 = vunpack.c.l.bf16 %v14948_v25  ;;  %v7459_v25 = vld [vmem:[%s14181_s4 + $0x38] sm:$0xff] }
 0x685   :  { %9150 = vmatprep.subr.mxu1 %v14555_v32  ;;  %9074 = vmatpush3.msra.mxu0 %v14947_v9 }
 0x686   :  { %9151 = vmatpush3.msra.mxu1 %v14949_v27  ;;  %9075 = vmatprep.subr.mxu0 %v14555_v32  ;;  %v7458_v27 = vld [vmem:[%s14181_s4 + $0x30] sm:$0xff] }
 0x687   :  { %9152 = vmatprep.subr.mxu1 %v14555_v32  ;;  %9076 = vmatpush3.msra.mxu0 %v14950_v33 }
 0x688   :  { %9077 = vmatprep.mubr.msk.f32.mxu0 %vm9502_vm0, %v14555_v32  ;;  %9153 = vmatpush3.msra.mxu1 %v14951_v10  ;;  %v7457_v10 = vld [vmem:[%s14181_s4 + $0x28] sm:$0xff] }
 0x689   :  { %9078 = vmatmul.mubr.f32.vlgmr.msra.gmra.mxu0 %v13716_v49  ;;  %9115 = vmatprep.subr.mxu0 %v14555_v32  ;;  %v14958_v49 = vld [vmem:[#allocation121_spill] sm:$0xff] }
 0x68a   :  { %9154 = vmatprep.subr.mxu1 %v14555_v32  ;;  %9116 = vmatpush3.msra.mxu0 %v14953_v40  ;;  %v14959_v31 = vunpack.c.h.bf16 %v14958_v49  ;;  %v14962_v19 = vunpack.c.l.bf16 %v14958_v49  ;;  %v7452_v49 = vld [vmem:[%s14181_s4] sm:$0xff] }
 0x68b   :  { %9155 = vmatpush3.msra.mxu1 %v14955_v3  ;;  %9117 = vmatprep.subr.mxu0 %v14555_v32  ;;  %v7454_v3 = vld [vmem:[%s14181_s4 + $0x10] sm:$0xff] }
 0x68c   :  { %9156 = vmatprep.subr.mxu1 %v14555_v32  ;;  %9118 = vmatpush3.msra.mxu0 %v14956_v17 }
 0x68d   :  { %9157 = vmatpush3.msra.mxu1 %v14957_v29  ;;  %9119 = vmatprep.subr.mxu0 %v14555_v32  ;;  %v7453_v29 = vld [vmem:[%s14181_s4 + $0x8] sm:$0xff] }
 0x68e   :  { %9158 = vmatprep.subr.mxu1 %v14555_v32  ;;  %9120 = vmatpush3.msra.mxu0 %v14959_v31 }
 0x68f   :  { %9159 = vmatpush3.msra.mxu1 %v14961_v61  ;;  %9121 = vmatprep.subr.mxu0 %v14555_v32  ;;  %v7482_v61 = vld [vmem:[%s14181_s4 + $0xf0] sm:$0xff] }
 0x690   :  { %9160 = vmatprep.subr.mxu1 %v14555_v32  ;;  %9122 = vmatpush3.msra.mxu0 %v14962_v19  ;;  %v7481_v19 = vld [vmem:[%s14181_s4 + $0xe8] sm:$0xff] }
 0x691   :  { %9161 = vmatpush3.msra.mxu1 %v14963_v38  ;;  %9123 = vmatprep.subr.mxu0 %v14555_v32  ;;  %v7480_v38 = vld [vmem:[%s14181_s4 + $0xe0] sm:$0xff] }
 0x692   :  { %9162 = vmatprep.subr.mxu1 %v14555_v32  ;;  %9124 = vmatpush3.msra.mxu0 %v14965_v58  ;;  %v7478_v58 = vld [vmem:[%s14181_s4 + $0xd0] sm:$0xff] }
 0x693   :  { %9163 = vmatpush3.msra.mxu1 %v14967_v56  ;;  %9125 = vmatprep.subr.mxu0 %v14555_v32  ;;  %v7476_v56 = vld [vmem:[%s14181_s4 + $0xc0] sm:$0xff] }
 0x694   :  { %9164 = vmatprep.subr.mxu1 %v14555_v32  ;;  %9126 = vmatpush3.msra.mxu0 %v14968_v23  ;;  %v7475_v23 = vld [vmem:[%s14181_s4 + $0xb8] sm:$0xff] }
 0x695   :  { %9165 = vmatpush3.msra.mxu1 %v14969_v63  ;;  %9127 = vmatprep.subr.mxu0 %v14555_v32  ;;  %v7474_v63 = vld [vmem:[%s14181_s4 + $0xb0] sm:$0xff] }
 0x696   :  { %9166 = vmatprep.subr.mxu1 %v14555_v32  ;;  %9128 = vmatpush3.msra.mxu0 %v14971_v41  ;;  %v7472_v41 = vld [vmem:[%s14181_s4 + $0xa0] sm:$0xff] }
 0x697   :  { %9167 = vmatpush3.msra.mxu1 %v14973_v48  ;;  %9129 = vmatprep.subr.mxu0 %v14555_v32  ;;  %v7470_v48 = vld [vmem:[%s14181_s4 + $0x90] sm:$0xff] }
 0x698   :  { %9168 = vmatprep.subr.mxu1 %v14555_v32  ;;  %9130 = vmatpush3.msra.mxu0 %v14974_v21  ;;  %v7469_v21 = vld [vmem:[%s14181_s4 + $0x88] sm:$0xff] }
 0x699   :  { %9169 = vmatpush3.msra.mxu1 %v14975_v45  ;;  %9131 = vmatprep.subr.mxu0 %v14555_v32  ;;  %v7468_v45 = vld [vmem:[%s14181_s4 + $0x80] sm:$0xff] }
 0x69a   :  { %9170 = vmatprep.subr.mxu1 %v14555_v32  ;;  %9132 = vmatpush3.msra.mxu0 %v14977_v51 }
 0x69b   :  { %9171 = vmatpush3.msra.mxu1 %v14979_v47  ;;  %9133 = vmatprep.subr.mxu0 %v14555_v32 }
 0x69c   :  { %9172 = vmatprep.subr.mxu1 %v14555_v32  ;;  %9134 = vmatpush3.msra.mxu0 %v14980_v53 }
 0x69d   :  { %9173 = vmatpush3.msra.mxu1 %v14981_v16  ;;  %9135 = vmatprep.subr.mxu0 %v14555_v32 }
 0x69e   :  { %9174 = vmatprep.subr.mxu1 %v14555_v32  ;;  %9136 = vmatpush3.msra.mxu0 %v14983_v1 }
 0x69f   :  { %9175 = vmatpush3.msra.mxu1 %v14985_v12  ;;  %9137 = vmatprep.subr.mxu0 %v14555_v32 }
 0x6a0   :  { %9176 = vmatprep.subr.mxu1 %v14555_v32  ;;  %9138 = vmatpush3.msra.mxu0 %v14986_v34 }
 0x6a1   :  { %9177 = vmatpush3.msra.mxu1 %v14987_v42  ;;  %9139 = vmatprep.subr.mxu0 %v14555_v32 }
 0x6a2   :  { %9178 = vmatprep.subr.mxu1 %v14555_v32  ;;  %9140 = vmatpush3.msra.mxu0 %v14989_v7 }
 0x6a3   :  { %9179 = vmatpush3.msra.mxu1 %v14991_v0  ;;  %9141 = vmatprep.subr.mxu0 %v14555_v32 }
 0x6a4   :  { %9180 = vmatprep.subr.mxu1 %v14555_v32  ;;  %9142 = vmatpush3.msra.mxu0 %v14992_v26 }
 0x6a5   :  { %9181 = vmatpush3.msra.mxu1 %v14993_v43  ;;  %9182 = vmatprep.mubr.msk.f32.mxu1 %vm9502_vm0, %v14555_v32 }
 0x6a6   :  { %9143 = vmatprep.subr.mxu0 %v14555_v32  ;;  %9183 = vmatmul.mubr.f32.vlgmr.msra.gmra.mxu1 %v13763_v28  ;;  %v4058_v28 = vadd.f32 %v14002_v24, %v14996_v46 }
 0x6a7   :  { %9220 = vmatprep.subr.mxu1 %v14555_v32  ;;  %9144 = vmatpush3.msra.mxu0 %v14995_v18 }
 0x6a8   :  { %9221 = vmatpush3.msra.mxu1 %v7467_v39  ;;  %9145 = vmatprep.subr.mxu0 %v14555_v32  ;;  %v4059_v55 = vmax.f32 %v4058_v28, 0.0 }
 0x6a9   :  { %9222 = vmatprep.subr.mxu1 %v14555_v32  ;;  %9146 = vmatpush3.msra.mxu0 %v14997_v35 }
 0x6aa   :  { %9147 = vmatprep.mubr.msk.f32.mxu0 %vm9502_vm0, %v14555_v32  ;;  %9223 = vmatpush3.msra.mxu1 %v7466_v13  ;;  %v4060_v54 = vrot.slane %v4059_v55, 4 }
 0x6ab   :  { %9148 = vmatmul.mubr.f32.vlgmr.msra.gmra.mxu0 %v13748_v44  ;;  %9224 = vmatprep.subr.mxu1 %v14555_v32  ;;  %v7462_v44 = vld [vmem:[%s14181_s4 + $0x50] sm:$0xff] }
 0x6ac   :  { %9225 = vmatpush3.msra.mxu1 %v7465_v2  ;;  %9252 = vmatprep.mubr.msk.f32.mxu1 %vm9502_vm0, %v14555_v32  ;;  %v4061_v9 = vmax.f32 %v4059_v55, %v4060_v54 }
 0x6ad   :  { %9226 = vmatprep.subr.mxu1 %v14555_v32  ;;  %9185 = vmatprep.subr.mxu0 %v14555_v32 }
 0x6ae   :  { %9227 = vmatpush3.msra.mxu1 %v7464_v20  ;;  %9217 = vmatprep.mubr.msk.f32.mxu0 %vm9502_vm0, %v14555_v32  ;;  %v4062_v33 = vrot.slane %v4061_v9, 2 }
 0x6af   :  { %9228 = vmatprep.subr.mxu1 %v14555_v32  ;;  %9186 = vmatpush3.msra.mxu0 %v7483_v57 }
 0x6b0   :  { %9229 = vmatpush3.msra.mxu1 %v7463_v37  ;;  %v4063_v40 = vmax.f32 %v4061_v9, %v4062_v33  ;;  %9187 = vmatprep.subr.mxu0 %v14555_v32  ;;  %v7630_v9 = vld [vmem:[%s14183_s6 + $0x20] sm:$0xff] }
 0x6b1   :  { %9230 = vmatprep.subr.mxu1 %v14555_v32  ;;  %9188 = vmatpush3.msra.mxu0 %v7482_v61 }
 0x6b2   :  { %9231 = vmatpush3.msra.mxu1 %v7462_v44  ;;  %v4064_v17 = vrot.slane %v4063_v40, 1  ;;  %9189 = vmatprep.subr.mxu0 %v14555_v32 }
 0x6b3   :  { %9232 = vmatprep.subr.mxu1 %v14555_v32  ;;  %9190 = vmatpush3.msra.mxu0 %v7481_v19 }
 0x6b4   :  { %9233 = vmatpush3.msra.mxu1 %v7461_v14  ;;  %v4065_v31 = vmax.f32 %v4063_v40, %v4064_v17  ;;  %9191 = vmatprep.subr.mxu0 %v14555_v32  ;;  %v7633_v14 = vld [vmem:[%s14183_s6 + $0x38] sm:$0xff]  ;;  %v7626_v40 = vld [vmem:[%s14183_s6] sm:$0xff] }
 0x6b5   :  { %9234 = vmatprep.subr.mxu1 %v14555_v32  ;;  %9192 = vmatpush3.msra.mxu0 %v7480_v38 }
 0x6b6   :  { %9235 = vmatpush3.msra.mxu1 %v7460_v22  ;;  %9193 = vmatprep.subr.mxu0 %v14555_v32  ;;  %v7632_v22 = vld [vmem:[%s14183_s6 + $0x30] sm:$0xff] }
 0x6b7   :  { %9236 = vmatprep.subr.mxu1 %v14555_v32  ;;  %9194 = vmatpush3.msra.mxu0 %v7479_v60 }
 0x6b8   :  { %9237 = vmatpush3.msra.mxu1 %v7459_v25  ;;  %9195 = vmatprep.subr.mxu0 %v14555_v32  ;;  %v7629_v25 = vld [vmem:[%s14183_s6 + $0x18] sm:$0xff] }
 0x6b9   :  { %9238 = vmatprep.subr.mxu1 %v14555_v32  ;;  %9196 = vmatpush3.msra.mxu0 %v7478_v58 }
 0x6ba   :  { %9239 = vmatpush3.msra.mxu1 %v7458_v27  ;;  %9197 = vmatprep.subr.mxu0 %v14555_v32 }
 0x6bb   :  { %9240 = vmatprep.subr.mxu1 %v14555_v32  ;;  %9198 = vmatpush3.msra.mxu0 %v7477_v50 }
 0x6bc   :  { %9241 = vmatpush3.msra.mxu1 %v7457_v10  ;;  %9199 = vmatprep.subr.mxu0 %v14555_v32  ;;  %v7628_v10 = vld [vmem:[%s14183_s6 + $0x10] sm:$0xff] }
 0x6bd   :  { %9242 = vmatprep.subr.mxu1 %v14555_v32  ;;  %9200 = vmatpush3.msra.mxu0 %v7476_v56 }
 0x6be   :  { %9243 = vmatpush3.msra.mxu1 %v7456_v4  ;;  %9201 = vmatprep.subr.mxu0 %v14555_v32  ;;  %v7627_v4 = vld [vmem:[%s14183_s6 + $0x8] sm:$0xff] }
 0x6bf   :  { %9244 = vmatprep.subr.mxu1 %v14555_v32  ;;  %9202 = vmatpush3.msra.mxu0 %v7475_v23 }
 0x6c0   :  { %9245 = vmatpush3.msra.mxu1 %v7455_v5  ;;  %9203 = vmatprep.subr.mxu0 %v14555_v32 }
 0x6c1   :  { %9246 = vmatprep.subr.mxu1 %v14555_v32  ;;  %9204 = vmatpush3.msra.mxu0 %v7474_v63 }
 0x6c2   :  { %9247 = vmatpush3.msra.mxu1 %v7454_v3  ;;  %9205 = vmatprep.subr.mxu0 %v14555_v32  ;;  %v7624_v3 = vld [vmem:[%s14182_s5] sm:$0x1] }
 0x6c3   :  { %9248 = vmatprep.subr.mxu1 %v14555_v32  ;;  %9206 = vmatpush3.msra.mxu0 %v7473_v52 }
 0x6c4   :  { %9249 = vmatpush3.msra.mxu1 %v7453_v29  ;;  %9207 = vmatprep.subr.mxu0 %v14555_v32 }
 0x6c5   :  { %9250 = vmatprep.subr.mxu1 %v14555_v32  ;;  %9208 = vmatpush3.msra.mxu0 %v7472_v41 }
 0x6c6   :  { %9251 = vmatpush3.msra.mxu1 %v7452_v49  ;;  %9209 = vmatprep.subr.mxu0 %v14555_v32 }
 0x6c7   :  { %9253 = vmatmul.mubr.f32.vlgmr.msra.gmra.mxu1 %v4065_v31  ;;  %9210 = vmatpush3.msra.mxu0 %v7471_v59  ;;  %v7634_v31 = vld [vmem:[#allocation2] sm:$0x1] }
 0x6c8   :  { %9211 = vmatprep.subr.mxu0 %v14555_v32 }
 0x6c9   :  { %9212 = vmatpush3.msra.mxu0 %v7470_v48 }
 0x6ca   :  { %9213 = vmatprep.subr.mxu0 %v14555_v32 }
 0x6cb   :  { %9214 = vmatpush3.msra.mxu0 %v7469_v21 }
 0x6cc   :  { %9215 = vmatprep.subr.mxu0 %v14555_v32 }
 0x6cd   :  { %9216 = vmatpush3.msra.mxu0 %v7468_v45 }
 0x6ce   :  { %9255 = vmatprep.subr.mxu0 %v14555_v32 }
 0x702   :  { %v7014_v15 = vpop.f32.mrf.mxu1 }
 0x704   :  { %v8974_v51 = vpop.f32.mrf.mxu1 }
 0x706   :  { %v6944_v6 = vpop.f32.mrf.mxu0 }
 0x707   :  { %v7015_v47 = vadd.f32 %v7014_v15, %v6944_v6 }
 0x708   :  { %v8939_v53 = vpop.f32.mrf.mxu0 }
 0x722   :  { %v7155_v16 = vpop.f32.mrf.mxu1 }
 0x724   :  { %v9044_v11 = vpop.f32.mrf.mxu1 }
 0x727   :  { %v7084_v1 = vpop.f32.mrf.mxu0 }
 0x728   :  { %v7088_v8 = vadd.f32 %v7084_v1, %v7015_v47 }
 0x729   :  { %v9009_v12 = vpop.f32.mrf.mxu0 }
 0x72a   :  { %v7159_v34 = vadd.f32 %v7155_v16, %v7088_v8 }
 0x744   :  { %v7297_v42 = vpop.f32.mrf.mxu1 }
 0x746   :  { %v9114_v36 = vpop.f32.mrf.mxu1 }
 0x749   :  { %v7226_v7 = vpop.f32.mrf.mxu0 }
 0x74a   :  { %v7230_v0 = vadd.f32 %v7226_v7, %v7159_v34 }
 0x74b   :  { %v9079_v62 = vpop.f32.mrf.mxu0 }
 0x74c   :  { %v7301_v39 = vadd.f32 %v7297_v42, %v7230_v0 }
 0x766   :  { %v7439_v26 = vpop.f32.mrf.mxu1 }
 0x768   :  { %v9184_v43 = vpop.f32.mrf.mxu1 }
 0x76b   :  { %v7368_v30 = vpop.f32.mrf.mxu0 }
 0x76c   :  { %v7372_v18 = vadd.f32 %v7368_v30, %v7301_v39 }
 0x76d   :  { %v9149_v13 = vpop.f32.mrf.mxu0 }
 0x76e   :  { %v7443_v46 = vadd.f32 %v7439_v26, %v7372_v18 }
 0x770   :  { %v7444_v28 = vadd.f32 %v14002_v24, %v7443_v46  ;;  %v7631_v24 = vld [vmem:[%s14183_s6 + $0x28] sm:$0xff]  ;;  %s9503_s6 = smov [#allocation3]  }
 0x771   :  { %s7723_s30 = sshll.u32 %s9503_s6, 4  ;;  %s7724_s30 = int_to_ptr.vmem [resolvable:$true] %s7723_s30 }
 0x772   :  { %v7445_v35 = vmax.f32 %v7444_v28, 0.0  ;;  %s9478_s5 = scalar_lea.vmem %s7724_s30, 16  ;;  %s9482_s9 = scalar_lea.vmem %s7724_s30, 32 }
 0x773   :  { %p9479_p0 = scmp.ne.s32.totalorder %s7724_s30, %s9478_s5  ;;  %p9483_p1 = scmp.lt.s32.totalorder %s7724_s30, %s7724_s30 }
 0x774   :  { %v7446_v2 = vrot.slane %v7445_v35, 4  ;;  %p9484_p2 = scmp.lt.s32.totalorder %s9482_s9, %s9478_s5 }
 0x776   :  { %v7447_v20 = vmax.f32 %v7445_v35, %v7446_v2  ;;  %p9485_p3 = por %p9484_p2, %p9483_p1 }
 0x778   :  { %v7448_v55 = vrot.slane %v7447_v20, 2  ;;  %p9486_p4 = pnand %p9485_p3, %p9479_p0 }
 0x77a   :  { %v7449_v37 = vmax.f32 %v7447_v20, %v7448_v55 }
 0x77c   :  { %v7450_v44 = vrot.slane %v7449_v37, 1 }
 0x77e   :  { %v7451_v54 = vmax.f32 %v7449_v37, %v7450_v44 }
 0x780   :  { %9218 = vmatmul.mubr.f32.vlgmr.msra.gmra.mxu0 %v7451_v54 }
 0x781   :  { %9256 = vmatpush3.msra.mxu0 %v7633_v14  ;;  %9271 = vmatprep.mubr.msk.f32.mxu0 %vm9502_vm0, %v14555_v32 }
 0x782   :  { %9257 = vmatprep.subr.mxu0 %v14555_v32 }
 0x783   :  { %9258 = vmatpush3.msra.mxu0 %v7632_v22 }
 0x784   :  { %9259 = vmatprep.subr.mxu0 %v14555_v32 }
 0x785   :  { %9260 = vmatpush3.msra.mxu0 %v7631_v24 }
 0x786   :  { %9261 = vmatprep.subr.mxu0 %v14555_v32 }
 0x787   :  { %v7620_v27 = vpop.f32.mrf.mxu1  ;;  %9262 = vmatpush3.msra.mxu0 %v7630_v9 }
 0x788   :  { %9263 = vmatprep.subr.mxu0 %v14555_v32 }
 0x789   :  { %v9254_v33 = vpop.f32.mrf.mxu1  ;;  %9264 = vmatpush3.msra.mxu0 %v7629_v25 }
 0x78a   :  { %9265 = vmatprep.subr.mxu0 %v14555_v32 }
 0x78b   :  { %9266 = vmatpush3.msra.mxu0 %v7628_v10 }
 0x78c   :  { %9267 = vmatprep.subr.mxu0 %v14555_v32 }
 0x78d   :  { %9268 = vmatpush3.msra.mxu0 %v7627_v4 }
 0x78e   :  { %9269 = vmatprep.subr.mxu0 %v14555_v32 }
 0x78f   :  { %9270 = vmatpush3.msra.mxu0 %v7626_v40 }
 0x840   :  { %v7550_v5 = vpop.f32.mrf.mxu0 }
 0x841   :  { %v7621_v17 = vadd.f32 %v7620_v27, %v7550_v5 }
 0x842   :  { %v9219_v29 = vpop.f32.mrf.mxu0 }
 0x843   :  { %v7625_v49 = vadd.f32 %v7624_v3, %v7621_v17 }
 0x845   :  { %9272 = vmatmul.mubr.msk.f32.vlgmr.msra.gmra.mxu0 %vm7635_vm1, %v7625_v49 }
 0x905   :  { %v7705_v57 = vpop.f32.mrf.mxu0 }
 0x906   :  { %v7706_v61 = vadd.f32 %v7705_v57, %v7634_v31 }
 0x907   :  { %v9273_v19 = vpop.f32.mrf.mxu0 }
 0x908   :  { %v8309_v32 = vmul.f32 -1.442695, %v7706_v61 }
 0x90a   :  { %9406 = vpow2.f32 %v8309_v32 }
 0x917   :  { %v9407_v38 = vpop.eup %9406 }
 0x918   :  { %v7712_v60 = vadd.f32 1.0, %v9407_v38 }
 0x91a   :  { %9408 = vrcp.f32 %v7712_v60 }
 0x927   :  { %v9409_v58 = vpop.eup %9408 }
 0x928   :  { %7716 = vst.msk [vmem:[#allocation3] sm:$0x1] %vm7715_vm2, %v9409_v58 }
 0x929   :  { %9489 = shalt.err (!%p9486_p4)
}
 0x92a   :  { %7726 = dma.vmem_to_hbm [thread:$0]  %s7724_s30, 16, %s14185_s8, [#allocation4]  }
 0x92b   :  { %9498 = dma.done.wait [#allocation4], 16  }
 0x92c   :  { %9499 = vsyncadd [#allocation4], 4294967280 }
 0x92d   :  { %7730 = vsyncpa [#allocation4], 1 }

</bundles_post_ra>
